<compile_context>
chip_gen: v7x
topology: tpu7x:2x2x1
jax: 0.10.0
libtpu: 0.0.40
codegen_flags: <defaults>
</compile_context>

<pallas_src>
import functools
import math

import jax
import jax.numpy as jnp
from jax import lax
from jax.experimental import pallas as pl
from jax.experimental.pallas import tpu as pltpu

LANE = 128
VMEM_LIMIT = 32 * 1024 * 1024  # explicit scoped-VMEM limit (v5e default is only 16 MiB)


def _round_up(x, m):
    return (x + m - 1) // m * m


def _pick_tile(m, cap=512):
    """Largest row tile from a sublane-friendly list that divides m."""
    for t in (1024, 512, 256, 128, 64, 32, 16, 8):
        if t <= cap and m % t == 0:
            return t
    return m


def _pick_tile_res(m, two_w, cap=512):
    """Row tile for the fused-upsample 1x1: must divide m, cover whole pairs of
    full-res image rows (multiple of 2*W) and keep tm//4 sublane-aligned."""
    for t in (1024, 512, 256, 128, 64, 32):
        if t <= cap and m % t == 0 and t % two_w == 0 and t % 32 == 0:
            return t
    t = two_w * 32 // math.gcd(two_w, 32)
    assert m % t == 0, "unsupported shape for fused-upsample tiling"
    return t


# ---------------------------------------------------------------------------
# 1x1 convolution as a tiled MXU matmul (bf16 operands, f32 accumulate).
# The "+ upsampled residual" variant reads the residual at HALF resolution and
# expands it in-kernel with a constant 0/1 selection matmul, so the upsampled
# tensor is never written to / re-read from HBM.
# ---------------------------------------------------------------------------
def _conv1x1_kernel(x_ref, w_ref, b_ref, o_ref):
    y = jnp.dot(x_ref[...], w_ref[...], preferred_element_type=jnp.float32)
    o_ref[...] = (y + b_ref[...]).astype(o_ref.dtype)


def _conv1x1_up_kernel(x_ref, w_ref, b_ref, r_ref, s_ref, o_ref):
    y = jnp.dot(x_ref[...], w_ref[...], preferred_element_type=jnp.float32)
    # Nearest-2x upsample of the half-res residual as a 0/1 selection matmul
    # (values are exact; MXU slot has slack in this memory-bound kernel).
    up = jnp.dot(s_ref[...], r_ref[...], preferred_element_type=jnp.float32)
    o_ref[...] = (y + b_ref[...] + up).astype(o_ref.dtype)


def conv1x1(x_nhwc, w, b, residual_half=None, *, block_rows=512):
    n, h, wd, cin = x_nhwc.shape
    cout = w.shape[1]                      # already padded to a multiple of 128
    m = n * h * wd
    xf = x_nhwc.reshape(m, cin)
    b2 = b.reshape(1, cout)
    cparams = pltpu.CompilerParams(dimension_semantics=("parallel",),
                                   vmem_limit_bytes=VMEM_LIMIT)
    out_shape = jax.ShapeDtypeStruct((m, cout), jnp.bfloat16)

    if residual_half is None:
        tm = _pick_tile(m, block_rows)
        out = pl.pallas_call(
            _conv1x1_kernel, grid=(m // tm,),
            in_specs=[pl.BlockSpec((tm, cin), lambda i: (i, 0)),
                      pl.BlockSpec((cin, cout), lambda i: (0, 0)),
                      pl.BlockSpec((1, cout), lambda i: (0, 0))],
            out_specs=pl.BlockSpec((tm, cout), lambda i: (i, 0)),
            out_shape=out_shape, compiler_params=cparams,
        )(xf, w, b2)
    else:
        # residual_half: (n, h//2, wd//2, cout) bf16 (previous level's 1x1 output)
        two_w = 2 * wd
        tm = _pick_tile_res(m, two_w, block_rows)
        rf = residual_half.reshape(m // 4, cout)
        # Constant per-block selection matrix: output row rho reads residual row
        # (rho // (2W)) * (W//2) + (rho % W) // 2.  The pattern is identical for
        # every block because tm is a multiple of 2*W.
        rows = jnp.arange(tm)
        src = (rows // two_w) * (wd // 2) + (rows % wd) // 2
        sel = (src[:, None] == jnp.arange(tm // 4)[None, :]).astype(jnp.bfloat16)
        out = pl.pallas_call(
            _conv1x1_up_kernel, grid=(m // tm,),
            in_specs=[pl.BlockSpec((tm, cin), lambda i: (i, 0)),
                      pl.BlockSpec((cin, cout), lambda i: (0, 0)),
                      pl.BlockSpec((1, cout), lambda i: (0, 0)),
                      pl.BlockSpec((tm // 4, cout), lambda i: (i, 0)),
                      pl.BlockSpec((tm, tm // 4), lambda i: (0, 0))],
            out_specs=pl.BlockSpec((tm, cout), lambda i: (i, 0)),
            out_shape=out_shape, compiler_params=cparams,
        )(xf, w, b2, rf, sel)
    return out.reshape(n, h, wd, cout)


# ---------------------------------------------------------------------------
# 3x3 convolution, padding=1 (optionally fused input ReLU).  The zero-padded
# input is flattened spatially with its width rounded up to a multiple of 8 so
# the kh*wpp tap offsets stay sublane-aligned; the 9 taps are accumulated as 9
# K=Cin matmuls into an f32 accumulator (no 9x-wide slab is ever materialized).
# ---------------------------------------------------------------------------
def _conv3x3_kernel(xf_ref, w_ref, b_ref, o_ref, *, h, wpp, stride, relu_input):
    # xf: (1, rows_in, Cin) bf16 zero-padded flattened input (with guard rows)
    # w : (9, Cin, Cout) bf16, taps ordered (kh, kw); b: (1, Cout) f32
    # o : (1, h_out*wpp, Cout) bf16
    x = xf_ref[0]
    if relu_input:
        x = jnp.maximum(x, 0)              # relu(0)=0, so fusing after padding is exact
    rows = h * wpp
    cout = w_ref.shape[2]
    acc = jnp.zeros((rows, cout), jnp.float32)
    # Per-tap accumulation in bf16: kh offsets are sublane aligned; kw = 1, 2
    # shifts cost a small VMEM-internal bf16 relayout each.
    # TODO(synk): generate the kw shifts with pltpu.roll so the relayout runs in
    # the XLU slot and overlaps with the MXU matmuls.
    for kh in range(3):
        for kw in range(3):
            tap = x[kh * wpp + kw: kh * wpp + kw + rows, :]
            acc = acc + jnp.dot(tap, w_ref[kh * 3 + kw],
                                preferred_element_type=jnp.float32)
    y = acc + b_ref[...]
    if stride == 2:
        # Keep only even output rows (wpp-aligned row blocks); even-column
        # selection happens in the wrapper on the (tiny) result.
        y = jnp.concatenate([y[r * wpp:(r + 1) * wpp] for r in range(0, h, 2)],
                            axis=0)
    o_ref[0] = y.astype(o_ref.dtype)


def conv3x3(x_nhwc, wk, b, *, stride=1, relu_input=False):
    # wk: (9, Cin_pad, Cout_pad) bf16 taps (kh-major), b: (Cout_pad,) f32
    n, h, wd, cin = x_nhwc.shape
    ntap, kcin, cout = wk.shape
    assert ntap == 9 and kcin == cin
    hp = h + 2
    wpp = _round_up(wd + 2, 8)             # sublane-aligned padded width
    # zero padding=1 (plus extra right columns up to wpp), flatten spatial dims,
    # plus >=2 zero guard rows so every tap slice stays in bounds.
    # TODO(synk): fold this padding into the kernel (zero-init VMEM scratch + row
    # copies) to avoid one extra HBM round trip of the level input.
    xp = jnp.pad(x_nhwc, ((0, 0), (1, 1), (1, wpp - wd - 1), (0, 0)))
    xf = xp.reshape(n, hp * wpp, cin)
    rows_in = _round_up(hp * wpp + 2, 8)
    xf = jnp.pad(xf, ((0, 0), (0, rows_in - hp * wpp), (0, 0)))

    h_out = h if stride == 1 else -(-h // 2)
    rows_out = h_out * wpp
    kern = functools.partial(_conv3x3_kernel, h=h, wpp=wpp, stride=stride,
                             relu_input=relu_input)
    out = pl.pallas_call(
        kern, grid=(n,),
        in_specs=[pl.BlockSpec((1, rows_in, cin), lambda i: (i, 0, 0)),
                  pl.BlockSpec((9, cin, cout), lambda i: (0, 0, 0)),
                  pl.BlockSpec((1, cout), lambda i: (0, 0))],
        out_specs=pl.BlockSpec((1, rows_out, cout), lambda i: (i, 0, 0)),
        out_shape=jax.ShapeDtypeStruct((n, rows_out, cout), jnp.bfloat16),
        compiler_params=pltpu.CompilerParams(dimension_semantics=("parallel",),
                                             vmem_limit_bytes=VMEM_LIMIT),
        # TODO(synk): at production FPN resolutions, row-tile this grid with a
        # 2-row halo (grid=(n, h//tr)) so blocks fit v7x's 64 MiB VMEM and both
        # TensorCores get parallel work, and skip the odd rows/cols of the
        # stride-2 matmuls instead of only their writeback.
    )(xf, wk, b.reshape(1, cout))

    out = out.reshape(n, h_out, wpp, cout)
    out = out[:, :, :wd, :] if stride == 1 else out[:, :, 0:wd:2, :]
    return out


# ---------------------------------------------------------------------------
# Parameter construction (deterministic, synthetic) + TPU-friendly preparation.
# ---------------------------------------------------------------------------
def init_params(key, c3, c4, c5, f):
    ks = iter(jax.random.split(key, 16))

    def w1(cin, cout):
        return 0.05 * jax.random.normal(next(ks), (cin, cout), jnp.float32)

    def w3(cin, cout):
        return 0.05 * jax.random.normal(next(ks), (9, cin, cout), jnp.float32)

    def bias(cout):
        return 0.05 * jax.random.normal(next(ks), (cout,), jnp.float32)

    return dict(
        P5_1_w=w1(c5, f), P5_1_b=bias(f),
        P5_2_w=w3(f, f),  P5_2_b=bias(f),
        P4_1_w=w1(c4, f), P4_1_b=bias(f),
        P4_2_w=w3(f, f),  P4_2_b=bias(f),
        P3_1_w=w1(c3, f), P3_1_b=bias(f),
        P3_2_w=w3(f, f),  P3_2_b=bias(f),
        P6_w=w3(c5, f),   P6_b=bias(f),
        P7_2_w=w3(f, f),  P7_2_b=bias(f),
    )


def prepare_params(p, f):
    """Pad channels to lane multiples (128) and cast matmul weights to bf16
    (biases stay f32).  Zero padding keeps padded lanes exactly zero end-to-end."""
    f_pad = _round_up(f, LANE)
    out = {}
    for k, v in p.items():
        if k.endswith("_b"):
            out[k] = jnp.pad(v, (0, f_pad - v.shape[0]))
        elif v.ndim == 2:                  # 1x1 weight: (Cin, Cout)
            cin = v.shape[0]
            out[k] = jnp.pad(v, ((0, _round_up(cin, LANE) - cin),
                                 (0, f_pad - v.shape[1]))).astype(jnp.bfloat16)
        else:                              # 3x3 weight: (9, Cin, Cout)
            cin = v.shape[1]
            out[k] = jnp.pad(v, ((0, 0), (0, _round_up(cin, LANE) - cin),
                                 (0, f_pad - v.shape[2]))).astype(jnp.bfloat16)
    return out


# ---------------------------------------------------------------------------
# Full FPN forward (mirrors FeaturePyramid.forward).
# ---------------------------------------------------------------------------
def feature_pyramid(params, c3_nchw, c4_nchw, c5_nchw, feature_size):
    def prep(t):  # NCHW f32 -> NHWC bf16 with channels padded to a lane multiple
        x = jnp.transpose(t, (0, 2, 3, 1)).astype(jnp.bfloat16)
        c = x.shape[-1]
        return jnp.pad(x, ((0, 0), (0, 0), (0, 0), (0, _round_up(c, LANE) - c)))

    to_nchw = lambda t: jnp.transpose(t, (0, 3, 1, 2))
    C3, C4, C5 = prep(c3_nchw), prep(c4_nchw), prep(c5_nchw)
    p = params

    P5_x = conv1x1(C5, p["P5_1_w"], p["P5_1_b"])                      # P5_1
    P5_out = conv3x3(P5_x, p["P5_2_w"], p["P5_2_b"])                  # P5_2
    P4_x = conv1x1(C4, p["P4_1_w"], p["P4_1_b"],
                   residual_half=P5_x)                                # P4_1 + up2(P5_x) fused
    P4_out = conv3x3(P4_x, p["P4_2_w"], p["P4_2_b"])                  # P4_2
    P3_x = conv1x1(C3, p["P3_1_w"], p["P3_1_b"],
                   residual_half=P4_x)                                # P3_1 + up2(P4_x) fused
    P3_out = conv3x3(P3_x, p["P3_2_w"], p["P3_2_b"])                  # P3_2
    P6_out = conv3x3(C5, p["P6_w"], p["P6_b"], stride=2)              # P6 (stride 2)
    P7_out = conv3x3(P6_out, p["P7_2_w"], p["P7_2_b"],
                     stride=2, relu_input=True)                       # P7_1 (ReLU) + P7_2
    # TODO(synk): fuse each level's 1x1(+residual) and 3x3 into one pallas_call to
    # drop per-level launch + HBM round-trip overhead at small batch sizes.

    outs = [P3_out, P4_out, P5_out, P6_out, P7_out]
    # slice padded feature channels back to the logical feature_size, return NCHW f32
    return [to_nchw(o[..., :feature_size].astype(jnp.float32)) for o in outs]


# ---------------------------------------------------------------------------
# Pure-JAX f32 reference (matches the PyTorch module), for validation.
# ---------------------------------------------------------------------------
def fpn_reference(p, c3, c4, c5):
    hi = lax.Precision.HIGHEST
    to_nhwc = lambda t: jnp.transpose(t, (0, 2, 3, 1))
    to_nchw = lambda t: jnp.transpose(t, (0, 3, 1, 2))

    def conv1(x, w, b):
        return jnp.einsum("nhwc,cf->nhwf", x, w, precision=hi) + b

    def conv3(x, w, b, stride=1):
        w4 = w.reshape(3, 3, w.shape[1], w.shape[2])
        y = lax.conv_general_dilated(
            x, w4, (stride, stride), ((1, 1), (1, 1)),
            dimension_numbers=("NHWC", "HWIO", "NHWC"), precision=hi)
        return y + b

    def up2(x):
        return jnp.repeat(jnp.repeat(x, 2, axis=1), 2, axis=2)

    C3, C4, C5 = to_nhwc(c3), to_nhwc(c4), to_nhwc(c5)
    P5x = conv1(C5, p["P5_1_w"], p["P5_1_b"])
    P5o = conv3(P5x, p["P5_2_w"], p["P5_2_b"])
    P4x = conv1(C4, p["P4_1_w"], p["P4_1_b"]) + up2(P5x)
    P4o = conv3(P4x, p["P4_2_w"], p["P4_2_b"])
    P3x = conv1(C3, p["P3_1_w"], p["P3_1_b"]) + up2(P4x)
    P3o = conv3(P3x, p["P3_2_w"], p["P3_2_b"])
    P6o = conv3(C5, p["P6_w"], p["P6_b"], stride=2)
    P7o = conv3(jnp.maximum(P6o, 0.0), p["P7_2_w"], p["P7_2_b"], stride=2)
    return [to_nchw(t) for t in (P3o, P4o, P5o, P6o, P7o)]


if __name__ == "__main__":
    # Small, FPN-consistent shapes (NCHW, matching the PyTorch module's inputs):
    #   C3: (2, 4, 16, 16), C4: (2, 8, 8, 8), C5: (2, 16, 4, 4), feature_size=32
    C3_size, C4_size, C5_size, feat = 4, 8, 16, 32
    key = jax.random.PRNGKey(0)
    k1, k2, k3, kp = jax.random.split(key, 4)
    C3 = jax.random.normal(k1, (2, C3_size, 16, 16), jnp.float32)
    C4 = jax.random.normal(k2, (2, C4_size, 8, 8), jnp.float32)
    C5 = jax.random.normal(k3, (2, C5_size, 4, 4), jnp.float32)
    raw = init_params(kp, C3_size, C4_size, C5_size, feat)
    params = prepare_params(raw, feat)

    fwd = jax.jit(functools.partial(feature_pyramid, feature_size=feat))
    outs = jax.block_until_ready(fwd(params, C3, C4, C5))

    expected = [(2, feat, 16, 16), (2, feat, 8, 8), (2, feat, 4, 4),
                (2, feat, 2, 2), (2, feat, 1, 1)]
    assert [o.shape for o in outs] == expected, [o.shape for o in outs]

    refs = fpn_reference(raw, C3, C4, C5)
    for o, r in zip(outs, refs):
        assert o.shape == r.shape
        err = float(jnp.max(jnp.abs(o - r)))
        assert err < 6e-2, f"max abs err {err}"  # loose tolerance: bf16 weights/activations
    print("KERNEL_OK")
</pallas_src>

<mosaic_0001>
module attributes {stable_mosaic.version = 11 : i64} {
  func.func @_conv1x1_kernel(%arg0: i32, %arg1: memref<32x128xbf16, #tpu.memory_space<vmem>>, %arg2: memref<128x128xbf16, #tpu.memory_space<vmem>>, %arg3: memref<1x128xf32, #tpu.memory_space<vmem>>, %arg4: memref<32x128xbf16, #tpu.memory_space<vmem>>) attributes {dimension_semantics = [#tpu.dimension_semantics<parallel>], iteration_bounds = array<i64: 1>, scalar_prefetch = 0 : i64, scratch_operands = 0 : i64, tpu.core_type = #tpu.core_type<tc>, window_params = [{transform_indices = @transform_0, window_bounds = array<i64: 32, 128>}, {pipeline_mode = #tpu.pipeline_mode<synchronous>, transform_indices = @transform_1, window_bounds = array<i64: 128, 128>}, {pipeline_mode = #tpu.pipeline_mode<synchronous>, transform_indices = @transform_2, window_bounds = array<i64: 1, 128>}, {transform_indices = @transform_3, window_bounds = array<i64: 32, 128>}]} {
    %c0 = arith.constant 0 : index
    %c0_0 = arith.constant 0 : index
    %0 = vector.load %arg1[%c0, %c0_0] : memref<32x128xbf16, #tpu.memory_space<vmem>>, vector<32x128xbf16>
    %c0_1 = arith.constant 0 : index
    %c0_2 = arith.constant 0 : index
    %1 = vector.load %arg2[%c0_1, %c0_2] : memref<128x128xbf16, #tpu.memory_space<vmem>>, vector<128x128xbf16>
    %cst = arith.constant dense<0.000000e+00> : vector<32x128xf32>
    %2 = tpu.matmul %0, %1, %cst {dimension_numbers = #tpu.dot_dimension_numbers<[1], [0], [0], [1], [0, 0, 1, 1], [], []>} : vector<32x128xbf16>, vector<128x128xbf16>, vector<32x128xf32> -> vector<32x128xf32>
    %c0_3 = arith.constant 0 : index
    %c0_4 = arith.constant 0 : index
    %3 = vector.load %arg3[%c0_3, %c0_4] : memref<1x128xf32, #tpu.memory_space<vmem>>, vector<1x128xf32>
    %4 = vector.broadcast %3 : vector<1x128xf32> to vector<32x128xf32>
    %5 = arith.addf %2, %4 : vector<32x128xf32>
    %6 = arith.truncf %5 : vector<32x128xf32> to vector<32x128xbf16>
    %c0_5 = arith.constant 0 : index
    %c0_6 = arith.constant 0 : index
    %7 = vector.load %arg4[%c0_5, %c0_6] : memref<32x128xbf16, #tpu.memory_space<vmem>>, vector<32x128xbf16>
    tpu.vector_store %arg4[%c0_5, %c0_6], %6 {strides = array<i32>} : memref<32x128xbf16, #tpu.memory_space<vmem>>, vector<32x128xbf16>,
    return
  }
  func.func @transform_0(%arg0: i32) -> (i32, i32) {
    %c0_i32 = arith.constant 0 : i32
    %c0_i32_0 = arith.constant 0 : i32
    return %arg0, %c0_i32 : i32, i32
  }
  func.func @transform_1(%arg0: i32) -> (i32, i32) {
    %c0_i32 = arith.constant 0 : i32
    %c0_i32_0 = arith.constant 0 : i32
    %c0_i32_1 = arith.constant 0 : i32
    return %c0_i32, %c0_i32_0 : i32, i32
  }
  func.func @transform_2(%arg0: i32) -> (i32, i32) {
    %c0_i32 = arith.constant 0 : i32
    %c0_i32_0 = arith.constant 0 : i32
    %c0_i32_1 = arith.constant 0 : i32
    return %c0_i32, %c0_i32_0 : i32, i32
  }
  func.func @transform_3(%arg0: i32) -> (i32, i32) {
    %c0_i32 = arith.constant 0 : i32
    %c0_i32_0 = arith.constant 0 : i32
    return %arg0, %c0_i32 : i32, i32
  }
}

module attributes {stable_mosaic.version = 11 : i64} {
  func.func @_conv1x1_up_kernel(%arg0: i32, %arg1: memref<128x128xbf16, #tpu.memory_space<vmem>>, %arg2: memref<128x128xbf16, #tpu.memory_space<vmem>>, %arg3: memref<1x128xf32, #tpu.memory_space<vmem>>, %arg4: memref<32x128xbf16, #tpu.memory_space<vmem>>, %arg5: memref<128x32xbf16, #tpu.memory_space<vmem>>, %arg6: memref<128x128xbf16, #tpu.memory_space<vmem>>) attributes {dimension_semantics = [#tpu.dimension_semantics<parallel>], iteration_bounds = array<i64: 1>, scalar_prefetch = 0 : i64, scratch_operands = 0 : i64, tpu.core_type = #tpu.core_type<tc>, window_params = [{transform_indices = @transform_0, window_bounds = array<i64: 128, 128>}, {pipeline_mode = #tpu.pipeline_mode<synchronous>, transform_indices = @transform_1, window_bounds = array<i64: 128, 128>}, {pipeline_mode = #tpu.pipeline_mode<synchronous>, transform_indices = @transform_2, window_bounds = array<i64: 1, 128>}, {transform_indices = @transform_3, window_bounds = array<i64: 32, 128>}, {pipeline_mode = #tpu.pipeline_mode<synchronous>, transform_indices = @transform_4, window_bounds = array<i64: 128, 32>}, {transform_indices = @transform_5, window_bounds = array<i64: 128, 128>}]} {
    %c0 = arith.constant 0 : index
    %c0_0 = arith.constant 0 : index
    %0 = vector.load %arg1[%c0, %c0_0] : memref<128x128xbf16, #tpu.memory_space<vmem>>, vector<128x128xbf16>
    %c0_1 = arith.constant 0 : index
    %c0_2 = arith.constant 0 : index
    %1 = vector.load %arg2[%c0_1, %c0_2] : memref<128x128xbf16, #tpu.memory_space<vmem>>, vector<128x128xbf16>
    %cst = arith.constant dense<0.000000e+00> : vector<128x128xf32>
    %2 = tpu.matmul %0, %1, %cst {dimension_numbers = #tpu.dot_dimension_numbers<[1], [0], [0], [1], [0, 0, 1, 1], [], []>} : vector<128x128xbf16>, vector<128x128xbf16>, vector<128x128xf32> -> vector<128x128xf32>
    %c0_3 = arith.constant 0 : index
    %c0_4 = arith.constant 0 : index
    %3 = vector.load %arg5[%c0_3, %c0_4] : memref<128x32xbf16, #tpu.memory_space<vmem>>, vector<128x32xbf16>
    %c0_5 = arith.constant 0 : index
    %c0_6 = arith.constant 0 : index
    %4 = vector.load %arg4[%c0_5, %c0_6] : memref<32x128xbf16, #tpu.memory_space<vmem>>, vector<32x128xbf16>
    %cst_7 = arith.constant dense<0.000000e+00> : vector<128x128xf32>
    %5 = tpu.matmul %3, %4, %cst_7 {dimension_numbers = #tpu.dot_dimension_numbers<[1], [0], [0], [1], [0, 0, 1, 1], [], []>} : vector<128x32xbf16>, vector<32x128xbf16>, vector<128x128xf32> -> vector<128x128xf32>
    %c0_8 = arith.constant 0 : index
    %c0_9 = arith.constant 0 : index
    %6 = vector.load %arg3[%c0_8, %c0_9] : memref<1x128xf32, #tpu.memory_space<vmem>>, vector<1x128xf32>
    %7 = vector.broadcast %6 : vector<1x128xf32> to vector<128x128xf32>
    %8 = arith.addf %2, %7 : vector<128x128xf32>
    %9 = arith.addf %8, %5 : vector<128x128xf32>
    %10 = arith.truncf %9 : vector<128x128xf32> to vector<128x128xbf16>
    %c0_10 = arith.constant 0 : index
    %c0_11 = arith.constant 0 : index
    %11 = vector.load %arg6[%c0_10, %c0_11] : memref<128x128xbf16, #tpu.memory_space<vmem>>, vector<128x128xbf16>
    tpu.vector_store %arg6[%c0_10, %c0_11], %10 {strides = array<i32>} : memref<128x128xbf16, #tpu.memory_space<vmem>>, vector<128x128xbf16>,
    return
  }
  func.func @transform_0(%arg0: i32) -> (i32, i32) {
    %c0_i32 = arith.constant 0 : i32
    %c0_i32_0 = arith.constant 0 : i32
    return %arg0, %c0_i32 : i32, i32
  }
  func.func @transform_1(%arg0: i32) -> (i32, i32) {
    %c0_i32 = arith.constant 0 : i32
    %c0_i32_0 = arith.constant 0 : i32
    %c0_i32_1 = arith.constant 0 : i32
    return %c0_i32, %c0_i32_0 : i32, i32
  }
  func.func @transform_2(%arg0: i32) -> (i32, i32) {
    %c0_i32 = arith.constant 0 : i32
    %c0_i32_0 = arith.constant 0 : i32
    %c0_i32_1 = arith.constant 0 : i32
    return %c0_i32, %c0_i32_0 : i32, i32
  }
  func.func @transform_3(%arg0: i32) -> (i32, i32) {
    %c0_i32 = arith.constant 0 : i32
    %c0_i32_0 = arith.constant 0 : i32
    return %arg0, %c0_i32 : i32, i32
  }
  func.func @transform_4(%arg0: i32) -> (i32, i32) {
    %c0_i32 = arith.constant 0 : i32
    %c0_i32_0 = arith.constant 0 : i32
    %c0_i32_1 = arith.constant 0 : i32
    return %c0_i32, %c0_i32_0 : i32, i32
  }
  func.func @transform_5(%arg0: i32) -> (i32, i32) {
    %c0_i32 = arith.constant 0 : i32
    %c0_i32_0 = arith.constant 0 : i32
    return %arg0, %c0_i32 : i32, i32
  }
}

module attributes {stable_mosaic.version = 11 : i64} {
  func.func @_conv1x1_up_kernel(%arg0: i32, %arg1: memref<512x128xbf16, #tpu.memory_space<vmem>>, %arg2: memref<128x128xbf16, #tpu.memory_space<vmem>>, %arg3: memref<1x128xf32, #tpu.memory_space<vmem>>, %arg4: memref<128x128xbf16, #tpu.memory_space<vmem>>, %arg5: memref<512x128xbf16, #tpu.memory_space<vmem>>, %arg6: memref<512x128xbf16, #tpu.memory_space<vmem>>) attributes {dimension_semantics = [#tpu.dimension_semantics<parallel>], iteration_bounds = array<i64: 1>, scalar_prefetch = 0 : i64, scratch_operands = 0 : i64, tpu.core_type = #tpu.core_type<tc>, window_params = [{transform_indices = @transform_0, window_bounds = array<i64: 512, 128>}, {pipeline_mode = #tpu.pipeline_mode<synchronous>, transform_indices = @transform_1, window_bounds = array<i64: 128, 128>}, {pipeline_mode = #tpu.pipeline_mode<synchronous>, transform_indices = @transform_2, window_bounds = array<i64: 1, 128>}, {transform_indices = @transform_3, window_bounds = array<i64: 128, 128>}, {pipeline_mode = #tpu.pipeline_mode<synchronous>, transform_indices = @transform_4, window_bounds = array<i64: 512, 128>}, {transform_indices = @transform_5, window_bounds = array<i64: 512, 128>}]} {
    %c0 = arith.constant 0 : index
    %c0_0 = arith.constant 0 : index
    %0 = vector.load %arg1[%c0, %c0_0] : memref<512x128xbf16, #tpu.memory_space<vmem>>, vector<512x128xbf16>
    %c0_1 = arith.constant 0 : index
    %c0_2 = arith.constant 0 : index
    %1 = vector.load %arg2[%c0_1, %c0_2] : memref<128x128xbf16, #tpu.memory_space<vmem>>, vector<128x128xbf16>
    %cst = arith.constant dense<0.000000e+00> : vector<512x128xf32>
    %2 = tpu.matmul %0, %1, %cst {dimension_numbers = #tpu.dot_dimension_numbers<[1], [0], [0], [1], [0, 0, 1, 1], [], []>} : vector<512x128xbf16>, vector<128x128xbf16>, vector<512x128xf32> -> vector<512x128xf32>
    %c0_3 = arith.constant 0 : index
    %c0_4 = arith.constant 0 : index
    %3 = vector.load %arg5[%c0_3, %c0_4] : memref<512x128xbf16, #tpu.memory_space<vmem>>, vector<512x128xbf16>
    %c0_5 = arith.constant 0 : index
    %c0_6 = arith.constant 0 : index
    %4 = vector.load %arg4[%c0_5, %c0_6] : memref<128x128xbf16, #tpu.memory_space<vmem>>, vector<128x128xbf16>
    %cst_7 = arith.constant dense<0.000000e+00> : vector<512x128xf32>
    %5 = tpu.matmul %3, %4, %cst_7 {dimension_numbers = #tpu.dot_dimension_numbers<[1], [0], [0], [1], [0, 0, 1, 1], [], []>} : vector<512x128xbf16>, vector<128x128xbf16>, vector<512x128xf32> -> vector<512x128xf32>
    %c0_8 = arith.constant 0 : index
    %c0_9 = arith.constant 0 : index
    %6 = vector.load %arg3[%c0_8, %c0_9] : memref<1x128xf32, #tpu.memory_space<vmem>>, vector<1x128xf32>
    %7 = vector.broadcast %6 : vector<1x128xf32> to vector<512x128xf32>
    %8 = arith.addf %2, %7 : vector<512x128xf32>
    %9 = arith.addf %8, %5 : vector<512x128xf32>
    %10 = arith.truncf %9 : vector<512x128xf32> to vector<512x128xbf16>
    %c0_10 = arith.constant 0 : index
    %c0_11 = arith.constant 0 : index
    %11 = vector.load %arg6[%c0_10, %c0_11] : memref<512x128xbf16, #tpu.memory_space<vmem>>, vector<512x128xbf16>
    tpu.vector_store %arg6[%c0_10, %c0_11], %10 {strides = array<i32>} : memref<512x128xbf16, #tpu.memory_space<vmem>>, vector<512x128xbf16>,
    return
  }
  func.func @transform_0(%arg0: i32) -> (i32, i32) {
    %c0_i32 = arith.constant 0 : i32
    %c0_i32_0 = arith.constant 0 : i32
    return %arg0, %c0_i32 : i32, i32
  }
  func.func @transform_1(%arg0: i32) -> (i32, i32) {
    %c0_i32 = arith.constant 0 : i32
    %c0_i32_0 = arith.constant 0 : i32
    %c0_i32_1 = arith.constant 0 : i32
    return %c0_i32, %c0_i32_0 : i32, i32
  }
  func.func @transform_2(%arg0: i32) -> (i32, i32) {
    %c0_i32 = arith.constant 0 : i32
    %c0_i32_0 = arith.constant 0 : i32
    %c0_i32_1 = arith.constant 0 : i32
    return %c0_i32, %c0_i32_0 : i32, i32
  }
  func.func @transform_3(%arg0: i32) -> (i32, i32) {
    %c0_i32 = arith.constant 0 : i32
    %c0_i32_0 = arith.constant 0 : i32
    return %arg0, %c0_i32 : i32, i32
  }
  func.func @transform_4(%arg0: i32) -> (i32, i32) {
    %c0_i32 = arith.constant 0 : i32
    %c0_i32_0 = arith.constant 0 : i32
    %c0_i32_1 = arith.constant 0 : i32
    return %c0_i32, %c0_i32_0 : i32, i32
  }
  func.func @transform_5(%arg0: i32) -> (i32, i32) {
    %c0_i32 = arith.constant 0 : i32
    %c0_i32_0 = arith.constant 0 : i32
    return %arg0, %c0_i32 : i32, i32
  }
}

module attributes {stable_mosaic.version = 11 : i64} {
  func.func @_conv3x3_kernel(%arg0: i32, %arg1: memref<1x440x128xbf16, #tpu.memory_space<vmem>>, %arg2: memref<9x128x128xbf16, #tpu.memory_space<vmem>>, %arg3: memref<1x128xf32, #tpu.memory_space<vmem>>, %arg4: memref<1x384x128xbf16, #tpu.memory_space<vmem>>) attributes {dimension_semantics = [#tpu.dimension_semantics<parallel>], iteration_bounds = array<i64: 2>, scalar_prefetch = 0 : i64, scratch_operands = 0 : i64, tpu.core_type = #tpu.core_type<tc>, window_params = [{transform_indices = @transform_0, window_bounds = array<i64: 1, 440, 128>}, {pipeline_mode = #tpu.pipeline_mode<synchronous>, transform_indices = @transform_1, window_bounds = array<i64: 9, 128, 128>}, {pipeline_mode = #tpu.pipeline_mode<synchronous>, transform_indices = @transform_2, window_bounds = array<i64: 1, 128>}, {transform_indices = @transform_3, window_bounds = array<i64: 1, 384, 128>}]} {
    %c0 = arith.constant 0 : index
    %c0_0 = arith.constant 0 : index
    %c0_1 = arith.constant 0 : index
    %0 = vector.load %arg1[%c0, %c0_0, %c0_1] : memref<1x440x128xbf16, #tpu.memory_space<vmem>>, vector<1x440x128xbf16>
    %1 = vector.shape_cast %0 : vector<1x440x128xbf16> to vector<440x128xbf16>
    %cst = arith.constant 0.000000e+00 : f32
    %2 = vector.broadcast %cst : f32 to vector<384x128xf32>
    %3 = vector.extract_strided_slice %1 {offsets = [0, 0], sizes = [384, 128], strides = [1, 1]} : vector<440x128xbf16> to vector<384x128xbf16>
    %c0_2 = arith.constant 0 : index
    %c0_3 = arith.constant 0 : index
    %c0_4 = arith.constant 0 : index
    %4 = vector.load %arg2[%c0_2, %c0_3, %c0_4] : memref<9x128x128xbf16, #tpu.memory_space<vmem>>, vector<1x128x128xbf16>
    %5 = vector.shape_cast %4 : vector<1x128x128xbf16> to vector<128x128xbf16>
    %cst_5 = arith.constant dense<0.000000e+00> : vector<384x128xf32>
    %6 = tpu.matmul %3, %5, %cst_5 {dimension_numbers = #tpu.dot_dimension_numbers<[1], [0], [0], [1], [0, 0, 1, 1], [], []>} : vector<384x128xbf16>, vector<128x128xbf16>, vector<384x128xf32> -> vector<384x128xf32>
    %7 = arith.addf %2, %6 : vector<384x128xf32>
    %8 = vector.extract_strided_slice %1 {offsets = [1, 0], sizes = [384, 128], strides = [1, 1]} : vector<440x128xbf16> to vector<384x128xbf16>
    %c1 = arith.constant 1 : index
    %c0_6 = arith.constant 0 : index
    %c0_7 = arith.constant 0 : index
    %9 = vector.load %arg2[%c1, %c0_6, %c0_7] : memref<9x128x128xbf16, #tpu.memory_space<vmem>>, vector<1x128x128xbf16>
    %10 = vector.shape_cast %9 : vector<1x128x128xbf16> to vector<128x128xbf16>
    %cst_8 = arith.constant dense<0.000000e+00> : vector<384x128xf32>
    %11 = tpu.matmul %8, %10, %cst_8 {dimension_numbers = #tpu.dot_dimension_numbers<[1], [0], [0], [1], [0, 0, 1, 1], [], []>} : vector<384x128xbf16>, vector<128x128xbf16>, vector<384x128xf32> -> vector<384x128xf32>
    %12 = arith.addf %7, %11 : vector<384x128xf32>
    %13 = vector.extract_strided_slice %1 {offsets = [2, 0], sizes = [384, 128], strides = [1, 1]} : vector<440x128xbf16> to vector<384x128xbf16>
    %c2 = arith.constant 2 : index
    %c0_9 = arith.constant 0 : index
    %c0_10 = arith.constant 0 : index
    %14 = vector.load %arg2[%c2, %c0_9, %c0_10] : memref<9x128x128xbf16, #tpu.memory_space<vmem>>, vector<1x128x128xbf16>
    %15 = vector.shape_cast %14 : vector<1x128x128xbf16> to vector<128x128xbf16>
    %cst_11 = arith.constant dense<0.000000e+00> : vector<384x128xf32>
    %16 = tpu.matmul %13, %15, %cst_11 {dimension_numbers = #tpu.dot_dimension_numbers<[1], [0], [0], [1], [0, 0, 1, 1], [], []>} : vector<384x128xbf16>, vector<128x128xbf16>, vector<384x128xf32> -> vector<384x128xf32>
    %17 = arith.addf %12, %16 : vector<384x128xf32>
    %18 = vector.extract_strided_slice %1 {offsets = [24, 0], sizes = [384, 128], strides = [1, 1]} : vector<440x128xbf16> to vector<384x128xbf16>
    %c3 = arith.constant 3 : index
    %c0_12 = arith.constant 0 : index
    %c0_13 = arith.constant 0 : index
    %19 = vector.load %arg2[%c3, %c0_12, %c0_13] : memref<9x128x128xbf16, #tpu.memory_space<vmem>>, vector<1x128x128xbf16>
    %20 = vector.shape_cast %19 : vector<1x128x128xbf16> to vector<128x128xbf16>
    %cst_14 = arith.constant dense<0.000000e+00> : vector<384x128xf32>
    %21 = tpu.matmul %18, %20, %cst_14 {dimension_numbers = #tpu.dot_dimension_numbers<[1], [0], [0], [1], [0, 0, 1, 1], [], []>} : vector<384x128xbf16>, vector<128x128xbf16>, vector<384x128xf32> -> vector<384x128xf32>
    %22 = arith.addf %17, %21 : vector<384x128xf32>
    %23 = vector.extract_strided_slice %1 {offsets = [25, 0], sizes = [384, 128], strides = [1, 1]} : vector<440x128xbf16> to vector<384x128xbf16>
    %c4 = arith.constant 4 : index
    %c0_15 = arith.constant 0 : index
    %c0_16 = arith.constant 0 : index
    %24 = vector.load %arg2[%c4, %c0_15, %c0_16] : memref<9x128x128xbf16, #tpu.memory_space<vmem>>, vector<1x128x128xbf16>
    %25 = vector.shape_cast %24 : vector<1x128x128xbf16> to vector<128x128xbf16>
    %cst_17 = arith.constant dense<0.000000e+00> : vector<384x128xf32>
    %26 = tpu.matmul %23, %25, %cst_17 {dimension_numbers = #tpu.dot_dimension_numbers<[1], [0], [0], [1], [0, 0, 1, 1], [], []>} : vector<384x128xbf16>, vector<128x128xbf16>, vector<384x128xf32> -> vector<384x128xf32>
    %27 = arith.addf %22, %26 : vector<384x128xf32>
    %28 = vector.extract_strided_slice %1 {offsets = [26, 0], sizes = [384, 128], strides = [1, 1]} : vector<440x128xbf16> to vector<384x128xbf16>
    %c5 = arith.constant 5 : index
    %c0_18 = arith.constant 0 : index
    %c0_19 = arith.constant 0 : index
    %29 = vector.load %arg2[%c5, %c0_18, %c0_19] : memref<9x128x128xbf16, #tpu.memory_space<vmem>>, vector<1x128x128xbf16>
    %30 = vector.shape_cast %29 : vector<1x128x128xbf16> to vector<128x128xbf16>
    %cst_20 = arith.constant dense<0.000000e+00> : vector<384x128xf32>
    %31 = tpu.matmul %28, %30, %cst_20 {dimension_numbers = #tpu.dot_dimension_numbers<[1], [0], [0], [1], [0, 0, 1, 1], [], []>} : vector<384x128xbf16>, vector<128x128xbf16>, vector<384x128xf32> -> vector<384x128xf32>
    %32 = arith.addf %27, %31 : vector<384x128xf32>
    %33 = vector.extract_strided_slice %1 {offsets = [48, 0], sizes = [384, 128], strides = [1, 1]} : vector<440x128xbf16> to vector<384x128xbf16>
    %c6 = arith.constant 6 : index
    %c0_21 = arith.constant 0 : index
    %c0_22 = arith.constant 0 : index
    %34 = vector.load %arg2[%c6, %c0_21, %c0_22] : memref<9x128x128xbf16, #tpu.memory_space<vmem>>, vector<1x128x128xbf16>
    %35 = vector.shape_cast %34 : vector<1x128x128xbf16> to vector<128x128xbf16>
    %cst_23 = arith.constant dense<0.000000e+00> : vector<384x128xf32>
    %36 = tpu.matmul %33, %35, %cst_23 {dimension_numbers = #tpu.dot_dimension_numbers<[1], [0], [0], [1], [0, 0, 1, 1], [], []>} : vector<384x128xbf16>, vector<128x128xbf16>, vector<384x128xf32> -> vector<384x128xf32>
    %37 = arith.addf %32, %36 : vector<384x128xf32>
    %38 = vector.extract_strided_slice %1 {offsets = [49, 0], sizes = [384, 128], strides = [1, 1]} : vector<440x128xbf16> to vector<384x128xbf16>
    %c7 = arith.constant 7 : index
    %c0_24 = arith.constant 0 : index
    %c0_25 = arith.constant 0 : index
    %39 = vector.load %arg2[%c7, %c0_24, %c0_25] : memref<9x128x128xbf16, #tpu.memory_space<vmem>>, vector<1x128x128xbf16>
    %40 = vector.shape_cast %39 : vector<1x128x128xbf16> to vector<128x128xbf16>
    %cst_26 = arith.constant dense<0.000000e+00> : vector<384x128xf32>
    %41 = tpu.matmul %38, %40, %cst_26 {dimension_numbers = #tpu.dot_dimension_numbers<[1], [0], [0], [1], [0, 0, 1, 1], [], []>} : vector<384x128xbf16>, vector<128x128xbf16>, vector<384x128xf32> -> vector<384x128xf32>
    %42 = arith.addf %37, %41 : vector<384x128xf32>
    %43 = vector.extract_strided_slice %1 {offsets = [50, 0], sizes = [384, 128], strides = [1, 1]} : vector<440x128xbf16> to vector<384x128xbf16>
    %c8 = arith.constant 8 : index
    %c0_27 = arith.constant 0 : index
    %c0_28 = arith.constant 0 : index
    %44 = vector.load %arg2[%c8, %c0_27, %c0_28] : memref<9x128x128xbf16, #tpu.memory_space<vmem>>, vector<1x128x128xbf16>
    %45 = vector.shape_cast %44 : vector<1x128x128xbf16> to vector<128x128xbf16>
    %cst_29 = arith.constant dense<0.000000e+00> : vector<384x128xf32>
    %46 = tpu.matmul %43, %45, %cst_29 {dimension_numbers = #tpu.dot_dimension_numbers<[1], [0], [0], [1], [0, 0, 1, 1], [], []>} : vector<384x128xbf16>, vector<128x128xbf16>, vector<384x128xf32> -> vector<384x128xf32>
    %47 = arith.addf %42, %46 : vector<384x128xf32>
    %c0_30 = arith.constant 0 : index
    %c0_31 = arith.constant 0 : index
    %48 = vector.load %arg3[%c0_30, %c0_31] : memref<1x128xf32, #tpu.memory_space<vmem>>, vector<1x128xf32>
    %49 = vector.broadcast %48 : vector<1x128xf32> to vector<384x128xf32>
    %50 = arith.addf %47, %49 : vector<384x128xf32>
    %51 = arith.truncf %50 : vector<384x128xf32> to vector<384x128xbf16>
    %c0_32 = arith.constant 0 : index
    %c0_33 = arith.constant 0 : index
    %c0_34 = arith.constant 0 : index
    %52 = vector.load %arg4[%c0_32, %c0_33, %c0_34] : memref<1x384x128xbf16, #tpu.memory_space<vmem>>, vector<1x384x128xbf16>
    %53 = vector.shape_cast %52 : vector<1x384x128xbf16> to vector<384x128xbf16>
    %54 = vector.shape_cast %51 : vector<384x128xbf16> to vector<1x384x128xbf16>
    tpu.vector_store %arg4[%c0_32, %c0_33, %c0_34], %54 {strides = array<i32>} : memref<1x384x128xbf16, #tpu.memory_space<vmem>>, vector<1x384x128xbf16>,
    return
  }
  func.func @transform_0(%arg0: i32) -> (i32, i32, i32) {
    %c0_i32 = arith.constant 0 : i32
    %c0_i32_0 = arith.constant 0 : i32
    %c0_i32_1 = arith.constant 0 : i32
    return %arg0, %c0_i32, %c0_i32_0 : i32, i32, i32
  }
  func.func @transform_1(%arg0: i32) -> (i32, i32, i32) {
    %c0_i32 = arith.constant 0 : i32
    %c0_i32_0 = arith.constant 0 : i32
    %c0_i32_1 = arith.constant 0 : i32
    %c0_i32_2 = arith.constant 0 : i32
    return %c0_i32, %c0_i32_0, %c0_i32_1 : i32, i32, i32
  }
  func.func @transform_2(%arg0: i32) -> (i32, i32) {
    %c0_i32 = arith.constant 0 : i32
    %c0_i32_0 = arith.constant 0 : i32
    %c0_i32_1 = arith.constant 0 : i32
    return %c0_i32, %c0_i32_0 : i32, i32
  }
  func.func @transform_3(%arg0: i32) -> (i32, i32, i32) {
    %c0_i32 = arith.constant 0 : i32
    %c0_i32_0 = arith.constant 0 : i32
    %c0_i32_1 = arith.constant 0 : i32
    return %arg0, %c0_i32, %c0_i32_0 : i32, i32, i32
  }
}

module attributes {stable_mosaic.version = 11 : i64} {
  func.func @_conv3x3_kernel(%arg0: i32, %arg1: memref<1x168x128xbf16, #tpu.memory_space<vmem>>, %arg2: memref<9x128x128xbf16, #tpu.memory_space<vmem>>, %arg3: memref<1x128xf32, #tpu.memory_space<vmem>>, %arg4: memref<1x128x128xbf16, #tpu.memory_space<vmem>>) attributes {dimension_semantics = [#tpu.dimension_semantics<parallel>], iteration_bounds = array<i64: 2>, scalar_prefetch = 0 : i64, scratch_operands = 0 : i64, tpu.core_type = #tpu.core_type<tc>, window_params = [{transform_indices = @transform_0, window_bounds = array<i64: 1, 168, 128>}, {pipeline_mode = #tpu.pipeline_mode<synchronous>, transform_indices = @transform_1, window_bounds = array<i64: 9, 128, 128>}, {pipeline_mode = #tpu.pipeline_mode<synchronous>, transform_indices = @transform_2, window_bounds = array<i64: 1, 128>}, {transform_indices = @transform_3, window_bounds = array<i64: 1, 128, 128>}]} {
    %c0 = arith.constant 0 : index
    %c0_0 = arith.constant 0 : index
    %c0_1 = arith.constant 0 : index
    %0 = vector.load %arg1[%c0, %c0_0, %c0_1] : memref<1x168x128xbf16, #tpu.memory_space<vmem>>, vector<1x168x128xbf16>
    %1 = vector.shape_cast %0 : vector<1x168x128xbf16> to vector<168x128xbf16>
    %cst = arith.constant 0.000000e+00 : f32
    %2 = vector.broadcast %cst : f32 to vector<128x128xf32>
    %3 = vector.extract_strided_slice %1 {offsets = [0, 0], sizes = [128, 128], strides = [1, 1]} : vector<168x128xbf16> to vector<128x128xbf16>
    %c0_2 = arith.constant 0 : index
    %c0_3 = arith.constant 0 : index
    %c0_4 = arith.constant 0 : index
    %4 = vector.load %arg2[%c0_2, %c0_3, %c0_4] : memref<9x128x128xbf16, #tpu.memory_space<vmem>>, vector<1x128x128xbf16>
    %5 = vector.shape_cast %4 : vector<1x128x128xbf16> to vector<128x128xbf16>
    %cst_5 = arith.constant dense<0.000000e+00> : vector<128x128xf32>
    %6 = tpu.matmul %3, %5, %cst_5 {dimension_numbers = #tpu.dot_dimension_numbers<[1], [0], [0], [1], [0, 0, 1, 1], [], []>} : vector<128x128xbf16>, vector<128x128xbf16>, vector<128x128xf32> -> vector<128x128xf32>
    %7 = arith.addf %2, %6 : vector<128x128xf32>
    %8 = vector.extract_strided_slice %1 {offsets = [1, 0], sizes = [128, 128], strides = [1, 1]} : vector<168x128xbf16> to vector<128x128xbf16>
    %c1 = arith.constant 1 : index
    %c0_6 = arith.constant 0 : index
    %c0_7 = arith.constant 0 : index
    %9 = vector.load %arg2[%c1, %c0_6, %c0_7] : memref<9x128x128xbf16, #tpu.memory_space<vmem>>, vector<1x128x128xbf16>
    %10 = vector.shape_cast %9 : vector<1x128x128xbf16> to vector<128x128xbf16>
    %cst_8 = arith.constant dense<0.000000e+00> : vector<128x128xf32>
    %11 = tpu.matmul %8, %10, %cst_8 {dimension_numbers = #tpu.dot_dimension_numbers<[1], [0], [0], [1], [0, 0, 1, 1], [], []>} : vector<128x128xbf16>, vector<128x128xbf16>, vector<128x128xf32> -> vector<128x128xf32>
    %12 = arith.addf %7, %11 : vector<128x128xf32>
    %13 = vector.extract_strided_slice %1 {offsets = [2, 0], sizes = [128, 128], strides = [1, 1]} : vector<168x128xbf16> to vector<128x128xbf16>
    %c2 = arith.constant 2 : index
    %c0_9 = arith.constant 0 : index
    %c0_10 = arith.constant 0 : index
    %14 = vector.load %arg2[%c2, %c0_9, %c0_10] : memref<9x128x128xbf16, #tpu.memory_space<vmem>>, vector<1x128x128xbf16>
    %15 = vector.shape_cast %14 : vector<1x128x128xbf16> to vector<128x128xbf16>
    %cst_11 = arith.constant dense<0.000000e+00> : vector<128x128xf32>
    %16 = tpu.matmul %13, %15, %cst_11 {dimension_numbers = #tpu.dot_dimension_numbers<[1], [0], [0], [1], [0, 0, 1, 1], [], []>} : vector<128x128xbf16>, vector<128x128xbf16>, vector<128x128xf32> -> vector<128x128xf32>
    %17 = arith.addf %12, %16 : vector<128x128xf32>
    %18 = vector.extract_strided_slice %1 {offsets = [16, 0], sizes = [128, 128], strides = [1, 1]} : vector<168x128xbf16> to vector<128x128xbf16>
    %c3 = arith.constant 3 : index
    %c0_12 = arith.constant 0 : index
    %c0_13 = arith.constant 0 : index
    %19 = vector.load %arg2[%c3, %c0_12, %c0_13] : memref<9x128x128xbf16, #tpu.memory_space<vmem>>, vector<1x128x128xbf16>
    %20 = vector.shape_cast %19 : vector<1x128x128xbf16> to vector<128x128xbf16>
    %cst_14 = arith.constant dense<0.000000e+00> : vector<128x128xf32>
    %21 = tpu.matmul %18, %20, %cst_14 {dimension_numbers = #tpu.dot_dimension_numbers<[1], [0], [0], [1], [0, 0, 1, 1], [], []>} : vector<128x128xbf16>, vector<128x128xbf16>, vector<128x128xf32> -> vector<128x128xf32>
    %22 = arith.addf %17, %21 : vector<128x128xf32>
    %23 = vector.extract_strided_slice %1 {offsets = [17, 0], sizes = [128, 128], strides = [1, 1]} : vector<168x128xbf16> to vector<128x128xbf16>
    %c4 = arith.constant 4 : index
    %c0_15 = arith.constant 0 : index
    %c0_16 = arith.constant 0 : index
    %24 = vector.load %arg2[%c4, %c0_15, %c0_16] : memref<9x128x128xbf16, #tpu.memory_space<vmem>>, vector<1x128x128xbf16>
    %25 = vector.shape_cast %24 : vector<1x128x128xbf16> to vector<128x128xbf16>
    %cst_17 = arith.constant dense<0.000000e+00> : vector<128x128xf32>
    %26 = tpu.matmul %23, %25, %cst_17 {dimension_numbers = #tpu.dot_dimension_numbers<[1], [0], [0], [1], [0, 0, 1, 1], [], []>} : vector<128x128xbf16>, vector<128x128xbf16>, vector<128x128xf32> -> vector<128x128xf32>
    %27 = arith.addf %22, %26 : vector<128x128xf32>
    %28 = vector.extract_strided_slice %1 {offsets = [18, 0], sizes = [128, 128], strides = [1, 1]} : vector<168x128xbf16> to vector<128x128xbf16>
    %c5 = arith.constant 5 : index
    %c0_18 = arith.constant 0 : index
    %c0_19 = arith.constant 0 : index
    %29 = vector.load %arg2[%c5, %c0_18, %c0_19] : memref<9x128x128xbf16, #tpu.memory_space<vmem>>, vector<1x128x128xbf16>
    %30 = vector.shape_cast %29 : vector<1x128x128xbf16> to vector<128x128xbf16>
    %cst_20 = arith.constant dense<0.000000e+00> : vector<128x128xf32>
    %31 = tpu.matmul %28, %30, %cst_20 {dimension_numbers = #tpu.dot_dimension_numbers<[1], [0], [0], [1], [0, 0, 1, 1], [], []>} : vector<128x128xbf16>, vector<128x128xbf16>, vector<128x128xf32> -> vector<128x128xf32>
    %32 = arith.addf %27, %31 : vector<128x128xf32>
    %33 = vector.extract_strided_slice %1 {offsets = [32, 0], sizes = [128, 128], strides = [1, 1]} : vector<168x128xbf16> to vector<128x128xbf16>
    %c6 = arith.constant 6 : index
    %c0_21 = arith.constant 0 : index
    %c0_22 = arith.constant 0 : index
    %34 = vector.load %arg2[%c6, %c0_21, %c0_22] : memref<9x128x128xbf16, #tpu.memory_space<vmem>>, vector<1x128x128xbf16>
    %35 = vector.shape_cast %34 : vector<1x128x128xbf16> to vector<128x128xbf16>
    %cst_23 = arith.constant dense<0.000000e+00> : vector<128x128xf32>
    %36 = tpu.matmul %33, %35, %cst_23 {dimension_numbers = #tpu.dot_dimension_numbers<[1], [0], [0], [1], [0, 0, 1, 1], [], []>} : vector<128x128xbf16>, vector<128x128xbf16>, vector<128x128xf32> -> vector<128x128xf32>
    %37 = arith.addf %32, %36 : vector<128x128xf32>
    %38 = vector.extract_strided_slice %1 {offsets = [33, 0], sizes = [128, 128], strides = [1, 1]} : vector<168x128xbf16> to vector<128x128xbf16>
    %c7 = arith.constant 7 : index
    %c0_24 = arith.constant 0 : index
    %c0_25 = arith.constant 0 : index
    %39 = vector.load %arg2[%c7, %c0_24, %c0_25] : memref<9x128x128xbf16, #tpu.memory_space<vmem>>, vector<1x128x128xbf16>
    %40 = vector.shape_cast %39 : vector<1x128x128xbf16> to vector<128x128xbf16>
    %cst_26 = arith.constant dense<0.000000e+00> : vector<128x128xf32>
    %41 = tpu.matmul %38, %40, %cst_26 {dimension_numbers = #tpu.dot_dimension_numbers<[1], [0], [0], [1], [0, 0, 1, 1], [], []>} : vector<128x128xbf16>, vector<128x128xbf16>, vector<128x128xf32> -> vector<128x128xf32>
    %42 = arith.addf %37, %41 : vector<128x128xf32>
    %43 = vector.extract_strided_slice %1 {offsets = [34, 0], sizes = [128, 128], strides = [1, 1]} : vector<168x128xbf16> to vector<128x128xbf16>
    %c8 = arith.constant 8 : index
    %c0_27 = arith.constant 0 : index
    %c0_28 = arith.constant 0 : index
    %44 = vector.load %arg2[%c8, %c0_27, %c0_28] : memref<9x128x128xbf16, #tpu.memory_space<vmem>>, vector<1x128x128xbf16>
    %45 = vector.shape_cast %44 : vector<1x128x128xbf16> to vector<128x128xbf16>
    %cst_29 = arith.constant dense<0.000000e+00> : vector<128x128xf32>
    %46 = tpu.matmul %43, %45, %cst_29 {dimension_numbers = #tpu.dot_dimension_numbers<[1], [0], [0], [1], [0, 0, 1, 1], [], []>} : vector<128x128xbf16>, vector<128x128xbf16>, vector<128x128xf32> -> vector<128x128xf32>
    %47 = arith.addf %42, %46 : vector<128x128xf32>
    %c0_30 = arith.constant 0 : index
    %c0_31 = arith.constant 0 : index
    %48 = vector.load %arg3[%c0_30, %c0_31] : memref<1x128xf32, #tpu.memory_space<vmem>>, vector<1x128xf32>
    %49 = vector.broadcast %48 : vector<1x128xf32> to vector<128x128xf32>
    %50 = arith.addf %47, %49 : vector<128x128xf32>
    %51 = arith.truncf %50 : vector<128x128xf32> to vector<128x128xbf16>
    %c0_32 = arith.constant 0 : index
    %c0_33 = arith.constant 0 : index
    %c0_34 = arith.constant 0 : index
    %52 = vector.load %arg4[%c0_32, %c0_33, %c0_34] : memref<1x128x128xbf16, #tpu.memory_space<vmem>>, vector<1x128x128xbf16>
    %53 = vector.shape_cast %52 : vector<1x128x128xbf16> to vector<128x128xbf16>
    %54 = vector.shape_cast %51 : vector<128x128xbf16> to vector<1x128x128xbf16>
    tpu.vector_store %arg4[%c0_32, %c0_33, %c0_34], %54 {strides = array<i32>} : memref<1x128x128xbf16, #tpu.memory_space<vmem>>, vector<1x128x128xbf16>,
    return
  }
  func.func @transform_0(%arg0: i32) -> (i32, i32, i32) {
    %c0_i32 = arith.constant 0 : i32
    %c0_i32_0 = arith.constant 0 : i32
    %c0_i32_1 = arith.constant 0 : i32
    return %arg0, %c0_i32, %c0_i32_0 : i32, i32, i32
  }
  func.func @transform_1(%arg0: i32) -> (i32, i32, i32) {
    %c0_i32 = arith.constant 0 : i32
    %c0_i32_0 = arith.constant 0 : i32
    %c0_i32_1 = arith.constant 0 : i32
    %c0_i32_2 = arith.constant 0 : i32
    return %c0_i32, %c0_i32_0, %c0_i32_1 : i32, i32, i32
  }
  func.func @transform_2(%arg0: i32) -> (i32, i32) {
    %c0_i32 = arith.constant 0 : i32
    %c0_i32_0 = arith.constant 0 : i32
    %c0_i32_1 = arith.constant 0 : i32
    return %c0_i32, %c0_i32_0 : i32, i32
  }
  func.func @transform_3(%arg0: i32) -> (i32, i32, i32) {
    %c0_i32 = arith.constant 0 : i32
    %c0_i32_0 = arith.constant 0 : i32
    %c0_i32_1 = arith.constant 0 : i32
    return %arg0, %c0_i32, %c0_i32_0 : i32, i32, i32
  }
}

module attributes {stable_mosaic.version = 11 : i64} {
  func.func @_conv3x3_kernel(%arg0: i32, %arg1: memref<1x56x128xbf16, #tpu.memory_space<vmem>>, %arg2: memref<9x128x128xbf16, #tpu.memory_space<vmem>>, %arg3: memref<1x128xf32, #tpu.memory_space<vmem>>, %arg4: memref<1x16x128xbf16, #tpu.memory_space<vmem>>) attributes {dimension_semantics = [#tpu.dimension_semantics<parallel>], iteration_bounds = array<i64: 2>, scalar_prefetch = 0 : i64, scratch_operands = 0 : i64, tpu.core_type = #tpu.core_type<tc>, window_params = [{transform_indices = @transform_0, window_bounds = array<i64: 1, 56, 128>}, {pipeline_mode = #tpu.pipeline_mode<synchronous>, transform_indices = @transform_1, window_bounds = array<i64: 9, 128, 128>}, {pipeline_mode = #tpu.pipeline_mode<synchronous>, transform_indices = @transform_2, window_bounds = array<i64: 1, 128>}, {transform_indices = @transform_3, window_bounds = array<i64: 1, 16, 128>}]} {
    %c0 = arith.constant 0 : index
    %c0_0 = arith.constant 0 : index
    %c0_1 = arith.constant 0 : index
    %0 = vector.load %arg1[%c0, %c0_0, %c0_1] : memref<1x56x128xbf16, #tpu.memory_space<vmem>>, vector<1x56x128xbf16>
    %1 = vector.shape_cast %0 : vector<1x56x128xbf16> to vector<56x128xbf16>
    %cst = arith.constant 0.000000e+00 : f32
    %2 = vector.broadcast %cst : f32 to vector<32x128xf32>
    %3 = vector.extract_strided_slice %1 {offsets = [0, 0], sizes = [32, 128], strides = [1, 1]} : vector<56x128xbf16> to vector<32x128xbf16>
    %c0_2 = arith.constant 0 : index
    %c0_3 = arith.constant 0 : index
    %c0_4 = arith.constant 0 : index
    %4 = vector.load %arg2[%c0_2, %c0_3, %c0_4] : memref<9x128x128xbf16, #tpu.memory_space<vmem>>, vector<1x128x128xbf16>
    %5 = vector.shape_cast %4 : vector<1x128x128xbf16> to vector<128x128xbf16>
    %cst_5 = arith.constant dense<0.000000e+00> : vector<32x128xf32>
    %6 = tpu.matmul %3, %5, %cst_5 {dimension_numbers = #tpu.dot_dimension_numbers<[1], [0], [0], [1], [0, 0, 1, 1], [], []>} : vector<32x128xbf16>, vector<128x128xbf16>, vector<32x128xf32> -> vector<32x128xf32>
    %7 = arith.addf %2, %6 : vector<32x128xf32>
    %8 = vector.extract_strided_slice %1 {offsets = [1, 0], sizes = [32, 128], strides = [1, 1]} : vector<56x128xbf16> to vector<32x128xbf16>
    %c1 = arith.constant 1 : index
    %c0_6 = arith.constant 0 : index
    %c0_7 = arith.constant 0 : index
    %9 = vector.load %arg2[%c1, %c0_6, %c0_7] : memref<9x128x128xbf16, #tpu.memory_space<vmem>>, vector<1x128x128xbf16>
    %10 = vector.shape_cast %9 : vector<1x128x128xbf16> to vector<128x128xbf16>
    %cst_8 = arith.constant dense<0.000000e+00> : vector<32x128xf32>
    %11 = tpu.matmul %8, %10, %cst_8 {dimension_numbers = #tpu.dot_dimension_numbers<[1], [0], [0], [1], [0, 0, 1, 1], [], []>} : vector<32x128xbf16>, vector<128x128xbf16>, vector<32x128xf32> -> vector<32x128xf32>
    %12 = arith.addf %7, %11 : vector<32x128xf32>
    %13 = vector.extract_strided_slice %1 {offsets = [2, 0], sizes = [32, 128], strides = [1, 1]} : vector<56x128xbf16> to vector<32x128xbf16>
    %c2 = arith.constant 2 : index
    %c0_9 = arith.constant 0 : index
    %c0_10 = arith.constant 0 : index
    %14 = vector.load %arg2[%c2, %c0_9, %c0_10] : memref<9x128x128xbf16, #tpu.memory_space<vmem>>, vector<1x128x128xbf16>
    %15 = vector.shape_cast %14 : vector<1x128x128xbf16> to vector<128x128xbf16>
    %cst_11 = arith.constant dense<0.000000e+00> : vector<32x128xf32>
    %16 = tpu.matmul %13, %15, %cst_11 {dimension_numbers = #tpu.dot_dimension_numbers<[1], [0], [0], [1], [0, 0, 1, 1], [], []>} : vector<32x128xbf16>, vector<128x128xbf16>, vector<32x128xf32> -> vector<32x128xf32>
    %17 = arith.addf %12, %16 : vector<32x128xf32>
    %18 = vector.extract_strided_slice %1 {offsets = [8, 0], sizes = [32, 128], strides = [1, 1]} : vector<56x128xbf16> to vector<32x128xbf16>
    %c3 = arith.constant 3 : index
    %c0_12 = arith.constant 0 : index
    %c0_13 = arith.constant 0 : index
    %19 = vector.load %arg2[%c3, %c0_12, %c0_13] : memref<9x128x128xbf16, #tpu.memory_space<vmem>>, vector<1x128x128xbf16>
    %20 = vector.shape_cast %19 : vector<1x128x128xbf16> to vector<128x128xbf16>
    %cst_14 = arith.constant dense<0.000000e+00> : vector<32x128xf32>
    %21 = tpu.matmul %18, %20, %cst_14 {dimension_numbers = #tpu.dot_dimension_numbers<[1], [0], [0], [1], [0, 0, 1, 1], [], []>} : vector<32x128xbf16>, vector<128x128xbf16>, vector<32x128xf32> -> vector<32x128xf32>
    %22 = arith.addf %17, %21 : vector<32x128xf32>
    %23 = vector.extract_strided_slice %1 {offsets = [9, 0], sizes = [32, 128], strides = [1, 1]} : vector<56x128xbf16> to vector<32x128xbf16>
    %c4 = arith.constant 4 : index
    %c0_15 = arith.constant 0 : index
    %c0_16 = arith.constant 0 : index
    %24 = vector.load %arg2[%c4, %c0_15, %c0_16] : memref<9x128x128xbf16, #tpu.memory_space<vmem>>, vector<1x128x128xbf16>
    %25 = vector.shape_cast %24 : vector<1x128x128xbf16> to vector<128x128xbf16>
    %cst_17 = arith.constant dense<0.000000e+00> : vector<32x128xf32>
    %26 = tpu.matmul %23, %25, %cst_17 {dimension_numbers = #tpu.dot_dimension_numbers<[1], [0], [0], [1], [0, 0, 1, 1], [], []>} : vector<32x128xbf16>, vector<128x128xbf16>, vector<32x128xf32> -> vector<32x128xf32>
    %27 = arith.addf %22, %26 : vector<32x128xf32>
    %28 = vector.extract_strided_slice %1 {offsets = [10, 0], sizes = [32, 128], strides = [1, 1]} : vector<56x128xbf16> to vector<32x128xbf16>
    %c5 = arith.constant 5 : index
    %c0_18 = arith.constant 0 : index
    %c0_19 = arith.constant 0 : index
    %29 = vector.load %arg2[%c5, %c0_18, %c0_19] : memref<9x128x128xbf16, #tpu.memory_space<vmem>>, vector<1x128x128xbf16>
    %30 = vector.shape_cast %29 : vector<1x128x128xbf16> to vector<128x128xbf16>
    %cst_20 = arith.constant dense<0.000000e+00> : vector<32x128xf32>
    %31 = tpu.matmul %28, %30, %cst_20 {dimension_numbers = #tpu.dot_dimension_numbers<[1], [0], [0], [1], [0, 0, 1, 1], [], []>} : vector<32x128xbf16>, vector<128x128xbf16>, vector<32x128xf32> -> vector<32x128xf32>
    %32 = arith.addf %27, %31 : vector<32x128xf32>
    %33 = vector.extract_strided_slice %1 {offsets = [16, 0], sizes = [32, 128], strides = [1, 1]} : vector<56x128xbf16> to vector<32x128xbf16>
    %c6 = arith.constant 6 : index
    %c0_21 = arith.constant 0 : index
    %c0_22 = arith.constant 0 : index
    %34 = vector.load %arg2[%c6, %c0_21, %c0_22] : memref<9x128x128xbf16, #tpu.memory_space<vmem>>, vector<1x128x128xbf16>
    %35 = vector.shape_cast %34 : vector<1x128x128xbf16> to vector<128x128xbf16>
    %cst_23 = arith.constant dense<0.000000e+00> : vector<32x128xf32>
    %36 = tpu.matmul %33, %35, %cst_23 {dimension_numbers = #tpu.dot_dimension_numbers<[1], [0], [0], [1], [0, 0, 1, 1], [], []>} : vector<32x128xbf16>, vector<128x128xbf16>, vector<32x128xf32> -> vector<32x128xf32>
    %37 = arith.addf %32, %36 : vector<32x128xf32>
    %38 = vector.extract_strided_slice %1 {offsets = [17, 0], sizes = [32, 128], strides = [1, 1]} : vector<56x128xbf16> to vector<32x128xbf16>
    %c7 = arith.constant 7 : index
    %c0_24 = arith.constant 0 : index
    %c0_25 = arith.constant 0 : index
    %39 = vector.load %arg2[%c7, %c0_24, %c0_25] : memref<9x128x128xbf16, #tpu.memory_space<vmem>>, vector<1x128x128xbf16>
    %40 = vector.shape_cast %39 : vector<1x128x128xbf16> to vector<128x128xbf16>
    %cst_26 = arith.constant dense<0.000000e+00> : vector<32x128xf32>
    %41 = tpu.matmul %38, %40, %cst_26 {dimension_numbers = #tpu.dot_dimension_numbers<[1], [0], [0], [1], [0, 0, 1, 1], [], []>} : vector<32x128xbf16>, vector<128x128xbf16>, vector<32x128xf32> -> vector<32x128xf32>
    %42 = arith.addf %37, %41 : vector<32x128xf32>
    %43 = vector.extract_strided_slice %1 {offsets = [18, 0], sizes = [32, 128], strides = [1, 1]} : vector<56x128xbf16> to vector<32x128xbf16>
    %c8 = arith.constant 8 : index
    %c0_27 = arith.constant 0 : index
    %c0_28 = arith.constant 0 : index
    %44 = vector.load %arg2[%c8, %c0_27, %c0_28] : memref<9x128x128xbf16, #tpu.memory_space<vmem>>, vector<1x128x128xbf16>
    %45 = vector.shape_cast %44 : vector<1x128x128xbf16> to vector<128x128xbf16>
    %cst_29 = arith.constant dense<0.000000e+00> : vector<32x128xf32>
    %46 = tpu.matmul %43, %45, %cst_29 {dimension_numbers = #tpu.dot_dimension_numbers<[1], [0], [0], [1], [0, 0, 1, 1], [], []>} : vector<32x128xbf16>, vector<128x128xbf16>, vector<32x128xf32> -> vector<32x128xf32>
    %47 = arith.addf %42, %46 : vector<32x128xf32>
    %c0_30 = arith.constant 0 : index
    %c0_31 = arith.constant 0 : index
    %48 = vector.load %arg3[%c0_30, %c0_31] : memref<1x128xf32, #tpu.memory_space<vmem>>, vector<1x128xf32>
    %49 = vector.broadcast %48 : vector<1x128xf32> to vector<32x128xf32>
    %50 = arith.addf %47, %49 : vector<32x128xf32>
    %51 = vector.extract_strided_slice %50 {offsets = [0, 0], sizes = [8, 128], strides = [1, 1]} : vector<32x128xf32> to vector<8x128xf32>
    %52 = vector.extract_strided_slice %50 {offsets = [16, 0], sizes = [8, 128], strides = [1, 1]} : vector<32x128xf32> to vector<8x128xf32>
    %53 = tpu.concatenate %51, %52 in 0 : vector<8x128xf32>, vector<8x128xf32> -> vector<16x128xf32>
    %54 = arith.truncf %53 : vector<16x128xf32> to vector<16x128xbf16>
    %c0_32 = arith.constant 0 : index
    %c0_33 = arith.constant 0 : index
    %c0_34 = arith.constant 0 : index
    %55 = vector.load %arg4[%c0_32, %c0_33, %c0_34] : memref<1x16x128xbf16, #tpu.memory_space<vmem>>, vector<1x16x128xbf16>
    %56 = vector.shape_cast %55 : vector<1x16x128xbf16> to vector<16x128xbf16>
    %57 = vector.shape_cast %54 : vector<16x128xbf16> to vector<1x16x128xbf16>
    tpu.vector_store %arg4[%c0_32, %c0_33, %c0_34], %57 {strides = array<i32>} : memref<1x16x128xbf16, #tpu.memory_space<vmem>>, vector<1x16x128xbf16>,
    return
  }
  func.func @transform_0(%arg0: i32) -> (i32, i32, i32) {
    %c0_i32 = arith.constant 0 : i32
    %c0_i32_0 = arith.constant 0 : i32
    %c0_i32_1 = arith.constant 0 : i32
    return %arg0, %c0_i32, %c0_i32_0 : i32, i32, i32
  }
  func.func @transform_1(%arg0: i32) -> (i32, i32, i32) {
    %c0_i32 = arith.constant 0 : i32
    %c0_i32_0 = arith.constant 0 : i32
    %c0_i32_1 = arith.constant 0 : i32
    %c0_i32_2 = arith.constant 0 : i32
    return %c0_i32, %c0_i32_0, %c0_i32_1 : i32, i32, i32
  }
  func.func @transform_2(%arg0: i32) -> (i32, i32) {
    %c0_i32 = arith.constant 0 : i32
    %c0_i32_0 = arith.constant 0 : i32
    %c0_i32_1 = arith.constant 0 : i32
    return %c0_i32, %c0_i32_0 : i32, i32
  }
  func.func @transform_3(%arg0: i32) -> (i32, i32, i32) {
    %c0_i32 = arith.constant 0 : i32
    %c0_i32_0 = arith.constant 0 : i32
    %c0_i32_1 = arith.constant 0 : i32
    return %arg0, %c0_i32, %c0_i32_0 : i32, i32, i32
  }
}

module attributes {stable_mosaic.version = 11 : i64} {
  func.func @_conv3x3_kernel(%arg0: i32, %arg1: memref<1x40x128xbf16, #tpu.memory_space<vmem>>, %arg2: memref<9x128x128xbf16, #tpu.memory_space<vmem>>, %arg3: memref<1x128xf32, #tpu.memory_space<vmem>>, %arg4: memref<1x8x128xbf16, #tpu.memory_space<vmem>>) attributes {dimension_semantics = [#tpu.dimension_semantics<parallel>], iteration_bounds = array<i64: 2>, scalar_prefetch = 0 : i64, scratch_operands = 0 : i64, tpu.core_type = #tpu.core_type<tc>, window_params = [{transform_indices = @transform_0, window_bounds = array<i64: 1, 40, 128>}, {pipeline_mode = #tpu.pipeline_mode<synchronous>, transform_indices = @transform_1, window_bounds = array<i64: 9, 128, 128>}, {pipeline_mode = #tpu.pipeline_mode<synchronous>, transform_indices = @transform_2, window_bounds = array<i64: 1, 128>}, {transform_indices = @transform_3, window_bounds = array<i64: 1, 8, 128>}]} {
    %c0 = arith.constant 0 : index
    %c0_0 = arith.constant 0 : index
    %c0_1 = arith.constant 0 : index
    %0 = vector.load %arg1[%c0, %c0_0, %c0_1] : memref<1x40x128xbf16, #tpu.memory_space<vmem>>, vector<1x40x128xbf16>
    %1 = vector.shape_cast %0 : vector<1x40x128xbf16> to vector<40x128xbf16>
    %cst = arith.constant 0.000000e+00 : bf16
    %2 = vector.broadcast %cst : bf16 to vector<40x128xbf16>
    %3 = arith.maximumf %1, %2 : vector<40x128xbf16>
    %cst_2 = arith.constant 0.000000e+00 : f32
    %4 = vector.broadcast %cst_2 : f32 to vector<16x128xf32>
    %5 = vector.extract_strided_slice %3 {offsets = [0, 0], sizes = [16, 128], strides = [1, 1]} : vector<40x128xbf16> to vector<16x128xbf16>
    %c0_3 = arith.constant 0 : index
    %c0_4 = arith.constant 0 : index
    %c0_5 = arith.constant 0 : index
    %6 = vector.load %arg2[%c0_3, %c0_4, %c0_5] : memref<9x128x128xbf16, #tpu.memory_space<vmem>>, vector<1x128x128xbf16>
    %7 = vector.shape_cast %6 : vector<1x128x128xbf16> to vector<128x128xbf16>
    %cst_6 = arith.constant dense<0.000000e+00> : vector<16x128xf32>
    %8 = tpu.matmul %5, %7, %cst_6 {dimension_numbers = #tpu.dot_dimension_numbers<[1], [0], [0], [1], [0, 0, 1, 1], [], []>} : vector<16x128xbf16>, vector<128x128xbf16>, vector<16x128xf32> -> vector<16x128xf32>
    %9 = arith.addf %4, %8 : vector<16x128xf32>
    %10 = vector.extract_strided_slice %3 {offsets = [1, 0], sizes = [16, 128], strides = [1, 1]} : vector<40x128xbf16> to vector<16x128xbf16>
    %c1 = arith.constant 1 : index
    %c0_7 = arith.constant 0 : index
    %c0_8 = arith.constant 0 : index
    %11 = vector.load %arg2[%c1, %c0_7, %c0_8] : memref<9x128x128xbf16, #tpu.memory_space<vmem>>, vector<1x128x128xbf16>
    %12 = vector.shape_cast %11 : vector<1x128x128xbf16> to vector<128x128xbf16>
    %cst_9 = arith.constant dense<0.000000e+00> : vector<16x128xf32>
    %13 = tpu.matmul %10, %12, %cst_9 {dimension_numbers = #tpu.dot_dimension_numbers<[1], [0], [0], [1], [0, 0, 1, 1], [], []>} : vector<16x128xbf16>, vector<128x128xbf16>, vector<16x128xf32> -> vector<16x128xf32>
    %14 = arith.addf %9, %13 : vector<16x128xf32>
    %15 = vector.extract_strided_slice %3 {offsets = [2, 0], sizes = [16, 128], strides = [1, 1]} : vector<40x128xbf16> to vector<16x128xbf16>
    %c2 = arith.constant 2 : index
    %c0_10 = arith.constant 0 : index
    %c0_11 = arith.constant 0 : index
    %16 = vector.load %arg2[%c2, %c0_10, %c0_11] : memref<9x128x128xbf16, #tpu.memory_space<vmem>>, vector<1x128x128xbf16>
    %17 = vector.shape_cast %16 : vector<1x128x128xbf16> to vector<128x128xbf16>
    %cst_12 = arith.constant dense<0.000000e+00> : vector<16x128xf32>
    %18 = tpu.matmul %15, %17, %cst_12 {dimension_numbers = #tpu.dot_dimension_numbers<[1], [0], [0], [1], [0, 0, 1, 1], [], []>} : vector<16x128xbf16>, vector<128x128xbf16>, vector<16x128xf32> -> vector<16x128xf32>
    %19 = arith.addf %14, %18 : vector<16x128xf32>
    %20 = vector.extract_strided_slice %3 {offsets = [8, 0], sizes = [16, 128], strides = [1, 1]} : vector<40x128xbf16> to vector<16x128xbf16>
    %c3 = arith.constant 3 : index
    %c0_13 = arith.constant 0 : index
    %c0_14 = arith.constant 0 : index
    %21 = vector.load %arg2[%c3, %c0_13, %c0_14] : memref<9x128x128xbf16, #tpu.memory_space<vmem>>, vector<1x128x128xbf16>
    %22 = vector.shape_cast %21 : vector<1x128x128xbf16> to vector<128x128xbf16>
    %cst_15 = arith.constant dense<0.000000e+00> : vector<16x128xf32>
    %23 = tpu.matmul %20, %22, %cst_15 {dimension_numbers = #tpu.dot_dimension_numbers<[1], [0], [0], [1], [0, 0, 1, 1], [], []>} : vector<16x128xbf16>, vector<128x128xbf16>, vector<16x128xf32> -> vector<16x128xf32>
    %24 = arith.addf %19, %23 : vector<16x128xf32>
    %25 = vector.extract_strided_slice %3 {offsets = [9, 0], sizes = [16, 128], strides = [1, 1]} : vector<40x128xbf16> to vector<16x128xbf16>
    %c4 = arith.constant 4 : index
    %c0_16 = arith.constant 0 : index
    %c0_17 = arith.constant 0 : index
    %26 = vector.load %arg2[%c4, %c0_16, %c0_17] : memref<9x128x128xbf16, #tpu.memory_space<vmem>>, vector<1x128x128xbf16>
    %27 = vector.shape_cast %26 : vector<1x128x128xbf16> to vector<128x128xbf16>
    %cst_18 = arith.constant dense<0.000000e+00> : vector<16x128xf32>
    %28 = tpu.matmul %25, %27, %cst_18 {dimension_numbers = #tpu.dot_dimension_numbers<[1], [0], [0], [1], [0, 0, 1, 1], [], []>} : vector<16x128xbf16>, vector<128x128xbf16>, vector<16x128xf32> -> vector<16x128xf32>
    %29 = arith.addf %24, %28 : vector<16x128xf32>
    %30 = vector.extract_strided_slice %3 {offsets = [10, 0], sizes = [16, 128], strides = [1, 1]} : vector<40x128xbf16> to vector<16x128xbf16>
    %c5 = arith.constant 5 : index
    %c0_19 = arith.constant 0 : index
    %c0_20 = arith.constant 0 : index
    %31 = vector.load %arg2[%c5, %c0_19, %c0_20] : memref<9x128x128xbf16, #tpu.memory_space<vmem>>, vector<1x128x128xbf16>
    %32 = vector.shape_cast %31 : vector<1x128x128xbf16> to vector<128x128xbf16>
    %cst_21 = arith.constant dense<0.000000e+00> : vector<16x128xf32>
    %33 = tpu.matmul %30, %32, %cst_21 {dimension_numbers = #tpu.dot_dimension_numbers<[1], [0], [0], [1], [0, 0, 1, 1], [], []>} : vector<16x128xbf16>, vector<128x128xbf16>, vector<16x128xf32> -> vector<16x128xf32>
    %34 = arith.addf %29, %33 : vector<16x128xf32>
    %35 = vector.extract_strided_slice %3 {offsets = [16, 0], sizes = [16, 128], strides = [1, 1]} : vector<40x128xbf16> to vector<16x128xbf16>
    %c6 = arith.constant 6 : index
    %c0_22 = arith.constant 0 : index
    %c0_23 = arith.constant 0 : index
    %36 = vector.load %arg2[%c6, %c0_22, %c0_23] : memref<9x128x128xbf16, #tpu.memory_space<vmem>>, vector<1x128x128xbf16>
    %37 = vector.shape_cast %36 : vector<1x128x128xbf16> to vector<128x128xbf16>
    %cst_24 = arith.constant dense<0.000000e+00> : vector<16x128xf32>
    %38 = tpu.matmul %35, %37, %cst_24 {dimension_numbers = #tpu.dot_dimension_numbers<[1], [0], [0], [1], [0, 0, 1, 1], [], []>} : vector<16x128xbf16>, vector<128x128xbf16>, vector<16x128xf32> -> vector<16x128xf32>
    %39 = arith.addf %34, %38 : vector<16x128xf32>
    %40 = vector.extract_strided_slice %3 {offsets = [17, 0], sizes = [16, 128], strides = [1, 1]} : vector<40x128xbf16> to vector<16x128xbf16>
    %c7 = arith.constant 7 : index
    %c0_25 = arith.constant 0 : index
    %c0_26 = arith.constant 0 : index
    %41 = vector.load %arg2[%c7, %c0_25, %c0_26] : memref<9x128x128xbf16, #tpu.memory_space<vmem>>, vector<1x128x128xbf16>
    %42 = vector.shape_cast %41 : vector<1x128x128xbf16> to vector<128x128xbf16>
    %cst_27 = arith.constant dense<0.000000e+00> : vector<16x128xf32>
    %43 = tpu.matmul %40, %42, %cst_27 {dimension_numbers = #tpu.dot_dimension_numbers<[1], [0], [0], [1], [0, 0, 1, 1], [], []>} : vector<16x128xbf16>, vector<128x128xbf16>, vector<16x128xf32> -> vector<16x128xf32>
    %44 = arith.addf %39, %43 : vector<16x128xf32>
    %45 = vector.extract_strided_slice %3 {offsets = [18, 0], sizes = [16, 128], strides = [1, 1]} : vector<40x128xbf16> to vector<16x128xbf16>
    %c8 = arith.constant 8 : index
    %c0_28 = arith.constant 0 : index
    %c0_29 = arith.constant 0 : index
    %46 = vector.load %arg2[%c8, %c0_28, %c0_29] : memref<9x128x128xbf16, #tpu.memory_space<vmem>>, vector<1x128x128xbf16>
    %47 = vector.shape_cast %46 : vector<1x128x128xbf16> to vector<128x128xbf16>
    %cst_30 = arith.constant dense<0.000000e+00> : vector<16x128xf32>
    %48 = tpu.matmul %45, %47, %cst_30 {dimension_numbers = #tpu.dot_dimension_numbers<[1], [0], [0], [1], [0, 0, 1, 1], [], []>} : vector<16x128xbf16>, vector<128x128xbf16>, vector<16x128xf32> -> vector<16x128xf32>
    %49 = arith.addf %44, %48 : vector<16x128xf32>
    %c0_31 = arith.constant 0 : index
    %c0_32 = arith.constant 0 : index
    %50 = vector.load %arg3[%c0_31, %c0_32] : memref<1x128xf32, #tpu.memory_space<vmem>>, vector<1x128xf32>
    %51 = vector.broadcast %50 : vector<1x128xf32> to vector<16x128xf32>
    %52 = arith.addf %49, %51 : vector<16x128xf32>
    %53 = vector.extract_strided_slice %52 {offsets = [0, 0], sizes = [8, 128], strides = [1, 1]} : vector<16x128xf32> to vector<8x128xf32>
    %54 = arith.truncf %53 : vector<8x128xf32> to vector<8x128xbf16>
    %c0_33 = arith.constant 0 : index
    %c0_34 = arith.constant 0 : index
    %c0_35 = arith.constant 0 : index
    %55 = vector.load %arg4[%c0_33, %c0_34, %c0_35] : memref<1x8x128xbf16, #tpu.memory_space<vmem>>, vector<1x8x128xbf16>
    %56 = vector.shape_cast %55 : vector<1x8x128xbf16> to vector<8x128xbf16>
    %57 = vector.shape_cast %54 : vector<8x128xbf16> to vector<1x8x128xbf16>
    tpu.vector_store %arg4[%c0_33, %c0_34, %c0_35], %57 {strides = array<i32>} : memref<1x8x128xbf16, #tpu.memory_space<vmem>>, vector<1x8x128xbf16>,
    return
  }
  func.func @transform_0(%arg0: i32) -> (i32, i32, i32) {
    %c0_i32 = arith.constant 0 : i32
    %c0_i32_0 = arith.constant 0 : i32
    %c0_i32_1 = arith.constant 0 : i32
    return %arg0, %c0_i32, %c0_i32_0 : i32, i32, i32
  }
  func.func @transform_1(%arg0: i32) -> (i32, i32, i32) {
    %c0_i32 = arith.constant 0 : i32
    %c0_i32_0 = arith.constant 0 : i32
    %c0_i32_1 = arith.constant 0 : i32
    %c0_i32_2 = arith.constant 0 : i32
    return %c0_i32, %c0_i32_0, %c0_i32_1 : i32, i32, i32
  }
  func.func @transform_2(%arg0: i32) -> (i32, i32) {
    %c0_i32 = arith.constant 0 : i32
    %c0_i32_0 = arith.constant 0 : i32
    %c0_i32_1 = arith.constant 0 : i32
    return %c0_i32, %c0_i32_0 : i32, i32
  }
  func.func @transform_3(%arg0: i32) -> (i32, i32, i32) {
    %c0_i32 = arith.constant 0 : i32
    %c0_i32_0 = arith.constant 0 : i32
    %c0_i32_1 = arith.constant 0 : i32
    return %arg0, %c0_i32, %c0_i32_0 : i32, i32, i32
  }
}

module attributes {stable_mosaic.version = 11 : i64} {
  func.func @_conv3x3_kernel(%arg0: i32, %arg1: memref<1x56x128xbf16, #tpu.memory_space<vmem>>, %arg2: memref<9x128x128xbf16, #tpu.memory_space<vmem>>, %arg3: memref<1x128xf32, #tpu.memory_space<vmem>>, %arg4: memref<1x32x128xbf16, #tpu.memory_space<vmem>>) attributes {dimension_semantics = [#tpu.dimension_semantics<parallel>], iteration_bounds = array<i64: 2>, scalar_prefetch = 0 : i64, scratch_operands = 0 : i64, tpu.core_type = #tpu.core_type<tc>, window_params = [{transform_indices = @transform_0, window_bounds = array<i64: 1, 56, 128>}, {pipeline_mode = #tpu.pipeline_mode<synchronous>, transform_indices = @transform_1, window_bounds = array<i64: 9, 128, 128>}, {pipeline_mode = #tpu.pipeline_mode<synchronous>, transform_indices = @transform_2, window_bounds = array<i64: 1, 128>}, {transform_indices = @transform_3, window_bounds = array<i64: 1, 32, 128>}]} {
    %c0 = arith.constant 0 : index
    %c0_0 = arith.constant 0 : index
    %c0_1 = arith.constant 0 : index
    %0 = vector.load %arg1[%c0, %c0_0, %c0_1] : memref<1x56x128xbf16, #tpu.memory_space<vmem>>, vector<1x56x128xbf16>
    %1 = vector.shape_cast %0 : vector<1x56x128xbf16> to vector<56x128xbf16>
    %cst = arith.constant 0.000000e+00 : f32
    %2 = vector.broadcast %cst : f32 to vector<32x128xf32>
    %3 = vector.extract_strided_slice %1 {offsets = [0, 0], sizes = [32, 128], strides = [1, 1]} : vector<56x128xbf16> to vector<32x128xbf16>
    %c0_2 = arith.constant 0 : index
    %c0_3 = arith.constant 0 : index
    %c0_4 = arith.constant 0 : index
    %4 = vector.load %arg2[%c0_2, %c0_3, %c0_4] : memref<9x128x128xbf16, #tpu.memory_space<vmem>>, vector<1x128x128xbf16>
    %5 = vector.shape_cast %4 : vector<1x128x128xbf16> to vector<128x128xbf16>
    %cst_5 = arith.constant dense<0.000000e+00> : vector<32x128xf32>
    %6 = tpu.matmul %3, %5, %cst_5 {dimension_numbers = #tpu.dot_dimension_numbers<[1], [0], [0], [1], [0, 0, 1, 1], [], []>} : vector<32x128xbf16>, vector<128x128xbf16>, vector<32x128xf32> -> vector<32x128xf32>
    %7 = arith.addf %2, %6 : vector<32x128xf32>
    %8 = vector.extract_strided_slice %1 {offsets = [1, 0], sizes = [32, 128], strides = [1, 1]} : vector<56x128xbf16> to vector<32x128xbf16>
    %c1 = arith.constant 1 : index
    %c0_6 = arith.constant 0 : index
    %c0_7 = arith.constant 0 : index
    %9 = vector.load %arg2[%c1, %c0_6, %c0_7] : memref<9x128x128xbf16, #tpu.memory_space<vmem>>, vector<1x128x128xbf16>
    %10 = vector.shape_cast %9 : vector<1x128x128xbf16> to vector<128x128xbf16>
    %cst_8 = arith.constant dense<0.000000e+00> : vector<32x128xf32>
    %11 = tpu.matmul %8, %10, %cst_8 {dimension_numbers = #tpu.dot_dimension_numbers<[1], [0], [0], [1], [0, 0, 1, 1], [], []>} : vector<32x128xbf16>, vector<128x128xbf16>, vector<32x128xf32> -> vector<32x128xf32>
    %12 = arith.addf %7, %11 : vector<32x128xf32>
    %13 = vector.extract_strided_slice %1 {offsets = [2, 0], sizes = [32, 128], strides = [1, 1]} : vector<56x128xbf16> to vector<32x128xbf16>
    %c2 = arith.constant 2 : index
    %c0_9 = arith.constant 0 : index
    %c0_10 = arith.constant 0 : index
    %14 = vector.load %arg2[%c2, %c0_9, %c0_10] : memref<9x128x128xbf16, #tpu.memory_space<vmem>>, vector<1x128x128xbf16>
    %15 = vector.shape_cast %14 : vector<1x128x128xbf16> to vector<128x128xbf16>
    %cst_11 = arith.constant dense<0.000000e+00> : vector<32x128xf32>
    %16 = tpu.matmul %13, %15, %cst_11 {dimension_numbers = #tpu.dot_dimension_numbers<[1], [0], [0], [1], [0, 0, 1, 1], [], []>} : vector<32x128xbf16>, vector<128x128xbf16>, vector<32x128xf32> -> vector<32x128xf32>
    %17 = arith.addf %12, %16 : vector<32x128xf32>
    %18 = vector.extract_strided_slice %1 {offsets = [8, 0], sizes = [32, 128], strides = [1, 1]} : vector<56x128xbf16> to vector<32x128xbf16>
    %c3 = arith.constant 3 : index
    %c0_12 = arith.constant 0 : index
    %c0_13 = arith.constant 0 : index
    %19 = vector.load %arg2[%c3, %c0_12, %c0_13] : memref<9x128x128xbf16, #tpu.memory_space<vmem>>, vector<1x128x128xbf16>
    %20 = vector.shape_cast %19 : vector<1x128x128xbf16> to vector<128x128xbf16>
    %cst_14 = arith.constant dense<0.000000e+00> : vector<32x128xf32>
    %21 = tpu.matmul %18, %20, %cst_14 {dimension_numbers = #tpu.dot_dimension_numbers<[1], [0], [0], [1], [0, 0, 1, 1], [], []>} : vector<32x128xbf16>, vector<128x128xbf16>, vector<32x128xf32> -> vector<32x128xf32>
    %22 = arith.addf %17, %21 : vector<32x128xf32>
    %23 = vector.extract_strided_slice %1 {offsets = [9, 0], sizes = [32, 128], strides = [1, 1]} : vector<56x128xbf16> to vector<32x128xbf16>
    %c4 = arith.constant 4 : index
    %c0_15 = arith.constant 0 : index
    %c0_16 = arith.constant 0 : index
    %24 = vector.load %arg2[%c4, %c0_15, %c0_16] : memref<9x128x128xbf16, #tpu.memory_space<vmem>>, vector<1x128x128xbf16>
    %25 = vector.shape_cast %24 : vector<1x128x128xbf16> to vector<128x128xbf16>
    %cst_17 = arith.constant dense<0.000000e+00> : vector<32x128xf32>
    %26 = tpu.matmul %23, %25, %cst_17 {dimension_numbers = #tpu.dot_dimension_numbers<[1], [0], [0], [1], [0, 0, 1, 1], [], []>} : vector<32x128xbf16>, vector<128x128xbf16>, vector<32x128xf32> -> vector<32x128xf32>
    %27 = arith.addf %22, %26 : vector<32x128xf32>
    %28 = vector.extract_strided_slice %1 {offsets = [10, 0], sizes = [32, 128], strides = [1, 1]} : vector<56x128xbf16> to vector<32x128xbf16>
    %c5 = arith.constant 5 : index
    %c0_18 = arith.constant 0 : index
    %c0_19 = arith.constant 0 : index
    %29 = vector.load %arg2[%c5, %c0_18, %c0_19] : memref<9x128x128xbf16, #tpu.memory_space<vmem>>, vector<1x128x128xbf16>
    %30 = vector.shape_cast %29 : vector<1x128x128xbf16> to vector<128x128xbf16>
    %cst_20 = arith.constant dense<0.000000e+00> : vector<32x128xf32>
    %31 = tpu.matmul %28, %30, %cst_20 {dimension_numbers = #tpu.dot_dimension_numbers<[1], [0], [0], [1], [0, 0, 1, 1], [], []>} : vector<32x128xbf16>, vector<128x128xbf16>, vector<32x128xf32> -> vector<32x128xf32>
    %32 = arith.addf %27, %31 : vector<32x128xf32>
    %33 = vector.extract_strided_slice %1 {offsets = [16, 0], sizes = [32, 128], strides = [1, 1]} : vector<56x128xbf16> to vector<32x128xbf16>
    %c6 = arith.constant 6 : index
    %c0_21 = arith.constant 0 : index
    %c0_22 = arith.constant 0 : index
    %34 = vector.load %arg2[%c6, %c0_21, %c0_22] : memref<9x128x128xbf16, #tpu.memory_space<vmem>>, vector<1x128x128xbf16>
    %35 = vector.shape_cast %34 : vector<1x128x128xbf16> to vector<128x128xbf16>
    %cst_23 = arith.constant dense<0.000000e+00> : vector<32x128xf32>
    %36 = tpu.matmul %33, %35, %cst_23 {dimension_numbers = #tpu.dot_dimension_numbers<[1], [0], [0], [1], [0, 0, 1, 1], [], []>} : vector<32x128xbf16>, vector<128x128xbf16>, vector<32x128xf32> -> vector<32x128xf32>
    %37 = arith.addf %32, %36 : vector<32x128xf32>
    %38 = vector.extract_strided_slice %1 {offsets = [17, 0], sizes = [32, 128], strides = [1, 1]} : vector<56x128xbf16> to vector<32x128xbf16>
    %c7 = arith.constant 7 : index
    %c0_24 = arith.constant 0 : index
    %c0_25 = arith.constant 0 : index
    %39 = vector.load %arg2[%c7, %c0_24, %c0_25] : memref<9x128x128xbf16, #tpu.memory_space<vmem>>, vector<1x128x128xbf16>
    %40 = vector.shape_cast %39 : vector<1x128x128xbf16> to vector<128x128xbf16>
    %cst_26 = arith.constant dense<0.000000e+00> : vector<32x128xf32>
    %41 = tpu.matmul %38, %40, %cst_26 {dimension_numbers = #tpu.dot_dimension_numbers<[1], [0], [0], [1], [0, 0, 1, 1], [], []>} : vector<32x128xbf16>, vector<128x128xbf16>, vector<32x128xf32> -> vector<32x128xf32>
    %42 = arith.addf %37, %41 : vector<32x128xf32>
    %43 = vector.extract_strided_slice %1 {offsets = [18, 0], sizes = [32, 128], strides = [1, 1]} : vector<56x128xbf16> to vector<32x128xbf16>
    %c8 = arith.constant 8 : index
    %c0_27 = arith.constant 0 : index
    %c0_28 = arith.constant 0 : index
    %44 = vector.load %arg2[%c8, %c0_27, %c0_28] : memref<9x128x128xbf16, #tpu.memory_space<vmem>>, vector<1x128x128xbf16>
    %45 = vector.shape_cast %44 : vector<1x128x128xbf16> to vector<128x128xbf16>
    %cst_29 = arith.constant dense<0.000000e+00> : vector<32x128xf32>
    %46 = tpu.matmul %43, %45, %cst_29 {dimension_numbers = #tpu.dot_dimension_numbers<[1], [0], [0], [1], [0, 0, 1, 1], [], []>} : vector<32x128xbf16>, vector<128x128xbf16>, vector<32x128xf32> -> vector<32x128xf32>
    %47 = arith.addf %42, %46 : vector<32x128xf32>
    %c0_30 = arith.constant 0 : index
    %c0_31 = arith.constant 0 : index
    %48 = vector.load %arg3[%c0_30, %c0_31] : memref<1x128xf32, #tpu.memory_space<vmem>>, vector<1x128xf32>
    %49 = vector.broadcast %48 : vector<1x128xf32> to vector<32x128xf32>
    %50 = arith.addf %47, %49 : vector<32x128xf32>
    %51 = arith.truncf %50 : vector<32x128xf32> to vector<32x128xbf16>
    %c0_32 = arith.constant 0 : index
    %c0_33 = arith.constant 0 : index
    %c0_34 = arith.constant 0 : index
    %52 = vector.load %arg4[%c0_32, %c0_33, %c0_34] : memref<1x32x128xbf16, #tpu.memory_space<vmem>>, vector<1x32x128xbf16>
    %53 = vector.shape_cast %52 : vector<1x32x128xbf16> to vector<32x128xbf16>
    %54 = vector.shape_cast %51 : vector<32x128xbf16> to vector<1x32x128xbf16>
    tpu.vector_store %arg4[%c0_32, %c0_33, %c0_34], %54 {strides = array<i32>} : memref<1x32x128xbf16, #tpu.memory_space<vmem>>, vector<1x32x128xbf16>,
    return
  }
  func.func @transform_0(%arg0: i32) -> (i32, i32, i32) {
    %c0_i32 = arith.constant 0 : i32
    %c0_i32_0 = arith.constant 0 : i32
    %c0_i32_1 = arith.constant 0 : i32
    return %arg0, %c0_i32, %c0_i32_0 : i32, i32, i32
  }
  func.func @transform_1(%arg0: i32) -> (i32, i32, i32) {
    %c0_i32 = arith.constant 0 : i32
    %c0_i32_0 = arith.constant 0 : i32
    %c0_i32_1 = arith.constant 0 : i32
    %c0_i32_2 = arith.constant 0 : i32
    return %c0_i32, %c0_i32_0, %c0_i32_1 : i32, i32, i32
  }
  func.func @transform_2(%arg0: i32) -> (i32, i32) {
    %c0_i32 = arith.constant 0 : i32
    %c0_i32_0 = arith.constant 0 : i32
    %c0_i32_1 = arith.constant 0 : i32
    return %c0_i32, %c0_i32_0 : i32, i32
  }
  func.func @transform_3(%arg0: i32) -> (i32, i32, i32) {
    %c0_i32 = arith.constant 0 : i32
    %c0_i32_0 = arith.constant 0 : i32
    %c0_i32_1 = arith.constant 0 : i32
    return %arg0, %c0_i32, %c0_i32_0 : i32, i32, i32
  }
}

</mosaic_0001>

<bundles_post_ra>
// kernel: feature_pyramid.8
= control target key start
LH: loop header
LB: loop body
LE: loop exit
PB: predicated region body
PF: predicated region fallthrough
CT: control target
= control target key end

     0   :  { %s304_s1 = inlined_call_operand.vmem [shape: bf16[128,128], index: 1, kind: input, shape index: {}]   ;;  %s305_s0 = inlined_call_operand.vmem [shape: bf16[32,128], index: 0, kind: input, shape index: {}]   ;;  %s306_s2 = inlined_call_operand.vmem [shape: f32[1,128], index: 2, kind: input, shape index: {}]   ;;  %s307_s3 = inlined_call_operand.vmem [shape: bf16[32,128], index: 3, kind: output, shape index: {}]  }
   0x1   :  { %v235_v0 = vld [vmem:[%s304_s1] sm:$0xff]   ;;  %v236_v1 = vld [vmem:[%s304_s1 + $0x8] sm:$0xff]   ;;  %v237_v2 = vld [vmem:[%s304_s1 + $0x10] sm:$0xff]  }
   0x2   :  { %215 = vmatprep.subr.bf16.mxu0 %v235_v0  ;;  %v238_v3 = vld [vmem:[%s304_s1 + $0x18] sm:$0xff]   ;;  %v243_v4 = vld [vmem:[%s305_s0] sm:$0xff]   ;;  %v240_v6 = vld [vmem:[%s304_s1 + $0x28] sm:$0xff]  }
   0x3   :  { %216 = vmatpush3.bf16.msra.mxu0 %v235_v0  ;;  %231 = vmatprep.mubr.bf16.mxu0 %v243_v4  ;;  %v239_v5 = vld [vmem:[%s304_s1 + $0x20] sm:$0xff]   ;;  %v241_v7 = vld [vmem:[%s304_s1 + $0x30] sm:$0xff]   ;;  %v242_v8 = vld [vmem:[%s304_s1 + $0x38] sm:$0xff]  }
   0x4   :  { %217 = vmatprep.subr.bf16.mxu0 %v236_v1  ;;  %v244_v9 = vld [vmem:[%s305_s0 + $0x8] sm:$0xff]   ;;  %v175_v11 = vld [vmem:[%s306_s2] ss:$0 sm:$0xff] }
   0x7   :  { %218 = vmatpush3.bf16.msra.mxu0 %v236_v1 }
   0x8   :  { %219 = vmatprep.subr.bf16.mxu0 %v237_v2 }
   0xb   :  { %220 = vmatpush3.bf16.msra.mxu0 %v237_v2 }
   0xc   :  { %221 = vmatprep.subr.bf16.mxu0 %v238_v3 }
   0xf   :  { %222 = vmatpush3.bf16.msra.mxu0 %v238_v3 }
  0x10   :  { %223 = vmatprep.subr.bf16.mxu0 %v239_v5 }
  0x13   :  { %224 = vmatpush3.bf16.msra.mxu0 %v239_v5 }
  0x14   :  { %225 = vmatprep.subr.bf16.mxu0 %v240_v6 }
  0x17   :  { %226 = vmatpush3.bf16.msra.mxu0 %v240_v6 }
  0x18   :  { %227 = vmatprep.subr.bf16.mxu0 %v241_v7 }
  0x1b   :  { %228 = vmatpush3.bf16.msra.mxu0 %v241_v7 }
  0x1c   :  { %229 = vmatprep.subr.bf16.mxu0 %v242_v8 }
  0x1f   :  { %230 = vmatpush3.bf16.msra.mxu0 %v242_v8 }
  0x22   :  { %232 = vmatmul.mubr.bf16.vlgmr.msra.gmra.mrb[0].mxu0 %v244_v9 }
  0xf5   :  { %v233_v10 = vpop.f32.mrb[0].mxu0 }
  0xf6   :  { %v136_v12 = vpop.f32.mrb[1].mxu0  ;;  %v145_v14 = vadd.f32 %v233_v10, %v175_v11 }
  0xf7   :  { %v234_v13 = vpop.f32.mrb[2].mxu0  ;;  %v137_v17 = vadd.f32 %v175_v11, %v136_v12 }
  0xf8   :  { %v148_v15 = vadd.f32 %v234_v13, %v175_v11  ;;  %v139_v16 = vpop.f32.mrb[3].mxu0 }
  0xf9   :  { %v140_v18 = vadd.f32 %v175_v11, %v139_v16 }
  0xfa   :  { %v202_v19 = vpack.c.bf16 %v148_v15, %v145_v14 }
  0xfb   :  { %v197_v20 = vpack.c.bf16 %v140_v18, %v137_v17 }
  0xfc   :  { %204 = vst [vmem:[%s307_s3 + $0x8] sm:$0xff] %v202_v19  }
  0xfd   :  { %198 = vst [vmem:[%s307_s3] sm:$0xff] %v197_v20  }

// kernel: feature_pyramid.10
= control target key start
LH: loop header
LB: loop body
LE: loop exit
PB: predicated region body
PF: predicated region fallthrough
CT: control target
= control target key end

     0   :  { %vm125_vm0 = vcmask 261120   ;;  %s956_s3 = inlined_call_operand.vmem [shape: bf16[32,128], index: 3, kind: input, shape index: {}]   ;;  %s957_s1 = inlined_call_operand.vmem [shape: bf16[128,128], index: 1, kind: input, shape index: {}]   ;;  %s958_s4 = inlined_call_operand.vmem [shape: bf16[128,32], index: 4, kind: input, shape index: {}]   ;;  %s959_s0 = inlined_call_operand.vmem [shape: bf16[128,128], index: 0, kind: input, shape index: {}]   ;;  %s960_s2 = inlined_call_operand.vmem [shape: f32[1,128], index: 2, kind: input, shape index: {}]   ;;  %s961_s5 = inlined_call_operand.vmem [shape: bf16[128,128], index: 5, kind: output, shape index: {}]  }
   0x1   :  { %v787_v0 = vld [vmem:[%s956_s3] sm:$0xff]   ;;  %v789_v2 = vld [vmem:[%s956_s3 + $0x8] sm:$0xff]   ;;  %v793_v6 = vld [vmem:[%s957_s1 + $0x10] sm:$0xff]  }
   0x2   :  { %v788_v1 = vld [vmem:[%s957_s1] sm:$0xff]   ;;  %687 = vmatprep.subr.bf16.mxu0 %v787_v0  ;;  %v790_v3 = vld [vmem:[%s957_s1 + $0x8] sm:$0xff]   ;;  %v795_v7 = vld [vmem:[%s958_s4 + $0x10] sm:$0xff]  }
   0x3   :  { %739 = vmatprep.subr.bf16.mxu1 %v788_v1  ;;  %688 = vmatpush3.bf16.msra.mxu0 %v787_v0  ;;  %v791_v4 = vld [vmem:[%s958_s4] sm:$0xff]   ;;  %v792_v5 = vld [vmem:[%s958_s4 + $0x8] sm:$0xff]   ;;  %v794_v8 = vld [vmem:[%s957_s1 + $0x18] sm:$0xff]  }
   0x4   :  { %747 = vmatpush3.bf16.msra.mxu1 %v788_v1  ;;  %689 = vmatprep.subr.bf16.mxu0 %v789_v2  ;;  %v797_v9 = vld [vmem:[%s957_s1 + $0x20] sm:$0xff]   ;;  %v796_v10 = vld [vmem:[%s958_s4 + $0x18] sm:$0xff]   ;;  %v798_v12 = vld [vmem:[%s957_s1 + $0x28] sm:$0xff]  }
   0x5   :  { %740 = vmatprep.subr.bf16.mxu1 %v790_v3  ;;  %691 = vmatprep.mubr.msk.bf16.mxu0 %vm125_vm0, %v791_v4  ;;  %v799_v11 = vld [vmem:[%s958_s4 + $0x20] sm:$0xff]   ;;  %v804_v13 = vld [vmem:[%s959_s0 + $0x10] sm:$0xff]   ;;  %v800_v15 = vld [vmem:[%s958_s4 + $0x28] sm:$0xff]  }
   0x6   :  { %v801_v14 = vld [vmem:[%s957_s1 + $0x30] sm:$0xff]   ;;  %727 = vmatprep.mubr.bf16.mxu1 %v804_v13  ;;  %v802_v17 = vld [vmem:[%s957_s1 + $0x38] sm:$0xff]   ;;  %v807_v20 = vld [vmem:[%s959_s0] sm:$0xff]  }
   0x7   :  { %690 = vmatpush3.bf16.msra.mxu0 %v789_v2  ;;  %v803_v16 = vld [vmem:[%s958_s4 + $0x30] sm:$0xff]   ;;  %v805_v18 = vld [vmem:[%s958_s4 + $0x38] sm:$0xff]   ;;  %v808_v21 = vld [vmem:[%s959_s0 + $0x20] sm:$0xff]  }
   0x8   :  { %748 = vmatpush3.bf16.msra.mxu1 %v790_v3  ;;  %707 = vmatprep.subr.bf16.mxu0 %v788_v1  ;;  %v806_v19 = vld [vmem:[%s959_s0 + $0x18] sm:$0xff]   ;;  %v809_v22 = vld [vmem:[%s959_s0 + $0x8] sm:$0xff]   ;;  %v811_v24 = vld [vmem:[%s959_s0 + $0x30] sm:$0xff]  }
   0x9   :  { %741 = vmatprep.subr.bf16.mxu1 %v793_v6  ;;  %v810_v23 = vld [vmem:[%s959_s0 + $0x28] sm:$0xff]   ;;  %v812_v25 = vld [vmem:[%s959_s0 + $0x38] sm:$0xff]   ;;  %v565_v34 = vld [vmem:[%s960_s2] ss:$0 sm:$0xff] }
   0xa   :  { %692 = vmatmul.mubr.msk.bf16.vlgmr.msra.gmra.mrb[0].mxu0 %vm125_vm0, %v792_v5 }
   0xb   :  { %708 = vmatpush3.bf16.msra.mxu0 %v788_v1  ;;  %695 = vmatprep.mubr.msk.bf16.mxu0 %vm125_vm0, %v795_v7 }
   0xc   :  { %749 = vmatpush3.bf16.msra.mxu1 %v793_v6  ;;  %709 = vmatprep.subr.bf16.mxu0 %v790_v3 }
   0xd   :  { %742 = vmatprep.subr.bf16.mxu1 %v794_v8 }
   0xf   :  { %710 = vmatpush3.bf16.msra.mxu0 %v790_v3 }
  0x10   :  { %750 = vmatpush3.bf16.msra.mxu1 %v794_v8  ;;  %711 = vmatprep.subr.bf16.mxu0 %v793_v6 }
  0x11   :  { %743 = vmatprep.subr.bf16.mxu1 %v797_v9 }
  0x12   :  { %696 = vmatmul.mubr.msk.bf16.gmra.mrb[4].mxu0 %vm125_vm0, %v796_v10 }
  0x13   :  { %712 = vmatpush3.bf16.msra.mxu0 %v793_v6  ;;  %699 = vmatprep.mubr.msk.bf16.mxu0 %vm125_vm0, %v799_v11 }
  0x14   :  { %751 = vmatpush3.bf16.msra.mxu1 %v797_v9  ;;  %713 = vmatprep.subr.bf16.mxu0 %v794_v8 }
  0x15   :  { %744 = vmatprep.subr.bf16.mxu1 %v798_v12 }
  0x17   :  { %714 = vmatpush3.bf16.msra.mxu0 %v794_v8 }
  0x18   :  { %752 = vmatpush3.bf16.msra.mxu1 %v798_v12  ;;  %715 = vmatprep.subr.bf16.mxu0 %v797_v9 }
  0x19   :  { %745 = vmatprep.subr.bf16.mxu1 %v801_v14 }
  0x1a   :  { %700 = vmatmul.mubr.msk.bf16.gmra.mrb[8].mxu0 %vm125_vm0, %v800_v15 }
  0x1b   :  { %716 = vmatpush3.bf16.msra.mxu0 %v797_v9  ;;  %703 = vmatprep.mubr.msk.bf16.mxu0 %vm125_vm0, %v803_v16 }
  0x1c   :  { %753 = vmatpush3.bf16.msra.mxu1 %v801_v14  ;;  %717 = vmatprep.subr.bf16.mxu0 %v798_v12 }
  0x1d   :  { %746 = vmatprep.subr.bf16.mxu1 %v802_v17 }
  0x1f   :  { %718 = vmatpush3.bf16.msra.mxu0 %v798_v12 }
  0x20   :  { %754 = vmatpush3.bf16.msra.mxu1 %v802_v17  ;;  %719 = vmatprep.subr.bf16.mxu0 %v801_v14 }
  0x22   :  { %704 = vmatmul.mubr.msk.bf16.gmra.mrb[12].mxu0 %vm125_vm0, %v805_v18 }
  0x23   :  { %728 = vmatmul.mubr.bf16.vlgmr.msra.gmra.mrb[0].mxu1 %v806_v19  ;;  %720 = vmatpush3.bf16.msra.mxu0 %v801_v14 }
  0x24   :  { %721 = vmatprep.subr.bf16.mxu0 %v802_v17  ;;  %723 = vmatprep.mubr.bf16.mxu0 %v807_v20 }
  0x25   :  { %731 = vmatprep.mubr.bf16.mxu1 %v808_v21 }
  0x27   :  { %722 = vmatpush3.bf16.msra.mxu0 %v802_v17 }
  0x2a   :  { %724 = vmatmul.mubr.bf16.vlgmr.msra.gmra.mrb[0].mxu0 %v809_v22 }
  0x2b   :  { %732 = vmatmul.mubr.bf16.gmra.mrb[4].mxu1 %v810_v23 }
  0x2c   :  { %735 = vmatprep.mubr.bf16.mxu1 %v811_v24 }
  0x33   :  { %736 = vmatmul.mubr.bf16.gmra.mrb[8].mxu1 %v812_v25 }
  0xe5   :  { %v697_v26 = vpop.f32.mrb[4].mxu0 }
  0xe6   :  { %v200_v27 = vpop.f32.mrb[5].mxu0  ;;  %v759_v35 = vadd.f32 %v697_v26, %v565_v34 }
  0xe7   :  { %v698_v28 = vpop.f32.mrb[6].mxu0  ;;  %v761_v37 = vadd.f32 %v565_v34, %v200_v27 }
  0xe8   :  { %v203_v29 = vpop.f32.mrb[7].mxu0  ;;  %v763_v40 = vadd.f32 %v698_v28, %v565_v34 }
  0xe9   :  { %v765_v44 = vadd.f32 %v565_v34, %v203_v29 }
  0xed   :  { %v701_v30 = vpop.f32.mrb[8].mxu0 }
  0xee   :  { %v216_v31 = vpop.f32.mrb[9].mxu0  ;;  %v767_v53 = vadd.f32 %v701_v30, %v565_v34 }
  0xef   :  { %v702_v32 = vpop.f32.mrb[10].mxu0  ;;  %v769_v55 = vadd.f32 %v565_v34, %v216_v31 }
  0xf0   :  { %v219_v33 = vpop.f32.mrb[11].mxu0  ;;  %v771_v58 = vadd.f32 %v702_v32, %v565_v34 }
  0xf1   :  { %v773_v62 = vadd.f32 %v565_v34, %v219_v33 }
  0xf5   :  { %v705_v36 = vpop.f32.mrb[12].mxu0 }
  0xf6   :  { %v729_v38 = vpop.f32.mrb[0].mxu1  ;;  %v232_v39 = vpop.f32.mrb[13].mxu0  ;;  %v775_v13 = vadd.f32 %v705_v36, %v565_v34 }
  0xf7   :  { %v760_v41 = vadd.f32 %v759_v35, %v729_v38  ;;  %v400_v42 = vpop.f32.mrb[1].mxu1  ;;  %v706_v43 = vpop.f32.mrb[14].mxu0  ;;  %v777_v14 = vadd.f32 %v565_v34, %v232_v39 }
  0xf8   :  { %v762_v45 = vadd.f32 %v761_v37, %v400_v42  ;;  %v730_v46 = vpop.f32.mrb[2].mxu1  ;;  %v235_v47 = vpop.f32.mrb[15].mxu0  ;;  %v779_v16 = vadd.f32 %v706_v43, %v565_v34 }
  0xf9   :  { %v764_v48 = vadd.f32 %v763_v40, %v730_v46  ;;  %v403_v49 = vpop.f32.mrb[3].mxu1  ;;  %v781_v19 = vadd.f32 %v565_v34, %v235_v47 }
  0xfa   :  { %v766_v50 = vadd.f32 %v765_v44, %v403_v49 }
  0xfb   :  { %v632_v51 = vpack.c.bf16 %v764_v48, %v760_v41 }
  0xfc   :  { %v627_v52 = vpack.c.bf16 %v766_v50, %v762_v45 }
  0xfd   :  { %656 = vst [vmem:[%s961_s5 + $0x18] sm:$0xff] %v632_v51   ;;  %v725_v54 = vpop.f32.mrb[0].mxu0 }
  0xfe   :  { %655 = vst [vmem:[%s961_s5 + $0x10] sm:$0xff] %v627_v52   ;;  %v733_v56 = vpop.f32.mrb[4].mxu1  ;;  %v384_v57 = vpop.f32.mrb[1].mxu0  ;;  %v393_v63 = vadd.f32 %v725_v54, %v565_v34 }
  0xff   :  { %v768_v59 = vadd.f32 %v767_v53, %v733_v56  ;;  %v416_v60 = vpop.f32.mrb[5].mxu1  ;;  %v726_v61 = vpop.f32.mrb[2].mxu0  ;;  %v385_v4 = vadd.f32 %v565_v34, %v384_v57 }
 0x100   :  { %v770_v0 = vadd.f32 %v769_v55, %v416_v60  ;;  %v396_v1 = vadd.f32 %v726_v61, %v565_v34  ;;  %v734_v2 = vpop.f32.mrb[6].mxu1  ;;  %v387_v3 = vpop.f32.mrb[3].mxu0 }
 0x101   :  { %v772_v5 = vadd.f32 %v771_v58, %v734_v2  ;;  %v388_v6 = vadd.f32 %v565_v34, %v387_v3  ;;  %v419_v7 = vpop.f32.mrb[7].mxu1 }
 0x102   :  { %v622_v8 = vpack.c.bf16 %v396_v1, %v393_v63  ;;  %v774_v9 = vadd.f32 %v773_v62, %v419_v7 }
 0x103   :  { %v642_v10 = vpack.c.bf16 %v772_v5, %v768_v59  ;;  %v617_v11 = vpack.c.bf16 %v388_v6, %v385_v4 }
 0x104   :  { %654 = vst [vmem:[%s961_s5 + $0x8] sm:$0xff] %v622_v8   ;;  %v637_v12 = vpack.c.bf16 %v774_v9, %v770_v0 }
 0x105   :  { %658 = vst [vmem:[%s961_s5 + $0x28] sm:$0xff] %v642_v10   ;;  %618 = vst [vmem:[%s961_s5] sm:$0xff] %v617_v11  }
 0x106   :  { %657 = vst [vmem:[%s961_s5 + $0x20] sm:$0xff] %v637_v12   ;;  %v737_v15 = vpop.f32.mrb[8].mxu1 }
 0x107   :  { %v776_v17 = vadd.f32 %v775_v13, %v737_v15  ;;  %v432_v18 = vpop.f32.mrb[9].mxu1 }
 0x108   :  { %v778_v20 = vadd.f32 %v777_v14, %v432_v18  ;;  %v738_v21 = vpop.f32.mrb[10].mxu1 }
 0x109   :  { %v780_v22 = vadd.f32 %v779_v16, %v738_v21  ;;  %v435_v23 = vpop.f32.mrb[11].mxu1 }
 0x10a   :  { %v782_v24 = vadd.f32 %v781_v19, %v435_v23 }
 0x10b   :  { %v652_v25 = vpack.c.bf16 %v780_v22, %v776_v17 }
 0x10c   :  { %v647_v26 = vpack.c.bf16 %v782_v24, %v778_v20 }
 0x10d   :  { %660 = vst [vmem:[%s961_s5 + $0x38] sm:$0xff] %v652_v25  }
 0x10e   :  { %659 = vst [vmem:[%s961_s5 + $0x30] sm:$0xff] %v647_v26  }

// kernel: feature_pyramid.12
= control target key start
LH: loop header
LB: loop body
LE: loop exit
PB: predicated region body
PF: predicated region fallthrough
CT: control target
= control target key end

     0   :  { %s2917_s3 = inlined_call_operand.vmem [shape: bf16[128,128], index: 3, kind: input, shape index: {}]   ;;  %s2918_s1 = inlined_call_operand.vmem [shape: bf16[128,128], index: 1, kind: input, shape index: {}]   ;;  %s2919_s4 = inlined_call_operand.vmem [shape: bf16[512,128], index: 4, kind: input, shape index: {}]   ;;  %s2920_s0 = inlined_call_operand.vmem [shape: bf16[512,128], index: 0, kind: input, shape index: {}]   ;;  %s2921_s2 = inlined_call_operand.vmem [shape: f32[1,128], index: 2, kind: input, shape index: {}]   ;;  %s2922_s5 = inlined_call_operand.vmem [shape: bf16[512,128], index: 5, kind: output, shape index: {}]  }
   0x1   :  { %v2402_v0 = vld [vmem:[%s2917_s3] sm:$0xff]   ;;  %v2404_v2 = vld [vmem:[%s2917_s3 + $0x8] sm:$0xff]   ;;  %v2406_v4 = vld [vmem:[%s2917_s3 + $0x10] sm:$0xff]  }
   0x2   :  { %v2403_v1 = vld [vmem:[%s2918_s1] sm:$0xff]   ;;  %2114 = vmatprep.subr.bf16.mxu1 %v2402_v0  ;;  %v2405_v3 = vld [vmem:[%s2918_s1 + $0x8] sm:$0xff]   ;;  %v2407_v5 = vld [vmem:[%s2918_s1 + $0x10] sm:$0xff]  }
   0x3   :  { %2194 = vmatprep.subr.bf16.mxu0 %v2403_v1  ;;  %2115 = vmatpush3.bf16.msra.mxu1 %v2402_v0  ;;  %v2408_v6 = vld [vmem:[%s2917_s3 + $0x18] sm:$0xff]   ;;  %v2410_v8 = vld [vmem:[%s2917_s3 + $0x20] sm:$0xff]   ;;  %v2412_v10 = vld [vmem:[%s2917_s3 + $0x28] sm:$0xff]  }
   0x4   :  { %2195 = vmatpush3.bf16.msra.mxu0 %v2403_v1  ;;  %2116 = vmatprep.subr.bf16.mxu1 %v2404_v2  ;;  %v2409_v7 = vld [vmem:[%s2918_s1 + $0x18] sm:$0xff]   ;;  %v2411_v9 = vld [vmem:[%s2918_s1 + $0x20] sm:$0xff]   ;;  %v2413_v11 = vld [vmem:[%s2918_s1 + $0x28] sm:$0xff]  }
   0x5   :  { %2196 = vmatprep.subr.bf16.mxu0 %v2405_v3  ;;  %v2418_v12 = vld [vmem:[%s2919_s4] sm:$0xff]   ;;  %v2414_v14 = vld [vmem:[%s2917_s3 + $0x30] sm:$0xff]   ;;  %v2416_v16 = vld [vmem:[%s2917_s3 + $0x38] sm:$0xff]  }
   0x6   :  { %v2419_v13 = vld [vmem:[%s2920_s0] sm:$0xff]   ;;  %2130 = vmatprep.mubr.bf16.mxu1 %v2418_v12  ;;  %v2415_v15 = vld [vmem:[%s2918_s1 + $0x30] sm:$0xff]   ;;  %v2417_v17 = vld [vmem:[%s2918_s1 + $0x38] sm:$0xff]  }
   0x7   :  { %2117 = vmatpush3.bf16.msra.mxu1 %v2404_v2  ;;  %2210 = vmatprep.mubr.bf16.mxu0 %v2419_v13  ;;  %v2420_v18 = vld [vmem:[%s2919_s4 + $0x8] sm:$0xff]   ;;  %v2422_v20 = vld [vmem:[%s2919_s4 + $0x10] sm:$0xff]   ;;  %v2424_v22 = vld [vmem:[%s2919_s4 + $0x18] sm:$0xff]  }
   0x8   :  { %2197 = vmatpush3.bf16.msra.mxu0 %v2405_v3  ;;  %2118 = vmatprep.subr.bf16.mxu1 %v2406_v4  ;;  %v2421_v19 = vld [vmem:[%s2920_s0 + $0x8] sm:$0xff]   ;;  %v2423_v21 = vld [vmem:[%s2920_s0 + $0x10] sm:$0xff]   ;;  %v2425_v23 = vld [vmem:[%s2920_s0 + $0x18] sm:$0xff]  }
   0x9   :  { %2198 = vmatprep.subr.bf16.mxu0 %v2407_v5  ;;  %v2426_v24 = vld [vmem:[%s2919_s4 + $0x20] sm:$0xff]   ;;  %v2428_v26 = vld [vmem:[%s2919_s4 + $0x28] sm:$0xff]   ;;  %v2430_v28 = vld [vmem:[%s2919_s4 + $0x30] sm:$0xff]  }
   0xa   :  { %v2427_v25 = vld [vmem:[%s2920_s0 + $0x20] sm:$0xff]   ;;  %v2429_v27 = vld [vmem:[%s2920_s0 + $0x28] sm:$0xff]   ;;  %v2431_v29 = vld [vmem:[%s2920_s0 + $0x30] sm:$0xff]  }
   0xb   :  { %2119 = vmatpush3.bf16.msra.mxu1 %v2406_v4  ;;  %v2432_v30 = vld [vmem:[%s2919_s4 + $0x38] sm:$0xff]   ;;  %v2434_v32 = vld [vmem:[%s2919_s4 + $0x40] sm:$0xff]   ;;  %v2436_v34 = vld [vmem:[%s2919_s4 + $0x48] sm:$0xff]  }
   0xc   :  { %2199 = vmatpush3.bf16.msra.mxu0 %v2407_v5  ;;  %2120 = vmatprep.subr.bf16.mxu1 %v2408_v6  ;;  %v2433_v31 = vld [vmem:[%s2920_s0 + $0x38] sm:$0xff]   ;;  %v2435_v33 = vld [vmem:[%s2920_s0 + $0x40] sm:$0xff]   ;;  %v2437_v35 = vld [vmem:[%s2920_s0 + $0x48] sm:$0xff]  }
   0xd   :  { %2200 = vmatprep.subr.bf16.mxu0 %v2409_v7  ;;  %v2438_v36 = vld [vmem:[%s2919_s4 + $0x50] sm:$0xff]   ;;  %v2440_v38 = vld [vmem:[%s2919_s4 + $0x58] sm:$0xff]   ;;  %v2442_v40 = vld [vmem:[%s2919_s4 + $0x60] sm:$0xff]  }
   0xe   :  { %v2439_v37 = vld [vmem:[%s2920_s0 + $0x50] sm:$0xff]   ;;  %v2441_v39 = vld [vmem:[%s2920_s0 + $0x58] sm:$0xff]   ;;  %v2443_v41 = vld [vmem:[%s2920_s0 + $0x60] sm:$0xff]  }
   0xf   :  { %2121 = vmatpush3.bf16.msra.mxu1 %v2408_v6  ;;  %v2444_v42 = vld [vmem:[%s2919_s4 + $0x68] sm:$0xff]   ;;  %v2446_v44 = vld [vmem:[%s2919_s4 + $0x70] sm:$0xff]   ;;  %v2448_v46 = vld [vmem:[%s2919_s4 + $0x78] sm:$0xff]  }
  0x10   :  { %2201 = vmatpush3.bf16.msra.mxu0 %v2409_v7  ;;  %2122 = vmatprep.subr.bf16.mxu1 %v2410_v8  ;;  %v2445_v43 = vld [vmem:[%s2920_s0 + $0x68] sm:$0xff]   ;;  %v2447_v45 = vld [vmem:[%s2920_s0 + $0x70] sm:$0xff]   ;;  %v2449_v47 = vld [vmem:[%s2920_s0 + $0x78] sm:$0xff]  }
  0x11   :  { %2202 = vmatprep.subr.bf16.mxu0 %v2411_v9  ;;  %v2450_v48 = vld [vmem:[%s2919_s4 + $0x80] sm:$0xff]   ;;  %v2452_v50 = vld [vmem:[%s2919_s4 + $0x88] sm:$0xff]   ;;  %v2454_v52 = vld [vmem:[%s2919_s4 + $0x90] sm:$0xff]  }
  0x12   :  { %v2451_v49 = vld [vmem:[%s2920_s0 + $0x80] sm:$0xff]   ;;  %v2453_v51 = vld [vmem:[%s2920_s0 + $0x88] sm:$0xff]   ;;  %v2455_v53 = vld [vmem:[%s2920_s0 + $0x90] sm:$0xff]  }
  0x13   :  { %2123 = vmatpush3.bf16.msra.mxu1 %v2410_v8  ;;  %v2456_v54 = vld [vmem:[%s2919_s4 + $0x98] sm:$0xff]   ;;  %v2458_v56 = vld [vmem:[%s2919_s4 + $0xa0] sm:$0xff]   ;;  %v2460_v58 = vld [vmem:[%s2919_s4 + $0xa8] sm:$0xff]  }
  0x14   :  { %2203 = vmatpush3.bf16.msra.mxu0 %v2411_v9  ;;  %2124 = vmatprep.subr.bf16.mxu1 %v2412_v10  ;;  %v2457_v55 = vld [vmem:[%s2920_s0 + $0x98] sm:$0xff]   ;;  %v2459_v57 = vld [vmem:[%s2920_s0 + $0xa0] sm:$0xff]   ;;  %v2461_v59 = vld [vmem:[%s2920_s0 + $0xa8] sm:$0xff]  }
  0x15   :  { %2204 = vmatprep.subr.bf16.mxu0 %v2413_v11  ;;  %v2462_v60 = vld [vmem:[%s2919_s4 + $0xb0] sm:$0xff]   ;;  %v2464_v62 = vld [vmem:[%s2919_s4 + $0xb8] sm:$0xff]   ;;  %v2466_v0 = vld [vmem:[%s2919_s4 + $0xc0] sm:$0xff]  }
  0x16   :  { %v2463_v61 = vld [vmem:[%s2920_s0 + $0xb0] sm:$0xff]   ;;  %v2465_v63 = vld [vmem:[%s2920_s0 + $0xb8] sm:$0xff]   ;;  %v2467_v1 = vld [vmem:[%s2920_s0 + $0xc0] sm:$0xff]  }
  0x17   :  { %2125 = vmatpush3.bf16.msra.mxu1 %v2412_v10  ;;  %v2468_v2 = vld [vmem:[%s2919_s4 + $0xc8] sm:$0xff]   ;;  %v2470_v4 = vld [vmem:[%s2919_s4 + $0xd0] sm:$0xff]   ;;  %v2472_v6 = vld [vmem:[%s2919_s4 + $0xd8] sm:$0xff]  }
  0x18   :  { %2205 = vmatpush3.bf16.msra.mxu0 %v2413_v11  ;;  %2126 = vmatprep.subr.bf16.mxu1 %v2414_v14  ;;  %v2469_v3 = vld [vmem:[%s2920_s0 + $0xc8] sm:$0xff]   ;;  %v2471_v5 = vld [vmem:[%s2920_s0 + $0xd0] sm:$0xff]   ;;  %v2473_v7 = vld [vmem:[%s2920_s0 + $0xd8] sm:$0xff]  }
  0x19   :  { %2206 = vmatprep.subr.bf16.mxu0 %v2415_v15  ;;  %v2474_v8 = vld [vmem:[%s2919_s4 + $0xe0] sm:$0xff]   ;;  %v2476_v10 = vld [vmem:[%s2919_s4 + $0xe8] sm:$0xff]   ;;  %v2478_v12 = vld [vmem:[%s2919_s4 + $0xf0] sm:$0xff]  }
  0x1a   :  { %v2475_v9 = vld [vmem:[%s2920_s0 + $0xe0] sm:$0xff]   ;;  %v2477_v11 = vld [vmem:[%s2920_s0 + $0xe8] sm:$0xff]   ;;  %v2479_v13 = vld [vmem:[%s2920_s0 + $0xf0] sm:$0xff]  }
  0x1b   :  { %2127 = vmatpush3.bf16.msra.mxu1 %v2414_v14  ;;  %v2480_v14 = vld [vmem:[%s2919_s4 + $0xf8] sm:$0xff]  }
  0x1c   :  { %2207 = vmatpush3.bf16.msra.mxu0 %v2415_v15  ;;  %2128 = vmatprep.subr.bf16.mxu1 %v2416_v16  ;;  %v2481_v15 = vld [vmem:[%s2920_s0 + $0xf8] sm:$0xff]  }
  0x1d   :  { %2208 = vmatprep.subr.bf16.mxu0 %v2417_v17 }
  0x1f   :  { %2129 = vmatpush3.bf16.msra.mxu1 %v2416_v16 }
  0x20   :  { %2209 = vmatpush3.bf16.msra.mxu0 %v2417_v17  ;;  %v2755_v17 = vld [vmem:[%s2921_s2] ss:$0 sm:$0xff] }
  0x22   :  { %2131 = vmatmul.mubr.bf16.vlgmr.msra.gmra.mrb[0].mxu1 %v2420_v18 }
  0x23   :  { %2211 = vmatmul.mubr.bf16.vlgmr.msra.gmra.mrb[0].mxu0 %v2421_v19  ;;  %2134 = vmatprep.mubr.bf16.mxu1 %v2422_v20 }
  0x24   :  { %2214 = vmatprep.mubr.bf16.mxu0 %v2423_v21 }
  0x2a   :  { %2135 = vmatmul.mubr.bf16.gmra.mrb[4].mxu1 %v2424_v22 }
  0x2b   :  { %2215 = vmatmul.mubr.bf16.gmra.mrb[4].mxu0 %v2425_v23  ;;  %2138 = vmatprep.mubr.bf16.mxu1 %v2426_v24 }
  0x2c   :  { %2218 = vmatprep.mubr.bf16.mxu0 %v2427_v25 }
  0x32   :  { %2139 = vmatmul.mubr.bf16.gmra.mrb[8].mxu1 %v2428_v26 }
  0x33   :  { %2219 = vmatmul.mubr.bf16.gmra.mrb[8].mxu0 %v2429_v27  ;;  %2142 = vmatprep.mubr.bf16.mxu1 %v2430_v28 }
  0x34   :  { %2222 = vmatprep.mubr.bf16.mxu0 %v2431_v29 }
  0x3a   :  { %2143 = vmatmul.mubr.bf16.gmra.mrb[12].mxu1 %v2432_v30 }
  0x3b   :  { %2223 = vmatmul.mubr.bf16.gmra.mrb[12].mxu0 %v2433_v31  ;;  %2146 = vmatprep.mubr.bf16.mxu1 %v2434_v32 }
  0x3c   :  { %2226 = vmatprep.mubr.bf16.mxu0 %v2435_v33 }
  0x42   :  { %2147 = vmatmul.mubr.bf16.gmra.mrb[16].mxu1 %v2436_v34 }
  0x43   :  { %2227 = vmatmul.mubr.bf16.gmra.mrb[16].mxu0 %v2437_v35  ;;  %2150 = vmatprep.mubr.bf16.mxu1 %v2438_v36 }
  0x44   :  { %2230 = vmatprep.mubr.bf16.mxu0 %v2439_v37 }
  0x4a   :  { %2151 = vmatmul.mubr.bf16.gmra.mrb[20].mxu1 %v2440_v38 }
  0x4b   :  { %2231 = vmatmul.mubr.bf16.gmra.mrb[20].mxu0 %v2441_v39  ;;  %2154 = vmatprep.mubr.bf16.mxu1 %v2442_v40 }
  0x4c   :  { %2234 = vmatprep.mubr.bf16.mxu0 %v2443_v41 }
  0x52   :  { %2155 = vmatmul.mubr.bf16.gmra.mrb[24].mxu1 %v2444_v42 }
  0x53   :  { %2235 = vmatmul.mubr.bf16.gmra.mrb[24].mxu0 %v2445_v43  ;;  %2158 = vmatprep.mubr.bf16.mxu1 %v2446_v44 }
  0x54   :  { %2238 = vmatprep.mubr.bf16.mxu0 %v2447_v45 }
  0x5a   :  { %2159 = vmatmul.mubr.bf16.gmra.mrb[28].mxu1 %v2448_v46 }
  0x5b   :  { %2239 = vmatmul.mubr.bf16.gmra.mrb[28].mxu0 %v2449_v47  ;;  %2162 = vmatprep.mubr.bf16.mxu1 %v2450_v48 }
  0x5c   :  { %2242 = vmatprep.mubr.bf16.mxu0 %v2451_v49 }
  0x62   :  { %2163 = vmatmul.mubr.bf16.gmra.mrb[32].mxu1 %v2452_v50 }
  0x63   :  { %2243 = vmatmul.mubr.bf16.gmra.mrb[32].mxu0 %v2453_v51  ;;  %2166 = vmatprep.mubr.bf16.mxu1 %v2454_v52 }
  0x64   :  { %2246 = vmatprep.mubr.bf16.mxu0 %v2455_v53 }
  0x6a   :  { %2167 = vmatmul.mubr.bf16.gmra.mrb[36].mxu1 %v2456_v54 }
  0x6b   :  { %2247 = vmatmul.mubr.bf16.gmra.mrb[36].mxu0 %v2457_v55  ;;  %2170 = vmatprep.mubr.bf16.mxu1 %v2458_v56 }
  0x6c   :  { %2250 = vmatprep.mubr.bf16.mxu0 %v2459_v57 }
  0x72   :  { %2171 = vmatmul.mubr.bf16.gmra.mrb[40].mxu1 %v2460_v58 }
  0x73   :  { %2251 = vmatmul.mubr.bf16.gmra.mrb[40].mxu0 %v2461_v59  ;;  %2174 = vmatprep.mubr.bf16.mxu1 %v2462_v60 }
  0x74   :  { %2254 = vmatprep.mubr.bf16.mxu0 %v2463_v61 }
  0x7a   :  { %2175 = vmatmul.mubr.bf16.gmra.mrb[44].mxu1 %v2464_v62 }
  0x7b   :  { %2255 = vmatmul.mubr.bf16.gmra.mrb[44].mxu0 %v2465_v63  ;;  %2178 = vmatprep.mubr.bf16.mxu1 %v2466_v0 }
  0x7c   :  { %2258 = vmatprep.mubr.bf16.mxu0 %v2467_v1 }
  0x82   :  { %2179 = vmatmul.mubr.bf16.gmra.mrb[48].mxu1 %v2468_v2 }
  0x83   :  { %2259 = vmatmul.mubr.bf16.gmra.mrb[48].mxu0 %v2469_v3  ;;  %2182 = vmatprep.mubr.bf16.mxu1 %v2470_v4 }
  0x84   :  { %2262 = vmatprep.mubr.bf16.mxu0 %v2471_v5 }
  0x8a   :  { %2183 = vmatmul.mubr.bf16.gmra.mrb[52].mxu1 %v2472_v6 }
  0x8b   :  { %2263 = vmatmul.mubr.bf16.gmra.mrb[52].mxu0 %v2473_v7  ;;  %2186 = vmatprep.mubr.bf16.mxu1 %v2474_v8 }
  0x8c   :  { %2266 = vmatprep.mubr.bf16.mxu0 %v2475_v9 }
  0x92   :  { %2187 = vmatmul.mubr.bf16.gmra.mrb[56].mxu1 %v2476_v10 }
  0x93   :  { %2267 = vmatmul.mubr.bf16.gmra.mrb[56].mxu0 %v2477_v11  ;;  %2190 = vmatprep.mubr.bf16.mxu1 %v2478_v12 }
  0x94   :  { %2270 = vmatprep.mubr.bf16.mxu0 %v2479_v13 }
  0x9a   :  { %2191 = vmatmul.mubr.bf16.gmra.mrb[60].mxu1 %v2480_v14 }
  0x9b   :  { %2271 = vmatmul.mubr.bf16.gmra.mrb[60].mxu0 %v2481_v15 }
  0xf5   :  { %v2132_v16 = vpop.f32.mrb[0].mxu1 }
  0xf6   :  { %v2212_v18 = vpop.f32.mrb[0].mxu0  ;;  %v455_v19 = vpop.f32.mrb[1].mxu1 }
  0xf7   :  { %v2274_v20 = vadd.f32 %v2212_v18, %v2132_v16  ;;  %v991_v21 = vpop.f32.mrb[1].mxu0  ;;  %v2133_v22 = vpop.f32.mrb[2].mxu1 }
  0xf8   :  { %v2276_v23 = vadd.f32 %v991_v21, %v455_v19  ;;  %v2278_v24 = vadd.f32 %v2133_v22, %v2755_v17  ;;  %v2213_v25 = vpop.f32.mrb[2].mxu0  ;;  %v458_v26 = vpop.f32.mrb[3].mxu1 }
  0xf9   :  { %v2280_v27 = vadd.f32 %v2755_v17, %v458_v26  ;;  %v994_v28 = vpop.f32.mrb[3].mxu0  ;;  %v2275_v29 = vadd.f32 %v2274_v20, %v2755_v17 }
  0xfa   :  { %v2279_v30 = vadd.f32 %v2278_v24, %v2213_v25  ;;  %v2277_v31 = vadd.f32 %v2276_v23, %v2755_v17 }
  0xfb   :  { %v2281_v32 = vadd.f32 %v2280_v27, %v994_v28 }
  0xfc   :  { %v1851_v33 = vpack.c.bf16 %v2279_v30, %v2275_v29 }
  0xfd   :  { %v1846_v34 = vpack.c.bf16 %v2281_v32, %v2277_v31  ;;  %v2136_v35 = vpop.f32.mrb[4].mxu1 }
  0xfe   :  { %2003 = vst [vmem:[%s2922_s5 + $0x8] sm:$0xff] %v1851_v33   ;;  %v2282_v36 = vadd.f32 %v2136_v35, %v2755_v17  ;;  %v2216_v37 = vpop.f32.mrb[4].mxu0  ;;  %v471_v38 = vpop.f32.mrb[5].mxu1 }
  0xff   :  { %1847 = vst [vmem:[%s2922_s5] sm:$0xff] %v1846_v34   ;;  %v2284_v39 = vadd.f32 %v2755_v17, %v471_v38  ;;  %v1007_v40 = vpop.f32.mrb[5].mxu0  ;;  %v2137_v41 = vpop.f32.mrb[6].mxu1 }
 0x100   :  { %v2283_v42 = vadd.f32 %v2282_v36, %v2216_v37  ;;  %v2286_v43 = vadd.f32 %v2137_v41, %v2755_v17  ;;  %v2217_v44 = vpop.f32.mrb[6].mxu0  ;;  %v474_v45 = vpop.f32.mrb[7].mxu1 }
 0x101   :  { %v2285_v46 = vadd.f32 %v2284_v39, %v1007_v40  ;;  %v2288_v47 = vadd.f32 %v2755_v17, %v474_v45  ;;  %v1010_v48 = vpop.f32.mrb[7].mxu0 }
 0x102   :  { %v2287_v49 = vadd.f32 %v2286_v43, %v2217_v44 }
 0x103   :  { %v2289_v50 = vadd.f32 %v2288_v47, %v1010_v48 }
 0x104   :  { %v1861_v51 = vpack.c.bf16 %v2287_v49, %v2283_v42 }
 0x105   :  { %v1856_v52 = vpack.c.bf16 %v2289_v50, %v2285_v46  ;;  %v2140_v53 = vpop.f32.mrb[8].mxu1 }
 0x106   :  { %2005 = vst [vmem:[%s2922_s5 + $0x18] sm:$0xff] %v1861_v51   ;;  %v2290_v54 = vadd.f32 %v2140_v53, %v2755_v17  ;;  %v2220_v55 = vpop.f32.mrb[8].mxu0  ;;  %v487_v56 = vpop.f32.mrb[9].mxu1 }
 0x107   :  { %2004 = vst [vmem:[%s2922_s5 + $0x10] sm:$0xff] %v1856_v52   ;;  %v2292_v57 = vadd.f32 %v2755_v17, %v487_v56  ;;  %v1023_v58 = vpop.f32.mrb[9].mxu0  ;;  %v2141_v59 = vpop.f32.mrb[10].mxu1 }
 0x108   :  { %v2291_v60 = vadd.f32 %v2290_v54, %v2220_v55  ;;  %v2294_v61 = vadd.f32 %v2141_v59, %v2755_v17  ;;  %v2221_v62 = vpop.f32.mrb[10].mxu0  ;;  %v490_v63 = vpop.f32.mrb[11].mxu1 }
 0x109   :  { %v2293_v0 = vadd.f32 %v2292_v57, %v1023_v58  ;;  %v2296_v1 = vadd.f32 %v2755_v17, %v490_v63  ;;  %v1026_v2 = vpop.f32.mrb[11].mxu0 }
 0x10a   :  { %v2295_v3 = vadd.f32 %v2294_v61, %v2221_v62 }
 0x10b   :  { %v2297_v4 = vadd.f32 %v2296_v1, %v1026_v2 }
 0x10c   :  { %v1871_v5 = vpack.c.bf16 %v2295_v3, %v2291_v60 }
 0x10d   :  { %v1866_v6 = vpack.c.bf16 %v2297_v4, %v2293_v0  ;;  %v2144_v7 = vpop.f32.mrb[12].mxu1 }
 0x10e   :  { %2007 = vst [vmem:[%s2922_s5 + $0x28] sm:$0xff] %v1871_v5   ;;  %v2298_v8 = vadd.f32 %v2144_v7, %v2755_v17  ;;  %v2224_v9 = vpop.f32.mrb[12].mxu0  ;;  %v503_v10 = vpop.f32.mrb[13].mxu1 }
 0x10f   :  { %2006 = vst [vmem:[%s2922_s5 + $0x20] sm:$0xff] %v1866_v6   ;;  %v2300_v11 = vadd.f32 %v2755_v17, %v503_v10  ;;  %v1039_v12 = vpop.f32.mrb[13].mxu0  ;;  %v2145_v13 = vpop.f32.mrb[14].mxu1 }
 0x110   :  { %v2299_v14 = vadd.f32 %v2298_v8, %v2224_v9  ;;  %v2302_v15 = vadd.f32 %v2145_v13, %v2755_v17  ;;  %v2225_v16 = vpop.f32.mrb[14].mxu0  ;;  %v506_v18 = vpop.f32.mrb[15].mxu1 }
 0x111   :  { %v2301_v19 = vadd.f32 %v2300_v11, %v1039_v12  ;;  %v2304_v20 = vadd.f32 %v2755_v17, %v506_v18  ;;  %v1042_v21 = vpop.f32.mrb[15].mxu0 }
 0x112   :  { %v2303_v22 = vadd.f32 %v2302_v15, %v2225_v16 }
 0x113   :  { %v2305_v23 = vadd.f32 %v2304_v20, %v1042_v21 }
 0x114   :  { %v1881_v24 = vpack.c.bf16 %v2303_v22, %v2299_v14 }
 0x115   :  { %v1876_v25 = vpack.c.bf16 %v2305_v23, %v2301_v19  ;;  %v2148_v26 = vpop.f32.mrb[16].mxu1 }
 0x116   :  { %2009 = vst [vmem:[%s2922_s5 + $0x38] sm:$0xff] %v1881_v24   ;;  %v2306_v27 = vadd.f32 %v2148_v26, %v2755_v17  ;;  %v2228_v28 = vpop.f32.mrb[16].mxu0  ;;  %v519_v29 = vpop.f32.mrb[17].mxu1 }
 0x117   :  { %2008 = vst [vmem:[%s2922_s5 + $0x30] sm:$0xff] %v1876_v25   ;;  %v2308_v30 = vadd.f32 %v2755_v17, %v519_v29  ;;  %v1055_v31 = vpop.f32.mrb[17].mxu0  ;;  %v2149_v32 = vpop.f32.mrb[18].mxu1 }
 0x118   :  { %v2307_v33 = vadd.f32 %v2306_v27, %v2228_v28  ;;  %v2310_v34 = vadd.f32 %v2149_v32, %v2755_v17  ;;  %v2229_v35 = vpop.f32.mrb[18].mxu0  ;;  %v522_v36 = vpop.f32.mrb[19].mxu1 }
 0x119   :  { %v2309_v37 = vadd.f32 %v2308_v30, %v1055_v31  ;;  %v2312_v38 = vadd.f32 %v2755_v17, %v522_v36  ;;  %v1058_v39 = vpop.f32.mrb[19].mxu0 }
 0x11a   :  { %v2311_v40 = vadd.f32 %v2310_v34, %v2229_v35 }
 0x11b   :  { %v2313_v41 = vadd.f32 %v2312_v38, %v1058_v39 }
 0x11c   :  { %v1891_v42 = vpack.c.bf16 %v2311_v40, %v2307_v33 }
 0x11d   :  { %v1886_v43 = vpack.c.bf16 %v2313_v41, %v2309_v37  ;;  %v2152_v44 = vpop.f32.mrb[20].mxu1 }
 0x11e   :  { %2011 = vst [vmem:[%s2922_s5 + $0x48] sm:$0xff] %v1891_v42   ;;  %v2314_v45 = vadd.f32 %v2152_v44, %v2755_v17  ;;  %v2232_v46 = vpop.f32.mrb[20].mxu0  ;;  %v535_v47 = vpop.f32.mrb[21].mxu1 }
 0x11f   :  { %2010 = vst [vmem:[%s2922_s5 + $0x40] sm:$0xff] %v1886_v43   ;;  %v2316_v48 = vadd.f32 %v2755_v17, %v535_v47  ;;  %v1071_v49 = vpop.f32.mrb[21].mxu0  ;;  %v2153_v50 = vpop.f32.mrb[22].mxu1 }
 0x120   :  { %v2315_v51 = vadd.f32 %v2314_v45, %v2232_v46  ;;  %v2318_v52 = vadd.f32 %v2153_v50, %v2755_v17  ;;  %v2233_v53 = vpop.f32.mrb[22].mxu0  ;;  %v538_v54 = vpop.f32.mrb[23].mxu1 }
 0x121   :  { %v2317_v55 = vadd.f32 %v2316_v48, %v1071_v49  ;;  %v2320_v56 = vadd.f32 %v2755_v17, %v538_v54  ;;  %v1074_v57 = vpop.f32.mrb[23].mxu0 }
 0x122   :  { %v2319_v58 = vadd.f32 %v2318_v52, %v2233_v53 }
 0x123   :  { %v2321_v59 = vadd.f32 %v2320_v56, %v1074_v57 }
 0x124   :  { %v1901_v60 = vpack.c.bf16 %v2319_v58, %v2315_v51 }
 0x125   :  { %v1896_v61 = vpack.c.bf16 %v2321_v59, %v2317_v55  ;;  %v2156_v62 = vpop.f32.mrb[24].mxu1 }
 0x126   :  { %2013 = vst [vmem:[%s2922_s5 + $0x58] sm:$0xff] %v1901_v60   ;;  %v2322_v63 = vadd.f32 %v2156_v62, %v2755_v17  ;;  %v2236_v0 = vpop.f32.mrb[24].mxu0  ;;  %v551_v1 = vpop.f32.mrb[25].mxu1 }
 0x127   :  { %2012 = vst [vmem:[%s2922_s5 + $0x50] sm:$0xff] %v1896_v61   ;;  %v2324_v2 = vadd.f32 %v2755_v17, %v551_v1  ;;  %v1087_v3 = vpop.f32.mrb[25].mxu0  ;;  %v2157_v4 = vpop.f32.mrb[26].mxu1 }
 0x128   :  { %v2323_v5 = vadd.f32 %v2322_v63, %v2236_v0  ;;  %v2326_v6 = vadd.f32 %v2157_v4, %v2755_v17  ;;  %v2237_v7 = vpop.f32.mrb[26].mxu0  ;;  %v554_v8 = vpop.f32.mrb[27].mxu1 }
 0x129   :  { %v2325_v9 = vadd.f32 %v2324_v2, %v1087_v3  ;;  %v2328_v10 = vadd.f32 %v2755_v17, %v554_v8  ;;  %v1090_v11 = vpop.f32.mrb[27].mxu0 }
 0x12a   :  { %v2327_v12 = vadd.f32 %v2326_v6, %v2237_v7 }
 0x12b   :  { %v2329_v13 = vadd.f32 %v2328_v10, %v1090_v11 }
 0x12c   :  { %v1911_v14 = vpack.c.bf16 %v2327_v12, %v2323_v5 }
 0x12d   :  { %v1906_v15 = vpack.c.bf16 %v2329_v13, %v2325_v9  ;;  %v2160_v16 = vpop.f32.mrb[28].mxu1 }
 0x12e   :  { %2015 = vst [vmem:[%s2922_s5 + $0x68] sm:$0xff] %v1911_v14   ;;  %v2330_v18 = vadd.f32 %v2160_v16, %v2755_v17  ;;  %v2240_v19 = vpop.f32.mrb[28].mxu0  ;;  %v567_v20 = vpop.f32.mrb[29].mxu1 }
 0x12f   :  { %2014 = vst [vmem:[%s2922_s5 + $0x60] sm:$0xff] %v1906_v15   ;;  %v2332_v21 = vadd.f32 %v2755_v17, %v567_v20  ;;  %v1103_v22 = vpop.f32.mrb[29].mxu0  ;;  %v2161_v23 = vpop.f32.mrb[30].mxu1 }
 0x130   :  { %v2331_v24 = vadd.f32 %v2330_v18, %v2240_v19  ;;  %v2334_v25 = vadd.f32 %v2161_v23, %v2755_v17  ;;  %v2241_v26 = vpop.f32.mrb[30].mxu0  ;;  %v570_v27 = vpop.f32.mrb[31].mxu1 }
 0x131   :  { %v2333_v28 = vadd.f32 %v2332_v21, %v1103_v22  ;;  %v2336_v29 = vadd.f32 %v2755_v17, %v570_v27  ;;  %v1106_v30 = vpop.f32.mrb[31].mxu0 }
 0x132   :  { %v2335_v31 = vadd.f32 %v2334_v25, %v2241_v26 }
 0x133   :  { %v2337_v32 = vadd.f32 %v2336_v29, %v1106_v30 }
 0x134   :  { %v1921_v33 = vpack.c.bf16 %v2335_v31, %v2331_v24 }
 0x135   :  { %v1916_v34 = vpack.c.bf16 %v2337_v32, %v2333_v28  ;;  %v2164_v35 = vpop.f32.mrb[32].mxu1 }
 0x136   :  { %2017 = vst [vmem:[%s2922_s5 + $0x78] sm:$0xff] %v1921_v33   ;;  %v2338_v36 = vadd.f32 %v2164_v35, %v2755_v17  ;;  %v2244_v37 = vpop.f32.mrb[32].mxu0  ;;  %v583_v38 = vpop.f32.mrb[33].mxu1 }
 0x137   :  { %2016 = vst [vmem:[%s2922_s5 + $0x70] sm:$0xff] %v1916_v34   ;;  %v2340_v39 = vadd.f32 %v2755_v17, %v583_v38  ;;  %v1119_v40 = vpop.f32.mrb[33].mxu0  ;;  %v2165_v41 = vpop.f32.mrb[34].mxu1 }
 0x138   :  { %v2339_v42 = vadd.f32 %v2338_v36, %v2244_v37  ;;  %v2342_v43 = vadd.f32 %v2165_v41, %v2755_v17  ;;  %v2245_v44 = vpop.f32.mrb[34].mxu0  ;;  %v586_v45 = vpop.f32.mrb[35].mxu1 }
 0x139   :  { %v2341_v46 = vadd.f32 %v2340_v39, %v1119_v40  ;;  %v2344_v47 = vadd.f32 %v2755_v17, %v586_v45  ;;  %v1122_v48 = vpop.f32.mrb[35].mxu0 }
 0x13a   :  { %v2343_v49 = vadd.f32 %v2342_v43, %v2245_v44 }
 0x13b   :  { %v2345_v50 = vadd.f32 %v2344_v47, %v1122_v48 }
 0x13c   :  { %v1931_v51 = vpack.c.bf16 %v2343_v49, %v2339_v42 }
 0x13d   :  { %v1926_v52 = vpack.c.bf16 %v2345_v50, %v2341_v46  ;;  %v2168_v53 = vpop.f32.mrb[36].mxu1 }
 0x13e   :  { %2019 = vst [vmem:[%s2922_s5 + $0x88] sm:$0xff] %v1931_v51   ;;  %v2346_v54 = vadd.f32 %v2168_v53, %v2755_v17  ;;  %v2248_v55 = vpop.f32.mrb[36].mxu0  ;;  %v599_v56 = vpop.f32.mrb[37].mxu1 }
 0x13f   :  { %2018 = vst [vmem:[%s2922_s5 + $0x80] sm:$0xff] %v1926_v52   ;;  %v2348_v57 = vadd.f32 %v2755_v17, %v599_v56  ;;  %v1135_v58 = vpop.f32.mrb[37].mxu0  ;;  %v2169_v59 = vpop.f32.mrb[38].mxu1 }
 0x140   :  { %v2347_v60 = vadd.f32 %v2346_v54, %v2248_v55  ;;  %v2350_v61 = vadd.f32 %v2169_v59, %v2755_v17  ;;  %v2249_v62 = vpop.f32.mrb[38].mxu0  ;;  %v602_v63 = vpop.f32.mrb[39].mxu1 }
 0x141   :  { %v2349_v0 = vadd.f32 %v2348_v57, %v1135_v58  ;;  %v2352_v1 = vadd.f32 %v2755_v17, %v602_v63  ;;  %v1138_v2 = vpop.f32.mrb[39].mxu0 }
 0x142   :  { %v2351_v3 = vadd.f32 %v2350_v61, %v2249_v62 }
 0x143   :  { %v2353_v4 = vadd.f32 %v2352_v1, %v1138_v2 }
 0x144   :  { %v1941_v5 = vpack.c.bf16 %v2351_v3, %v2347_v60 }
 0x145   :  { %v1936_v6 = vpack.c.bf16 %v2353_v4, %v2349_v0  ;;  %v2172_v7 = vpop.f32.mrb[40].mxu1 }
 0x146   :  { %2021 = vst [vmem:[%s2922_s5 + $0x98] sm:$0xff] %v1941_v5   ;;  %v2354_v8 = vadd.f32 %v2172_v7, %v2755_v17  ;;  %v2252_v9 = vpop.f32.mrb[40].mxu0  ;;  %v615_v10 = vpop.f32.mrb[41].mxu1 }
 0x147   :  { %2020 = vst [vmem:[%s2922_s5 + $0x90] sm:$0xff] %v1936_v6   ;;  %v2356_v11 = vadd.f32 %v2755_v17, %v615_v10  ;;  %v1151_v12 = vpop.f32.mrb[41].mxu0  ;;  %v2173_v13 = vpop.f32.mrb[42].mxu1 }
 0x148   :  { %v2355_v14 = vadd.f32 %v2354_v8, %v2252_v9  ;;  %v2358_v15 = vadd.f32 %v2173_v13, %v2755_v17  ;;  %v2253_v16 = vpop.f32.mrb[42].mxu0  ;;  %v618_v18 = vpop.f32.mrb[43].mxu1 }
 0x149   :  { %v2357_v19 = vadd.f32 %v2356_v11, %v1151_v12  ;;  %v2360_v20 = vadd.f32 %v2755_v17, %v618_v18  ;;  %v1154_v21 = vpop.f32.mrb[43].mxu0 }
 0x14a   :  { %v2359_v22 = vadd.f32 %v2358_v15, %v2253_v16 }
 0x14b   :  { %v2361_v23 = vadd.f32 %v2360_v20, %v1154_v21 }
 0x14c   :  { %v1951_v24 = vpack.c.bf16 %v2359_v22, %v2355_v14 }
 0x14d   :  { %v1946_v25 = vpack.c.bf16 %v2361_v23, %v2357_v19  ;;  %v2176_v26 = vpop.f32.mrb[44].mxu1 }
 0x14e   :  { %2023 = vst [vmem:[%s2922_s5 + $0xa8] sm:$0xff] %v1951_v24   ;;  %v2362_v27 = vadd.f32 %v2176_v26, %v2755_v17  ;;  %v2256_v28 = vpop.f32.mrb[44].mxu0  ;;  %v631_v29 = vpop.f32.mrb[45].mxu1 }
 0x14f   :  { %2022 = vst [vmem:[%s2922_s5 + $0xa0] sm:$0xff] %v1946_v25   ;;  %v2364_v30 = vadd.f32 %v2755_v17, %v631_v29  ;;  %v1167_v31 = vpop.f32.mrb[45].mxu0  ;;  %v2177_v32 = vpop.f32.mrb[46].mxu1 }
 0x150   :  { %v2363_v33 = vadd.f32 %v2362_v27, %v2256_v28  ;;  %v2366_v34 = vadd.f32 %v2177_v32, %v2755_v17  ;;  %v2257_v35 = vpop.f32.mrb[46].mxu0  ;;  %v634_v36 = vpop.f32.mrb[47].mxu1 }
 0x151   :  { %v2365_v37 = vadd.f32 %v2364_v30, %v1167_v31  ;;  %v2368_v38 = vadd.f32 %v2755_v17, %v634_v36  ;;  %v1170_v39 = vpop.f32.mrb[47].mxu0 }
 0x152   :  { %v2367_v40 = vadd.f32 %v2366_v34, %v2257_v35 }
 0x153   :  { %v2369_v41 = vadd.f32 %v2368_v38, %v1170_v39 }
 0x154   :  { %v1961_v42 = vpack.c.bf16 %v2367_v40, %v2363_v33 }
 0x155   :  { %v1956_v43 = vpack.c.bf16 %v2369_v41, %v2365_v37  ;;  %v2180_v44 = vpop.f32.mrb[48].mxu1 }
 0x156   :  { %2025 = vst [vmem:[%s2922_s5 + $0xb8] sm:$0xff] %v1961_v42   ;;  %v2370_v45 = vadd.f32 %v2180_v44, %v2755_v17  ;;  %v2260_v46 = vpop.f32.mrb[48].mxu0  ;;  %v647_v47 = vpop.f32.mrb[49].mxu1 }
 0x157   :  { %2024 = vst [vmem:[%s2922_s5 + $0xb0] sm:$0xff] %v1956_v43   ;;  %v2372_v48 = vadd.f32 %v2755_v17, %v647_v47  ;;  %v1183_v49 = vpop.f32.mrb[49].mxu0  ;;  %v2181_v50 = vpop.f32.mrb[50].mxu1 }
 0x158   :  { %v2371_v51 = vadd.f32 %v2370_v45, %v2260_v46  ;;  %v2374_v52 = vadd.f32 %v2181_v50, %v2755_v17  ;;  %v2261_v53 = vpop.f32.mrb[50].mxu0  ;;  %v650_v54 = vpop.f32.mrb[51].mxu1 }
 0x159   :  { %v2373_v55 = vadd.f32 %v2372_v48, %v1183_v49  ;;  %v2376_v56 = vadd.f32 %v2755_v17, %v650_v54  ;;  %v1186_v57 = vpop.f32.mrb[51].mxu0 }
 0x15a   :  { %v2375_v58 = vadd.f32 %v2374_v52, %v2261_v53 }
 0x15b   :  { %v2377_v59 = vadd.f32 %v2376_v56, %v1186_v57 }
 0x15c   :  { %v1971_v60 = vpack.c.bf16 %v2375_v58, %v2371_v51 }
 0x15d   :  { %v1966_v61 = vpack.c.bf16 %v2377_v59, %v2373_v55  ;;  %v2184_v62 = vpop.f32.mrb[52].mxu1 }
 0x15e   :  { %2027 = vst [vmem:[%s2922_s5 + $0xc8] sm:$0xff] %v1971_v60   ;;  %v2378_v63 = vadd.f32 %v2184_v62, %v2755_v17  ;;  %v2264_v0 = vpop.f32.mrb[52].mxu0  ;;  %v663_v1 = vpop.f32.mrb[53].mxu1 }
 0x15f   :  { %2026 = vst [vmem:[%s2922_s5 + $0xc0] sm:$0xff] %v1966_v61   ;;  %v2380_v2 = vadd.f32 %v2755_v17, %v663_v1  ;;  %v1199_v3 = vpop.f32.mrb[53].mxu0  ;;  %v2185_v4 = vpop.f32.mrb[54].mxu1 }
 0x160   :  { %v2379_v5 = vadd.f32 %v2378_v63, %v2264_v0  ;;  %v2382_v6 = vadd.f32 %v2185_v4, %v2755_v17  ;;  %v2265_v7 = vpop.f32.mrb[54].mxu0  ;;  %v666_v8 = vpop.f32.mrb[55].mxu1 }
 0x161   :  { %v2381_v9 = vadd.f32 %v2380_v2, %v1199_v3  ;;  %v2384_v10 = vadd.f32 %v2755_v17, %v666_v8  ;;  %v1202_v11 = vpop.f32.mrb[55].mxu0 }
 0x162   :  { %v2383_v12 = vadd.f32 %v2382_v6, %v2265_v7 }
 0x163   :  { %v2385_v13 = vadd.f32 %v2384_v10, %v1202_v11 }
 0x164   :  { %v1981_v14 = vpack.c.bf16 %v2383_v12, %v2379_v5 }
 0x165   :  { %v1976_v15 = vpack.c.bf16 %v2385_v13, %v2381_v9  ;;  %v2188_v16 = vpop.f32.mrb[56].mxu1 }
 0x166   :  { %2029 = vst [vmem:[%s2922_s5 + $0xd8] sm:$0xff] %v1981_v14   ;;  %v2386_v18 = vadd.f32 %v2188_v16, %v2755_v17  ;;  %v2268_v19 = vpop.f32.mrb[56].mxu0  ;;  %v679_v20 = vpop.f32.mrb[57].mxu1 }
 0x167   :  { %2028 = vst [vmem:[%s2922_s5 + $0xd0] sm:$0xff] %v1976_v15   ;;  %v2388_v21 = vadd.f32 %v2755_v17, %v679_v20  ;;  %v1215_v22 = vpop.f32.mrb[57].mxu0  ;;  %v2189_v23 = vpop.f32.mrb[58].mxu1 }
 0x168   :  { %v2387_v24 = vadd.f32 %v2386_v18, %v2268_v19  ;;  %v2390_v25 = vadd.f32 %v2189_v23, %v2755_v17  ;;  %v2269_v26 = vpop.f32.mrb[58].mxu0  ;;  %v682_v27 = vpop.f32.mrb[59].mxu1 }
 0x169   :  { %v2389_v28 = vadd.f32 %v2388_v21, %v1215_v22  ;;  %v2392_v29 = vadd.f32 %v2755_v17, %v682_v27  ;;  %v1218_v30 = vpop.f32.mrb[59].mxu0 }
 0x16a   :  { %v2391_v31 = vadd.f32 %v2390_v25, %v2269_v26 }
 0x16b   :  { %v2393_v32 = vadd.f32 %v2392_v29, %v1218_v30 }
 0x16c   :  { %v1991_v33 = vpack.c.bf16 %v2391_v31, %v2387_v24 }
 0x16d   :  { %v1986_v34 = vpack.c.bf16 %v2393_v32, %v2389_v28  ;;  %v2192_v35 = vpop.f32.mrb[60].mxu1 }
 0x16e   :  { %2031 = vst [vmem:[%s2922_s5 + $0xe8] sm:$0xff] %v1991_v33   ;;  %v2394_v36 = vadd.f32 %v2192_v35, %v2755_v17  ;;  %v2272_v37 = vpop.f32.mrb[60].mxu0  ;;  %v695_v38 = vpop.f32.mrb[61].mxu1 }
 0x16f   :  { %2030 = vst [vmem:[%s2922_s5 + $0xe0] sm:$0xff] %v1986_v34   ;;  %v2396_v39 = vadd.f32 %v2755_v17, %v695_v38  ;;  %v1231_v40 = vpop.f32.mrb[61].mxu0  ;;  %v2193_v41 = vpop.f32.mrb[62].mxu1 }
 0x170   :  { %v2395_v42 = vadd.f32 %v2394_v36, %v2272_v37  ;;  %v2398_v43 = vadd.f32 %v2193_v41, %v2755_v17  ;;  %v2273_v44 = vpop.f32.mrb[62].mxu0  ;;  %v698_v45 = vpop.f32.mrb[63].mxu1 }
 0x171   :  { %v2397_v46 = vadd.f32 %v2396_v39, %v1231_v40  ;;  %v2400_v47 = vadd.f32 %v2755_v17, %v698_v45  ;;  %v1234_v48 = vpop.f32.mrb[63].mxu0 }
 0x172   :  { %v2399_v49 = vadd.f32 %v2398_v43, %v2273_v44 }
 0x173   :  { %v2401_v50 = vadd.f32 %v2400_v47, %v1234_v48 }
 0x174   :  { %v2001_v51 = vpack.c.bf16 %v2399_v49, %v2395_v42 }
 0x175   :  { %v1996_v52 = vpack.c.bf16 %v2401_v50, %v2397_v46 }
 0x176   :  { %2033 = vst [vmem:[%s2922_s5 + $0xf8] sm:$0xff] %v2001_v51  }
 0x177   :  { %2032 = vst [vmem:[%s2922_s5 + $0xf0] sm:$0xff] %v1996_v52  }

// kernel: feature_pyramid.14
= control target key start
LH: loop header
LB: loop body
LE: loop exit
PB: predicated region body
PF: predicated region fallthrough
CT: control target
= control target key end

     0   :  { %s1998_s12 = smov 0   ;;  %s2330_s0 = inlined_call_operand.vmem [shape: bf16[2,56,128], index: 0, kind: input, shape index: {}]   ;;  %s2331_s1 = inlined_call_operand.vmem [shape: bf16[9,128,128], index: 1, kind: input, shape index: {}]   ;;  %s2332_s2 = inlined_call_operand.vmem [shape: f32[1,128], index: 2, kind: input, shape index: {}]   ;;  %s2333_s3 = inlined_call_operand.vmem [shape: bf16[2,16,128], index: 3, kind: output, shape index: {}]  }
   0x1 LB: > { %s1382_s13 = sadd.s32 4294967295, %s1976_s12   ;;  %p1386_p0 = scmp.ge.s32.totalorder %s1976_s12, 1  ;;  %s1976_s12 = sphi %s1998_s12, %s13_s12  }
   0x2   : > { %p137_p1 = scmp.lt.s32.totalorder %s1976_s12, 3 }
   0x4   : > { %p138_p2 = pnand %p1386_p0, %p137_p1 }
   0x5   : > { %v1890_v0 = vld [vmem:[%s2331_s1 + $0x40] sm:$0xff] (!%p138_p2)   ;;  %p161_p3 = scmp.lt.s32.totalorder (!%p138_p2), %s1382_s13, 1  ;;  %v1892_v2 = vld [vmem:[%s2331_s1 + $0x48] sm:$0xff] (!%p138_p2)   ;;  %v1894_v4 = vld [vmem:[%s2331_s1 + $0x50] sm:$0xff] (!%p138_p2)   ;;  %vm225_vm0 = vsmask.f32 (!%p138_p2), 7424 }
   0x6   : > { %141 = sbr.rel (%p138_p2) target bundleno = 386 (0x182), region = 32  ;;  %v1891_v1 = vld [vmem:[%s2331_s1] sm:$0xff] (!%p138_p2)   ;;  %1701 = vmatprep.subr.bf16.mxu0 (!%p138_p2), %v1890_v0  ;;  %v1893_v3 = vld [vmem:[%s2331_s1 + $0x8] sm:$0xff] (!%p138_p2)   ;;  %v1895_v5 = vld [vmem:[%s2331_s1 + $0x10] sm:$0xff] (!%p138_p2)   ;;  %vm457_vm1 = vcmask (!%p138_p2), 1046528  }
   0x7   : > { %1721 = vmatprep.subr.bf16.mxu1 (!%p138_p2), %v1891_v1  ;;  %1702 = vmatpush3.bf16.msra.mxu0 (!%p138_p2), %v1890_v0  ;;  %v1896_v6 = vld [vmem:[%s2331_s1 + $0x58] sm:$0xff] (!%p138_p2)   ;;  %v1898_v8 = vld [vmem:[%s2331_s1 + $0x60] sm:$0xff] (!%p138_p2)   ;;  %v1900_v10 = vld [vmem:[%s2331_s1 + $0x68] sm:$0xff] (!%p138_p2)  }
   0x8   : > { %1722 = vmatpush3.bf16.msra.mxu1 (!%p138_p2), %v1891_v1  ;;  %1703 = vmatprep.subr.bf16.mxu0 (!%p138_p2), %v1892_v2  ;;  %v1897_v7 = vld [vmem:[%s2331_s1 + $0x18] sm:$0xff] (!%p138_p2)   ;;  %v1899_v9 = vld [vmem:[%s2331_s1 + $0x20] sm:$0xff] (!%p138_p2)   ;;  %v1901_v14 = vld [vmem:[%s2331_s1 + $0x28] sm:$0xff] (!%p138_p2)  }
   0x9   : > { %1723 = vmatprep.subr.bf16.mxu1 (!%p138_p2), %v1893_v3  ;;  %v1902_v22 = vld [vmem:[%s2331_s1 + $0x70] sm:$0xff] (!%p138_p2)   ;;  %v1904_v30 = vld [vmem:[%s2331_s1 + $0x78] sm:$0xff] (!%p138_p2)   ;;  %v1909_v35 = vld [vmem:[%s2331_s1 + $0x80] sm:$0xff] (!%p138_p2)  }
   0xa   : > { %v1903_v24 = vld [vmem:[%s2331_s1 + $0x30] sm:$0xff] (!%p138_p2)   ;;  %v1905_v31 = vld [vmem:[%s2331_s1 + $0x38] sm:$0xff] (!%p138_p2)   ;;  %v1910_v36 = vld [vmem:[%s2331_s1 + $0xc0] sm:$0xff] (!%p138_p2)  }
   0xb   : > { %1704 = vmatpush3.bf16.msra.mxu0 (!%p138_p2), %v1892_v2  ;;  %v1911_v40 = vld [vmem:[%s2331_s1 + $0x88] sm:$0xff] (!%p138_p2)   ;;  %v1913_v44 = vld [vmem:[%s2331_s1 + $0x90] sm:$0xff] (!%p138_p2)   ;;  %v1915_v46 = vld [vmem:[%s2331_s1 + $0x98] sm:$0xff] (!%p138_p2)  }
   0xc   : > { %1724 = vmatpush3.bf16.msra.mxu1 (!%p138_p2), %v1893_v3  ;;  %1705 = vmatprep.subr.bf16.mxu0 (!%p138_p2), %v1894_v4  ;;  %v1912_v41 = vld [vmem:[%s2331_s1 + $0xc8] sm:$0xff] (!%p138_p2)   ;;  %v1914_v45 = vld [vmem:[%s2331_s1 + $0xd0] sm:$0xff] (!%p138_p2)   ;;  %v1916_v47 = vld [vmem:[%s2331_s1 + $0xd8] sm:$0xff] (!%p138_p2)  }
   0xd   : > { %s2335_s13 = smov (!%p161_p3, %s1382_s13), 1  ;;  %1725 = vmatprep.subr.bf16.mxu1 %v1895_v5  ;;  %v1917_v49 = vld [vmem:[%s2331_s1 + $0xa0] sm:$0xff]   ;;  %v1919_v52 = vld [vmem:[%s2331_s1 + $0xa8] sm:$0xff]   ;;  %v1921_v59 = vld [vmem:[%s2331_s1 + $0xb0] sm:$0xff]  }
   0xe   : > { %s1881_s30 = smul.u32 28, %s2335_s13  ;;  %v1918_v50 = vld [vmem:[%s2331_s1 + $0xe0] sm:$0xff]   ;;  %v1920_v53 = vld [vmem:[%s2331_s1 + $0xe8] sm:$0xff]   ;;  %v1922_v60 = vld [vmem:[%s2331_s1 + $0xf0] sm:$0xff]   ;;  %s1603_s16 = sshll.u32 %s2335_s13, 3 }
   0xf   : > { %1706 = vmatpush3.bf16.msra.mxu0 %v1894_v4  ;;  %v1923_v2 = vld [vmem:[%s2331_s1 + $0xb8] sm:$0xff]   ;;  %s170_s19 = scalar_lea.vmem %s2333_s3, %s1603_s16 }
  0x10   : > { %1726 = vmatpush3.bf16.msra.mxu1 %v1895_v5  ;;  %1707 = vmatprep.subr.bf16.mxu0 %v1896_v6  ;;  %s2042_s10 = scalar_lea.vmem %s2330_s0, %s1881_s30  ;;  %v1924_v4 = vld [vmem:[%s2331_s1 + $0xf8] sm:$0xff]  }
  0x11   : > { %1727 = vmatprep.subr.bf16.mxu1 %v1897_v7  ;;  %v172_v11 = vld [vmem:[%s2042_s10] sm:$0xf]  ;;  %v173_v12 = vld [vmem:[%s2042_s10 + $0x4] sm:$0xf]  ;;  %v174_v13 = vld [vmem:[%s2042_s10 + $0x8] sm:$0xf] }
  0x12   : > { %v2054_v15 = vld [vmem:[%s2042_s10 + $0xc] sm:$0xf]  ;;  %v1406_v16 = vcombine.low %v172_v11, %v173_v12  ;;  %v2057_v17 = vld [vmem:[%s2042_s10 + $0x10] sm:$0xf]  ;;  %v2103_v43 = vcombine.low %v173_v12, %v174_v13  ;;  %v177_v56 = vld [vmem:[%s2042_s10 + $0x14] sm:$0xf] }
  0x13   : > { %1708 = vmatpush3.bf16.msra.mxu0 %v1896_v6  ;;  %v2060_v18 = vcombine.low %v174_v13, %v2054_v15  ;;  %v2064_v19 = vcombine.low %v2057_v17, %v2057_v17  ;;  %v2121_v48 = vcombine.low %v2054_v15, %v2057_v17  ;;  %v2138_v57 = vcombine.low %v177_v56, %v177_v56  ;;  %v1925_v11 = vld [vmem:[%s2331_s1 + $0x100] sm:$0xff]  }
  0x14   : > { %1728 = vmatpush3.bf16.msra.mxu1 %v1897_v7  ;;  %1709 = vmatprep.subr.bf16.mxu0 %v1898_v8  ;;  %v227_v20 = vshrl.u32 %v1406_v16, 16  ;;  %v229_v21 = vshll.u32 %v1406_v16, 16  ;;  %v458_v37 = vrot.slane %v1406_v16, 1  ;;  %v2141_v58 = vcombine.low %v2057_v17, %v177_v56  ;;  %v1928_v13 = vld [vmem:[%s2331_s1 + $0x140] sm:$0xff]   ;;  %v1956_v56 = vld [vmem:[%s2331_s1 + $0x1b0] sm:$0xff]  }
  0x15   : > { %1729 = vmatprep.subr.bf16.mxu1 %v1899_v9  ;;  %1737 = vmatprep.mubr.bf16.mxu1 %v1406_v16  ;;  %v234_v23 = vshll.u32 %v2060_v18, 16  ;;  %v238_v27 = vshrl.u32 %v2060_v18, 16  ;;  %v242_v28 = vshll.u32 %v2064_v19, 16  ;;  %v2091_v38 = vrot.slane %v2060_v18, 1 }
  0x16   : > { %v231_v25 = vrot.slane %v229_v21, 1  ;;  %v708_v51 = vshll.u32 %v2121_v48, 16  ;;  %v712_v55 = vshrl.u32 %v2121_v48, 16  ;;  %v716_v62 = vshll.u32 %v2138_v57, 16 }
  0x17   : > { %1710 = vmatpush3.bf16.msra.mxu0 %v1898_v8  ;;  %v236_v26 = vrot.slane %v234_v23, 1  ;;  %v244_v34 = vrot.slane %v242_v28, 1  ;;  %v460_v42 = vsel %vm457_vm1, %v458_v37, %v2091_v38  ;;  %v703_v63 = vshll.u32 %v2103_v43, 16  ;;  %v1937_v37 = vld [vmem:[%s2331_s1 + $0x128] sm:$0xff]  }
  0x18   : > { %1730 = vmatpush3.bf16.msra.mxu1 %v1899_v9  ;;  %1711 = vmatprep.subr.bf16.mxu0 %v1900_v10  ;;  %v232_v29 = vor.u32 %v231_v25, %v227_v20  ;;  %v710_v54 = vrot.slane %v708_v51, 1  ;;  %v1077_v0 = vshll.u32 %v2141_v58, 16  ;;  %v718_v1 = vrot.slane %v716_v62, 1  ;;  %v1930_v20 = vld [vmem:[%s2331_s1 + $0x148] sm:$0xff]   ;;  %v1962_v25 = vld [vmem:[%s2042_s10 + $0x18] ss:$0 sps:$4 sm:$0xff]  }
  0x19   : > { %1731 = vmatprep.subr.bf16.mxu1 %v1901_v14  ;;  %v2082_v33 = vor.u32 %v238_v27, %v236_v26  ;;  %v701_v5 = vshrl.u32 %v2103_v43, 16  ;;  %v705_v7 = vrot.slane %v703_v63, 1  ;;  %v1205_v9 = vrot.slane %v2141_v58, 1  ;;  %v1950_v51 = vld [vmem:[%s2331_s1 + $0x198] sm:$0xff]   ;;  %v1963_v62 = vld [vmem:[%s2331_s1 + $0x208] sm:$0xff]   ;;  %v1964_v63 = vld [vmem:[%s2331_s1 + $0x210] sm:$0xff]  }
  0x1a   : > { %v237_v32 = vsel %vm225_vm0, %v232_v29, %v236_v26  ;;  %v714_v61 = vor.u32 %v712_v55, %v710_v54  ;;  %v1079_v3 = vrot.slane %v1077_v0, 1  ;;  %v836_v16 = vrot.slane %v2103_v43, 1  ;;  %v1932_v26 = vld [vmem:[%s2331_s1 + $0x150] sm:$0xff]   ;;  %v1955_v55 = vld [vmem:[%s2331_s1 + $0x1e8] sm:$0xff]   ;;  %v1965_v0 = vld [vmem:[%s2331_s1 + $0x218] sm:$0xff]  }
  0x1b   : > { %1712 = vmatpush3.bf16.msra.mxu0 %v1900_v10  ;;  %1717 = vmatprep.mubr.bf16.mxu0 %v237_v32  ;;  %v245_v39 = vsel %vm225_vm0, %v2082_v33, %v244_v34  ;;  %v461_v10 = vrot.slane %v2064_v19, 1  ;;  %v2173_v12 = vsel %vm457_vm1, %v2091_v38, %v1205_v9  ;;  %v837_v17 = vrot.slane %v2121_v48, 1  ;;  %v1929_v19 = vld [vmem:[%s2331_s1 + $0x108] sm:$0xff]   ;;  %v1934_v32 = vld [vmem:[%s2331_s1 + $0x158] sm:$0xff]  }
  0x1c   : > { %1732 = vmatpush3.bf16.msra.mxu1 %v1901_v14  ;;  %1713 = vmatprep.subr.bf16.mxu0 %v1902_v22  ;;  %v2160_v6 = vsel %vm225_vm0, %v714_v61, %v718_v1  ;;  %v2164_v8 = vsel %vm225_vm0, %v2082_v33, %v1079_v3  ;;  %v706_v14 = vor.u32 %v705_v7, %v701_v5  ;;  %v1085_v28 = vshll.u32 %v1962_v25, 16  ;;  %v1961_v61 = vld [vmem:[%s2331_s1 + $0x200] sm:$0xff]   ;;  %v1967_v1 = vld [vmem:[%s2331_s1 + $0x228] sm:$0xff]  }
  0x1d   : > { %1733 = vmatprep.subr.bf16.mxu1 %v1903_v24  ;;  %v462_v15 = vsel %vm457_vm1, %v2091_v38, %v461_v10  ;;  %v838_v23 = vsel %vm457_vm1, %v836_v16, %v837_v17  ;;  %v1207_v29 = vrot.slane %v1962_v25, 1  ;;  %v1938_v38 = vld [vmem:[%s2331_s1 + $0x168] sm:$0xff]  }
  0x1e   : > { %v711_v21 = vsel %vm225_vm0, %v706_v14, %v710_v54  ;;  %v1954_v54 = vld [vmem:[%s2331_s1 + $0x1a8] sm:$0xff]  }
  0x1f   : > { %1714 = vmatpush3.bf16.msra.mxu0 %v1902_v22  ;;  %v1081_v22 = vshrl.u32 %v2141_v58, 16  ;;  %v2208_v33 = vsel %vm457_vm1, %v1205_v9, %v1207_v29 }
  0x20   : > { %1734 = vmatpush3.bf16.msra.mxu1 %v1903_v24  ;;  %1715 = vmatprep.subr.bf16.mxu0 %v1904_v30  ;;  %v1931_v24 = vld [vmem:[%s2331_s1 + $0x110] sm:$0xff]  }
  0x21   : > { %1735 = vmatprep.subr.bf16.mxu1 %v1905_v31  ;;  %v1083_v27 = vor.u32 %v1081_v22, %v1079_v3  ;;  %v1969_v3 = vld [vmem:[%s2331_s1 + $0x238] sm:$0xff]  }
  0x23   : > { %1716 = vmatpush3.bf16.msra.mxu0 %v1904_v30  ;;  %v1933_v30 = vld [vmem:[%s2331_s1 + $0x118] sm:$0xff]  }
  0x24   : > { %1736 = vmatpush3.bf16.msra.mxu1 %v1905_v31  ;;  %1741 = vmatprep.subr.bf16.mxu0 %v1909_v35  ;;  %v1087_v31 = vrot.slane %v1085_v28, 1 }
  0x25   : > { %1761 = vmatprep.subr.bf16.mxu1 %v1910_v36 }
  0x26   : > { %1718 = vmatmul.mubr.bf16.vlgmr.msra.gmra.mrb[0].mxu0 %v245_v39  ;;  %v2211_v34 = vsel %vm225_vm0, %v1083_v27, %v1087_v31  ;;  %v1939_v39 = vld [vmem:[%s2331_s1 + $0x130] sm:$0xff]  }
  0x27   : > { %1738 = vmatmul.mubr.bf16.vlgmr.msra.gmra.mrb[0].mxu1 %v2060_v18  ;;  %1742 = vmatpush3.bf16.msra.mxu0 %v1909_v35  ;;  %v1935_v35 = vld [vmem:[%s2331_s1 + $0x120] sm:$0xff]  }
  0x28   : > { %1762 = vmatpush3.bf16.msra.mxu1 %v1910_v36  ;;  %1743 = vmatprep.subr.bf16.mxu0 %v1911_v40  ;;  %v1936_v36 = vld [vmem:[%s2331_s1 + $0x160] sm:$0xff]  }
  0x29   : > { %1763 = vmatprep.subr.bf16.mxu1 %v1912_v41  ;;  %1757 = vmatprep.mubr.bf16.mxu0 %v460_v42  ;;  %v1942_v42 = vld [vmem:[%s2331_s1 + $0x178] sm:$0xff]  }
  0x2a   : > { %1777 = vmatprep.mubr.bf16.mxu1 %v2103_v43  ;;  %v1944_v43 = vld [vmem:[%s2331_s1 + $0x180] sm:$0xff]  }
  0x2b   : > { %1744 = vmatpush3.bf16.msra.mxu0 %v1911_v40  ;;  %v1940_v40 = vld [vmem:[%s2331_s1 + $0x170] sm:$0xff]  }
  0x2c   : > { %1764 = vmatpush3.bf16.msra.mxu1 %v1912_v41  ;;  %1745 = vmatprep.subr.bf16.mxu0 %v1913_v44  ;;  %v1941_v41 = vld [vmem:[%s2331_s1 + $0x138] sm:$0xff]  }
  0x2d   : > { %1765 = vmatprep.subr.bf16.mxu1 %v1914_v45 }
  0x2f   : > { %1746 = vmatpush3.bf16.msra.mxu0 %v1913_v44  ;;  %v839_v44 = vrot.slane %v2138_v57, 1  ;;  %v1957_v57 = vld [vmem:[%s2331_s1 + $0x1f0] sm:$0xff]  }
  0x30   : > { %1766 = vmatpush3.bf16.msra.mxu1 %v1914_v45  ;;  %1747 = vmatprep.subr.bf16.mxu0 %v1915_v46  ;;  %v1945_v45 = vld [vmem:[%s2331_s1 + $0x1c0] sm:$0xff]  }
  0x31   : > { %1767 = vmatprep.subr.bf16.mxu1 %v1916_v47 }
  0x33   : > { %1748 = vmatpush3.bf16.msra.mxu0 %v1915_v46  ;;  %v840_v46 = vsel %vm457_vm1, %v837_v17, %v839_v44 }
  0x34   : > { %1768 = vmatpush3.bf16.msra.mxu1 %v1916_v47  ;;  %1749 = vmatprep.subr.bf16.mxu0 %v1917_v49  ;;  %v1946_v47 = vld [vmem:[%s2331_s1 + $0x188] sm:$0xff]  }
  0x35   : > { %1769 = vmatprep.subr.bf16.mxu1 %v1918_v50 }
  0x37   : > { %1750 = vmatpush3.bf16.msra.mxu0 %v1917_v49  ;;  %v1947_v49 = vld [vmem:[%s2331_s1 + $0x1c8] sm:$0xff]  }
  0x38   : > { %1770 = vmatpush3.bf16.msra.mxu1 %v1918_v50  ;;  %1751 = vmatprep.subr.bf16.mxu0 %v1919_v52  ;;  %v1949_v50 = vld [vmem:[%s2331_s1 + $0x1d0] sm:$0xff]  }
  0x39   : > { %1771 = vmatprep.subr.bf16.mxu1 %v1920_v53 }
  0x3b   : > { %1752 = vmatpush3.bf16.msra.mxu0 %v1919_v52  ;;  %v1951_v52 = vld [vmem:[%s2331_s1 + $0x1d8] sm:$0xff]  }
  0x3c   : > { %1772 = vmatpush3.bf16.msra.mxu1 %v1920_v53  ;;  %1753 = vmatprep.subr.bf16.mxu0 %v1921_v59  ;;  %v1953_v53 = vld [vmem:[%s2331_s1 + $0x1e0] sm:$0xff]  }
  0x3d   : > { %1773 = vmatprep.subr.bf16.mxu1 %v1922_v60 }
  0x3f   : > { %1754 = vmatpush3.bf16.msra.mxu0 %v1921_v59  ;;  %v1958_v59 = vld [vmem:[%s2331_s1 + $0x1b8] sm:$0xff]  }
  0x40   : > { %1774 = vmatpush3.bf16.msra.mxu1 %v1922_v60  ;;  %1755 = vmatprep.subr.bf16.mxu0 %v1923_v2  ;;  %v1959_v60 = vld [vmem:[%s2331_s1 + $0x1f8] sm:$0xff]  }
  0x41   : > { %1775 = vmatprep.subr.bf16.mxu1 %v1924_v4 }
  0x43   : > { %1756 = vmatpush3.bf16.msra.mxu0 %v1923_v2  ;;  %v1968_v2 = vld [vmem:[%s2331_s1 + $0x230] sm:$0xff]  }
  0x44   : > { %1776 = vmatpush3.bf16.msra.mxu1 %v1924_v4  ;;  %1781 = vmatprep.subr.bf16.mxu0 %v1925_v11 }
  0x45   : > { %1801 = vmatprep.subr.bf16.mxu1 %v1928_v13 }
  0x46   : > { %1758 = vmatmul.mubr.bf16.vlgmr.msra.gmra.mrb[4].mxu0 %v462_v15 }
  0x47   : > { %1782 = vmatpush3.bf16.msra.mxu0 %v1925_v11  ;;  %1778 = vmatmul.mubr.bf16.vlgmr.msra.gmra.mrb[4].mxu1 %v2121_v48  ;;  %v1948_v48 = vld [vmem:[%s2331_s1 + $0x190] sm:$0xff]  }
  0x48   : > { %1802 = vmatpush3.bf16.msra.mxu1 %v1928_v13  ;;  %1783 = vmatprep.subr.bf16.mxu0 %v1929_v19 }
  0x49   : > { %1803 = vmatprep.subr.bf16.mxu1 %v1930_v20  ;;  %1797 = vmatprep.mubr.bf16.mxu0 %v711_v21 }
  0x4a   : > { %1817 = vmatprep.mubr.bf16.mxu1 %v838_v23 }
  0x4b   : > { %1784 = vmatpush3.bf16.msra.mxu0 %v1929_v19 }
  0x4c   : > { %1804 = vmatpush3.bf16.msra.mxu1 %v1930_v20  ;;  %1785 = vmatprep.subr.bf16.mxu0 %v1931_v24 }
  0x4d   : > { %1805 = vmatprep.subr.bf16.mxu1 %v1932_v26 }
  0x4f   : > { %1786 = vmatpush3.bf16.msra.mxu0 %v1931_v24 }
  0x50   : > { %1806 = vmatpush3.bf16.msra.mxu1 %v1932_v26  ;;  %1787 = vmatprep.subr.bf16.mxu0 %v1933_v30 }
  0x51   : > { %1807 = vmatprep.subr.bf16.mxu1 %v1934_v32 }
  0x53   : > { %1788 = vmatpush3.bf16.msra.mxu0 %v1933_v30 }
  0x54   : > { %1808 = vmatpush3.bf16.msra.mxu1 %v1934_v32  ;;  %1789 = vmatprep.subr.bf16.mxu0 %v1935_v35 }
  0x55   : > { %1809 = vmatprep.subr.bf16.mxu1 %v1936_v36 }
  0x57   : > { %1790 = vmatpush3.bf16.msra.mxu0 %v1935_v35 }
  0x58   : > { %1810 = vmatpush3.bf16.msra.mxu1 %v1936_v36  ;;  %1791 = vmatprep.subr.bf16.mxu0 %v1937_v37 }
  0x59   : > { %1811 = vmatprep.subr.bf16.mxu1 %v1938_v38 }
  0x5b   : > { %1792 = vmatpush3.bf16.msra.mxu0 %v1937_v37 }
  0x5c   : > { %1812 = vmatpush3.bf16.msra.mxu1 %v1938_v38  ;;  %1793 = vmatprep.subr.bf16.mxu0 %v1939_v39 }
  0x5d   : > { %1813 = vmatprep.subr.bf16.mxu1 %v1940_v40 }
  0x5f   : > { %1794 = vmatpush3.bf16.msra.mxu0 %v1939_v39 }
  0x60   : > { %1814 = vmatpush3.bf16.msra.mxu1 %v1940_v40  ;;  %1795 = vmatprep.subr.bf16.mxu0 %v1941_v41 }
  0x61   : > { %1815 = vmatprep.subr.bf16.mxu1 %v1942_v42 }
  0x63   : > { %1796 = vmatpush3.bf16.msra.mxu0 %v1941_v41 }
  0x64   : > { %1816 = vmatpush3.bf16.msra.mxu1 %v1942_v42  ;;  %1821 = vmatprep.subr.bf16.mxu0 %v1944_v43 }
  0x65   : > { %1841 = vmatprep.subr.bf16.mxu1 %v1945_v45 }
  0x66   : > { %1798 = vmatmul.mubr.bf16.vlgmr.msra.gmra.mrb[8].mxu0 %v2160_v6 }
  0x67   : > { %1822 = vmatpush3.bf16.msra.mxu0 %v1944_v43  ;;  %1818 = vmatmul.mubr.bf16.vlgmr.msra.gmra.mrb[8].mxu1 %v840_v46 }
  0x68   : > { %1842 = vmatpush3.bf16.msra.mxu1 %v1945_v45  ;;  %1823 = vmatprep.subr.bf16.mxu0 %v1946_v47 }
  0x69   : > { %1843 = vmatprep.subr.bf16.mxu1 %v1947_v49  ;;  %1837 = vmatprep.mubr.bf16.mxu0 %v2060_v18  ;;  %v1952_v18 = vld [vmem:[%s2331_s1 + $0x1a0] sm:$0xff]  }
  0x6a   : > { %1857 = vmatprep.mubr.bf16.mxu1 %v2164_v8 }
  0x6b   : > { %1824 = vmatpush3.bf16.msra.mxu0 %v1946_v47 }
  0x6c   : > { %1844 = vmatpush3.bf16.msra.mxu1 %v1947_v49  ;;  %1825 = vmatprep.subr.bf16.mxu0 %v1948_v48 }
  0x6d   : > { %1845 = vmatprep.subr.bf16.mxu1 %v1949_v50 }
  0x6f   : > { %1826 = vmatpush3.bf16.msra.mxu0 %v1948_v48 }
  0x70   : > { %1846 = vmatpush3.bf16.msra.mxu1 %v1949_v50  ;;  %1827 = vmatprep.subr.bf16.mxu0 %v1950_v51 }
  0x71   : > { %1847 = vmatprep.subr.bf16.mxu1 %v1951_v52 }
  0x73   : > { %1828 = vmatpush3.bf16.msra.mxu0 %v1950_v51 }
  0x74   : > { %1848 = vmatpush3.bf16.msra.mxu1 %v1951_v52  ;;  %1829 = vmatprep.subr.bf16.mxu0 %v1952_v18  ;;  %v1598_v52 = vld [vmem:[%s2332_s2] ss:$0 sm:$0xff] }
  0x75   : > { %1849 = vmatprep.subr.bf16.mxu1 %v1953_v53 }
  0x77   : > { %1830 = vmatpush3.bf16.msra.mxu0 %v1952_v18 }
  0x78   : > { %1850 = vmatpush3.bf16.msra.mxu1 %v1953_v53  ;;  %1831 = vmatprep.subr.bf16.mxu0 %v1954_v54 }
  0x79   : > { %1851 = vmatprep.subr.bf16.mxu1 %v1955_v55 }
  0x7b   : > { %1832 = vmatpush3.bf16.msra.mxu0 %v1954_v54 }
  0x7c   : > { %1852 = vmatpush3.bf16.msra.mxu1 %v1955_v55  ;;  %1833 = vmatprep.subr.bf16.mxu0 %v1956_v56 }
  0x7d   : > { %1853 = vmatprep.subr.bf16.mxu1 %v1957_v57 }
  0x7f   : > { %1834 = vmatpush3.bf16.msra.mxu0 %v1956_v56 }
  0x80   : > { %1854 = vmatpush3.bf16.msra.mxu1 %v1957_v57  ;;  %1835 = vmatprep.subr.bf16.mxu0 %v1958_v59 }
  0x81   : > { %1855 = vmatprep.subr.bf16.mxu1 %v1959_v60 }
  0x83   : > { %1836 = vmatpush3.bf16.msra.mxu0 %v1958_v59 }
  0x84   : > { %1856 = vmatpush3.bf16.msra.mxu1 %v1959_v60  ;;  %1861 = vmatprep.subr.bf16.mxu0 %v1961_v61 }
  0x86   : > { %1838 = vmatmul.mubr.bf16.vlgmr.msra.gmra.mrb[12].mxu0 %v2141_v58  ;;  %v1966_v58 = vld [vmem:[%s2331_s1 + $0x220] sm:$0xff]  }
  0x87   : > { %1862 = vmatpush3.bf16.msra.mxu0 %v1961_v61  ;;  %1858 = vmatmul.mubr.bf16.vlgmr.msra.gmra.mrb[12].mxu1 %v2211_v34 }
  0x88   : > { %1863 = vmatprep.subr.bf16.mxu0 %v1963_v62  ;;  %1877 = vmatprep.mubr.bf16.mxu0 %v2173_v12 }
  0x8b   : > { %1864 = vmatpush3.bf16.msra.mxu0 %v1963_v62 }
  0x8c   : > { %1865 = vmatprep.subr.bf16.mxu0 %v1964_v63 }
  0x8f   : > { %1866 = vmatpush3.bf16.msra.mxu0 %v1964_v63 }
  0x90   : > { %1867 = vmatprep.subr.bf16.mxu0 %v1965_v0 }
  0x93   : > { %1868 = vmatpush3.bf16.msra.mxu0 %v1965_v0 }
  0x94   : > { %1869 = vmatprep.subr.bf16.mxu0 %v1966_v58 }
  0x97   : > { %1870 = vmatpush3.bf16.msra.mxu0 %v1966_v58 }
  0x98   : > { %1871 = vmatprep.subr.bf16.mxu0 %v1967_v1 }
  0x9b   : > { %1872 = vmatpush3.bf16.msra.mxu0 %v1967_v1 }
  0x9c   : > { %1873 = vmatprep.subr.bf16.mxu0 %v1968_v2 }
  0x9f   : > { %1874 = vmatpush3.bf16.msra.mxu0 %v1968_v2 }
  0xa0   : > { %1875 = vmatprep.subr.bf16.mxu0 %v1969_v3 }
  0xa3   : > { %1876 = vmatpush3.bf16.msra.mxu0 %v1969_v3 }
  0xa6   : > { %1878 = vmatmul.mubr.bf16.vlgmr.msra.gmra.mrb[16].mxu0 %v2208_v33 }
  0xf9   : > { %v1719_v4 = vpop.f32.mrb[0].mxu0 }
  0xfa   : > { %v1739_v5 = vpop.f32.mrb[0].mxu1  ;;  %v330_v6 = vpop.f32.mrb[1].mxu0 }
  0xfb   : > { %v435_v7 = vadd.f32 %v1739_v5, %v1719_v4  ;;  %v427_v8 = vpop.f32.mrb[1].mxu1  ;;  %v1720_v9 = vpop.f32.mrb[2].mxu0 }
  0xfc   : > { %v428_v10 = vadd.f32 %v427_v8, %v330_v6  ;;  %v333_v11 = vpop.f32.mrb[3].mxu0  ;;  %v1740_v12 = vpop.f32.mrb[2].mxu1 }
  0xfd   : > { %v430_v13 = vpop.f32.mrb[3].mxu1 }
 0x119   : > { %v1759_v14 = vpop.f32.mrb[4].mxu0 }
 0x11a   : > { %v561_v15 = vadd.f32 %v1759_v14, %v435_v7  ;;  %v547_v16 = vpop.f32.mrb[5].mxu0  ;;  %v1779_v17 = vpop.f32.mrb[4].mxu1 }
 0x11b   : > { %v560_v19 = vadd.f32 %v547_v16, %v428_v10  ;;  %v1760_v20 = vpop.f32.mrb[6].mxu0  ;;  %v665_v21 = vpop.f32.mrb[5].mxu1 }
 0x11c   : > { %v679_v22 = vadd.f32 %v1779_v17, %v561_v15  ;;  %v550_v23 = vpop.f32.mrb[7].mxu0  ;;  %v1780_v24 = vpop.f32.mrb[6].mxu1 }
 0x11d   : > { %v678_v25 = vadd.f32 %v665_v21, %v560_v19  ;;  %v668_v26 = vpop.f32.mrb[7].mxu1 }
 0x139   : > { %v1799_v27 = vpop.f32.mrb[8].mxu0 }
 0x13a   : > { %v818_v28 = vadd.f32 %v1799_v27, %v679_v22  ;;  %v804_v29 = vpop.f32.mrb[9].mxu0  ;;  %v1819_v30 = vpop.f32.mrb[8].mxu1 }
 0x13b   : > { %v817_v31 = vadd.f32 %v804_v29, %v678_v25  ;;  %v1800_v32 = vpop.f32.mrb[10].mxu0  ;;  %v925_v33 = vpop.f32.mrb[9].mxu1 }
 0x13c   : > { %v939_v34 = vadd.f32 %v1819_v30, %v818_v28  ;;  %v807_v35 = vpop.f32.mrb[11].mxu0  ;;  %v1820_v36 = vpop.f32.mrb[10].mxu1 }
 0x13d   : > { %v938_v37 = vadd.f32 %v925_v33, %v817_v31  ;;  %v928_v38 = vpop.f32.mrb[11].mxu1 }
 0x159   : > { %v1839_v39 = vpop.f32.mrb[12].mxu0 }
 0x15a   : > { %v1055_v40 = vadd.f32 %v1839_v39, %v939_v34  ;;  %v1041_v41 = vpop.f32.mrb[13].mxu0  ;;  %v1859_v42 = vpop.f32.mrb[12].mxu1 }
 0x15b   : > { %v1054_v43 = vadd.f32 %v1041_v41, %v938_v37  ;;  %v1840_v44 = vpop.f32.mrb[14].mxu0  ;;  %v1173_v45 = vpop.f32.mrb[13].mxu1 }
 0x15c   : > { %v1187_v46 = vadd.f32 %v1859_v42, %v1055_v40  ;;  %v1044_v47 = vpop.f32.mrb[15].mxu0  ;;  %v1860_v49 = vpop.f32.mrb[14].mxu1 }
 0x15d   : > { %v1186_v48 = vadd.f32 %v1173_v45, %v1054_v43  ;;  %v1176_v50 = vpop.f32.mrb[15].mxu1 }
 0x179   : > { %v1879_v51 = vpop.f32.mrb[16].mxu0 }
 0x17a   : > { %v1307_v18 = vadd.f32 %v1879_v51, %v1187_v46  ;;  %v1293_v53 = vpop.f32.mrb[17].mxu0 }
 0x17b   : > { %v1306_v54 = vadd.f32 %v1293_v53, %v1186_v48  ;;  %v1880_v55 = vpop.f32.mrb[18].mxu0 }
 0x17c   : > { %v1316_v56 = vadd.f32 %v1598_v52, %v1307_v18  ;;  %v1296_v57 = vpop.f32.mrb[19].mxu0 }
 0x17d   : > { %v1315_v59 = vadd.f32 %v1598_v52, %v1306_v54 }
 0x17f   : > { %v1609_v60 = vpack.c.bf16 %v1316_v56, %v1315_v59 }
 0x181   : > { %1610 = vst [vmem:[%s170_s19] sm:$0xff] %v1609_v60  }
 0x182 PF: > { %s13_s12 = sadd.s32 1, %s1976_s12  }
 0x183   : > { %p10_p4 = scmp.ge.s32.totalorder %s13_s12, 4  }
 0x185   :  { %12 = sbr.rel (!%p10_p4) target bundleno = 1 (0x1), region = 70 }

// kernel: feature_pyramid.11
= control target key start
LH: loop header
LB: loop body
LE: loop exit
PB: predicated region body
PF: predicated region fallthrough
CT: control target
= control target key end

     0   :  { %s3132_s12 = smov 0   ;;  %s3607_s0 = inlined_call_operand.vmem [shape: bf16[2,168,128], index: 0, kind: input, shape index: {}]   ;;  %s3608_s1 = inlined_call_operand.vmem [shape: bf16[9,128,128], index: 1, kind: input, shape index: {}]   ;;  %s3609_s2 = inlined_call_operand.vmem [shape: f32[1,128], index: 2, kind: input, shape index: {}]   ;;  %s3610_s3 = inlined_call_operand.vmem [shape: bf16[2,128,128], index: 3, kind: output, shape index: {}]  }
   0x1 LB: > { %s2130_s13 = sadd.s32 4294967295, %s3110_s12   ;;  %p2134_p0 = scmp.ge.s32.totalorder %s3110_s12, 1  ;;  %s3110_s12 = sphi %s3132_s12, %s13_s12  }
   0x2   : > { %p137_p1 = scmp.lt.s32.totalorder %s3110_s12, 3 }
   0x4   : > { %p138_p2 = pnand %p2134_p0, %p137_p1 }
   0x5   : > { %v3019_v0 = vld [vmem:[%s3608_s1 + $0x40] sm:$0xff] (!%p138_p2)   ;;  %v3021_v2 = vld [vmem:[%s3608_s1 + $0x48] sm:$0xff] (!%p138_p2)   ;;  %p161_p3 = scmp.lt.s32.totalorder (!%p138_p2), %s2130_s13, 1  ;;  %v3023_v4 = vld [vmem:[%s3608_s1 + $0x50] sm:$0xff] (!%p138_p2)   ;;  %vm269_vm0 = vsmask.f32 (!%p138_p2), 7424 }
   0x6   : > { %141 = sbr.rel (%p138_p2) target bundleno = 397 (0x18d), region = 32  ;;  %v3020_v1 = vld [vmem:[%s3608_s1 + $0x100] sm:$0xff] (!%p138_p2)   ;;  %2578 = vmatprep.subr.bf16.mxu1 (!%p138_p2), %v3019_v0  ;;  %v3022_v3 = vld [vmem:[%s3608_s1 + $0x108] sm:$0xff] (!%p138_p2)   ;;  %v3024_v5 = vld [vmem:[%s3608_s1 + $0x110] sm:$0xff] (!%p138_p2)   ;;  %vm661_vm1 = vcmask (!%p138_p2), 1046528  }
   0x7   : > { %2706 = vmatprep.subr.bf16.mxu0 (!%p138_p2), %v3020_v1  ;;  %2579 = vmatpush3.bf16.msra.mxu1 (!%p138_p2), %v3019_v0  ;;  %v3025_v6 = vld [vmem:[%s3608_s1 + $0x58] sm:$0xff] (!%p138_p2)   ;;  %v3027_v8 = vld [vmem:[%s3608_s1 + $0x60] sm:$0xff] (!%p138_p2)   ;;  %v3029_v10 = vld [vmem:[%s3608_s1 + $0x68] sm:$0xff] (!%p138_p2)  }
   0x8   : > { %2707 = vmatpush3.bf16.msra.mxu0 (!%p138_p2), %v3020_v1  ;;  %2580 = vmatprep.subr.bf16.mxu1 (!%p138_p2), %v3021_v2  ;;  %v3026_v7 = vld [vmem:[%s3608_s1 + $0x118] sm:$0xff] (!%p138_p2)   ;;  %v3028_v9 = vld [vmem:[%s3608_s1 + $0x120] sm:$0xff] (!%p138_p2)   ;;  %v3030_v11 = vld [vmem:[%s3608_s1 + $0x128] sm:$0xff] (!%p138_p2)  }
   0x9   : > { %2708 = vmatprep.subr.bf16.mxu0 (!%p138_p2), %v3022_v3  ;;  %v3031_v19 = vld [vmem:[%s3608_s1 + $0x70] sm:$0xff] (!%p138_p2)   ;;  %v3033_v25 = vld [vmem:[%s3608_s1 + $0x78] sm:$0xff] (!%p138_p2)   ;;  %v3038_v35 = vld [vmem:[%s3608_s1] sm:$0xff] (!%p138_p2)  }
   0xa   : > { %v3032_v21 = vld [vmem:[%s3608_s1 + $0x130] sm:$0xff] (!%p138_p2)   ;;  %v3034_v27 = vld [vmem:[%s3608_s1 + $0x138] sm:$0xff] (!%p138_p2)   ;;  %v3040_v41 = vld [vmem:[%s3608_s1 + $0x140] sm:$0xff] (!%p138_p2)  }
   0xb   : > { %2581 = vmatpush3.bf16.msra.mxu1 (!%p138_p2), %v3021_v2  ;;  %v3041_v42 = vld [vmem:[%s3608_s1 + $0x8] sm:$0xff] (!%p138_p2)   ;;  %v3044_v50 = vld [vmem:[%s3608_s1 + $0x10] sm:$0xff] (!%p138_p2)   ;;  %v3047_v60 = vld [vmem:[%s3608_s1 + $0x18] sm:$0xff] (!%p138_p2)  }
   0xc   : > { %2709 = vmatpush3.bf16.msra.mxu0 (!%p138_p2), %v3022_v3  ;;  %2582 = vmatprep.subr.bf16.mxu1 (!%p138_p2), %v3023_v4  ;;  %v3042_v49 = vld [vmem:[%s3608_s1 + $0x148] sm:$0xff] (!%p138_p2)   ;;  %v3046_v56 = vld [vmem:[%s3608_s1 + $0x150] sm:$0xff] (!%p138_p2)   ;;  %v3048_v3 = vld [vmem:[%s3608_s1 + $0x158] sm:$0xff] (!%p138_p2)  }
   0xd   : > { %s3612_s13 = smov (!%p161_p3, %s2130_s13), 1  ;;  %2710 = vmatprep.subr.bf16.mxu0 %v3024_v5 }
   0xe   : > { %s3010_s30 = smul.u32 84, %s3612_s13  ;;  %s2370_s16 = sshll.u32 %s3612_s13, 6 }
   0xf   : > { %2583 = vmatpush3.bf16.msra.mxu1 %v3023_v4  ;;  %s3590_s19 = scalar_lea.vmem %s3610_s3, %s2370_s16 }
  0x10   : > { %2711 = vmatpush3.bf16.msra.mxu0 %v3024_v5  ;;  %2584 = vmatprep.subr.bf16.mxu1 %v3025_v6  ;;  %s3179_s14 = scalar_lea.vmem %s3607_s0, %s3010_s30 }
  0x11   : > { %2712 = vmatprep.subr.bf16.mxu0 %v3026_v7  ;;  %v3185_v12 = vld [vmem:[%s3179_s14] sm:$0xff]   ;;  %v3188_v13 = vld [vmem:[%s3179_s14 + $0x8] sm:$0xff]   ;;  %v3191_v14 = vld [vmem:[%s3179_s14 + $0x10] sm:$0xff]  }
  0x12   : > { %v271_v15 = vshrl.u32 %v3185_v12, 16  ;;  %v273_v16 = vshll.u32 %v3185_v12, 16  ;;  %v278_v17 = vshll.u32 %v3188_v13, 16  ;;  %v282_v18 = vshrl.u32 %v3188_v13, 16  ;;  %v3205_v24 = vld [vmem:[%s3179_s14 + $0x18] sm:$0xff]   ;;  %v3218_v34 = vld [vmem:[%s3179_s14 + $0x20] sm:$0xff]  }
  0x13   : > { %2585 = vmatpush3.bf16.msra.mxu1 %v3025_v6  ;;  %v286_v20 = vshll.u32 %v3191_v14, 16  ;;  %v290_v30 = vshrl.u32 %v3191_v14, 16  ;;  %v294_v31 = vshll.u32 %v3205_v24, 16  ;;  %v298_v36 = vshrl.u32 %v3205_v24, 16  ;;  %v3226_v40 = vld [vmem:[%s3179_s14 + $0x28] sm:$0xff]   ;;  %v3240_v48 = vld [vmem:[%s3179_s14 + $0x30] sm:$0xff]  }
  0x14   : > { %2713 = vmatpush3.bf16.msra.mxu0 %v3026_v7  ;;  %2586 = vmatprep.subr.bf16.mxu1 %v3027_v8  ;;  %v275_v22 = vrot.slane %v273_v16, 1  ;;  %v280_v23 = vrot.slane %v278_v17, 1  ;;  %v302_v37 = vshll.u32 %v3218_v34, 16  ;;  %v306_v45 = vshrl.u32 %v3218_v34, 16  ;;  %v3258_v57 = vld [vmem:[%s3179_s14 + $0x38] sm:$0xff]   ;;  %v3052_v16 = vld [vmem:[%s3608_s1 + $0x160] sm:$0xff]  }
  0x15   : > { %2714 = vmatprep.subr.bf16.mxu0 %v3028_v9  ;;  %v288_v26 = vrot.slane %v286_v20, 1  ;;  %v296_v39 = vrot.slane %v294_v31, 1  ;;  %v310_v47 = vshll.u32 %v3226_v40, 16  ;;  %v314_v51 = vshrl.u32 %v3226_v40, 16  ;;  %v188_v58 = vld [vmem:[%s3179_s14 + $0x40] sm:$0xf] }
  0x16   : > { %v276_v28 = vor.u32 %v275_v22, %v271_v15  ;;  %v284_v29 = vor.u32 %v282_v18, %v280_v23  ;;  %v304_v44 = vrot.slane %v302_v37, 1  ;;  %v318_v52 = vshll.u32 %v3240_v48, 16  ;;  %v189_v59 = vld [vmem:[%s3179_s14 + $0x44] sm:$0xf]  ;;  %v3278_v4 = vld [vmem:[%s3179_s14 + $0x48] sm:$0xf] }
  0x17   : > { %2587 = vmatpush3.bf16.msra.mxu1 %v3027_v8  ;;  %v292_v38 = vor.u32 %v290_v30, %v288_v26  ;;  %v300_v43 = vor.u32 %v298_v36, %v296_v39  ;;  %v312_v55 = vrot.slane %v310_v47, 1  ;;  %v3267_v63 = vcombine.low %v188_v58, %v189_v59  ;;  %v3053_v17 = vld [vmem:[%s3608_s1 + $0x28] sm:$0xff]   ;;  %v3059_v31 = vld [vmem:[%s3608_s1 + $0x170] sm:$0xff]   ;;  %v3060_v37 = vld [vmem:[%s3608_s1 + $0x38] sm:$0xff]  }
  0x18   : > { %2715 = vmatpush3.bf16.msra.mxu0 %v3028_v9  ;;  %2588 = vmatprep.subr.bf16.mxu1 %v3029_v10  ;;  %v281_v32 = vsel %vm269_vm0, %v276_v28, %v280_v23  ;;  %v289_v33 = vsel %vm269_vm0, %v284_v29, %v288_v26  ;;  %v308_v54 = vor.u32 %v306_v45, %v304_v44  ;;  %v320_v62 = vrot.slane %v318_v52, 1  ;;  %v3050_v9 = vld [vmem:[%s3608_s1 + $0x20] sm:$0xff]   ;;  %v3057_v28 = vld [vmem:[%s3608_s1 + $0x30] sm:$0xff]   ;;  %v3064_v47 = vld [vmem:[%s3608_s1 + $0x88] sm:$0xff]  }
  0x19   : > { %2716 = vmatprep.subr.bf16.mxu0 %v3030_v11  ;;  %2594 = vmatprep.mubr.bf16.mxu1 %v281_v32  ;;  %v3236_v46 = vsel %vm269_vm0, %v292_v38, %v296_v39  ;;  %v3252_v53 = vsel %vm269_vm0, %v300_v43, %v304_v44  ;;  %v316_v61 = vor.u32 %v314_v51, %v312_v55  ;;  %v322_v1 = vshrl.u32 %v3240_v48, 16  ;;  %v3061_v38 = vld [vmem:[%s3608_s1 + $0x178] sm:$0xff]   ;;  %v3063_v43 = vld [vmem:[%s3608_s1 + $0x180] sm:$0xff]   ;;  %v3066_v51 = vld [vmem:[%s3608_s1 + $0x90] sm:$0xff]  }
  0x1a   : > { %2722 = vmatprep.mubr.bf16.mxu0 %v289_v33  ;;  %v3270_v0 = vsel %vm269_vm0, %v308_v54, %v312_v55  ;;  %v326_v2 = vshll.u32 %v3258_v57, 16  ;;  %v330_v6 = vshrl.u32 %v3258_v57, 16  ;;  %v1051_v7 = vshll.u32 %v3267_v63, 16  ;;  %v3067_v54 = vld [vmem:[%s3608_s1 + $0x190] sm:$0xff]   ;;  %v191_v59 = vld [vmem:[%s3179_s14 + $0x4c] sm:$0xf] }
  0x1b   : > { %2589 = vmatpush3.bf16.msra.mxu1 %v3029_v10  ;;  %v3283_v5 = vsel %vm269_vm0, %v316_v61, %v320_v62  ;;  %v3287_v8 = vcombine.low %v188_v58, %v188_v58  ;;  %v324_v10 = vor.u32 %v322_v1, %v320_v62  ;;  %v3294_v15 = vcombine.low %v3278_v4, %v3278_v4  ;;  %v3068_v58 = vld [vmem:[%s3608_s1 + $0x98] sm:$0xff]  }
  0x1c   : > { %2717 = vmatpush3.bf16.msra.mxu0 %v3030_v11  ;;  %2590 = vmatprep.subr.bf16.mxu1 %v3031_v19  ;;  %v328_v11 = vrot.slane %v326_v2, 1  ;;  %v1055_v22 = vshrl.u32 %v3267_v63, 16  ;;  %v669_v44 = vrot.slane %v3218_v34, 1  ;;  %v671_v52 = vrot.slane %v3226_v40, 1  ;;  %v3070_v2 = vld [vmem:[%s3608_s1 + $0xa0] sm:$0xff]  }
  0x1d   : > { %2718 = vmatprep.subr.bf16.mxu0 %v3032_v21  ;;  %v334_v20 = vshll.u32 %v3287_v8, 16  ;;  %v1059_v23 = vshll.u32 %v3294_v15, 16  ;;  %v673_v55 = vrot.slane %v3240_v48, 1  ;;  %v3389_v61 = vcombine.low %v3278_v4, %v191_v59  ;;  %v3071_v4 = vld [vmem:[%s3608_s1 + $0x1a0] sm:$0xff]   ;;  %v3090_v59 = vld [vmem:[%s3608_s1 + $0xf0] sm:$0xff]  }
  0x1e   : > { %v332_v18 = vor.u32 %v330_v6, %v328_v11 }
  0x1f   : > { %2591 = vmatpush3.bf16.msra.mxu1 %v3031_v19  ;;  %v1053_v19 = vrot.slane %v1051_v7, 1  ;;  %v1061_v30 = vrot.slane %v1059_v23, 1  ;;  %v3394_v62 = vsel %vm661_vm1, %v671_v52, %v673_v55  ;;  %v1613_v1 = vshll.u32 %v3389_v61, 16  ;;  %v3074_v23 = vld [vmem:[%s3608_s1 + $0xb0] sm:$0xff]  }
  0x20   : > { %2719 = vmatpush3.bf16.msra.mxu0 %v3032_v21  ;;  %2592 = vmatprep.subr.bf16.mxu1 %v3033_v25  ;;  %v3306_v21 = vsel %vm269_vm0, %v324_v10, %v328_v11  ;;  %v1243_v7 = vrot.slane %v3267_v63, 1 }
  0x21   : > { %2720 = vmatprep.subr.bf16.mxu0 %v3034_v27  ;;  %v3316_v26 = vsel %vm269_vm0, %v332_v18, %v1053_v19  ;;  %v3321_v29 = vor.u32 %v1055_v22, %v1053_v19  ;;  %v1615_v6 = vrot.slane %v1613_v1, 1  ;;  %v3073_v19 = vld [vmem:[%s3608_s1 + $0x1a8] sm:$0xff]  }
  0x23   : > { %2593 = vmatpush3.bf16.msra.mxu1 %v3033_v25  ;;  %v3054_v25 = vld [vmem:[%s3608_s1 + $0x168] sm:$0xff]   ;;  %v1062_v36 = vsel %vm269_vm0, %v3321_v29, %v1061_v30  ;;  %v3412_v10 = vsel %vm269_vm0, %v3321_v29, %v1615_v6  ;;  %v3075_v30 = vld [vmem:[%s3608_s1 + $0x1b0] sm:$0xff]  }
  0x24   : > { %2721 = vmatpush3.bf16.msra.mxu0 %v3034_v27  ;;  %2610 = vmatprep.subr.bf16.mxu1 %v3038_v35  ;;  %v336_v27 = vrot.slane %v334_v20, 1  ;;  %v3101_v20 = vld [vmem:[%s3179_s14 + $0x50] ss:$0 sps:$4 sm:$0xff]  }
  0x25   : > { %2738 = vmatprep.subr.bf16.mxu0 %v3040_v41  ;;  %v1807_v29 = vrot.slane %v3101_v20, 1 }
  0x26   : > { %2595 = vmatmul.mubr.bf16.vlgmr.msra.gmra.mrb[0].mxu1 %v289_v33  ;;  %v337_v32 = vsel %vm269_vm0, %v332_v18, %v336_v27  ;;  %v663_v33 = vrot.slane %v3188_v13, 1 }
  0x27   : > { %2723 = vmatmul.mubr.bf16.vlgmr.msra.gmra.mrb[0].mxu0 %v3236_v46  ;;  %2611 = vmatpush3.bf16.msra.mxu1 %v3038_v35  ;;  %v665_v35 = vrot.slane %v3191_v14, 1 }
  0x28   : > { %2739 = vmatpush3.bf16.msra.mxu0 %v3040_v41  ;;  %2612 = vmatprep.subr.bf16.mxu1 %v3041_v42  ;;  %v3062_v41 = vld [vmem:[%s3608_s1 + $0x80] sm:$0xff]  }
  0x29   : > { %2740 = vmatprep.subr.bf16.mxu0 %v3042_v49  ;;  %2598 = vmatprep.mubr.bf16.mxu1 %v3236_v46  ;;  %v3342_v39 = vsel %vm661_vm1, %v663_v33, %v665_v35 }
  0x2a   : > { %2726 = vmatprep.mubr.bf16.mxu0 %v3252_v53 }
  0x2b   : > { %2613 = vmatpush3.bf16.msra.mxu1 %v3041_v42  ;;  %v667_v42 = vrot.slane %v3205_v24, 1 }
  0x2c   : > { %2741 = vmatpush3.bf16.msra.mxu0 %v3042_v49  ;;  %2614 = vmatprep.subr.bf16.mxu1 %v3044_v50  ;;  %v3065_v49 = vld [vmem:[%s3608_s1 + $0x188] sm:$0xff]  }
  0x2d   : > { %2742 = vmatprep.subr.bf16.mxu0 %v3046_v56  ;;  %v3355_v45 = vsel %vm661_vm1, %v665_v35, %v667_v42 }
  0x2e   : > { %2599 = vmatmul.mubr.bf16.gmra.mrb[4].mxu1 %v3252_v53 }
  0x2f   : > { %2727 = vmatmul.mubr.bf16.gmra.mrb[4].mxu0 %v3270_v0  ;;  %2615 = vmatpush3.bf16.msra.mxu1 %v3044_v50  ;;  %v3366_v50 = vsel %vm661_vm1, %v667_v42, %v669_v44  ;;  %v3079_v42 = vld [vmem:[%s3608_s1 + $0x1c0] sm:$0xff]  }
  0x30   : > { %2743 = vmatpush3.bf16.msra.mxu0 %v3046_v56  ;;  %2616 = vmatprep.subr.bf16.mxu1 %v3047_v60  ;;  %v3379_v56 = vsel %vm661_vm1, %v669_v44, %v671_v52  ;;  %v3082_v44 = vld [vmem:[%s3608_s1 + $0xd0] sm:$0xff]   ;;  %v3087_v52 = vld [vmem:[%s3608_s1 + $0x1e0] sm:$0xff]  }
  0x31   : > { %2744 = vmatprep.subr.bf16.mxu0 %v3048_v3  ;;  %2602 = vmatprep.mubr.bf16.mxu1 %v3270_v0 }
  0x32   : > { %2730 = vmatprep.mubr.bf16.mxu0 %v3283_v5 }
  0x33   : > { %2617 = vmatpush3.bf16.msra.mxu1 %v3047_v60  ;;  %v3069_v60 = vld [vmem:[%s3608_s1 + $0x198] sm:$0xff]  }
  0x34   : > { %2745 = vmatpush3.bf16.msra.mxu0 %v3048_v3  ;;  %2618 = vmatprep.subr.bf16.mxu1 %v3050_v9  ;;  %v3401_v3 = vrot.slane %v3258_v57, 1 }
  0x35   : > { %2746 = vmatprep.subr.bf16.mxu0 %v3052_v16 }
  0x36   : > { %2603 = vmatmul.mubr.bf16.gmra.mrb[8].mxu1 %v3283_v5  ;;  %v3416_v11 = vsel %vm661_vm1, %v673_v55, %v3401_v3  ;;  %v3433_v22 = vsel %vm661_vm1, %v3401_v3, %v1243_v7  ;;  %v3089_v55 = vld [vmem:[%s3608_s1 + $0x1e8] sm:$0xff]  }
  0x37   : > { %2731 = vmatmul.mubr.bf16.gmra.mrb[8].mxu0 %v3306_v21  ;;  %2619 = vmatpush3.bf16.msra.mxu1 %v3050_v9  ;;  %v1805_v9 = vrot.slane %v3389_v61, 1 }
  0x38   : > { %2747 = vmatpush3.bf16.msra.mxu0 %v3052_v16  ;;  %2620 = vmatprep.subr.bf16.mxu1 %v3053_v17  ;;  %v3072_v16 = vld [vmem:[%s3608_s1 + $0xa8] sm:$0xff]  }
  0x39   : > { %2748 = vmatprep.subr.bf16.mxu0 %v3054_v25  ;;  %2606 = vmatprep.mubr.bf16.mxu1 %v3306_v21  ;;  %v3423_v18 = vsel %vm661_vm1, %v1243_v7, %v1805_v9  ;;  %v3446_v35 = vsel %vm661_vm1, %v1805_v9, %v1807_v29 }
  0x3a   : > { %2734 = vmatprep.mubr.bf16.mxu0 %v3316_v26 }
  0x3b   : > { %2621 = vmatpush3.bf16.msra.mxu1 %v3053_v17  ;;  %v1617_v17 = vshrl.u32 %v3389_v61, 16 }
  0x3c   : > { %2749 = vmatpush3.bf16.msra.mxu0 %v3054_v25  ;;  %2622 = vmatprep.subr.bf16.mxu1 %v3057_v28  ;;  %v1245_v25 = vrot.slane %v3294_v15, 1 }
  0x3d   : > { %2750 = vmatprep.subr.bf16.mxu0 %v3059_v31  ;;  %v1619_v27 = vor.u32 %v1617_v17, %v1615_v6 }
  0x3e   : > { %2607 = vmatmul.mubr.bf16.gmra.mrb[12].mxu1 %v337_v32  ;;  %v1246_v15 = vsel %vm661_vm1, %v1243_v7, %v1245_v25 }
  0x3f   : > { %2735 = vmatmul.mubr.bf16.gmra.mrb[12].mxu0 %v1062_v36  ;;  %2623 = vmatpush3.bf16.msra.mxu1 %v3057_v28  ;;  %v1621_v28 = vshll.u32 %v3101_v20, 16  ;;  %v3076_v36 = vld [vmem:[%s3608_s1 + $0xb8] sm:$0xff]  }
  0x40   : > { %2751 = vmatpush3.bf16.msra.mxu0 %v3059_v31  ;;  %2624 = vmatprep.subr.bf16.mxu1 %v3060_v37  ;;  %v662_v31 = vrot.slane %v3185_v12, 1 }
  0x41   : > { %2752 = vmatprep.subr.bf16.mxu0 %v3061_v38  ;;  %2626 = vmatprep.mubr.bf16.mxu1 %v3185_v12  ;;  %v1623_v32 = vrot.slane %v1621_v28, 1  ;;  %v3077_v12 = vld [vmem:[%s3608_s1 + $0x1b8] sm:$0xff]  }
  0x42   : > { %2754 = vmatprep.mubr.bf16.mxu0 %v3342_v39 }
  0x43   : > { %2625 = vmatpush3.bf16.msra.mxu1 %v3060_v37  ;;  %v3453_v37 = vsel %vm269_vm0, %v1619_v27, %v1623_v32 }
  0x44   : > { %2753 = vmatpush3.bf16.msra.mxu0 %v3061_v38  ;;  %2642 = vmatprep.subr.bf16.mxu1 %v3062_v41  ;;  %v664_v38 = vsel %vm661_vm1, %v662_v31, %v663_v33  ;;  %v3080_v33 = vld [vmem:[%s3608_s1 + $0xc8] sm:$0xff]  }
  0x45   : > { %2770 = vmatprep.subr.bf16.mxu0 %v3063_v43 }
  0x46   : > { %2627 = vmatmul.mubr.bf16.vlgmr.msra.gmra.mrb[0].mxu1 %v3188_v13 }
  0x47   : > { %2755 = vmatmul.mubr.bf16.vlgmr.msra.gmra.mrb[0].mxu0 %v3355_v45  ;;  %2643 = vmatpush3.bf16.msra.mxu1 %v3062_v41  ;;  %v3078_v41 = vld [vmem:[%s3608_s1 + $0xc0] sm:$0xff]  }
  0x48   : > { %2771 = vmatpush3.bf16.msra.mxu0 %v3063_v43  ;;  %2644 = vmatprep.subr.bf16.mxu1 %v3064_v47  ;;  %v3081_v43 = vld [vmem:[%s3608_s1 + $0x1c8] sm:$0xff]  }
  0x49   : > { %2772 = vmatprep.subr.bf16.mxu0 %v3065_v49  ;;  %2630 = vmatprep.mubr.bf16.mxu1 %v3191_v14 }
  0x4a   : > { %2758 = vmatprep.mubr.bf16.mxu0 %v3366_v50 }
  0x4b   : > { %2645 = vmatpush3.bf16.msra.mxu1 %v3064_v47  ;;  %v3083_v47 = vld [vmem:[%s3608_s1 + $0x1d0] sm:$0xff]  }
  0x4c   : > { %2773 = vmatpush3.bf16.msra.mxu0 %v3065_v49  ;;  %2646 = vmatprep.subr.bf16.mxu1 %v3066_v51  ;;  %v3085_v49 = vld [vmem:[%s3608_s1 + $0x1d8] sm:$0xff]  }
  0x4d   : > { %2774 = vmatprep.subr.bf16.mxu0 %v3067_v54 }
  0x4e   : > { %2631 = vmatmul.mubr.bf16.gmra.mrb[4].mxu1 %v3205_v24 }
  0x4f   : > { %2759 = vmatmul.mubr.bf16.gmra.mrb[4].mxu0 %v3379_v56  ;;  %2647 = vmatpush3.bf16.msra.mxu1 %v3066_v51  ;;  %v3086_v51 = vld [vmem:[%s3608_s1 + $0xe0] sm:$0xff]  }
  0x50   : > { %2775 = vmatpush3.bf16.msra.mxu0 %v3067_v54  ;;  %2648 = vmatprep.subr.bf16.mxu1 %v3068_v58  ;;  %v3088_v54 = vld [vmem:[%s3608_s1 + $0xe8] sm:$0xff]  }
  0x51   : > { %2776 = vmatprep.subr.bf16.mxu0 %v3069_v60  ;;  %2634 = vmatprep.mubr.bf16.mxu1 %v3218_v34 }
  0x52   : > { %2762 = vmatprep.mubr.bf16.mxu0 %v3394_v62 }
  0x53   : > { %2649 = vmatpush3.bf16.msra.mxu1 %v3068_v58  ;;  %v677_v58 = vrot.slane %v3287_v8, 1  ;;  %v3093_v8 = vld [vmem:[%s3608_s1 + $0xf8] sm:$0xff]  }
  0x54   : > { %2777 = vmatpush3.bf16.msra.mxu0 %v3069_v60  ;;  %2650 = vmatprep.subr.bf16.mxu1 %v3070_v2  ;;  %v3092_v60 = vld [vmem:[%s3608_s1 + $0x1f0] sm:$0xff]  }
  0x55   : > { %2778 = vmatprep.subr.bf16.mxu0 %v3071_v4  ;;  %v678_v1 = vsel %vm661_vm1, %v3401_v3, %v677_v58  ;;  %v3095_v3 = vld [vmem:[%s3608_s1 + $0x200] sm:$0xff]  }
  0x56   : > { %2635 = vmatmul.mubr.bf16.gmra.mrb[8].mxu1 %v3226_v40 }
  0x57   : > { %2763 = vmatmul.mubr.bf16.gmra.mrb[8].mxu0 %v3416_v11  ;;  %2651 = vmatpush3.bf16.msra.mxu1 %v3070_v2  ;;  %v3094_v2 = vld [vmem:[%s3608_s1 + $0x1f8] sm:$0xff]  }
  0x58   : > { %2779 = vmatpush3.bf16.msra.mxu0 %v3071_v4  ;;  %2652 = vmatprep.subr.bf16.mxu1 %v3072_v16  ;;  %v3096_v4 = vld [vmem:[%s3608_s1 + $0x208] sm:$0xff]  }
  0x59   : > { %2780 = vmatprep.subr.bf16.mxu0 %v3073_v19  ;;  %2638 = vmatprep.mubr.bf16.mxu1 %v3240_v48 }
  0x5a   : > { %2766 = vmatprep.mubr.bf16.mxu0 %v3433_v22 }
  0x5b   : > { %2653 = vmatpush3.bf16.msra.mxu1 %v3072_v16 }
  0x5c   : > { %2781 = vmatpush3.bf16.msra.mxu0 %v3073_v19  ;;  %2654 = vmatprep.subr.bf16.mxu1 %v3074_v23 }
  0x5d   : > { %2782 = vmatprep.subr.bf16.mxu0 %v3075_v30 }
  0x5e   : > { %2639 = vmatmul.mubr.bf16.gmra.mrb[12].mxu1 %v3258_v57 }
  0x5f   : > { %2767 = vmatmul.mubr.bf16.gmra.mrb[12].mxu0 %v1246_v15  ;;  %2655 = vmatpush3.bf16.msra.mxu1 %v3074_v23 }
  0x60   : > { %2783 = vmatpush3.bf16.msra.mxu0 %v3075_v30  ;;  %2656 = vmatprep.subr.bf16.mxu1 %v3076_v36 }
  0x61   : > { %2784 = vmatprep.subr.bf16.mxu0 %v3077_v12  ;;  %2658 = vmatprep.mubr.bf16.mxu1 %v664_v38  ;;  %v2351_v38 = vld [vmem:[%s3609_s2] ss:$0 sm:$0xff] }
  0x62   : > { %2786 = vmatprep.mubr.bf16.mxu0 %v3191_v14 }
  0x63   : > { %2657 = vmatpush3.bf16.msra.mxu1 %v3076_v36 }
  0x64   : > { %2785 = vmatpush3.bf16.msra.mxu0 %v3077_v12  ;;  %2674 = vmatprep.subr.bf16.mxu1 %v3078_v41 }
  0x65   : > { %2802 = vmatprep.subr.bf16.mxu0 %v3079_v42 }
  0x66   : > { %2659 = vmatmul.mubr.bf16.vlgmr.msra.gmra.mrb[0].mxu1 %v3342_v39  ;;  %v3084_v39 = vld [vmem:[%s3608_s1 + $0xd8] sm:$0xff]  }
  0x67   : > { %2787 = vmatmul.mubr.bf16.vlgmr.msra.gmra.mrb[0].mxu0 %v3205_v24  ;;  %2675 = vmatpush3.bf16.msra.mxu1 %v3078_v41 }
  0x68   : > { %2803 = vmatpush3.bf16.msra.mxu0 %v3079_v42  ;;  %2676 = vmatprep.subr.bf16.mxu1 %v3080_v33 }
  0x69   : > { %2804 = vmatprep.subr.bf16.mxu0 %v3081_v43  ;;  %2662 = vmatprep.mubr.bf16.mxu1 %v3355_v45 }
  0x6a   : > { %2790 = vmatprep.mubr.bf16.mxu0 %v3218_v34 }
  0x6b   : > { %2677 = vmatpush3.bf16.msra.mxu1 %v3080_v33 }
  0x6c   : > { %2805 = vmatpush3.bf16.msra.mxu0 %v3081_v43  ;;  %2678 = vmatprep.subr.bf16.mxu1 %v3082_v44 }
  0x6d   : > { %2806 = vmatprep.subr.bf16.mxu0 %v3083_v47 }
  0x6e   : > { %2663 = vmatmul.mubr.bf16.gmra.mrb[4].mxu1 %v3366_v50 }
  0x6f   : > { %2791 = vmatmul.mubr.bf16.gmra.mrb[4].mxu0 %v3226_v40  ;;  %2679 = vmatpush3.bf16.msra.mxu1 %v3082_v44 }
  0x70   : > { %2807 = vmatpush3.bf16.msra.mxu0 %v3083_v47  ;;  %2680 = vmatprep.subr.bf16.mxu1 %v3084_v39 }
  0x71   : > { %2808 = vmatprep.subr.bf16.mxu0 %v3085_v49  ;;  %2666 = vmatprep.mubr.bf16.mxu1 %v3379_v56 }
  0x72   : > { %2794 = vmatprep.mubr.bf16.mxu0 %v3240_v48 }
  0x73   : > { %2681 = vmatpush3.bf16.msra.mxu1 %v3084_v39 }
  0x74   : > { %2809 = vmatpush3.bf16.msra.mxu0 %v3085_v49  ;;  %2682 = vmatprep.subr.bf16.mxu1 %v3086_v51 }
  0x75   : > { %2810 = vmatprep.subr.bf16.mxu0 %v3087_v52 }
  0x76   : > { %2667 = vmatmul.mubr.bf16.gmra.mrb[8].mxu1 %v3394_v62 }
  0x77   : > { %2795 = vmatmul.mubr.bf16.gmra.mrb[8].mxu0 %v3258_v57  ;;  %2683 = vmatpush3.bf16.msra.mxu1 %v3086_v51 }
  0x78   : > { %2811 = vmatpush3.bf16.msra.mxu0 %v3087_v52  ;;  %2684 = vmatprep.subr.bf16.mxu1 %v3088_v54 }
  0x79   : > { %2812 = vmatprep.subr.bf16.mxu0 %v3089_v55  ;;  %2670 = vmatprep.mubr.bf16.mxu1 %v3416_v11 }
  0x7a   : > { %2798 = vmatprep.mubr.bf16.mxu0 %v3267_v63 }
  0x7b   : > { %2685 = vmatpush3.bf16.msra.mxu1 %v3088_v54 }
  0x7c   : > { %2813 = vmatpush3.bf16.msra.mxu0 %v3089_v55  ;;  %2686 = vmatprep.subr.bf16.mxu1 %v3090_v59 }
  0x7d   : > { %2814 = vmatprep.subr.bf16.mxu0 %v3092_v60 }
  0x7e   : > { %2671 = vmatmul.mubr.bf16.gmra.mrb[12].mxu1 %v678_v1 }
  0x7f   : > { %2799 = vmatmul.mubr.bf16.gmra.mrb[12].mxu0 %v3389_v61  ;;  %2687 = vmatpush3.bf16.msra.mxu1 %v3090_v59 }
  0x80   : > { %2815 = vmatpush3.bf16.msra.mxu0 %v3092_v60  ;;  %2688 = vmatprep.subr.bf16.mxu1 %v3093_v8 }
  0x81   : > { %2816 = vmatprep.subr.bf16.mxu0 %v3094_v2  ;;  %2690 = vmatprep.mubr.bf16.mxu1 %v3188_v13  ;;  %v3097_v13 = vld [vmem:[%s3608_s1 + $0x210] sm:$0xff]  }
  0x82   : > { %2818 = vmatprep.mubr.bf16.mxu0 %v3236_v46  ;;  %v3103_v46 = vld [vmem:[%s3608_s1 + $0x238] sm:$0xff]  }
  0x83   : > { %2689 = vmatpush3.bf16.msra.mxu1 %v3093_v8 }
  0x84   : > { %2817 = vmatpush3.bf16.msra.mxu0 %v3094_v2  ;;  %2866 = vmatprep.subr.bf16.mxu1 %v3095_v3 }
  0x85   : > { %2834 = vmatprep.subr.bf16.mxu0 %v3095_v3 }
  0x86   : > { %2691 = vmatmul.mubr.bf16.vlgmr.msra.gmra.mrb[0].mxu1 %v3191_v14  ;;  %v3098_v14 = vld [vmem:[%s3608_s1 + $0x218] sm:$0xff]  }
  0x87   : > { %2819 = vmatmul.mubr.bf16.vlgmr.msra.gmra.mrb[0].mxu0 %v3252_v53  ;;  %2874 = vmatpush3.bf16.msra.mxu1 %v3095_v3 }
  0x88   : > { %2835 = vmatpush3.bf16.msra.mxu0 %v3095_v3  ;;  %2867 = vmatprep.subr.bf16.mxu1 %v3096_v4 }
  0x89   : > { %2836 = vmatprep.subr.bf16.mxu0 %v3096_v4  ;;  %2694 = vmatprep.mubr.bf16.mxu1 %v3205_v24  ;;  %v3099_v24 = vld [vmem:[%s3608_s1 + $0x220] sm:$0xff]  }
  0x8a   : > { %2822 = vmatprep.mubr.bf16.mxu0 %v3270_v0 }
  0x8b   : > { %2875 = vmatpush3.bf16.msra.mxu1 %v3096_v4 }
  0x8c   : > { %2837 = vmatpush3.bf16.msra.mxu0 %v3096_v4  ;;  %2868 = vmatprep.subr.bf16.mxu1 %v3097_v13 }
  0x8d   : > { %2838 = vmatprep.subr.bf16.mxu0 %v3097_v13 }
  0x8e   : > { %2695 = vmatmul.mubr.bf16.gmra.mrb[4].mxu1 %v3218_v34  ;;  %v3100_v34 = vld [vmem:[%s3608_s1 + $0x228] sm:$0xff]  }
  0x8f   : > { %2823 = vmatmul.mubr.bf16.gmra.mrb[4].mxu0 %v3283_v5  ;;  %2876 = vmatpush3.bf16.msra.mxu1 %v3097_v13 }
  0x90   : > { %2839 = vmatpush3.bf16.msra.mxu0 %v3097_v13  ;;  %2869 = vmatprep.subr.bf16.mxu1 %v3098_v14 }
  0x91   : > { %2840 = vmatprep.subr.bf16.mxu0 %v3098_v14  ;;  %2698 = vmatprep.mubr.bf16.mxu1 %v3226_v40  ;;  %v3102_v40 = vld [vmem:[%s3608_s1 + $0x230] sm:$0xff]  }
  0x92   : > { %2826 = vmatprep.mubr.bf16.mxu0 %v3306_v21 }
  0x93   : > { %2877 = vmatpush3.bf16.msra.mxu1 %v3098_v14 }
  0x94   : > { %2841 = vmatpush3.bf16.msra.mxu0 %v3098_v14  ;;  %2870 = vmatprep.subr.bf16.mxu1 %v3099_v24 }
  0x95   : > { %2842 = vmatprep.subr.bf16.mxu0 %v3099_v24 }
  0x96   : > { %2699 = vmatmul.mubr.bf16.gmra.mrb[8].mxu1 %v3240_v48 }
  0x97   : > { %2827 = vmatmul.mubr.bf16.gmra.mrb[8].mxu0 %v3316_v26  ;;  %2878 = vmatpush3.bf16.msra.mxu1 %v3099_v24 }
  0x98   : > { %2843 = vmatpush3.bf16.msra.mxu0 %v3099_v24  ;;  %2871 = vmatprep.subr.bf16.mxu1 %v3100_v34 }
  0x99   : > { %2844 = vmatprep.subr.bf16.mxu0 %v3100_v34  ;;  %2702 = vmatprep.mubr.bf16.mxu1 %v3258_v57 }
  0x9a   : > { %2830 = vmatprep.mubr.bf16.mxu0 %v3412_v10 }
  0x9b   : > { %2879 = vmatpush3.bf16.msra.mxu1 %v3100_v34 }
  0x9c   : > { %2845 = vmatpush3.bf16.msra.mxu0 %v3100_v34  ;;  %2872 = vmatprep.subr.bf16.mxu1 %v3102_v40 }
  0x9d   : > { %2846 = vmatprep.subr.bf16.mxu0 %v3102_v40 }
  0x9e   : > { %2703 = vmatmul.mubr.bf16.gmra.mrb[12].mxu1 %v3267_v63 }
  0x9f   : > { %2831 = vmatmul.mubr.bf16.gmra.mrb[12].mxu0 %v3453_v37  ;;  %2880 = vmatpush3.bf16.msra.mxu1 %v3102_v40 }
  0xa0   : > { %2847 = vmatpush3.bf16.msra.mxu0 %v3102_v40  ;;  %2873 = vmatprep.subr.bf16.mxu1 %v3103_v46 }
  0xa1   : > { %2848 = vmatprep.subr.bf16.mxu0 %v3103_v46  ;;  %2850 = vmatprep.mubr.bf16.mxu0 %v3355_v45 }
  0xa2   : > { %2858 = vmatprep.mubr.bf16.mxu1 %v3416_v11 }
  0xa3   : > { %2881 = vmatpush3.bf16.msra.mxu1 %v3103_v46 }
  0xa4   : > { %2849 = vmatpush3.bf16.msra.mxu0 %v3103_v46 }
  0xa6   : > { %2859 = vmatmul.mubr.bf16.vlgmr.msra.gmra.mrb[16].mxu1 %v3433_v22 }
  0xa7   : > { %2851 = vmatmul.mubr.bf16.vlgmr.msra.gmra.mrb[0].mxu0 %v3366_v50  ;;  %2862 = vmatprep.mubr.bf16.mxu1 %v3423_v18 }
  0xa8   : > { %2854 = vmatprep.mubr.bf16.mxu0 %v3379_v56 }
  0xae   : > { %2863 = vmatmul.mubr.bf16.gmra.mrb[20].mxu1 %v3446_v35 }
  0xaf   : > { %2855 = vmatmul.mubr.bf16.gmra.mrb[4].mxu0 %v3394_v62 }
 0x159   : > { %v2692_v48 = vpop.f32.mrb[0].mxu1 }
 0x15a   : > { %v951_v53 = vpop.f32.mrb[1].mxu1 }
 0x15b   : > { %v2693_v57 = vpop.f32.mrb[2].mxu1 }
 0x15c   : > { %v954_v63 = vpop.f32.mrb[3].mxu1 }
 0x161   : > { %v3575_v0 = vpop.f32.mrb[4].mxu1 }
 0x162   : > { %v3577_v5 = vpop.f32.mrb[5].mxu1 }
 0x163   : > { %v3579_v21 = vpop.f32.mrb[6].mxu1 }
 0x164   : > { %v3581_v26 = vpop.f32.mrb[7].mxu1 }
 0x169   : > { %v2700_v45 = vpop.f32.mrb[8].mxu1 }
 0x16a   : > { %v2828_v50 = vpop.f32.mrb[8].mxu0  ;;  %v983_v61 = vpop.f32.mrb[9].mxu1 }
 0x16b   : > { %v2890_v56 = vadd.f32 %v2828_v50, %v2700_v45  ;;  %v1741_v6 = vpop.f32.mrb[9].mxu0  ;;  %v2701_v7 = vpop.f32.mrb[10].mxu1 }
 0x16c   : > { %v2892_v9 = vadd.f32 %v1741_v6, %v983_v61  ;;  %v2829_v62 = vpop.f32.mrb[10].mxu0  ;;  %v986_v10 = vpop.f32.mrb[11].mxu1 }
 0x16d   : > { %v2894_v11 = vadd.f32 %v2829_v62, %v2701_v7  ;;  %v1744_v16 = vpop.f32.mrb[11].mxu0 }
 0x16e   : > { %v2896_v17 = vadd.f32 %v1744_v16, %v986_v10 }
 0x171   : > { %v2704_v18 = vpop.f32.mrb[12].mxu1 }
 0x172   : > { %v2832_v19 = vpop.f32.mrb[12].mxu0  ;;  %v999_v20 = vpop.f32.mrb[13].mxu1 }
 0x173   : > { %v2898_v22 = vadd.f32 %v2832_v19, %v2704_v18  ;;  %v1757_v23 = vpop.f32.mrb[13].mxu0  ;;  %v2705_v25 = vpop.f32.mrb[14].mxu1 }
 0x174   : > { %v2900_v27 = vadd.f32 %v1757_v23, %v999_v20  ;;  %v2833_v28 = vpop.f32.mrb[14].mxu0  ;;  %v1002_v29 = vpop.f32.mrb[15].mxu1 }
 0x175   : > { %v2902_v30 = vadd.f32 %v2833_v28, %v2705_v25  ;;  %v1760_v31 = vpop.f32.mrb[15].mxu0 }
 0x176   : > { %v2904_v32 = vadd.f32 %v1760_v31, %v1002_v29 }
 0x179   : > { %v2860_v35 = vpop.f32.mrb[16].mxu1 }
 0x17a   : > { %v2852_v15 = vpop.f32.mrb[0].mxu0  ;;  %v2891_v36 = vadd.f32 %v2890_v56, %v2860_v35  ;;  %v1925_v37 = vpop.f32.mrb[17].mxu1 }
 0x17b   : > { %v2882_v12 = vadd.f32 %v2852_v15, %v2692_v48  ;;  %v1893_v41 = vpop.f32.mrb[1].mxu0  ;;  %v2893_v42 = vadd.f32 %v2892_v9, %v1925_v37  ;;  %v2861_v33 = vpop.f32.mrb[18].mxu1 }
 0x17c   : > { %v2883_v43 = vadd.f32 %v1893_v41, %v951_v53  ;;  %v2853_v44 = vpop.f32.mrb[2].mxu0  ;;  %v2895_v47 = vadd.f32 %v2894_v11, %v2861_v33  ;;  %v1928_v39 = vpop.f32.mrb[19].mxu1  ;;  %v1989_v54 = vadd.f32 %v2891_v36, %v2351_v38 }
 0x17d   : > { %v2884_v49 = vadd.f32 %v2853_v44, %v2693_v57  ;;  %v1896_v51 = vpop.f32.mrb[3].mxu0  ;;  %v2897_v52 = vadd.f32 %v2896_v17, %v1928_v39  ;;  %v1981_v59 = vadd.f32 %v2882_v12, %v2351_v38  ;;  %v1987_v60 = vadd.f32 %v2893_v42, %v2351_v38 }
 0x17e   : > { %v1990_v55 = vadd.f32 %v2895_v47, %v2351_v38  ;;  %v2885_v58 = vadd.f32 %v1896_v51, %v954_v63  ;;  %v1979_v2 = vadd.f32 %v2883_v43, %v2351_v38 }
 0x17f   : > { %v1982_v1 = vadd.f32 %v2884_v49, %v2351_v38  ;;  %v1988_v8 = vadd.f32 %v2897_v52, %v2351_v38 }
 0x180   : > { %v2415_v3 = vpack.c.bf16 %v1990_v55, %v1989_v54  ;;  %v1980_v4 = vadd.f32 %v2885_v58, %v2351_v38 }
 0x181   : > { %v2395_v13 = vpack.c.bf16 %v1982_v1, %v1981_v59  ;;  %v2410_v14 = vpack.c.bf16 %v1988_v8, %v1987_v60  ;;  %v2864_v24 = vpop.f32.mrb[20].mxu1 }
 0x182   : > { %2431 = vst [vmem:[%s3590_s19 + $0x28] sm:$0xff] %v2415_v3   ;;  %v2390_v34 = vpack.c.bf16 %v1980_v4, %v1979_v2  ;;  %v2856_v40 = vpop.f32.mrb[4].mxu0  ;;  %v2899_v46 = vadd.f32 %v2898_v22, %v2864_v24  ;;  %v1941_v48 = vpop.f32.mrb[21].mxu1 }
 0x183   : > { %2427 = vst [vmem:[%s3590_s19 + $0x8] sm:$0xff] %v2395_v13   ;;  %2430 = vst [vmem:[%s3590_s19 + $0x20] sm:$0xff] %v2410_v14   ;;  %v2886_v53 = vadd.f32 %v2856_v40, %v3575_v0  ;;  %v1909_v57 = vpop.f32.mrb[5].mxu0  ;;  %v2901_v63 = vadd.f32 %v2900_v27, %v1941_v48  ;;  %v2865_v45 = vpop.f32.mrb[22].mxu1 }
 0x184   : > { %2391 = vst [vmem:[%s3590_s19] sm:$0xff] %v2390_v34   ;;  %v2887_v50 = vadd.f32 %v1909_v57, %v3577_v5  ;;  %v2857_v61 = vpop.f32.mrb[6].mxu0  ;;  %v2903_v56 = vadd.f32 %v2902_v30, %v2865_v45  ;;  %v1944_v6 = vpop.f32.mrb[23].mxu1  ;;  %v1993_v10 = vadd.f32 %v2899_v46, %v2351_v38 }
 0x185   : > { %v2888_v7 = vadd.f32 %v2857_v61, %v3579_v21  ;;  %v1912_v9 = vpop.f32.mrb[7].mxu0  ;;  %v2905_v62 = vadd.f32 %v2904_v32, %v1944_v6  ;;  %v1985_v16 = vadd.f32 %v2886_v53, %v2351_v38  ;;  %v1991_v17 = vadd.f32 %v2901_v63, %v2351_v38 }
 0x186   : > { %v1994_v11 = vadd.f32 %v2903_v56, %v2351_v38  ;;  %v2889_v0 = vadd.f32 %v1912_v9, %v3581_v26  ;;  %v1983_v5 = vadd.f32 %v2887_v50, %v2351_v38 }
 0x187   : > { %v1986_v18 = vadd.f32 %v2888_v7, %v2351_v38  ;;  %v1992_v19 = vadd.f32 %v2905_v62, %v2351_v38 }
 0x188   : > { %v2425_v20 = vpack.c.bf16 %v1994_v11, %v1993_v10  ;;  %v1984_v22 = vadd.f32 %v2889_v0, %v2351_v38 }
 0x189   : > { %v2405_v23 = vpack.c.bf16 %v1986_v18, %v1985_v16  ;;  %v2420_v25 = vpack.c.bf16 %v1992_v19, %v1991_v17 }
 0x18a   : > { %2433 = vst [vmem:[%s3590_s19 + $0x38] sm:$0xff] %v2425_v20   ;;  %v2400_v21 = vpack.c.bf16 %v1984_v22, %v1983_v5 }
 0x18b   : > { %2429 = vst [vmem:[%s3590_s19 + $0x18] sm:$0xff] %v2405_v23   ;;  %2432 = vst [vmem:[%s3590_s19 + $0x30] sm:$0xff] %v2420_v25  }
 0x18c   : > { %2428 = vst [vmem:[%s3590_s19 + $0x10] sm:$0xff] %v2400_v21  }
 0x18d PF: > { %s13_s12 = sadd.s32 1, %s3110_s12  }
 0x18e   : > { %p10_p4 = scmp.ge.s32.totalorder %s13_s12, 4  }
 0x190   :  { %12 = sbr.rel (!%p10_p4) target bundleno = 1 (0x1), region = 70 }

// kernel: feature_pyramid.15
= control target key start
LH: loop header
LB: loop body
LE: loop exit
PB: predicated region body
PF: predicated region fallthrough
CT: control target
= control target key end

     0   :  { %s1858_s12 = smov 0   ;;  %s2247_s0 = inlined_call_operand.vmem [shape: bf16[2,40,128], index: 0, kind: input, shape index: {}]   ;;  %s2248_s1 = inlined_call_operand.vmem [shape: bf16[9,128,128], index: 1, kind: input, shape index: {}]   ;;  %s2249_s2 = inlined_call_operand.vmem [shape: f32[1,128], index: 2, kind: input, shape index: {}]   ;;  %s2250_s3 = inlined_call_operand.vmem [shape: bf16[2,8,128], index: 3, kind: output, shape index: {}]  }
   0x1 LB: > { %s1266_s13 = sadd.s32 4294967295, %s1833_s12   ;;  %p1270_p0 = scmp.ge.s32.totalorder %s1833_s12, 1  ;;  %s1833_s12 = sphi %s1858_s12, %s13_s12  }
   0x2   : > { %p137_p1 = scmp.lt.s32.totalorder %s1833_s12, 3 }
   0x4   : > { %p138_p2 = pnand %p1270_p0, %p137_p1 }
   0x5   : > { %v1755_v0 = vld [vmem:[%s2248_s1 + $0x40] sm:$0xff] (!%p138_p2)   ;;  %v1835_v1 = vmov (!%p138_p2), 0.0   ;;  %v1757_v3 = vld [vmem:[%s2248_s1 + $0x48] sm:$0xff] (!%p138_p2)   ;;  %vm1836_vm0 = vmmov (!%p138_p2), 0   ;;  %p160_p3 = scmp.lt.s32.totalorder (!%p138_p2), %s1266_s13, 1  ;;  %v1759_v5 = vld [vmem:[%s2248_s1 + $0x50] sm:$0xff] (!%p138_p2)  }
   0x6   : > { %141 = sbr.rel (%p138_p2) target bundleno = 385 (0x181), region = 32  ;;  %1563 = vmatprep.subr.bf16.mxu0 (!%p138_p2), %v1835_v1  ;;  %1583 = vmatprep.subr.bf16.mxu1 (!%p138_p2), %v1835_v1  ;;  %v1756_v2 = vld [vmem:[%s2248_s1] sm:$0xff] (!%p138_p2)   ;;  %v1758_v4 = vld [vmem:[%s2248_s1 + $0x8] sm:$0xff] (!%p138_p2)   ;;  %v1760_v6 = vld [vmem:[%s2248_s1 + $0x10] sm:$0xff] (!%p138_p2)   ;;  %v1837_v14 = vmov (!%p138_p2), 0   ;;  %vm429_vm2 = vcmask (!%p138_p2), 1046528  }
   0x7   : > { %1564 = vmatpush3.bf16.msra.mxu0 (!%p138_p2), %v1755_v0  ;;  %1579 = vmatprep.mubr.msk.bf16.mxu0 (!%p138_p2), %vm1836_vm0, %v1835_v1  ;;  %v1761_v7 = vld [vmem:[%s2248_s1 + $0x58] sm:$0xff] (!%p138_p2)   ;;  %v1763_v9 = vld [vmem:[%s2248_s1 + $0x60] sm:$0xff] (!%p138_p2)   ;;  %v1765_v18 = vld [vmem:[%s2248_s1 + $0x68] sm:$0xff] (!%p138_p2)   ;;  %vm221_vm1 = vsmask.f32 (!%p138_p2), 7424 }
   0x8   : > { %1584 = vmatpush3.bf16.msra.mxu1 (!%p138_p2), %v1756_v2  ;;  %1565 = vmatprep.subr.bf16.mxu0 (!%p138_p2), %v1835_v1  ;;  %v1762_v8 = vld [vmem:[%s2248_s1 + $0x18] sm:$0xff] (!%p138_p2)   ;;  %v1764_v10 = vld [vmem:[%s2248_s1 + $0x20] sm:$0xff] (!%p138_p2)   ;;  %v1766_v19 = vld [vmem:[%s2248_s1 + $0x28] sm:$0xff] (!%p138_p2)  }
   0x9   : > { %1585 = vmatprep.subr.bf16.mxu1 (!%p138_p2), %v1835_v1  ;;  %1599 = vmatprep.mubr.msk.bf16.mxu1 (!%p138_p2), %vm1836_vm0, %v1835_v1  ;;  %v1767_v22 = vld [vmem:[%s2248_s1 + $0x70] sm:$0xff] (!%p138_p2)   ;;  %v1769_v28 = vld [vmem:[%s2248_s1 + $0x78] sm:$0xff] (!%p138_p2)   ;;  %v1771_v33 = vld [vmem:[%s2248_s1 + $0x80] sm:$0xff] (!%p138_p2)  }
   0xa   : > { %v1768_v26 = vld [vmem:[%s2248_s1 + $0x30] sm:$0xff] (!%p138_p2)   ;;  %v1770_v29 = vld [vmem:[%s2248_s1 + $0x38] sm:$0xff] (!%p138_p2)   ;;  %v1772_v34 = vld [vmem:[%s2248_s1 + $0xc0] sm:$0xff] (!%p138_p2)  }
   0xb   : > { %1566 = vmatpush3.bf16.msra.mxu0 (!%p138_p2), %v1757_v3  ;;  %v1773_v35 = vld [vmem:[%s2248_s1 + $0x88] sm:$0xff] (!%p138_p2)   ;;  %v1775_v37 = vld [vmem:[%s2248_s1 + $0x90] sm:$0xff] (!%p138_p2)   ;;  %v1777_v39 = vld [vmem:[%s2248_s1 + $0x98] sm:$0xff] (!%p138_p2)  }
   0xc   : > { %1586 = vmatpush3.bf16.msra.mxu1 (!%p138_p2), %v1758_v4  ;;  %1567 = vmatprep.subr.bf16.mxu0 (!%p138_p2), %v1835_v1  ;;  %v1774_v36 = vld [vmem:[%s2248_s1 + $0xc8] sm:$0xff] (!%p138_p2)   ;;  %v1776_v38 = vld [vmem:[%s2248_s1 + $0xd0] sm:$0xff] (!%p138_p2)   ;;  %v1778_v40 = vld [vmem:[%s2248_s1 + $0xd8] sm:$0xff] (!%p138_p2)  }
   0xd   : > { %s2252_s13 = smov (!%p160_p3, %s1266_s13), 1  ;;  %1587 = vmatprep.subr.bf16.mxu1 %v1835_v1  ;;  %v1779_v42 = vld [vmem:[%s2248_s1 + $0xa0] sm:$0xff]   ;;  %v1781_v47 = vld [vmem:[%s2248_s1 + $0xa8] sm:$0xff]   ;;  %v1783_v53 = vld [vmem:[%s2248_s1 + $0xb0] sm:$0xff]  }
   0xe   : > { %s1743_s26 = smul.u32 20, %s2252_s13  ;;  %v1780_v44 = vld [vmem:[%s2248_s1 + $0xe0] sm:$0xff]   ;;  %v1782_v50 = vld [vmem:[%s2248_s1 + $0xe8] sm:$0xff]   ;;  %v1784_v56 = vld [vmem:[%s2248_s1 + $0xf0] sm:$0xff]   ;;  %s1272_s16 = sshll.u32 %s2252_s13, 2 }
   0xf   : > { %1568 = vmatpush3.bf16.msra.mxu0 %v1759_v5  ;;  %v1785_v59 = vld [vmem:[%s2248_s1 + $0xb8] sm:$0xff]   ;;  %v1787_v0 = vld [vmem:[%s2248_s1 + $0x100] sm:$0xff]   ;;  %v1789_v4 = vld [vmem:[%s2248_s1 + $0x108] sm:$0xff]  }
  0x10   : > { %1588 = vmatpush3.bf16.msra.mxu1 %v1760_v6  ;;  %1569 = vmatprep.subr.bf16.mxu0 %v1835_v1  ;;  %s1908_s6 = scalar_lea.vmem %s2247_s0, %s1743_s26  ;;  %v1786_v62 = vld [vmem:[%s2248_s1 + $0xf8] sm:$0xff]   ;;  %v1788_v2 = vld [vmem:[%s2248_s1 + $0x140] sm:$0xff]   ;;  %v1790_v5 = vld [vmem:[%s2248_s1 + $0x148] sm:$0xff]  }
  0x11   : > { %1589 = vmatprep.subr.bf16.mxu1 %v1835_v1  ;;  %v170_v11 = vld [vmem:[%s1908_s6] sm:$0xf]  ;;  %v171_v12 = vld [vmem:[%s1908_s6 + $0x4] sm:$0xf]  ;;  %v172_v13 = vld [vmem:[%s1908_s6 + $0x8] sm:$0xf] }
  0x12   : > { %v175_v15 = vmax.bf16 %v1837_v14, %v170_v11  ;;  %v176_v16 = vmax.bf16 %v1837_v14, %v171_v12  ;;  %v1924_v17 = vmax.bf16 %v1837_v14, %v172_v13  ;;  %v173_v45 = vld [vmem:[%s1908_s6 + $0xc] sm:$0xf]  ;;  %v174_v6 = vld [vmem:[%s1908_s6 + $0x10] sm:$0xf]  ;;  %s168_s6 = scalar_lea.vmem %s2250_s3, %s1272_s16 }
  0x13   : > { %1570 = vmatpush3.bf16.msra.mxu0 %v1761_v7  ;;  %v178_v48 = vmax.bf16 %v1837_v14, %v173_v45  ;;  %v179_v7 = vmax.bf16 %v1837_v14, %v174_v6  ;;  %v1792_v12 = vld [vmem:[%s2248_s1 + $0x150] sm:$0xff]  }
  0x14   : > { %1590 = vmatpush3.bf16.msra.mxu1 %v1762_v8  ;;  %1571 = vmatprep.subr.bf16.mxu0 %v1835_v1  ;;  %v1933_v20 = vcombine.low %v175_v15, %v176_v16  ;;  %v1937_v21 = vcombine.low %v1924_v17, %v1924_v17  ;;  %v1998_v41 = vcombine.low %v176_v16, %v1924_v17  ;;  %v1815_v45 = vld [vmem:[%s2248_s1 + $0x1b0] sm:$0xff]  }
  0x15   : > { %1591 = vmatprep.subr.bf16.mxu1 %v1835_v1  ;;  %v2020_v51 = vcombine.low %v178_v48, %v178_v48  ;;  %v2023_v52 = vcombine.low %v1924_v17, %v178_v48  ;;  %v1446_v11 = vcombine.low %v179_v7, %v179_v7  ;;  %v1793_v17 = vld [vmem:[%s2248_s1 + $0x118] sm:$0xff]  }
  0x16   : > { %v225_v23 = vshll.u32 %v1933_v20, 16  ;;  %v223_v24 = vshrl.u32 %v1933_v20, 16  ;;  %v230_v25 = vshll.u32 %v1937_v21, 16  ;;  %v654_v43 = vshll.u32 %v1998_v41, 16  ;;  %v1818_v48 = vld [vmem:[%s2248_s1 + $0x1f8] sm:$0xff]  }
  0x17   : > { %1572 = vmatpush3.bf16.msra.mxu0 %v1763_v9  ;;  %v652_v46 = vshrl.u32 %v1998_v41, 16  ;;  %v659_v55 = vshll.u32 %v2020_v51, 16  ;;  %v430_v58 = vrot.slane %v1933_v20, 1  ;;  %v431_v60 = vrot.slane %v1937_v21, 1 }
  0x18   : > { %1592 = vmatpush3.bf16.msra.mxu1 %v1764_v10  ;;  %1573 = vmatprep.subr.bf16.mxu0 %v1835_v1  ;;  %v227_v27 = vrot.slane %v225_v23, 1  ;;  %v232_v31 = vrot.slane %v230_v25, 1  ;;  %v656_v49 = vrot.slane %v654_v43, 1  ;;  %v994_v3 = vshll.u32 %v2023_v52, 16  ;;  %v1791_v10 = vld [vmem:[%s2248_s1 + $0x110] sm:$0xff]   ;;  %v1796_v23 = vld [vmem:[%s2248_s1 + $0x160] sm:$0xff]  }
  0x19   : > { %1593 = vmatprep.subr.bf16.mxu1 %v1835_v1  ;;  %v661_v57 = vrot.slane %v659_v55, 1  ;;  %v432_v63 = vsel %vm429_vm2, %v430_v58, %v431_v60  ;;  %v992_v8 = vshrl.u32 %v2023_v52, 16  ;;  %v1110_v13 = vrot.slane %v2023_v52, 1  ;;  %v1798_v25 = vld [vmem:[%s2248_s1 + $0x168] sm:$0xff]   ;;  %v1825_v55 = vld [vmem:[%s2248_s1 + $0x230] sm:$0xff]  }
  0x1a   : > { %v228_v30 = vor.u32 %v227_v27, %v223_v24  ;;  %v657_v54 = vor.u32 %v656_v49, %v652_v46  ;;  %v996_v9 = vrot.slane %v994_v3, 1  ;;  %v999_v15 = vshll.u32 %v1446_v11, 16  ;;  %v1797_v24 = vld [vmem:[%s2248_s1 + $0x128] sm:$0xff]   ;;  %v1800_v27 = vld [vmem:[%s2248_s1 + $0x170] sm:$0xff]   ;;  %v1819_v49 = vld [vmem:[%s2248_s1 + $0x200] sm:$0xff]  }
  0x1b   : > { %1574 = vmatpush3.bf16.msra.mxu0 %v1765_v18  ;;  %v1111_v16 = vrot.slane %v1446_v11, 1  ;;  %v1813_v43 = vld [vmem:[%s2248_s1 + $0x1a8] sm:$0xff]   ;;  %v1816_v46 = vld [vmem:[%s2248_s1 + $0x1f0] sm:$0xff]  }
  0x1c   : > { %1594 = vmatpush3.bf16.msra.mxu1 %v1766_v19  ;;  %1575 = vmatprep.subr.bf16.mxu0 %v1835_v1  ;;  %v233_v32 = vsel %vm221_vm1, %v228_v30, %v232_v31  ;;  %v2040_v61 = vsel %vm221_vm1, %v657_v54, %v661_v57  ;;  %v997_v14 = vor.u32 %v996_v9, %v992_v8  ;;  %v1001_v18 = vrot.slane %v999_v15, 1  ;;  %v1794_v19 = vld [vmem:[%s2248_s1 + $0x158] sm:$0xff]   ;;  %v1824_v54 = vld [vmem:[%s2248_s1 + $0x228] sm:$0xff]  }
  0x1d   : > { %1595 = vmatprep.subr.bf16.mxu1 %v1835_v1  ;;  %v770_v30 = vrot.slane %v1998_v41, 1  ;;  %v771_v31 = vrot.slane %v2020_v51, 1  ;;  %v1821_v51 = vld [vmem:[%s2248_s1 + $0x210] sm:$0xff]  }
  0x1e   : > { %v2094_v21 = vsel %vm221_vm1, %v997_v14, %v1001_v18 }
  0x1f   : > { %1576 = vmatpush3.bf16.msra.mxu0 %v1767_v22  ;;  %v1795_v22 = vld [vmem:[%s2248_s1 + $0x120] sm:$0xff]  }
  0x20   : > { %1596 = vmatpush3.bf16.msra.mxu1 %v1768_v26  ;;  %1577 = vmatprep.subr.bf16.mxu0 %v1835_v1  ;;  %v1799_v26 = vld [vmem:[%s2248_s1 + $0x130] sm:$0xff]  }
  0x21   : > { %1597 = vmatprep.subr.bf16.mxu1 %v1835_v1 }
  0x23   : > { %1578 = vmatpush3.bf16.msra.mxu0 %v1769_v28  ;;  %v1801_v28 = vld [vmem:[%s2248_s1 + $0x138] sm:$0xff]  }
  0x24   : > { %1598 = vmatpush3.bf16.msra.mxu1 %v1770_v29  ;;  %1603 = vmatprep.subr.bf16.mxu0 %v1835_v1  ;;  %v1802_v29 = vld [vmem:[%s2248_s1 + $0x178] sm:$0xff]  }
  0x25   : > { %1623 = vmatprep.subr.bf16.mxu1 %v1835_v1 }
  0x26   : > { %1580 = vmatmul.mubr.bf16.vlgmr.msra.gmra.mrb[0].mxu0 %v233_v32  ;;  %v1803_v32 = vld [vmem:[%s2248_s1 + $0x180] sm:$0xff]  }
  0x27   : > { %1600 = vmatmul.mubr.bf16.vlgmr.msra.gmra.mrb[0].mxu1 %v1933_v20  ;;  %1604 = vmatpush3.bf16.msra.mxu0 %v1771_v33  ;;  %v2090_v20 = vsel %vm429_vm2, %v1110_v13, %v1111_v16  ;;  %v772_v33 = vsel %vm429_vm2, %v770_v30, %v771_v31 }
  0x28   : > { %1624 = vmatpush3.bf16.msra.mxu1 %v1772_v34  ;;  %1605 = vmatprep.subr.bf16.mxu0 %v1835_v1  ;;  %v1804_v34 = vld [vmem:[%s2248_s1 + $0x1c0] sm:$0xff]  }
  0x29   : > { %1625 = vmatprep.subr.bf16.mxu1 %v1835_v1  ;;  %1619 = vmatprep.mubr.msk.bf16.mxu0 %vm1836_vm0, %v1835_v1 }
  0x2a   : > { %1639 = vmatprep.mubr.msk.bf16.mxu1 %vm1836_vm0, %v1835_v1 }
  0x2b   : > { %1606 = vmatpush3.bf16.msra.mxu0 %v1773_v35  ;;  %v1805_v35 = vld [vmem:[%s2248_s1 + $0x188] sm:$0xff]  }
  0x2c   : > { %1626 = vmatpush3.bf16.msra.mxu1 %v1774_v36  ;;  %1607 = vmatprep.subr.bf16.mxu0 %v1835_v1  ;;  %v1806_v36 = vld [vmem:[%s2248_s1 + $0x1c8] sm:$0xff]  }
  0x2d   : > { %1627 = vmatprep.subr.bf16.mxu1 %v1835_v1 }
  0x2f   : > { %1608 = vmatpush3.bf16.msra.mxu0 %v1775_v37  ;;  %v1807_v37 = vld [vmem:[%s2248_s1 + $0x190] sm:$0xff]  }
  0x30   : > { %1628 = vmatpush3.bf16.msra.mxu1 %v1776_v38  ;;  %1609 = vmatprep.subr.bf16.mxu0 %v1835_v1  ;;  %v1808_v38 = vld [vmem:[%s2248_s1 + $0x1d0] sm:$0xff]  }
  0x31   : > { %1629 = vmatprep.subr.bf16.mxu1 %v1835_v1 }
  0x33   : > { %1610 = vmatpush3.bf16.msra.mxu0 %v1777_v39  ;;  %v1809_v39 = vld [vmem:[%s2248_s1 + $0x198] sm:$0xff]  }
  0x34   : > { %1630 = vmatpush3.bf16.msra.mxu1 %v1778_v40  ;;  %1611 = vmatprep.subr.bf16.mxu0 %v1835_v1  ;;  %v1810_v40 = vld [vmem:[%s2248_s1 + $0x1d8] sm:$0xff]  }
  0x35   : > { %1631 = vmatprep.subr.bf16.mxu1 %v1835_v1 }
  0x37   : > { %1612 = vmatpush3.bf16.msra.mxu0 %v1779_v42  ;;  %v1812_v42 = vld [vmem:[%s2248_s1 + $0x1e0] sm:$0xff]  }
  0x38   : > { %1632 = vmatpush3.bf16.msra.mxu1 %v1780_v44  ;;  %1613 = vmatprep.subr.bf16.mxu0 %v1835_v1  ;;  %v1814_v44 = vld [vmem:[%s2248_s1 + $0x1e8] sm:$0xff]  }
  0x39   : > { %1633 = vmatprep.subr.bf16.mxu1 %v1835_v1 }
  0x3b   : > { %1614 = vmatpush3.bf16.msra.mxu0 %v1781_v47  ;;  %v1817_v47 = vld [vmem:[%s2248_s1 + $0x1b8] sm:$0xff]  }
  0x3c   : > { %1634 = vmatpush3.bf16.msra.mxu1 %v1782_v50  ;;  %1615 = vmatprep.subr.bf16.mxu0 %v1835_v1  ;;  %v1820_v50 = vld [vmem:[%s2248_s1 + $0x208] sm:$0xff]  }
  0x3d   : > { %1635 = vmatprep.subr.bf16.mxu1 %v1835_v1 }
  0x3f   : > { %1616 = vmatpush3.bf16.msra.mxu0 %v1783_v53  ;;  %v1823_v53 = vld [vmem:[%s2248_s1 + $0x220] sm:$0xff]  }
  0x40   : > { %1636 = vmatpush3.bf16.msra.mxu1 %v1784_v56  ;;  %1617 = vmatprep.subr.bf16.mxu0 %v1835_v1  ;;  %v1826_v56 = vld [vmem:[%s2248_s1 + $0x238] sm:$0xff]  }
  0x41   : > { %1637 = vmatprep.subr.bf16.mxu1 %v1835_v1 }
  0x43   : > { %1618 = vmatpush3.bf16.msra.mxu0 %v1785_v59 }
  0x44   : > { %1638 = vmatpush3.bf16.msra.mxu1 %v1786_v62  ;;  %1643 = vmatprep.subr.bf16.mxu0 %v1835_v1 }
  0x45   : > { %1663 = vmatprep.subr.bf16.mxu1 %v1835_v1 }
  0x46   : > { %1620 = vmatmul.mubr.bf16.vlgmr.msra.gmra.mrb[4].mxu0 %v432_v63 }
  0x47   : > { %1644 = vmatpush3.bf16.msra.mxu0 %v1787_v0  ;;  %1640 = vmatmul.mubr.bf16.vlgmr.msra.gmra.mrb[4].mxu1 %v1998_v41  ;;  %v1811_v41 = vld [vmem:[%s2248_s1 + $0x1a0] sm:$0xff]  }
  0x48   : > { %1664 = vmatpush3.bf16.msra.mxu1 %v1788_v2  ;;  %1645 = vmatprep.subr.bf16.mxu0 %v1835_v1 }
  0x49   : > { %1665 = vmatprep.subr.bf16.mxu1 %v1835_v1  ;;  %1659 = vmatprep.mubr.msk.bf16.mxu0 %vm1836_vm0, %v1835_v1 }
  0x4a   : > { %1679 = vmatprep.mubr.msk.bf16.mxu1 %vm1836_vm0, %v1835_v1 }
  0x4b   : > { %1646 = vmatpush3.bf16.msra.mxu0 %v1789_v4 }
  0x4c   : > { %1666 = vmatpush3.bf16.msra.mxu1 %v1790_v5  ;;  %1647 = vmatprep.subr.bf16.mxu0 %v1835_v1 }
  0x4d   : > { %1667 = vmatprep.subr.bf16.mxu1 %v1835_v1 }
  0x4f   : > { %1648 = vmatpush3.bf16.msra.mxu0 %v1791_v10 }
  0x50   : > { %1668 = vmatpush3.bf16.msra.mxu1 %v1792_v12  ;;  %1649 = vmatprep.subr.bf16.mxu0 %v1835_v1 }
  0x51   : > { %1669 = vmatprep.subr.bf16.mxu1 %v1835_v1 }
  0x53   : > { %1650 = vmatpush3.bf16.msra.mxu0 %v1793_v17 }
  0x54   : > { %1670 = vmatpush3.bf16.msra.mxu1 %v1794_v19  ;;  %1651 = vmatprep.subr.bf16.mxu0 %v1835_v1 }
  0x55   : > { %1671 = vmatprep.subr.bf16.mxu1 %v1835_v1 }
  0x57   : > { %1652 = vmatpush3.bf16.msra.mxu0 %v1795_v22 }
  0x58   : > { %1672 = vmatpush3.bf16.msra.mxu1 %v1796_v23  ;;  %1653 = vmatprep.subr.bf16.mxu0 %v1835_v1 }
  0x59   : > { %1673 = vmatprep.subr.bf16.mxu1 %v1835_v1 }
  0x5b   : > { %1654 = vmatpush3.bf16.msra.mxu0 %v1797_v24 }
  0x5c   : > { %1674 = vmatpush3.bf16.msra.mxu1 %v1798_v25  ;;  %1655 = vmatprep.subr.bf16.mxu0 %v1835_v1 }
  0x5d   : > { %1675 = vmatprep.subr.bf16.mxu1 %v1835_v1 }
  0x5f   : > { %1656 = vmatpush3.bf16.msra.mxu0 %v1799_v26 }
  0x60   : > { %1676 = vmatpush3.bf16.msra.mxu1 %v1800_v27  ;;  %1657 = vmatprep.subr.bf16.mxu0 %v1835_v1 }
  0x61   : > { %1677 = vmatprep.subr.bf16.mxu1 %v1835_v1 }
  0x63   : > { %1658 = vmatpush3.bf16.msra.mxu0 %v1801_v28 }
  0x64   : > { %1678 = vmatpush3.bf16.msra.mxu1 %v1802_v29  ;;  %1683 = vmatprep.subr.bf16.mxu0 %v1835_v1 }
  0x65   : > { %1703 = vmatprep.subr.bf16.mxu1 %v1835_v1 }
  0x66   : > { %1660 = vmatmul.mubr.bf16.vlgmr.msra.gmra.mrb[8].mxu0 %v2040_v61 }
  0x67   : > { %1684 = vmatpush3.bf16.msra.mxu0 %v1803_v32  ;;  %1680 = vmatmul.mubr.bf16.vlgmr.msra.gmra.mrb[8].mxu1 %v772_v33  ;;  %v1479_v33 = vld [vmem:[%s2249_s2] ss:$0 sm:$0xff] }
  0x68   : > { %1704 = vmatpush3.bf16.msra.mxu1 %v1804_v34  ;;  %1685 = vmatprep.subr.bf16.mxu0 %v1835_v1 }
  0x69   : > { %1705 = vmatprep.subr.bf16.mxu1 %v1835_v1  ;;  %1699 = vmatprep.mubr.msk.bf16.mxu0 %vm1836_vm0, %v1835_v1 }
  0x6a   : > { %1719 = vmatprep.mubr.msk.bf16.mxu1 %vm1836_vm0, %v1835_v1 }
  0x6b   : > { %1686 = vmatpush3.bf16.msra.mxu0 %v1805_v35 }
  0x6c   : > { %1706 = vmatpush3.bf16.msra.mxu1 %v1806_v36  ;;  %1687 = vmatprep.subr.bf16.mxu0 %v1835_v1 }
  0x6d   : > { %1707 = vmatprep.subr.bf16.mxu1 %v1835_v1 }
  0x6f   : > { %1688 = vmatpush3.bf16.msra.mxu0 %v1807_v37 }
  0x70   : > { %1708 = vmatpush3.bf16.msra.mxu1 %v1808_v38  ;;  %1689 = vmatprep.subr.bf16.mxu0 %v1835_v1 }
  0x71   : > { %1709 = vmatprep.subr.bf16.mxu1 %v1835_v1 }
  0x73   : > { %1690 = vmatpush3.bf16.msra.mxu0 %v1809_v39 }
  0x74   : > { %1710 = vmatpush3.bf16.msra.mxu1 %v1810_v40  ;;  %1691 = vmatprep.subr.bf16.mxu0 %v1835_v1 }
  0x75   : > { %1711 = vmatprep.subr.bf16.mxu1 %v1835_v1 }
  0x77   : > { %1692 = vmatpush3.bf16.msra.mxu0 %v1811_v41 }
  0x78   : > { %1712 = vmatpush3.bf16.msra.mxu1 %v1812_v42  ;;  %1693 = vmatprep.subr.bf16.mxu0 %v1835_v1 }
  0x79   : > { %1713 = vmatprep.subr.bf16.mxu1 %v1835_v1 }
  0x7b   : > { %1694 = vmatpush3.bf16.msra.mxu0 %v1813_v43 }
  0x7c   : > { %1714 = vmatpush3.bf16.msra.mxu1 %v1814_v44  ;;  %1695 = vmatprep.subr.bf16.mxu0 %v1835_v1 }
  0x7d   : > { %1715 = vmatprep.subr.bf16.mxu1 %v1835_v1 }
  0x7f   : > { %1696 = vmatpush3.bf16.msra.mxu0 %v1815_v45 }
  0x80   : > { %1716 = vmatpush3.bf16.msra.mxu1 %v1816_v46  ;;  %1697 = vmatprep.subr.bf16.mxu0 %v1835_v1 }
  0x81   : > { %1717 = vmatprep.subr.bf16.mxu1 %v1835_v1 }
  0x83   : > { %1698 = vmatpush3.bf16.msra.mxu0 %v1817_v47 }
  0x84   : > { %1718 = vmatpush3.bf16.msra.mxu1 %v1818_v48  ;;  %1723 = vmatprep.subr.bf16.mxu0 %v1835_v1 }
  0x86   : > { %1700 = vmatmul.mubr.bf16.vlgmr.msra.gmra.mrb[12].mxu0 %v2023_v52  ;;  %v1822_v52 = vld [vmem:[%s2248_s1 + $0x218] sm:$0xff]  }
  0x87   : > { %1724 = vmatpush3.bf16.msra.mxu0 %v1819_v49  ;;  %1720 = vmatmul.mubr.bf16.vlgmr.msra.gmra.mrb[12].mxu1 %v2094_v21 }
  0x88   : > { %1725 = vmatprep.subr.bf16.mxu0 %v1835_v1  ;;  %1739 = vmatprep.mubr.msk.bf16.mxu0 %vm1836_vm0, %v1835_v1 }
  0x8b   : > { %1726 = vmatpush3.bf16.msra.mxu0 %v1820_v50 }
  0x8c   : > { %1727 = vmatprep.subr.bf16.mxu0 %v1835_v1 }
  0x8f   : > { %1728 = vmatpush3.bf16.msra.mxu0 %v1821_v51 }
  0x90   : > { %1729 = vmatprep.subr.bf16.mxu0 %v1835_v1 }
  0x93   : > { %1730 = vmatpush3.bf16.msra.mxu0 %v1822_v52 }
  0x94   : > { %1731 = vmatprep.subr.bf16.mxu0 %v1835_v1 }
  0x97   : > { %1732 = vmatpush3.bf16.msra.mxu0 %v1823_v53 }
  0x98   : > { %1733 = vmatprep.subr.bf16.mxu0 %v1835_v1 }
  0x9b   : > { %1734 = vmatpush3.bf16.msra.mxu0 %v1824_v54 }
  0x9c   : > { %1735 = vmatprep.subr.bf16.mxu0 %v1835_v1 }
  0x9f   : > { %1736 = vmatpush3.bf16.msra.mxu0 %v1825_v55 }
  0xa0   : > { %1737 = vmatprep.subr.bf16.mxu0 %v1835_v1 }
  0xa3   : > { %1738 = vmatpush3.bf16.msra.mxu0 %v1826_v56 }
  0xa6   : > { %1740 = vmatmul.mubr.bf16.vlgmr.msra.gmra.mrb[16].mxu0 %v2090_v20 }
  0xf9   : > { %v317_v57 = vpop.f32.mrb[0].mxu0 }
  0xfa   : > { %v1581_v58 = vpop.f32.mrb[1].mxu0  ;;  %v406_v59 = vpop.f32.mrb[0].mxu1 }
  0xfb   : > { %v407_v60 = vadd.f32 %v406_v59, %v317_v57  ;;  %v320_v61 = vpop.f32.mrb[2].mxu0  ;;  %v1601_v62 = vpop.f32.mrb[1].mxu1 }
  0xfc   : > { %v1582_v63 = vpop.f32.mrb[3].mxu0  ;;  %v409_v0 = vpop.f32.mrb[2].mxu1 }
  0xfd   : > { %v1602_v2 = vpop.f32.mrb[3].mxu1 }
 0x119   : > { %v516_v3 = vpop.f32.mrb[4].mxu0 }
 0x11a   : > { %v522_v4 = vadd.f32 %v516_v3, %v407_v60  ;;  %v1621_v5 = vpop.f32.mrb[5].mxu0  ;;  %v624_v6 = vpop.f32.mrb[4].mxu1 }
 0x11b   : > { %v519_v7 = vpop.f32.mrb[6].mxu0  ;;  %v1641_v8 = vpop.f32.mrb[5].mxu1 }
 0x11c   : > { %v630_v9 = vadd.f32 %v624_v6, %v522_v4  ;;  %v1622_v1 = vpop.f32.mrb[7].mxu0  ;;  %v627_v10 = vpop.f32.mrb[6].mxu1 }
 0x11d   : > { %v1642_v11 = vpop.f32.mrb[7].mxu1 }
 0x139   : > { %v746_v12 = vpop.f32.mrb[8].mxu0 }
 0x13a   : > { %v752_v13 = vadd.f32 %v746_v12, %v630_v9  ;;  %v1661_v14 = vpop.f32.mrb[9].mxu0  ;;  %v856_v15 = vpop.f32.mrb[8].mxu1 }
 0x13b   : > { %v749_v16 = vpop.f32.mrb[10].mxu0  ;;  %v1681_v17 = vpop.f32.mrb[9].mxu1 }
 0x13c   : > { %v862_v18 = vadd.f32 %v856_v15, %v752_v13  ;;  %v1662_v19 = vpop.f32.mrb[11].mxu0  ;;  %v859_v20 = vpop.f32.mrb[10].mxu1 }
 0x13d   : > { %v1682_v21 = vpop.f32.mrb[11].mxu1 }
 0x159   : > { %v964_v22 = vpop.f32.mrb[12].mxu0 }
 0x15a   : > { %v970_v23 = vadd.f32 %v964_v22, %v862_v18  ;;  %v1701_v24 = vpop.f32.mrb[13].mxu0  ;;  %v1086_v25 = vpop.f32.mrb[12].mxu1 }
 0x15b   : > { %v967_v26 = vpop.f32.mrb[14].mxu0  ;;  %v1721_v27 = vpop.f32.mrb[13].mxu1 }
 0x15c   : > { %v1092_v28 = vadd.f32 %v1086_v25, %v970_v23  ;;  %v1702_v29 = vpop.f32.mrb[15].mxu0  ;;  %v1089_v30 = vpop.f32.mrb[14].mxu1 }
 0x15d   : > { %v1722_v31 = vpop.f32.mrb[15].mxu1 }
 0x179   : > { %v1196_v32 = vpop.f32.mrb[16].mxu0 }
 0x17a   : > { %v1202_v34 = vadd.f32 %v1196_v32, %v1092_v28  ;;  %v1741_v35 = vpop.f32.mrb[17].mxu0 }
 0x17b   : > { %v1199_v36 = vpop.f32.mrb[18].mxu0 }
 0x17c   : > { %v1210_v37 = vadd.f32 %v1479_v33, %v1202_v34  ;;  %v1742_v38 = vpop.f32.mrb[19].mxu0 }
 0x17e   : > { %v1211_v39 = vpack.c.bf16 %v1210_v37, %v1210_v37 }
 0x180   : > { %1212 = vst [vmem:[%s168_s6] sm:$0xf] %v1211_v39 }
 0x181 PF: > { %s13_s12 = sadd.s32 1, %s1833_s12  }
 0x182   : > { %p10_p4 = scmp.ge.s32.totalorder %s13_s12, 4  }
 0x184   :  { %12 = sbr.rel (!%p10_p4) target bundleno = 1 (0x1), region = 70 }

// kernel: feature_pyramid.13
= control target key start
LH: loop header
LB: loop body
LE: loop exit
PB: predicated region body
PF: predicated region fallthrough
CT: control target
= control target key end

     0   :  { %s6310_s12 = smov 0   ;;  %s7462_s0 = inlined_call_operand.vmem [shape: bf16[2,440,128], index: 0, kind: input, shape index: {}]   ;;  %s7463_s1 = inlined_call_operand.vmem [shape: bf16[9,128,128], index: 1, kind: input, shape index: {}]   ;;  %s7464_s2 = inlined_call_operand.vmem [shape: f32[1,128], index: 2, kind: input, shape index: {}]   ;;  %s7465_s3 = inlined_call_operand.vmem [shape: bf16[2,384,128], index: 3, kind: output, shape index: {}]  }
   0x1 LB: > { %s4370_s13 = sadd.s32 4294967295, %s6288_s12   ;;  %p4374_p0 = scmp.ge.s32.totalorder %s6288_s12, 1  ;;  %s6288_s12 = sphi %s6310_s12, %s13_s12  }
   0x2   : > { %p137_p1 = scmp.lt.s32.totalorder %s6288_s12, 3 }
   0x4   : > { %p138_p2 = pnand %p4374_p0, %p137_p1 }
   0x6   : > { %141 = sbr.rel (%p138_p2) target bundleno = 693 (0x2b5), region = 32 }
   0xd   : > { %v6147_v0 = vld [vmem:[%s7463_s1 + $0x40] sm:$0xff]   ;;  %p161_p3 = scmp.lt.s32.totalorder %s4370_s13, 1  ;;  %v6149_v2 = vld [vmem:[%s7463_s1 + $0x48] sm:$0xff]   ;;  %v6151_v4 = vld [vmem:[%s7463_s1 + $0x50] sm:$0xff]   ;;  %vm383_vm0 = vsmask.f32 7424 }
   0xe   : > { %v6148_v1 = vld [vmem:[%s7463_s1 + $0x100] sm:$0xff]   ;;  %5161 = vmatprep.subr.bf16.mxu1 %v6147_v0  ;;  %v6150_v3 = vld [vmem:[%s7463_s1 + $0x108] sm:$0xff]   ;;  %v6152_v5 = vld [vmem:[%s7463_s1 + $0x110] sm:$0xff]   ;;  %vm1191_vm1 = vcmask 1046528  }
   0xf   : > { %5417 = vmatprep.subr.bf16.mxu0 %v6148_v1  ;;  %5162 = vmatpush3.bf16.msra.mxu1 %v6147_v0  ;;  %s7557_s13 = smov (!%p161_p3, %s4370_s13), 1  ;;  %v6153_v6 = vld [vmem:[%s7463_s1 + $0x58] sm:$0xff]   ;;  %v6155_v8 = vld [vmem:[%s7463_s1 + $0x60] sm:$0xff]   ;;  %v6157_v10 = vld [vmem:[%s7463_s1 + $0x68] sm:$0xff]  }
  0x10   : > { %5418 = vmatpush3.bf16.msra.mxu0 %v6148_v1  ;;  %5163 = vmatprep.subr.bf16.mxu1 %v6149_v2  ;;  %v6154_v7 = vld [vmem:[%s7463_s1 + $0x118] sm:$0xff]   ;;  %s6137_s30 = smul.u32 220, %s7557_s13  ;;  %v6156_v9 = vld [vmem:[%s7463_s1 + $0x120] sm:$0xff]   ;;  %v6158_v12 = vld [vmem:[%s7463_s1 + $0x128] sm:$0xff]  }
  0x11   : > { %5419 = vmatprep.subr.bf16.mxu0 %v6150_v3  ;;  %v6159_v15 = vld [vmem:[%s7463_s1 + $0x70] sm:$0xff]   ;;  %v6161_v42 = vld [vmem:[%s7463_s1 + $0x78] sm:$0xff]   ;;  %v6169_v61 = vld [vmem:[%s7463_s1] sm:$0xff]   ;;  %s6138_s7 = smul.u32 192, %s7557_s13 }
  0x12   : > { %s6354_s10 = scalar_lea.vmem %s7462_s0, %s6137_s30  ;;  %v6160_v20 = vld [vmem:[%s7463_s1 + $0x130] sm:$0xff]   ;;  %v6162_v43 = vld [vmem:[%s7463_s1 + $0x138] sm:$0xff]   ;;  %v6171_v62 = vld [vmem:[%s7463_s1 + $0x140] sm:$0xff]  }
  0x13   : > { %5164 = vmatpush3.bf16.msra.mxu1 %v6149_v2  ;;  %v174_v11 = vld [vmem:[%s6354_s10 + $0x8] sm:$0xf]  ;;  %v175_v13 = vld [vmem:[%s6354_s10 + $0xc] sm:$0xf]  ;;  %v6163_v14 = vld [vmem:[%s6354_s10] sm:$0xff]   ;;  %s7376_s11 = scalar_lea.vmem %s7465_s3, %s6138_s7 }
  0x14   : > { %5420 = vmatpush3.bf16.msra.mxu0 %v6150_v3  ;;  %5165 = vmatprep.subr.bf16.mxu1 %v6151_v4  ;;  %v6368_v16 = vcombine.low %v174_v11, %v175_v13  ;;  %v176_v17 = vld [vmem:[%s6354_s10 + $0x10] sm:$0xf]  ;;  %v177_v18 = vld [vmem:[%s6354_s10 + $0x14] sm:$0xf]  ;;  %v178_v19 = vld [vmem:[%s6354_s10 + $0x18] sm:$0xf] }
  0x15   : > { %5421 = vmatprep.subr.bf16.mxu0 %v6152_v5  ;;  %v385_v21 = vshrl.u32 %v6163_v14, 16  ;;  %v387_v22 = vshll.u32 %v6163_v14, 16  ;;  %v179_v23 = vld [vmem:[%s6354_s10 + $0x1c] sm:$0xf]  ;;  %v6377_v24 = vcombine.low %v175_v13, %v176_v17  ;;  %v6379_v25 = vcombine.low %v177_v18, %v178_v19  ;;  %v180_v30 = vld [vmem:[%s6354_s10 + $0x20] sm:$0xf] }
  0x16   : > { %v392_v26 = vshll.u32 %v6368_v16, 16  ;;  %v6382_v27 = vcombine.low %v178_v19, %v179_v23  ;;  %v6384_v28 = vcombine.low %v176_v17, %v177_v18  ;;  %v396_v29 = vshrl.u32 %v6368_v16, 16  ;;  %v181_v46 = vld [vmem:[%s6354_s10 + $0x24] sm:$0xf]  ;;  %v182_v51 = vld [vmem:[%s6354_s10 + $0x28] sm:$0xf] }
  0x17   : > { %5166 = vmatpush3.bf16.msra.mxu1 %v6151_v4  ;;  %7498 = vst [vmem:[#allocation2_spill] sm:$0xff] %v6377_v24  ;;  %7499 = vst [vmem:[#allocation3_spill] sm:$0xff] %v6379_v25  ;;  %v389_v31 = vrot.slane %v387_v22, 1  ;;  %v1997_v32 = vshrl.u32 %v6377_v24, 16  ;;  %v1999_v33 = vshll.u32 %v6377_v24, 16  ;;  %v2004_v34 = vshll.u32 %v6379_v25, 16 }
  0x18   : > { %5422 = vmatpush3.bf16.msra.mxu0 %v6152_v5  ;;  %5167 = vmatprep.subr.bf16.mxu1 %v6153_v6  ;;  %v394_v35 = vrot.slane %v392_v26, 1  ;;  %v400_v36 = vshll.u32 %v6384_v28, 16  ;;  %v6392_v37 = vcombine.low %v179_v23, %v180_v30  ;;  %v2008_v38 = vshrl.u32 %v6379_v25, 16  ;;  %v183_v52 = vld [vmem:[%s6354_s10 + $0x2c] sm:$0xf] }
  0x19   : > { %5423 = vmatprep.subr.bf16.mxu0 %v6154_v7  ;;  %v390_v39 = vor.u32 %v389_v31, %v385_v21  ;;  %v2001_v40 = vrot.slane %v1999_v33, 1  ;;  %v2006_v41 = vrot.slane %v2004_v34, 1  ;;  %v404_v49 = vshrl.u32 %v6384_v28, 16  ;;  %v184_v57 = vld [vmem:[%s6354_s10 + $0x30] sm:$0xf]  ;;  %v6177_v31 = vld [vmem:[%s7463_s1 + $0x8] sm:$0xff]  }
  0x1a   : > { %7500 = vst [vmem:[#allocation4_spill] sm:$0xff] %v6392_v37  ;;  %v398_v44 = vor.u32 %v396_v29, %v394_v35  ;;  %v2012_v45 = vshll.u32 %v6392_v37, 16  ;;  %v408_v50 = vshll.u32 %v6382_v27, 16  ;;  %v402_v53 = vrot.slane %v400_v36, 1  ;;  %v185_v5 = vld [vmem:[%s6354_s10 + $0x34] sm:$0xf] }
  0x1b   : > { %5168 = vmatpush3.bf16.msra.mxu1 %v6153_v6  ;;  %v395_v47 = vsel %vm383_vm0, %v390_v39, %v394_v35  ;;  %v2002_v48 = vor.u32 %v2001_v40, %v1997_v32  ;;  %v2010_v54 = vor.u32 %v2008_v38, %v2006_v41  ;;  %v6408_v56 = vcombine.low %v180_v30, %v181_v46  ;;  %v186_v6 = vld [vmem:[%s6354_s10 + $0x38] sm:$0xf]  ;;  %v188_v21 = vld [vmem:[%s6354_s10 + $0x40] sm:$0xf]  ;;  %v189_v29 = vld [vmem:[%s6354_s10 + $0x44] sm:$0xf] }
  0x1c   : > { %5424 = vmatpush3.bf16.msra.mxu0 %v6154_v7  ;;  %5169 = vmatprep.subr.bf16.mxu1 %v6155_v8  ;;  %v2014_v55 = vrot.slane %v2012_v45, 1  ;;  %v6412_v59 = vcombine.low %v181_v46, %v182_v51  ;;  %v2016_v60 = vshrl.u32 %v6392_v37, 16  ;;  %v410_v63 = vrot.slane %v408_v50, 1  ;;  %v190_v33 = vld [vmem:[%s6354_s10 + $0x48] sm:$0xf]  ;;  %v6186_v39 = vld [vmem:[%s7463_s1 + $0x10] sm:$0xff]  }
  0x1d   : > { %5425 = vmatprep.subr.bf16.mxu0 %v6156_v9  ;;  %5177 = vmatprep.mubr.bf16.mxu1 %v395_v47  ;;  %v2007_v58 = vsel %vm383_vm0, %v2002_v48, %v2006_v41  ;;  %v6421_v0 = vcombine.low %v182_v51, %v183_v52  ;;  %v406_v1 = vor.u32 %v404_v49, %v402_v53  ;;  %v416_v3 = vshll.u32 %v6408_v56, 16  ;;  %v6183_v51 = vld [vmem:[%s7463_s1 + $0x158] sm:$0xff]  }
  0x1e   : > { %7501 = vst [vmem:[#allocation5_spill] sm:$0xff] %v6412_v59  ;;  %5433 = vmatprep.mubr.bf16.mxu0 %v2007_v58  ;;  %v2020_v2 = vshll.u32 %v6412_v59, 16  ;;  %v6425_v4 = vcombine.low %v183_v52, %v184_v57  ;;  %v403_v7 = vsel %vm383_vm0, %v398_v44, %v402_v53  ;;  %v420_v14 = vshrl.u32 %v6408_v56, 16  ;;  %v6178_v44 = vld [vmem:[%s7463_s1 + $0x150] sm:$0xff]  }
  0x1f   : > { %5170 = vmatpush3.bf16.msra.mxu1 %v6155_v8  ;;  %v2015_v8 = vsel %vm383_vm0, %v2010_v54, %v2014_v55  ;;  %v2024_v17 = vshrl.u32 %v6412_v59, 16  ;;  %v424_v18 = vshll.u32 %v6421_v0, 16  ;;  %v6440_v19 = vcombine.low %v184_v57, %v185_v5  ;;  %v191_v54 = vld [vmem:[%s6354_s10 + $0x4c] sm:$0xf] }
  0x20   : > { %5426 = vmatpush3.bf16.msra.mxu0 %v6156_v9  ;;  %5171 = vmatprep.subr.bf16.mxu1 %v6157_v10  ;;  %7502 = vst [vmem:[#allocation6_spill] sm:$0xff] %v6425_v4  ;;  %v2018_v9 = vor.u32 %v2016_v60, %v2014_v55  ;;  %v2022_v11 = vrot.slane %v2020_v2, 1  ;;  %v2028_v13 = vshll.u32 %v6425_v4, 16  ;;  %v411_v22 = vsel %vm383_vm0, %v406_v1, %v410_v63 }
  0x21   : > { %5427 = vmatprep.subr.bf16.mxu0 %v6158_v12  ;;  %v418_v23 = vrot.slane %v416_v3, 1  ;;  %v2032_v26 = vshrl.u32 %v6425_v4, 16  ;;  %v426_v41 = vrot.slane %v424_v18, 1  ;;  %v6465_v47 = vcombine.low %v189_v29, %v190_v33 }
  0x22   : > { %v2023_v30 = vsel %vm383_vm0, %v2018_v9, %v2022_v11  ;;  %v2030_v35 = vrot.slane %v2028_v13, 1  ;;  %v2026_v40 = vor.u32 %v2024_v17, %v2022_v11  ;;  %v428_v48 = vshrl.u32 %v6421_v0, 16 }
  0x23   : > { %5172 = vmatpush3.bf16.msra.mxu1 %v6157_v10  ;;  %v6172_v10 = vld [vmem:[%s7463_s1 + $0x148] sm:$0xff]   ;;  %v422_v36 = vor.u32 %v420_v14, %v418_v23  ;;  %7505 = vst [vmem:[#allocation9_spill] sm:$0xff] %v6465_v47  ;;  %v436_v52 = vshrl.u32 %v6440_v19, 16  ;;  %v6489_v2 = vcombine.low %v188_v21, %v189_v29  ;;  %v6499_v14 = vcombine.low %v190_v33, %v191_v54  ;;  %v196_v29 = vld [vmem:[%s6354_s10 + $0x60] sm:$0xf] }
  0x24   : > { %5428 = vmatpush3.bf16.msra.mxu0 %v6158_v12  ;;  %5173 = vmatprep.subr.bf16.mxu1 %v6159_v15  ;;  %v412_v12 = vshrl.u32 %v6382_v27, 16  ;;  %v2034_v45 = vor.u32 %v2032_v26, %v2030_v35  ;;  %v2031_v55 = vsel %vm383_vm0, %v2026_v40, %v2030_v35  ;;  %v195_v26 = vld [vmem:[%s6354_s10 + $0x5c] sm:$0xf] }
  0x25   : > { %5429 = vmatprep.subr.bf16.mxu0 %v6160_v20  ;;  %v6480_v57 = vsel %vm383_vm0, %v422_v36, %v426_v41  ;;  %v448_v18 = vshll.u32 %v6489_v2, 16  ;;  %v452_v35 = vshrl.u32 %v6489_v2, 16  ;;  %v456_v36 = vshll.u32 %v6499_v14, 16 }
  0x26   : > { %v414_v34 = vor.u32 %v412_v12, %v410_v63  ;;  %7507 = vst [vmem:[#allocation11_spill] sm:$0xff] %v6480_v57  ;;  %v6195_v63 = vld [vmem:[%s7463_s1 + $0x18] sm:$0xff]  }
  0x27   : > { %5174 = vmatpush3.bf16.msra.mxu1 %v6159_v15  ;;  %v187_v15 = vld [vmem:[%s6354_s10 + $0x3c] sm:$0xf] }
  0x28   : > { %5430 = vmatpush3.bf16.msra.mxu0 %v6160_v20  ;;  %5175 = vmatprep.subr.bf16.mxu1 %v6161_v42  ;;  %v6442_v20 = vcombine.low %v185_v5, %v186_v6  ;;  %v6454_v38 = vcombine.low %v186_v6, %v187_v15  ;;  %v6469_v49 = vsel %vm383_vm0, %v414_v34, %v418_v23  ;;  %v2052_v5 = vshll.u32 %v6465_v47, 16  ;;  %v6203_v23 = vld [vmem:[%s7463_s1 + $0x20] sm:$0xff]  }
  0x29   : > { %5431 = vmatprep.subr.bf16.mxu0 %v6162_v43  ;;  %7506 = vst [vmem:[#allocation10_spill] sm:$0xff] %v6469_v49  ;;  %v430_v6 = vor.u32 %v428_v48, %v426_v41  ;;  %v6190_v41 = vld [vmem:[%s7463_s1 + $0x168] sm:$0xff]  }
  0x2a   : > { %7503 = vst [vmem:[#allocation7_spill] sm:$0xff] %v6442_v20  ;;  %v2036_v32 = vshll.u32 %v6442_v20, 16  ;;  %v440_v53 = vshll.u32 %v6454_v38, 16  ;;  %v2040_v60 = vshrl.u32 %v6442_v20, 16  ;;  %v444_v13 = vshrl.u32 %v6454_v38, 16 }
  0x2b   : > { %5176 = vmatpush3.bf16.msra.mxu1 %v6161_v42  ;;  %v432_v42 = vshll.u32 %v6440_v19, 16  ;;  %v2054_v17 = vrot.slane %v2052_v5, 1  ;;  %v198_v48 = vld [vmem:[%s6354_s10 + $0x68] sm:$0xf] }
  0x2c   : > { %5432 = vmatpush3.bf16.msra.mxu0 %v6162_v43  ;;  %5225 = vmatprep.subr.bf16.mxu1 %v6169_v61  ;;  %v6460_v43 = vcombine.low %v187_v15, %v188_v21  ;;  %v2038_v46 = vrot.slane %v2036_v32, 1  ;;  %v6189_v21 = vld [vmem:[%s7463_s1 + $0x160] sm:$0xff]   ;;  %v2056_v32 = vshrl.u32 %v6465_v47, 16 }
  0x2d   : > { %5481 = vmatprep.subr.bf16.mxu0 %v6171_v62  ;;  %v434_v58 = vrot.slane %v432_v42, 1 }
  0x2e   : > { %5178 = vmatmul.mubr.bf16.vlgmr.msra.gmra.mrb[0].mxu1 %v403_v7  ;;  %7504 = vst [vmem:[#allocation8_spill] sm:$0xff] %v6460_v43  ;;  %v2044_v50 = vshll.u32 %v6460_v43, 16  ;;  %v2039_v1 = vsel %vm383_vm0, %v2034_v45, %v2038_v46  ;;  %v2048_v3 = vshrl.u32 %v6460_v43, 16  ;;  %v194_v7 = vld [vmem:[%s6354_s10 + $0x58] sm:$0xf]  ;;  %v2042_v12 = vor.u32 %v2040_v60, %v2038_v46 }
  0x2f   : > { %5434 = vmatmul.mubr.bf16.vlgmr.msra.gmra.mrb[0].mxu0 %v2015_v8  ;;  %5226 = vmatpush3.bf16.msra.mxu1 %v6169_v61  ;;  %v192_v61 = vld [vmem:[%s6354_s10 + $0x50] sm:$0xf]  ;;  %v438_v9 = vor.u32 %v436_v52, %v434_v58  ;;  %v197_v46 = vld [vmem:[%s6354_s10 + $0x64] sm:$0xf] }
  0x30   : > { %5482 = vmatpush3.bf16.msra.mxu0 %v6171_v62  ;;  %5181 = vmatprep.mubr.bf16.mxu1 %v411_v22  ;;  %v193_v62 = vld [vmem:[%s6354_s10 + $0x54] sm:$0xf]  ;;  %v2046_v8 = vrot.slane %v2044_v50, 1  ;;  %v6496_v11 = vcombine.low %v191_v54, %v192_v61  ;;  %v6207_v54 = vld [vmem:[%s7463_s1 + $0x28] sm:$0xff]  }
  0x31   : > { %5483 = vmatprep.subr.bf16.mxu0 %v6172_v10  ;;  %5437 = vmatprep.mubr.bf16.mxu0 %v2023_v30  ;;  %v6505_v22 = vcombine.low %v193_v62, %v194_v7  ;;  %v6513_v30 = vsel %vm383_vm0, %v430_v6, %v434_v58  ;;  %v6530_v45 = vcombine.low %v192_v61, %v193_v62  ;;  %v458_v58 = vrot.slane %v456_v36, 1  ;;  %v6196_v62 = vld [vmem:[%s7463_s1 + $0x170] sm:$0xff]  }
  0x32   : > { %5227 = vmatprep.subr.bf16.mxu1 %v6177_v31  ;;  %7508 = vst [vmem:[#allocation12_spill] sm:$0xff] %v6496_v11  ;;  %v2050_v15 = vor.u32 %v2048_v3, %v2046_v8  ;;  %7510 = vst [vmem:[#allocation14_spill] sm:$0xff] %v6513_v30  ;;  %v2060_v33 = vshll.u32 %v6496_v11, 16  ;;  %v2047_v34 = vsel %vm383_vm0, %v2042_v12, %v2046_v8  ;;  %v2064_v42 = vshrl.u32 %v6496_v11, 16 }
  0x33   : > { %5228 = vmatpush3.bf16.msra.mxu1 %v6177_v31  ;;  %7509 = vst [vmem:[#allocation13_spill] sm:$0xff] %v6505_v22  ;;  %v6540_v61 = vcombine.low %v194_v7, %v195_v26  ;;  %v464_v3 = vshll.u32 %v6530_v45, 16  ;;  %v460_v6 = vshrl.u32 %v6499_v14, 16  ;;  %v2072_v7 = vshrl.u32 %v6505_v22, 16 }
  0x34   : > { %5484 = vmatpush3.bf16.msra.mxu0 %v6172_v10  ;;  %5229 = vmatprep.subr.bf16.mxu1 %v6186_v39  ;;  %v442_v10 = vrot.slane %v440_v53, 1  ;;  %v2055_v40 = vsel %vm383_vm0, %v2050_v15, %v2054_v17  ;;  %v2062_v52 = vrot.slane %v2060_v33, 1  ;;  %v6535_v53 = vcombine.low %v195_v26, %v196_v29  ;;  %v6202_v15 = vld [vmem:[%s7463_s1 + $0x178] sm:$0xff]   ;;  %v200_v26 = vld [vmem:[%s6354_s10 + $0x70] sm:$0xf] }
  0x35   : > { %5485 = vmatprep.subr.bf16.mxu0 %v6178_v44  ;;  %v468_v12 = vshrl.u32 %v6530_v45, 16  ;;  %v6569_v33 = vcombine.low %v196_v29, %v197_v46 }
  0x36   : > { %5182 = vmatmul.mubr.bf16.gmra.mrb[4].mxu1 %v6469_v49  ;;  %v6516_v31 = vsel %vm383_vm0, %v438_v9, %v442_v10  ;;  %v446_v50 = vor.u32 %v444_v13, %v442_v10  ;;  %v2076_v8 = vshll.u32 %v6535_v53, 16  ;;  %v472_v13 = vshll.u32 %v6540_v61, 16  ;;  %v6755_v49 = vld [vmem:[%s6354_s10 + $0xb4] sm:$0xf] }
  0x37   : > { %5438 = vmatmul.mubr.bf16.gmra.mrb[4].mxu0 %v2031_v55  ;;  %5185 = vmatprep.mubr.bf16.mxu1 %v6480_v57  ;;  %7511 = vst [vmem:[#allocation15_spill] sm:$0xff] %v6516_v31  ;;  %v6752_v57 = vld [vmem:[%s6354_s10 + $0xb0] sm:$0xf] }
  0x38   : > { %5486 = vmatpush3.bf16.msra.mxu0 %v6178_v44  ;;  %5441 = vmatprep.mubr.bf16.mxu0 %v2039_v1  ;;  %v450_v44 = vrot.slane %v448_v18, 1  ;;  %v6545_v1 = vcombine.low %v197_v46, %v198_v48  ;;  %v2080_v18 = vshrl.u32 %v6535_v53, 16 }
  0x39   : > { %5487 = vmatprep.subr.bf16.mxu0 %v6183_v51  ;;  %5230 = vmatpush3.bf16.msra.mxu1 %v6186_v39  ;;  %v2068_v39 = vshll.u32 %v6505_v22, 16 }
  0x3a   : > { %5231 = vmatprep.subr.bf16.mxu1 %v6195_v63  ;;  %v454_v55 = vor.u32 %v452_v35, %v450_v44  ;;  %v6549_v5 = vsel %vm383_vm0, %v446_v50, %v450_v44  ;;  %v462_v35 = vor.u32 %v460_v6, %v458_v58  ;;  %v6582_v50 = vld [vmem:[%s7463_s1 + $0x180] sm:$0xff]   ;;  %v484_v6 = vshrl.u32 %v6569_v33, 16 }
  0x3b   : > { %v2070_v60 = vrot.slane %v2068_v39, 1  ;;  %7512 = vst [vmem:[#allocation16_spill] sm:$0xff] %v6549_v5  ;;  %v2078_v39 = vrot.slane %v2076_v8, 1 }
  0x3c   : > { %5488 = vmatpush3.bf16.msra.mxu0 %v6183_v51  ;;  %v2058_v51 = vor.u32 %v2056_v32, %v2054_v17  ;;  %v6556_v10 = vsel %vm383_vm0, %v454_v55, %v458_v58  ;;  %v466_v32 = vrot.slane %v464_v3, 1 }
  0x3d   : > { %5489 = vmatprep.subr.bf16.mxu0 %v6189_v21  ;;  %5232 = vmatpush3.bf16.msra.mxu1 %v6195_v63  ;;  %v2066_v63 = vor.u32 %v2064_v42, %v2062_v52  ;;  %7513 = vst [vmem:[#allocation17_spill] sm:$0xff] %v6556_v10  ;;  %v2074_v36 = vor.u32 %v2072_v7, %v2070_v60 }
  0x3e   : > { %5186 = vmatmul.mubr.bf16.gmra.mrb[8].mxu1 %v6513_v30  ;;  %5233 = vmatprep.subr.bf16.mxu1 %v6203_v23  ;;  %v2063_v9 = vsel %vm383_vm0, %v2058_v51, %v2062_v52  ;;  %v2082_v44 = vor.u32 %v2080_v18, %v2078_v39  ;;  %v480_v51 = vshll.u32 %v6569_v33, 16  ;;  %v6586_v52 = vld [vmem:[%s6354_s10 + $0x74] sm:$0xf]  ;;  %v6592_v55 = vsel %vm383_vm0, %v462_v35, %v466_v32 }
  0x3f   : > { %5442 = vmatmul.mubr.bf16.gmra.mrb[8].mxu0 %v2047_v34  ;;  %5189 = vmatprep.mubr.bf16.mxu1 %v6516_v31  ;;  %v2071_v17 = vsel %vm383_vm0, %v2066_v63, %v2070_v60  ;;  %v6213_v34 = vld [vmem:[%s7463_s1 + $0x30] sm:$0xff]   ;;  %7514 = vst [vmem:[#allocation18_spill] sm:$0xff] %v6592_v55  ;;  %v2079_v58 = vsel %vm383_vm0, %v2074_v36, %v2078_v39  ;;  %v476_v60 = vshrl.u32 %v6540_v61, 16  ;;  %v2555_v35 = vrot.slane %v6379_v25, 1  ;;  %v6630_v36 = vld [vmem:[%s6354_s10 + $0x80] sm:$0xf] }
  0x40   : > { %5445 = vmatprep.mubr.bf16.mxu0 %v2055_v40  ;;  %5490 = vmatpush3.bf16.msra.mxu0 %v6189_v21  ;;  %v2084_v21 = vshll.u32 %v6545_v1, 16  ;;  %v470_v40 = vor.u32 %v468_v12, %v466_v32  ;;  %v482_v12 = vrot.slane %v480_v51, 1  ;;  %v6633_v39 = vld [vmem:[%s6354_s10 + $0x84] sm:$0xf]  ;;  %v2567_v31 = vrot.slane %v6465_v47, 1 }
  0x41   : > { %5491 = vmatprep.subr.bf16.mxu0 %v6190_v41  ;;  %5234 = vmatpush3.bf16.msra.mxu1 %v6203_v23  ;;  %v199_v23 = vld [vmem:[%s6354_s10 + $0x6c] sm:$0xf] }
  0x42   : > { %5235 = vmatprep.subr.bf16.mxu1 %v6207_v54  ;;  %v6575_v42 = vcombine.low %v198_v48, %v199_v23  ;;  %v6577_v29 = vcombine.low %v199_v23, %v200_v26  ;;  %v2086_v46 = vrot.slane %v2084_v21, 1  ;;  %v6217_v48 = vld [vmem:[%s7463_s1 + $0x38] sm:$0xff]   ;;  %v486_v23 = vor.u32 %v484_v6, %v482_v12 }
  0x44   : > { %5492 = vmatpush3.bf16.msra.mxu0 %v6190_v41  ;;  %v474_v41 = vrot.slane %v472_v13, 1  ;;  %v2092_v3 = vshll.u32 %v6577_v29, 16  ;;  %v488_v7 = vshll.u32 %v6575_v42, 16  ;;  %v2087_v8 = vsel %vm383_vm0, %v2082_v44, %v2086_v46 }
  0x45   : > { %5493 = vmatprep.subr.bf16.mxu0 %v6196_v62  ;;  %5236 = vmatpush3.bf16.msra.mxu1 %v6207_v54  ;;  %v6598_v54 = vld [vmem:[%s6354_s10 + $0x78] sm:$0xf]  ;;  %v6613_v13 = vcombine.low %v200_v26, %v6586_v52  ;;  %v492_v44 = vshrl.u32 %v6575_v42, 16 }
  0x46   : > { %5190 = vmatmul.mubr.bf16.gmra.mrb[12].mxu1 %v6549_v5  ;;  %5237 = vmatprep.subr.bf16.mxu1 %v6213_v34  ;;  %v6601_v63 = vsel %vm383_vm0, %v470_v40, %v474_v41  ;;  %v6621_v21 = vrot.slane %v2092_v3, 1  ;;  %v490_v32 = vrot.slane %v488_v7, 1  ;;  %v6653_v3 = vld [vmem:[%s6354_s10 + $0x8c] sm:$0xf]  ;;  %v6658_v7 = vcombine.low %v6630_v36, %v6633_v39 }
  0x47   : > { %5446 = vmatmul.mubr.bf16.gmra.mrb[12].mxu0 %v2063_v9  ;;  %5193 = vmatprep.mubr.bf16.mxu1 %v6556_v10  ;;  %7515 = vst [vmem:[#allocation19_spill] sm:$0xff] %v6601_v63  ;;  %v6609_v9 = vld [vmem:[%s6354_s10 + $0x7c] sm:$0xf]  ;;  %v496_v40 = vshll.u32 %v6613_v13, 16  ;;  %v6715_v10 = vld [vmem:[%s6354_s10 + $0xac] sm:$0xf] }
  0x48   : > { %5449 = vmatprep.mubr.bf16.mxu0 %v2071_v17  ;;  %5494 = vmatpush3.bf16.msra.mxu0 %v6196_v62  ;;  %v2088_v62 = vshrl.u32 %v6545_v1, 16  ;;  %v478_v17 = vor.u32 %v476_v60, %v474_v41  ;;  %7516 = vst [vmem:[#allocation20_spill] sm:$0xff] %v6621_v21  ;;  %v6625_v26 = vcombine.low %v6598_v54, %v6609_v9 }
  0x49   : > { %5495 = vmatprep.subr.bf16.mxu0 %v6202_v15  ;;  %5238 = vmatpush3.bf16.msra.mxu1 %v6213_v34  ;;  %v2554_v34 = vrot.slane %v6377_v24, 1  ;;  %v6644_v51 = vsel %vm383_vm0, %v486_v23, %v490_v32  ;;  %v498_v6 = vrot.slane %v496_v40, 1  ;;  %v6668_v40 = vld [vmem:[%s6354_s10 + $0x90] sm:$0xf] }
  0x4a   : > { %5239 = vmatprep.subr.bf16.mxu1 %v6217_v48  ;;  %v2090_v18 = vor.u32 %v2088_v62, %v2086_v46  ;;  %v6638_v41 = vsel %vm383_vm0, %v478_v17, %v482_v12  ;;  %7518 = vst [vmem:[#allocation22_spill] sm:$0xff] %v6644_v51  ;;  %v6650_v62 = vld [vmem:[%s6354_s10 + $0x88] sm:$0xf]  ;;  %v2557_v12 = vrot.slane %v6392_v37, 1  ;;  %v516_v37 = vshrl.u32 %v6658_v7, 16 }
  0x4b   : > { %7517 = vst [vmem:[#allocation21_spill] sm:$0xff] %v6638_v41  ;;  %v2556_v60 = vsel %vm1191_vm1, %v2554_v34, %v2555_v35  ;;  %v6664_v23 = vcombine.low %v6650_v62, %v6653_v3  ;;  %v2559_v34 = vrot.slane %v6412_v59, 1 }
  0x4c   : > { %5496 = vmatpush3.bf16.msra.mxu0 %v6202_v15  ;;  %v6618_v15 = vld [vmem:[%s7463_s1 + $0x80] sm:$0xff]   ;;  %v2095_v46 = vsel %vm383_vm0, %v2090_v18, %v6621_v21  ;;  %v6671_v21 = vld [vmem:[%s6354_s10 + $0x94] sm:$0xf] }
  0x4d   : > { %5545 = vmatprep.subr.bf16.mxu0 %v6582_v50  ;;  %5240 = vmatpush3.bf16.msra.mxu1 %v6217_v48  ;;  %v504_v48 = vshll.u32 %v6625_v26, 16  ;;  %v520_v25 = vshll.u32 %v6664_v23, 16  ;;  %v6692_v24 = vcombine.low %v6668_v40, %v6671_v21 }
  0x4e   : > { %5194 = vmatmul.mubr.bf16.gmra.mrb[16].mxu1 %v6592_v55  ;;  %5289 = vmatprep.subr.bf16.mxu1 %v6618_v15  ;;  %v6712_v55 = vld [vmem:[%s6354_s10 + $0xa8] sm:$0xf] }
  0x4f   : > { %5450 = vmatmul.mubr.bf16.gmra.mrb[16].mxu0 %v2079_v58  ;;  %5197 = vmatprep.mubr.bf16.mxu1 %v6601_v63  ;;  %v500_v58 = vshrl.u32 %v6613_v13, 16  ;;  %v506_v18 = vrot.slane %v504_v48, 1  ;;  %v2558_v48 = vsel %vm1191_vm1, %v2555_v35, %v2557_v12  ;;  %7521 = vst [vmem:[#allocation25_spill] sm:$0xff] %v6692_v24  ;;  %v6208_v35 = vld [vmem:[%s7463_s1 + $0x188] sm:$0xff]  }
  0x50   : > { %5453 = vmatprep.mubr.bf16.mxu0 %v2087_v8  ;;  %v494_v8 = vor.u32 %v492_v44, %v490_v32  ;;  %v6675_v32 = vld [vmem:[%s6354_s10 + $0x98] sm:$0xf]  ;;  %v6678_v44 = vld [vmem:[%s6354_s10 + $0x9c] sm:$0xf] }
  0x51   : > { %v502_v17 = vor.u32 %v500_v58, %v498_v6 }
  0x52   : > { %v6681_v58 = vsel %vm383_vm0, %v494_v8, %v498_v6  ;;  %v2560_v6 = vsel %vm1191_vm1, %v2557_v12, %v2559_v34  ;;  %v6709_v12 = vcombine.low %v6675_v32, %v6678_v44 }
  0x53   : > { %7519 = vst [vmem:[#allocation23_spill] sm:$0xff] %v6681_v58  ;;  %v6686_v59 = vsel %vm383_vm0, %v502_v17, %v506_v18  ;;  %v2561_v17 = vrot.slane %v6425_v4, 1  ;;  %v522_v4 = vrot.slane %v520_v25, 1 }
  0x54   : > { %7520 = vst [vmem:[#allocation24_spill] sm:$0xff] %v6686_v59  ;;  %7522 = vst [vmem:[#allocation26_spill] sm:$0xff] %v6709_v12  ;;  %v536_v25 = vshll.u32 %v6709_v12, 16  ;;  %v540_v30 = vshrl.u32 %v6709_v12, 16  ;;  %v6235_v12 = vld [vmem:[%s7463_s1 + $0x1b0] sm:$0xff]  }
  0x56   : > { %5198 = vmatmul.mubr.bf16.gmra.mrb[20].mxu1 %v6638_v41  ;;  %v6704_v41 = vld [vmem:[%s6354_s10 + $0xa4] sm:$0xf] }
  0x57   : > { %5454 = vmatmul.mubr.bf16.gmra.mrb[20].mxu0 %v2095_v46  ;;  %5201 = vmatprep.mubr.bf16.mxu1 %v6644_v51  ;;  %v512_v46 = vshll.u32 %v6658_v7, 16  ;;  %v6701_v51 = vld [vmem:[%s6354_s10 + $0xa0] sm:$0xf] }
  0x58   : > { %5497 = vmatprep.mubr.bf16.mxu0 %v2556_v60  ;;  %v508_v60 = vshrl.u32 %v6625_v26, 16 }
  0x59   : > { %v514_v8 = vrot.slane %v512_v46, 1 }
  0x5a   : > { %v510_v63 = vor.u32 %v508_v60, %v506_v18  ;;  %v6214_v18 = vld [vmem:[%s7463_s1 + $0x190] sm:$0xff]   ;;  %v2562_v60 = vsel %vm1191_vm1, %v2559_v34, %v2561_v17 }
  0x5b   : > { %v518_v46 = vor.u32 %v516_v37, %v514_v8  ;;  %v6732_v37 = vcombine.low %v6701_v51, %v6704_v41 }
  0x5c   : > { %v6726_v5 = vsel %vm383_vm0, %v510_v63, %v514_v8  ;;  %v532_v8 = vshrl.u32 %v6692_v24, 16 }
  0x5d   : > { %7523 = vst [vmem:[#allocation27_spill] sm:$0xff] %v6726_v5  ;;  %7524 = vst [vmem:[#allocation28_spill] sm:$0xff] %v6732_v37  ;;  %v6738_v34 = vsel %vm383_vm0, %v518_v46, %v522_v4  ;;  %v544_v46 = vshll.u32 %v6732_v37, 16 }
  0x5e   : > { %5202 = vmatmul.mubr.bf16.gmra.mrb[24].mxu1 %v6681_v58  ;;  %v528_v58 = vshll.u32 %v6692_v24, 16  ;;  %7525 = vst [vmem:[#allocation29_spill] sm:$0xff] %v6738_v34 }
  0x5f   : > { %5498 = vmatmul.mubr.bf16.vlgmr.msra.gmra.mrb[0].mxu0 %v2558_v48  ;;  %5205 = vmatprep.mubr.bf16.mxu1 %v6686_v59  ;;  %v2563_v48 = vrot.slane %v6442_v20, 1  ;;  %v524_v59 = vshrl.u32 %v6664_v23, 16 }
  0x60   : > { %5546 = vmatpush3.bf16.msra.mxu0 %v6582_v50  ;;  %5501 = vmatprep.mubr.bf16.mxu0 %v2560_v6  ;;  %v2565_v50 = vrot.slane %v6460_v43, 1  ;;  %v6218_v6 = vld [vmem:[%s7463_s1 + $0x198] sm:$0xff]   ;;  %v530_v63 = vrot.slane %v528_v58, 1  ;;  %v6743_v43 = vcombine.low %v6712_v55, %v6715_v10 }
  0x61   : > { %5547 = vmatprep.subr.bf16.mxu0 %v6208_v35  ;;  %v2564_v20 = vsel %vm1191_vm1, %v2561_v17, %v2563_v48  ;;  %v526_v58 = vor.u32 %v524_v59, %v522_v4  ;;  %v6225_v17 = vld [vmem:[%s7463_s1 + $0x1a0] sm:$0xff]   ;;  %v6766_v4 = vld [vmem:[%s6354_s10 + $0xb8] sm:$0xf] }
  0x62   : > { %v534_v47 = vor.u32 %v532_v8, %v530_v63  ;;  %v6780_v8 = vcombine.low %v6752_v57, %v6755_v49 }
  0x63   : > { %v6763_v59 = vsel %vm383_vm0, %v526_v58, %v530_v63  ;;  %v2568_v63 = vsel %vm1191_vm1, %v2565_v50, %v2567_v31  ;;  %v546_v58 = vrot.slane %v544_v46, 1 }
  0x64   : > { %5548 = vmatpush3.bf16.msra.mxu0 %v6208_v35  ;;  %v538_v35 = vrot.slane %v536_v25, 1  ;;  %v6769_v25 = vld [vmem:[%s6354_s10 + $0xbc] sm:$0xf]  ;;  %v560_v24 = vshll.u32 %v6780_v8, 16 }
  0x65   : > { %5549 = vmatprep.subr.bf16.mxu0 %v6214_v18  ;;  %v6793_v46 = vcombine.low %v6766_v4, %v6769_v25 }
  0x66   : > { %5206 = vmatmul.mubr.bf16.gmra.mrb[28].mxu1 %v6726_v5  ;;  %v552_v5 = vshll.u32 %v6743_v43, 16 }
  0x67   : > { %5502 = vmatmul.mubr.bf16.gmra.mrb[4].mxu0 %v2562_v60  ;;  %5209 = vmatprep.mubr.bf16.mxu1 %v6738_v34  ;;  %v548_v60 = vshrl.u32 %v6732_v37, 16  ;;  %v6229_v34 = vld [vmem:[%s7463_s1 + $0x1a8] sm:$0xff]   ;;  %v542_v37 = vor.u32 %v540_v30, %v538_v35 }
  0x68   : > { %5505 = vmatprep.mubr.bf16.mxu0 %v2564_v20  ;;  %5550 = vmatpush3.bf16.msra.mxu0 %v6214_v18  ;;  %v2566_v20 = vsel %vm1191_vm1, %v2563_v48, %v2565_v50  ;;  %v6776_v18 = vsel %vm383_vm0, %v534_v47, %v538_v35  ;;  %v2569_v48 = vrot.slane %v6496_v11, 1  ;;  %v2571_v47 = vrot.slane %v6505_v22, 1 }
  0x69   : > { %5551 = vmatprep.subr.bf16.mxu0 %v6218_v6  ;;  %7526 = vst [vmem:[#allocation30_spill] sm:$0xff] %v6776_v18  ;;  %v554_v50 = vrot.slane %v552_v5, 1  ;;  %v6796_v30 = vsel %vm383_vm0, %v542_v37, %v546_v58  ;;  %v556_v35 = vshrl.u32 %v6743_v43, 16  ;;  %v564_v5 = vshrl.u32 %v6780_v8, 16  ;;  %v6238_v37 = vld [vmem:[%s7463_s1 + $0x1b8] sm:$0xff]  }
  0x6c   : > { %5552 = vmatpush3.bf16.msra.mxu0 %v6218_v6  ;;  %v550_v6 = vor.u32 %v548_v60, %v546_v58  ;;  %v568_v60 = vshll.u32 %v6793_v46, 16  ;;  %v558_v58 = vor.u32 %v556_v35, %v554_v50  ;;  %v572_v35 = vshrl.u32 %v6793_v46, 16 }
  0x6d   : > { %5553 = vmatprep.subr.bf16.mxu0 %v6225_v17 }
  0x6e   : > { %5210 = vmatmul.mubr.bf16.gmra.mrb[32].mxu1 %v6763_v59  ;;  %v6801_v22 = vsel %vm383_vm0, %v550_v6, %v554_v50  ;;  %v570_v11 = vrot.slane %v568_v60, 1  ;;  %v6837_v60 = vcombine.low %v6586_v52, %v6598_v54 }
  0x6f   : > { %5506 = vmatmul.mubr.bf16.gmra.mrb[8].mxu0 %v2566_v20  ;;  %5213 = vmatprep.mubr.bf16.mxu1 %v6776_v18  ;;  %v2570_v20 = vsel %vm1191_vm1, %v2567_v31, %v2569_v48  ;;  %v562_v31 = vrot.slane %v560_v24, 1  ;;  %v2575_v18 = vrot.slane %v6545_v1, 1  ;;  %v6823_v24 = vld [vmem:[%s7463_s1 + $0x1c0] sm:$0xff]  }
  0x70   : > { %5509 = vmatprep.mubr.bf16.mxu0 %v2568_v63  ;;  %5554 = vmatpush3.bf16.msra.mxu0 %v6225_v17  ;;  %v6806_v63 = vld [vmem:[%s6354_s10 + $0xc0] sm:$0xf]  ;;  %v2572_v17 = vsel %vm1191_vm1, %v2569_v48, %v2571_v47 }
  0x71   : > { %5555 = vmatprep.subr.bf16.mxu0 %v6229_v34  ;;  %v6816_v6 = vcombine.low %v6806_v63, %v6806_v63  ;;  %v566_v48 = vor.u32 %v564_v5, %v562_v31  ;;  %v6826_v50 = vsel %vm383_vm0, %v558_v58, %v562_v31  ;;  %v6842_v31 = vor.u32 %v572_v35, %v570_v11  ;;  %v6859_v35 = vld [vmem:[%s6354_s10] sm:$0xff]  }
  0x72   : > { %v2579_v58 = vrot.slane %v6837_v60, 1 }
  0x73   : > { %v6832_v5 = vsel %vm383_vm0, %v566_v48, %v570_v11  ;;  %v6856_v11 = vcombine.low %v6633_v39, %v6650_v62  ;;  %v221_v39 = vld [vmem:[%s6354_s10 + $0xc4] sm:$0xf] }
  0x74   : > { %5556 = vmatpush3.bf16.msra.mxu0 %v6229_v34  ;;  %v2573_v34 = vrot.slane %v6535_v53, 1 }
  0x75   : > { %5557 = vmatprep.subr.bf16.mxu0 %v6235_v12 }
  0x76   : > { %5214 = vmatmul.mubr.bf16.gmra.mrb[36].mxu1 %v6796_v30 }
  0x77   : > { %5510 = vmatmul.mubr.bf16.gmra.mrb[12].mxu0 %v2570_v20  ;;  %5217 = vmatprep.mubr.bf16.mxu1 %v6801_v22  ;;  %v576_v20 = vshll.u32 %v6816_v6, 16 }
  0x78   : > { %5513 = vmatprep.mubr.bf16.mxu0 %v2572_v17  ;;  %5558 = vmatpush3.bf16.msra.mxu0 %v6235_v12  ;;  %v2574_v17 = vsel %vm1191_vm1, %v2571_v47, %v2573_v34  ;;  %v2576_v12 = vsel %vm1191_vm1, %v2573_v34, %v2575_v18  ;;  %v6851_v34 = vcombine.low %v6609_v9, %v6630_v36  ;;  %v2583_v9 = vrot.slane %v6856_v11, 1 }
  0x79   : > { %5559 = vmatprep.subr.bf16.mxu0 %v6238_v37  ;;  %v578_v47 = vrot.slane %v576_v20, 1  ;;  %v6867_v20 = vcombine.low %v6653_v3, %v6668_v40 }
  0x7b   : > { %v579_v52 = vsel %vm383_vm0, %v6842_v31, %v578_v47  ;;  %v6879_v47 = vcombine.low %v6806_v63, %v221_v39  ;;  %v2585_v40 = vrot.slane %v6867_v20, 1 }
  0x7c   : > { %5560 = vmatpush3.bf16.msra.mxu0 %v6238_v37  ;;  %v2577_v37 = vrot.slane %v6577_v29, 1 }
  0x7d   : > { %5609 = vmatprep.subr.bf16.mxu0 %v6823_v24 }
  0x7e   : > { %5218 = vmatmul.mubr.bf16.gmra.mrb[40].mxu1 %v6826_v50  ;;  %v2578_v54 = vsel %vm1191_vm1, %v2575_v18, %v2577_v37  ;;  %v2580_v48 = vsel %vm1191_vm1, %v2577_v37, %v2579_v58  ;;  %v2581_v18 = vrot.slane %v6851_v34, 1  ;;  %v222_v37 = vld [vmem:[%s6354_s10 + $0xc8] sm:$0xf] }
  0x7f   : > { %5514 = vmatmul.mubr.bf16.gmra.mrb[16].mxu0 %v2574_v17  ;;  %5221 = vmatprep.mubr.bf16.mxu1 %v6832_v5  ;;  %v6228_v17 = vld [vmem:[%s7463_s1 + $0x88] sm:$0xff]  }
  0x80   : > { %5517 = vmatprep.mubr.bf16.mxu0 %v2576_v12  ;;  %v2582_v36 = vsel %vm1191_vm1, %v2579_v58, %v2581_v18  ;;  %v2584_v62 = vsel %vm1191_vm1, %v2581_v18, %v2583_v9  ;;  %v6876_v12 = vcombine.low %v6671_v21, %v6675_v32  ;;  %v223_v58 = vld [vmem:[%s6354_s10 + $0xcc] sm:$0xf]  ;;  %v6233_v21 = vld [vmem:[%s7463_s1 + $0x90] sm:$0xff]   ;;  %v6237_v18 = vld [vmem:[%s7463_s1 + $0x98] sm:$0xff]  }
  0x81   : > { %v6885_v3 = vcombine.low %v222_v37, %v223_v58 }
  0x82   : > { %v2587_v32 = vrot.slane %v6876_v12, 1 }
  0x86   : > { %5222 = vmatmul.mubr.bf16.gmra.mrb[44].mxu1 %v579_v52  ;;  %v2586_v52 = vsel %vm1191_vm1, %v2583_v9, %v2585_v40  ;;  %v6916_v9 = vcombine.low %v6715_v10, %v6752_v57 }
  0x87   : > { %5518 = vmatmul.mubr.bf16.gmra.mrb[20].mxu0 %v2578_v54  ;;  %5241 = vmatprep.mubr.bf16.mxu1 %v6859_v35  ;;  %v2588_v54 = vsel %vm1191_vm1, %v2585_v40, %v2587_v32 }
  0x88   : > { %5521 = vmatprep.mubr.bf16.mxu0 %v2580_v48  ;;  %v6901_v48 = vcombine.low %v6704_v41, %v6712_v55  ;;  %v6241_v55 = vld [vmem:[%s7463_s1 + $0xa0] sm:$0xff]   ;;  %v2593_v57 = vrot.slane %v6916_v9, 1 }
  0x8e   : > { %5242 = vmatmul.mubr.bf16.vlgmr.msra.gmra.mrb[0].mxu1 %v6368_v16 }
  0x8f   : > { %5522 = vmatmul.mubr.bf16.gmra.mrb[24].mxu0 %v2582_v36  ;;  %5290 = vmatpush3.bf16.msra.mxu1 %v6618_v15  ;;  %v6896_v15 = vcombine.low %v6678_v44, %v6701_v51  ;;  %v2591_v44 = vrot.slane %v6901_v48, 1 }
  0x90   : > { %5245 = vmatprep.mubr.bf16.mxu1 %v6384_v28  ;;  %5525 = vmatprep.mubr.bf16.mxu0 %v2584_v62  ;;  %v6921_v62 = vcombine.low %v6755_v49, %v6766_v4  ;;  %v6245_v49 = vld [vmem:[%s7463_s1 + $0xb0] sm:$0xff]   ;;  %v6935_v4 = vcombine.low %v6769_v25, %v6806_v63 }
  0x91   : > { %5291 = vmatprep.subr.bf16.mxu1 %v6228_v17  ;;  %v2589_v51 = vrot.slane %v6896_v15, 1  ;;  %v2594_v40 = vsel %vm1191_vm1, %v2591_v44, %v2593_v57 }
  0x92   : > { %v2595_v10 = vrot.slane %v6921_v62, 1  ;;  %v2597_v25 = vrot.slane %v6935_v4, 1 }
  0x93   : > { %5292 = vmatpush3.bf16.msra.mxu1 %v6228_v17  ;;  %v2590_v41 = vsel %vm1191_vm1, %v2587_v32, %v2589_v51  ;;  %v2592_v36 = vsel %vm1191_vm1, %v2589_v51, %v2591_v44  ;;  %v6243_v17 = vld [vmem:[%s7463_s1 + $0xa8] sm:$0xff]   ;;  %v6939_v32 = vcombine.low %v221_v39, %v222_v37  ;;  %v6951_v39 = vld [vmem:[%s7463_s1 + $0xc0] sm:$0xff]  }
  0x94   : > { %5293 = vmatprep.subr.bf16.mxu1 %v6233_v21  ;;  %v2598_v37 = vsel %vm1191_vm1, %v2595_v10, %v2597_v25 }
  0x95   : > { %v2599_v63 = vrot.slane %v6939_v32, 1 }
  0x96   : > { %5246 = vmatmul.mubr.bf16.gmra.mrb[4].mxu1 %v6382_v27 }
  0x97   : > { %5526 = vmatmul.mubr.bf16.gmra.mrb[28].mxu0 %v2586_v52  ;;  %5249 = vmatprep.mubr.bf16.mxu1 %v6408_v56  ;;  %v6247_v52 = vld [vmem:[%s7463_s1 + $0xb8] sm:$0xff]  }
  0x98   : > { %5529 = vmatprep.mubr.bf16.mxu0 %v2588_v54  ;;  %5294 = vmatpush3.bf16.msra.mxu1 %v6233_v21  ;;  %v2596_v21 = vsel %vm1191_vm1, %v2593_v57, %v2595_v10  ;;  %v6954_v54 = vcombine.low %v223_v58, %v223_v58  ;;  %v6244_v58 = vld [vmem:[%s7463_s1 + $0x1c8] sm:$0xff]   ;;  %v6254_v57 = vld [vmem:[%s7463_s1 + $0x1f0] sm:$0xff]   ;;  %v6257_v10 = vld [vmem:[%s7463_s1 + $0x1f8] sm:$0xff]  }
  0x99   : > { %5295 = vmatprep.subr.bf16.mxu1 %v6237_v18 }
  0x9a   : > { %v2601_v51 = vrot.slane %v6954_v54, 1 }
  0x9c   : > { %5296 = vmatpush3.bf16.msra.mxu1 %v6237_v18  ;;  %v2600_v18 = vsel %vm1191_vm1, %v2597_v25, %v2599_v63  ;;  %v2602_v44 = vsel %vm1191_vm1, %v2599_v63, %v2601_v51  ;;  %v1193_v25 = vrot.slane %v6368_v16, 1  ;;  %v6251_v16 = vld [vmem:[%s7463_s1 + $0xc8] sm:$0xff]  }
  0x9d   : > { %5297 = vmatprep.subr.bf16.mxu1 %v6241_v55 }
  0x9e   : > { %5250 = vmatmul.mubr.bf16.gmra.mrb[8].mxu1 %v6421_v0 }
  0x9f   : > { %5530 = vmatmul.mubr.bf16.gmra.mrb[32].mxu0 %v2590_v41  ;;  %5253 = vmatprep.mubr.bf16.mxu1 %v6440_v19  ;;  %v6248_v41 = vld [vmem:[%s7463_s1 + $0x1d8] sm:$0xff]  }
  0xa0   : > { %5533 = vmatprep.mubr.bf16.mxu0 %v2592_v36  ;;  %5298 = vmatpush3.bf16.msra.mxu1 %v6241_v55  ;;  %v6246_v55 = vld [vmem:[%s7463_s1 + $0x1d0] sm:$0xff]   ;;  %v6252_v36 = vld [vmem:[%s7463_s1 + $0x1e8] sm:$0xff]  }
  0xa1   : > { %5299 = vmatprep.subr.bf16.mxu1 %v6243_v17 }
  0xa4   : > { %5300 = vmatpush3.bf16.msra.mxu1 %v6243_v17  ;;  %v7527_v17 = vld [vmem:[#allocation25_spill] sm:$0xff] }
  0xa5   : > { %5301 = vmatprep.subr.bf16.mxu1 %v6245_v49 }
  0xa6   : > { %5254 = vmatmul.mubr.bf16.gmra.mrb[12].mxu1 %v6454_v38 }
  0xa7   : > { %5534 = vmatmul.mubr.bf16.gmra.mrb[36].mxu0 %v2594_v40  ;;  %5257 = vmatprep.mubr.bf16.mxu1 %v6489_v2  ;;  %v7529_v40 = vld [vmem:[#allocation28_spill] sm:$0xff] }
  0xa8   : > { %5537 = vmatprep.mubr.bf16.mxu0 %v2596_v21  ;;  %5302 = vmatpush3.bf16.msra.mxu1 %v6245_v49  ;;  %v7528_v49 = vld [vmem:[#allocation26_spill] sm:$0xff] }
  0xa9   : > { %5303 = vmatprep.subr.bf16.mxu1 %v6247_v52  ;;  %v7006_v21 = vld [vmem:[%s7463_s1 + $0x200] sm:$0xff]  }
  0xac   : > { %5304 = vmatpush3.bf16.msra.mxu1 %v6247_v52  ;;  %v1192_v52 = vrot.slane %v6859_v35, 1  ;;  %v1199_v35 = vrot.slane %v6408_v56, 1 }
  0xad   : > { %5353 = vmatprep.subr.bf16.mxu1 %v6951_v39 }
  0xae   : > { %5258 = vmatmul.mubr.bf16.gmra.mrb[16].mxu1 %v6499_v14  ;;  %v1194_v63 = vsel %vm1191_vm1, %v1192_v52, %v1193_v25 }
  0xaf   : > { %5538 = vmatmul.mubr.bf16.gmra.mrb[40].mxu0 %v2598_v37  ;;  %5261 = vmatprep.mubr.bf16.mxu1 %v6530_v45  ;;  %v1195_v37 = vrot.slane %v6384_v28, 1  ;;  %v6253_v28 = vld [vmem:[%s7463_s1 + $0xd0] sm:$0xff]  }
  0xb0   : > { %5541 = vmatprep.mubr.bf16.mxu0 %v2600_v18  ;;  %v1197_v18 = vrot.slane %v6382_v27, 1 }
  0xb1   : > { %v1196_v51 = vsel %vm1191_vm1, %v1193_v25, %v1195_v37 }
  0xb6   : > { %5262 = vmatmul.mubr.bf16.gmra.mrb[20].mxu1 %v6540_v61 }
  0xb7   : > { %5542 = vmatmul.mubr.bf16.gmra.mrb[44].mxu0 %v2602_v44  ;;  %5265 = vmatprep.mubr.bf16.mxu1 %v6569_v33  ;;  %v1198_v44 = vsel %vm1191_vm1, %v1195_v37, %v1197_v18 }
  0xb8   : > { %5561 = vmatprep.mubr.bf16.mxu0 %v6382_v27  ;;  %v1201_v27 = vrot.slane %v6421_v0, 1 }
  0xbe   : > { %5266 = vmatmul.mubr.bf16.gmra.mrb[24].mxu1 %v6575_v42 }
  0xbf   : > { %5562 = vmatmul.mubr.bf16.vlgmr.msra.gmra.mrb[0].mxu0 %v6408_v56  ;;  %5269 = vmatprep.mubr.bf16.mxu1 %v6613_v13  ;;  %v6256_v56 = vld [vmem:[%s7463_s1 + $0xd8] sm:$0xff]  }
  0xc0   : > { %5610 = vmatpush3.bf16.msra.mxu0 %v6823_v24  ;;  %5565 = vmatprep.mubr.bf16.mxu0 %v6421_v0  ;;  %v6250_v24 = vld [vmem:[%s7463_s1 + $0x1e0] sm:$0xff]   ;;  %v1203_v0 = vrot.slane %v6440_v19, 1 }
  0xc1   : > { %5611 = vmatprep.subr.bf16.mxu0 %v6244_v58 }
  0xc4   : > { %5612 = vmatpush3.bf16.msra.mxu0 %v6244_v58  ;;  %v7035_v58 = vsel %vm1191_vm1, %v1197_v18, %v1199_v35 }
  0xc5   : > { %5613 = vmatprep.subr.bf16.mxu0 %v6246_v55 }
  0xc6   : > { %5270 = vmatmul.mubr.bf16.gmra.mrb[28].mxu1 %v6625_v26 }
  0xc7   : > { %5566 = vmatmul.mubr.bf16.gmra.mrb[4].mxu0 %v6440_v19  ;;  %5273 = vmatprep.mubr.bf16.mxu1 %v6658_v7  ;;  %v6262_v19 = vld [vmem:[%s7463_s1 + $0xe8] sm:$0xff]  }
  0xc8   : > { %5569 = vmatprep.mubr.bf16.mxu0 %v6454_v38  ;;  %5614 = vmatpush3.bf16.msra.mxu0 %v6246_v55  ;;  %v7038_v55 = vsel %vm1191_vm1, %v1199_v35, %v1201_v27 }
  0xc9   : > { %5615 = vmatprep.subr.bf16.mxu0 %v6248_v41 }
  0xcc   : > { %5616 = vmatpush3.bf16.msra.mxu0 %v6248_v41  ;;  %v6260_v41 = vld [vmem:[%s7463_s1 + $0xe0] sm:$0xff]  }
  0xcd   : > { %5617 = vmatprep.subr.bf16.mxu0 %v6250_v24 }
  0xce   : > { %5274 = vmatmul.mubr.bf16.gmra.mrb[32].mxu1 %v6664_v23 }
  0xcf   : > { %5570 = vmatmul.mubr.bf16.gmra.mrb[8].mxu0 %v6489_v2  ;;  %5277 = vmatprep.mubr.bf16.mxu1 %v7527_v17 }
  0xd0   : > { %5573 = vmatprep.mubr.bf16.mxu0 %v6499_v14  ;;  %5618 = vmatpush3.bf16.msra.mxu0 %v6250_v24  ;;  %v7053_v24 = vsel %vm1191_vm1, %v1201_v27, %v1203_v0  ;;  %v7530_v27 = vld [vmem:[#allocation10_spill] sm:$0xff] }
  0xd1   : > { %5619 = vmatprep.subr.bf16.mxu0 %v6252_v36 }
  0xd4   : > { %5620 = vmatpush3.bf16.msra.mxu0 %v6252_v36 }
  0xd5   : > { %5621 = vmatprep.subr.bf16.mxu0 %v6254_v57 }
  0xd6   : > { %5278 = vmatmul.mubr.bf16.gmra.mrb[36].mxu1 %v7528_v49 }
  0xd7   : > { %5574 = vmatmul.mubr.bf16.gmra.mrb[12].mxu0 %v6530_v45  ;;  %5281 = vmatprep.mubr.bf16.mxu1 %v7529_v40 }
  0xd8   : > { %5577 = vmatprep.mubr.bf16.mxu0 %v6540_v61  ;;  %5622 = vmatpush3.bf16.msra.mxu0 %v6254_v57  ;;  %v1209_v57 = vrot.slane %v6499_v14, 1  ;;  %v1211_v14 = vrot.slane %v6530_v45, 1  ;;  %v1215_v45 = vrot.slane %v6569_v33, 1 }
  0xd9   : > { %5623 = vmatprep.subr.bf16.mxu0 %v6257_v10 }
  0xda   : > { %v7086_v37 = vsel %vm1191_vm1, %v1209_v57, %v1211_v14 }
  0xdc   : > { %5624 = vmatpush3.bf16.msra.mxu0 %v6257_v10  ;;  %v6264_v10 = vld [vmem:[%s7463_s1 + $0xf0] sm:$0xff]  }
  0xdd   : > { %5673 = vmatprep.subr.bf16.mxu0 %v7006_v21 }
  0xde   : > { %5282 = vmatmul.mubr.bf16.gmra.mrb[40].mxu1 %v6743_v43 }
  0xdf   : > { %5578 = vmatmul.mubr.bf16.gmra.mrb[16].mxu0 %v6569_v33  ;;  %5285 = vmatprep.mubr.bf16.mxu1 %v6780_v8  ;;  %v1219_v33 = vrot.slane %v6613_v13, 1 }
  0xe0   : > { %5581 = vmatprep.mubr.bf16.mxu0 %v6575_v42 }
  0xe6   : > { %5286 = vmatmul.mubr.bf16.gmra.mrb[44].mxu1 %v6793_v46 }
  0xe7   : > { %5582 = vmatmul.mubr.bf16.gmra.mrb[20].mxu0 %v6613_v13  ;;  %5305 = vmatprep.mubr.bf16.mxu1 %v1194_v63  ;;  %v1213_v63 = vrot.slane %v6540_v61, 1  ;;  %v1217_v61 = vrot.slane %v6575_v42, 1  ;;  %v1221_v42 = vrot.slane %v6625_v26, 1  ;;  %v1223_v13 = vrot.slane %v6658_v7, 1 }
  0xe8   : > { %5585 = vmatprep.mubr.bf16.mxu0 %v6625_v26  ;;  %v7532_v26 = vld [vmem:[#allocation14_spill] sm:$0xff] }
  0xe9   : > { %v7089_v18 = vsel %vm1191_vm1, %v1211_v14, %v1213_v63  ;;  %v7110_v35 = vsel %vm1191_vm1, %v1215_v45, %v1217_v61  ;;  %v6268_v14 = vld [vmem:[%s7463_s1 + $0x220] sm:$0xff]  }
  0xee   : > { %5306 = vmatmul.mubr.bf16.vlgmr.msra.gmra.mrb[0].mxu1 %v1196_v51  ;;  %v7094_v51 = vld [vmem:[%s7463_s1 + $0x100] sm:$0xff]  }
  0xef   : > { %5586 = vmatmul.mubr.bf16.gmra.mrb[24].mxu0 %v6658_v7  ;;  %5354 = vmatpush3.bf16.msra.mxu1 %v6951_v39  ;;  %v1205_v39 = vrot.slane %v6454_v38, 1  ;;  %v1207_v38 = vrot.slane %v6489_v2, 1  ;;  %v6266_v2 = vld [vmem:[%s7463_s1 + $0xf8] sm:$0xff]  }
  0xf0   : > { %5309 = vmatprep.mubr.bf16.mxu1 %v1198_v44  ;;  %5589 = vmatprep.mubr.bf16.mxu0 %v6664_v23  ;;  %v7104_v44 = vsel %vm1191_vm1, %v1213_v63, %v1215_v45  ;;  %v6267_v7 = vld [vmem:[%s7463_s1 + $0x218] sm:$0xff]  }
  0xf1   : > { %5355 = vmatprep.subr.bf16.mxu1 %v6251_v16  ;;  %v7056_v36 = vsel %vm1191_vm1, %v1203_v0, %v1205_v39  ;;  %v7071_v52 = vsel %vm1191_vm1, %v1205_v39, %v1207_v38  ;;  %v7074_v25 = vsel %vm1191_vm1, %v1207_v38, %v1209_v57  ;;  %v6263_v0 = vld [vmem:[%s7463_s1 + $0x208] sm:$0xff]   ;;  %v7138_v38 = vsel %vm1191_vm1, %v1221_v42, %v1223_v13 }
  0xf2   : > { %v7531_v39 = vld [vmem:[#allocation11_spill] sm:$0xff] }
  0xf3   : > { %5356 = vmatpush3.bf16.msra.mxu1 %v6251_v16  ;;  %v7107_v16 = vld [vmem:[%s6354_s10 + $0xd0] sm:$0xff]  }
  0xf4   : > { %5357 = vmatprep.subr.bf16.mxu1 %v6253_v28 }
  0xf6   : > { %5310 = vmatmul.mubr.bf16.gmra.mrb[4].mxu1 %v7035_v58 }
  0xf7   : > { %5590 = vmatmul.mubr.bf16.gmra.mrb[28].mxu0 %v7527_v17  ;;  %5313 = vmatprep.mubr.bf16.mxu1 %v7038_v55 }
  0xf8   : > { %5593 = vmatprep.mubr.bf16.mxu0 %v7528_v49  ;;  %5358 = vmatpush3.bf16.msra.mxu1 %v6253_v28  ;;  %v7119_v28 = vsel %vm1191_vm1, %v1217_v61, %v1219_v33  ;;  %v1231_v61 = vrot.slane %v7529_v40, 1 }
  0xf9   : > { %5359 = vmatprep.subr.bf16.mxu1 %v6256_v56 }
  0xfc   : > { %5360 = vmatpush3.bf16.msra.mxu1 %v6256_v56  ;;  %v7122_v56 = vsel %vm1191_vm1, %v1219_v33, %v1221_v42  ;;  %v7536_v33 = vld [vmem:[#allocation18_spill] sm:$0xff]  ;;  %v6270_v42 = vld [vmem:[%s7463_s1 + $0x230] sm:$0xff]  }
  0xfd   : > { %5361 = vmatprep.subr.bf16.mxu1 %v6260_v41 }
  0xfe   : > { %5314 = vmatmul.mubr.bf16.gmra.mrb[8].mxu1 %v7053_v24 }
  0xff   : > { %5594 = vmatmul.mubr.bf16.gmra.mrb[32].mxu0 %v7529_v40  ;;  %5317 = vmatprep.mubr.bf16.mxu1 %v7056_v36  ;;  %v6271_v40 = vld [vmem:[%s7463_s1 + $0x238] sm:$0xff]  }
 0x100   : > { %5597 = vmatprep.mubr.bf16.mxu0 %v6743_v43  ;;  %5362 = vmatpush3.bf16.msra.mxu1 %v6260_v41  ;;  %v1225_v41 = vrot.slane %v6664_v23, 1  ;;  %v7533_v23 = vld [vmem:[#allocation15_spill] sm:$0xff] }
 0x101   : > { %5363 = vmatprep.subr.bf16.mxu1 %v6262_v19 }
 0x102   : > { %v7141_v57 = vsel %vm1191_vm1, %v1223_v13, %v1225_v41  ;;  %v1235_v13 = vrot.slane %v6780_v8, 1 }
 0x104   : > { %5364 = vmatpush3.bf16.msra.mxu1 %v6262_v19  ;;  %v6265_v19 = vld [vmem:[%s7463_s1 + $0x210] sm:$0xff]  }
 0x105   : > { %5365 = vmatprep.subr.bf16.mxu1 %v6264_v10 }
 0x106   : > { %5318 = vmatmul.mubr.bf16.gmra.mrb[12].mxu1 %v7071_v52 }
 0x107   : > { %5598 = vmatmul.mubr.bf16.gmra.mrb[36].mxu0 %v6780_v8  ;;  %5321 = vmatprep.mubr.bf16.mxu1 %v7074_v25  ;;  %v1239_v8 = vrot.slane %v6816_v6, 1  ;;  %v6275_v6 = vld [vmem:[%s7463_s1 + $0x108] sm:$0xff]  }
 0x108   : > { %5601 = vmatprep.mubr.bf16.mxu0 %v6793_v46  ;;  %5366 = vmatpush3.bf16.msra.mxu1 %v6264_v10  ;;  %v7534_v10 = vld [vmem:[#allocation16_spill] sm:$0xff] }
 0x109   : > { %5367 = vmatprep.subr.bf16.mxu1 %v6266_v2 }
 0x10c   : > { %5368 = vmatpush3.bf16.msra.mxu1 %v6266_v2  ;;  %v1229_v2 = vrot.slane %v7528_v49, 1  ;;  %v7535_v49 = vld [vmem:[#allocation17_spill] sm:$0xff] }
 0x10d   : > { %5737 = vmatprep.subr.bf16.mxu1 %v7094_v51 }
 0x10e   : > { %5322 = vmatmul.mubr.bf16.gmra.mrb[16].mxu1 %v7086_v37 }
 0x10f   : > { %5602 = vmatmul.mubr.bf16.gmra.mrb[40].mxu0 %v6879_v47  ;;  %5325 = vmatprep.mubr.bf16.mxu1 %v7089_v18 }
 0x110   : > { %5605 = vmatprep.mubr.bf16.mxu0 %v6885_v3 }
 0x116   : > { %5326 = vmatmul.mubr.bf16.gmra.mrb[20].mxu1 %v7104_v44 }
 0x117   : > { %5606 = vmatmul.mubr.bf16.gmra.mrb[44].mxu0 %v7107_v16  ;;  %5329 = vmatprep.mubr.bf16.mxu1 %v7110_v35 }
 0x118   : > { %5625 = vmatprep.mubr.bf16.mxu0 %v7530_v27  ;;  %v1233_v27 = vrot.slane %v6743_v43, 1  ;;  %v7537_v43 = vld [vmem:[#allocation19_spill] sm:$0xff] }
 0x11e   : > { %5330 = vmatmul.mubr.bf16.gmra.mrb[24].mxu1 %v7119_v28 }
 0x11f   : > { %5626 = vmatmul.mubr.bf16.vlgmr.msra.gmra.mrb[0].mxu0 %v7531_v39  ;;  %5333 = vmatprep.mubr.bf16.mxu1 %v7122_v56  ;;  %v7177_v39 = vsel %vm1191_vm1, %v1231_v61, %v1233_v27 }
 0x120   : > { %5674 = vmatpush3.bf16.msra.mxu0 %v7006_v21  ;;  %5629 = vmatprep.mubr.bf16.mxu0 %v7532_v26  ;;  %v1227_v21 = vrot.slane %v7527_v17, 1  ;;  %v6269_v17 = vld [vmem:[%s7463_s1 + $0x228] sm:$0xff]   ;;  %v7538_v26 = vld [vmem:[#allocation21_spill] sm:$0xff] }
 0x121   : > { %5675 = vmatprep.subr.bf16.mxu0 %v6263_v0 }
 0x122   : > { %v7156_v63 = vsel %vm1191_vm1, %v1225_v41, %v1227_v21  ;;  %v7159_v45 = vsel %vm1191_vm1, %v1227_v21, %v1229_v2  ;;  %v7188_v41 = vrot.slane %v6793_v46, 1  ;;  %v7540_v46 = vld [vmem:[#allocation23_spill] sm:$0xff] }
 0x124   : > { %5676 = vmatpush3.bf16.msra.mxu0 %v6263_v0  ;;  %v7174_v0 = vsel %vm1191_vm1, %v1229_v2, %v1231_v61  ;;  %v1240_v21 = vsel %vm1191_vm1, %v7188_v41, %v1239_v8  ;;  %v7542_v2 = vld [vmem:[#allocation2_spill] sm:$0xff]  ;;  %v7546_v61 = vld [vmem:[#allocation4_spill] sm:$0xff]  ;;  %v3325_v8 = vshll.u32 %v6885_v3, 16 }
 0x125   : > { %5677 = vmatprep.subr.bf16.mxu0 %v6265_v19 }
 0x126   : > { %5334 = vmatmul.mubr.bf16.gmra.mrb[28].mxu1 %v7138_v38 }
 0x127   : > { %5630 = vmatmul.mubr.bf16.gmra.mrb[4].mxu0 %v7533_v23  ;;  %5337 = vmatprep.mubr.bf16.mxu1 %v7141_v57  ;;  %v7539_v23 = vld [vmem:[#allocation22_spill] sm:$0xff] }
 0x128   : > { %5633 = vmatprep.mubr.bf16.mxu0 %v7534_v10  ;;  %5678 = vmatpush3.bf16.msra.mxu0 %v6265_v19  ;;  %v7191_v19 = vsel %vm1191_vm1, %v1233_v27, %v1235_v13  ;;  %v7541_v10 = vld [vmem:[#allocation24_spill] sm:$0xff]  ;;  %v7547_v27 = vld [vmem:[#allocation5_spill] sm:$0xff] }
 0x129   : > { %5679 = vmatprep.subr.bf16.mxu0 %v6267_v7 }
 0x12c   : > { %5680 = vmatpush3.bf16.msra.mxu0 %v6267_v7  ;;  %v7195_v7 = vsel %vm1191_vm1, %v1235_v13, %v7188_v41  ;;  %v7550_v13 = vld [vmem:[#allocation7_spill] sm:$0xff] }
 0x12d   : > { %5681 = vmatprep.subr.bf16.mxu0 %v6268_v14 }
 0x12e   : > { %5338 = vmatmul.mubr.bf16.gmra.mrb[32].mxu1 %v7156_v63 }
 0x12f   : > { %5634 = vmatmul.mubr.bf16.gmra.mrb[8].mxu0 %v7535_v49  ;;  %5341 = vmatprep.mubr.bf16.mxu1 %v7159_v45  ;;  %v7545_v49 = vld [vmem:[#allocation29_spill] sm:$0xff] }
 0x130   : > { %5637 = vmatprep.mubr.bf16.mxu0 %v7536_v33  ;;  %5682 = vmatpush3.bf16.msra.mxu0 %v6268_v14  ;;  %v7543_v14 = vld [vmem:[#allocation27_spill] sm:$0xff]  ;;  %v6276_v33 = vld [vmem:[%s7463_s1 + $0x110] sm:$0xff]  }
 0x131   : > { %5683 = vmatprep.subr.bf16.mxu0 %v6269_v17 }
 0x134   : > { %5684 = vmatpush3.bf16.msra.mxu0 %v6269_v17  ;;  %v7544_v17 = vld [vmem:[#allocation3_spill] sm:$0xff] }
 0x135   : > { %5685 = vmatprep.subr.bf16.mxu0 %v6270_v42 }
 0x136   : > { %5342 = vmatmul.mubr.bf16.gmra.mrb[36].mxu1 %v7174_v0 }
 0x137   : > { %5638 = vmatmul.mubr.bf16.gmra.mrb[12].mxu0 %v7537_v43  ;;  %5345 = vmatprep.mubr.bf16.mxu1 %v7177_v39  ;;  %v6278_v43 = vld [vmem:[%s7463_s1 + $0x120] sm:$0xff]  }
 0x138   : > { %5641 = vmatprep.mubr.bf16.mxu0 %v7538_v26  ;;  %5686 = vmatpush3.bf16.msra.mxu0 %v6270_v42  ;;  %v7548_v42 = vld [vmem:[#allocation30_spill] sm:$0xff]  ;;  %v7551_v26 = vld [vmem:[#allocation8_spill] sm:$0xff] }
 0x139   : > { %5687 = vmatprep.subr.bf16.mxu0 %v6271_v40 }
 0x13c   : > { %5688 = vmatpush3.bf16.msra.mxu0 %v6271_v40  ;;  %v3317_v40 = vshll.u32 %v6879_v47, 16 }
 0x13e   : > { %5346 = vmatmul.mubr.bf16.gmra.mrb[40].mxu1 %v7191_v19 }
 0x13f   : > { %5642 = vmatmul.mubr.bf16.gmra.mrb[16].mxu0 %v7539_v23  ;;  %5349 = vmatprep.mubr.bf16.mxu1 %v7195_v7  ;;  %v6279_v23 = vld [vmem:[%s7463_s1 + $0x128] sm:$0xff]  }
 0x140   : > { %5645 = vmatprep.mubr.bf16.mxu0 %v7540_v46  ;;  %v3321_v46 = vshrl.u32 %v6879_v47, 16 }
 0x146   : > { %5350 = vmatmul.mubr.bf16.gmra.mrb[44].mxu1 %v1240_v21  ;;  %v3329_v21 = vshrl.u32 %v6885_v3, 16 }
 0x147   : > { %5646 = vmatmul.mubr.bf16.gmra.mrb[20].mxu0 %v7541_v10  ;;  %5369 = vmatprep.mubr.bf16.mxu1 %v7542_v2  ;;  %v6280_v10 = vld [vmem:[%s7463_s1 + $0x130] sm:$0xff]   ;;  %v7552_v2 = vld [vmem:[#allocation9_spill] sm:$0xff] }
 0x148   : > { %5649 = vmatprep.mubr.bf16.mxu0 %v7543_v14  ;;  %v7553_v14 = vld [vmem:[#allocation12_spill] sm:$0xff] }
 0x14e   : > { %5370 = vmatmul.mubr.bf16.vlgmr.msra.gmra.mrb[0].mxu1 %v7544_v17  ;;  %v3327_v17 = vrot.slane %v3325_v8, 1  ;;  %v2132_v8 = vshll.u32 %v6876_v12, 16 }
 0x14f   : > { %5650 = vmatmul.mubr.bf16.gmra.mrb[24].mxu0 %v7545_v49  ;;  %5745 = vmatpush3.bf16.msra.mxu1 %v7094_v51  ;;  %v7549_v51 = vld [vmem:[#allocation6_spill] sm:$0xff] }
 0x150   : > { %5373 = vmatprep.mubr.bf16.mxu1 %v7546_v61  ;;  %5653 = vmatprep.mubr.bf16.mxu0 %v6763_v59  ;;  %v6277_v59 = vld [vmem:[%s7463_s1 + $0x118] sm:$0xff]  }
 0x151   : > { %5738 = vmatprep.subr.bf16.mxu1 %v6275_v6  ;;  %v7249_v61 = vld [vmem:[%s6354_s10 + $0xd8] ss:$0 sps:$4 sm:$0xff]  }
 0x153   : > { %5746 = vmatpush3.bf16.msra.mxu1 %v6275_v6 }
 0x154   : > { %5739 = vmatprep.subr.bf16.mxu1 %v6276_v33 }
 0x156   : > { %5374 = vmatmul.mubr.bf16.gmra.mrb[4].mxu1 %v7547_v27 }
 0x157   : > { %5654 = vmatmul.mubr.bf16.gmra.mrb[28].mxu0 %v7548_v42  ;;  %5377 = vmatprep.mubr.bf16.mxu1 %v7549_v51  ;;  %v3337_v42 = vshrl.u32 %v7107_v16, 16 }
 0x158   : > { %5657 = vmatprep.mubr.bf16.mxu0 %v6796_v30  ;;  %5747 = vmatpush3.bf16.msra.mxu1 %v6276_v33  ;;  %v3319_v30 = vrot.slane %v3317_v40, 1  ;;  %v6281_v33 = vld [vmem:[%s7463_s1 + $0x138] sm:$0xff]  }
 0x159   : > { %5740 = vmatprep.subr.bf16.mxu1 %v6277_v59 }
 0x15a   : > { %v3323_v49 = vor.u32 %v3321_v46, %v3319_v30 }
 0x15c   : > { %5748 = vmatpush3.bf16.msra.mxu1 %v6277_v59  ;;  %v3328_v27 = vsel %vm383_vm0, %v3323_v49, %v3327_v17  ;;  %v7554_v59 = vld [vmem:[#allocation13_spill] sm:$0xff]  ;;  %v2156_v49 = vshll.u32 %v6916_v9, 16 }
 0x15d   : > { %5741 = vmatprep.subr.bf16.mxu1 %v6278_v43 }
 0x15e   : > { %5378 = vmatmul.mubr.bf16.gmra.mrb[8].mxu1 %v7550_v13 }
 0x15f   : > { %5658 = vmatmul.mubr.bf16.gmra.mrb[32].mxu0 %v6801_v22  ;;  %5381 = vmatprep.mubr.bf16.mxu1 %v7551_v26  ;;  %v3320_v22 = vsel %vm383_vm0, %v6842_v31, %v3319_v30  ;;  %v3331_v31 = vor.u32 %v3329_v21, %v3327_v17  ;;  %v2124_v26 = vshll.u32 %v6867_v20, 16  ;;  %v2120_v30 = vshrl.u32 %v6856_v11, 16 }
 0x160   : > { %5661 = vmatprep.mubr.bf16.mxu0 %v6826_v50  ;;  %5749 = vmatpush3.bf16.msra.mxu1 %v6278_v43  ;;  %v3333_v50 = vshll.u32 %v7107_v16, 16  ;;  %v2140_v21 = vshll.u32 %v6896_v15, 16 }
 0x161   : > { %5742 = vmatprep.subr.bf16.mxu1 %v6279_v23 }
 0x162   : > { %v3335_v6 = vrot.slane %v3333_v50, 1  ;;  %v2136_v50 = vshrl.u32 %v6876_v12, 16 }
 0x164   : > { %5750 = vmatpush3.bf16.msra.mxu1 %v6279_v23  ;;  %v3336_v51 = vsel %vm383_vm0, %v3331_v31, %v3335_v6  ;;  %v3339_v40 = vor.u32 %v3337_v42, %v3335_v6  ;;  %v2128_v23 = vshrl.u32 %v6867_v20, 16  ;;  %v2152_v31 = vshrl.u32 %v6901_v48, 16 }
 0x165   : > { %5743 = vmatprep.subr.bf16.mxu1 %v6280_v10  ;;  %v2160_v6 = vshrl.u32 %v6916_v9, 16 }
 0x166   : > { %5382 = vmatmul.mubr.bf16.gmra.mrb[12].mxu1 %v7552_v2  ;;  %v2148_v2 = vshll.u32 %v6901_v48, 16 }
 0x167   : > { %5662 = vmatmul.mubr.bf16.gmra.mrb[36].mxu0 %v6832_v5  ;;  %5385 = vmatprep.mubr.bf16.mxu1 %v7553_v14  ;;  %v3341_v5 = vshll.u32 %v7249_v61, 16 }
 0x168   : > { %5665 = vmatprep.mubr.bf16.mxu0 %v3320_v22  ;;  %5751 = vmatpush3.bf16.msra.mxu1 %v6280_v10  ;;  %v2134_v22 = vrot.slane %v2132_v8, 1  ;;  %v2144_v10 = vshrl.u32 %v6896_v15, 16  ;;  %v2150_v17 = vrot.slane %v2148_v2, 1 }
 0x169   : > { %5744 = vmatprep.subr.bf16.mxu1 %v6281_v33  ;;  %v3343_v43 = vrot.slane %v3341_v5, 1  ;;  %v3687_v5 = vrot.slane %v6879_v47, 1 }
 0x16b   : > { %v3344_v13 = vsel %vm383_vm0, %v3339_v40, %v3343_v43  ;;  %v2176_v40 = vshrl.u32 %v6935_v4, 16  ;;  %v3688_v43 = vsel %vm1191_vm1, %v7188_v41, %v3687_v5 }
 0x16c   : > { %5752 = vmatpush3.bf16.msra.mxu1 %v6281_v33  ;;  %v2164_v33 = vshll.u32 %v6921_v62, 16 }
 0x16e   : > { %5386 = vmatmul.mubr.bf16.gmra.mrb[16].mxu1 %v7554_v59  ;;  %v2166_v42 = vrot.slane %v2164_v33, 1 }
 0x16f   : > { %5666 = vmatmul.mubr.bf16.gmra.mrb[40].mxu0 %v3328_v27  ;;  %5389 = vmatprep.mubr.bf16.mxu1 %v6535_v53  ;;  %v2096_v53 = vshrl.u32 %v6577_v29, 16 }
 0x170   : > { %5669 = vmatprep.mubr.bf16.mxu0 %v3336_v51 }
 0x176   : > { %5390 = vmatmul.mubr.bf16.gmra.mrb[20].mxu1 %v6545_v1  ;;  %v2100_v1 = vshll.u32 %v6837_v60, 16 }
 0x177   : > { %5670 = vmatmul.mubr.bf16.gmra.mrb[44].mxu0 %v3344_v13  ;;  %5393 = vmatprep.mubr.bf16.mxu1 %v6577_v29  ;;  %v2112_v29 = vshrl.u32 %v6851_v34, 16  ;;  %v3689_v13 = vrot.slane %v6885_v3, 1 }
 0x178   : > { %5689 = vmatprep.mubr.bf16.mxu0 %v7035_v58  ;;  %v7555_v58 = vld [vmem:[#allocation20_spill] sm:$0xff] }
 0x179   : > { %v3690_v41 = vsel %vm1191_vm1, %v3687_v5, %v3689_v13 }
 0x17e   : > { %5394 = vmatmul.mubr.bf16.gmra.mrb[24].mxu1 %v6837_v60 }
 0x17f   : > { %5690 = vmatmul.mubr.bf16.vlgmr.msra.gmra.mrb[0].mxu0 %v7038_v55  ;;  %5397 = vmatprep.mubr.bf16.mxu1 %v6851_v34  ;;  %v2098_v55 = vor.u32 %v2096_v53, %v7555_v58  ;;  %v2184_v58 = vshrl.u32 %v6939_v32, 16 }
 0x180   : > { %5693 = vmatprep.mubr.bf16.mxu0 %v7053_v24  ;;  %v2102_v24 = vrot.slane %v2100_v1, 1  ;;  %v3691_v1 = vrot.slane %v7107_v16, 1  ;;  %v3693_v16 = vrot.slane %v7249_v61, 1 }
 0x186   : > { %5398 = vmatmul.mubr.bf16.gmra.mrb[28].mxu1 %v6856_v11 }
 0x187   : > { %5694 = vmatmul.mubr.bf16.gmra.mrb[4].mxu0 %v7056_v36  ;;  %5401 = vmatprep.mubr.bf16.mxu1 %v6867_v20  ;;  %v2108_v36 = vshll.u32 %v6851_v34, 16 }
 0x188   : > { %5697 = vmatprep.mubr.bf16.mxu0 %v7071_v52  ;;  %v2104_v52 = vshrl.u32 %v6837_v60, 16 }
 0x18e   : > { %5402 = vmatmul.mubr.bf16.gmra.mrb[32].mxu1 %v6876_v12 }
 0x18f   : > { %5698 = vmatmul.mubr.bf16.gmra.mrb[8].mxu0 %v7074_v25  ;;  %5405 = vmatprep.mubr.bf16.mxu1 %v6896_v15  ;;  %v2103_v25 = vsel %vm383_vm0, %v2098_v55, %v2102_v24  ;;  %v2188_v55 = vshll.u32 %v6954_v54, 16 }
 0x190   : > { %5701 = vmatprep.mubr.bf16.mxu0 %v7086_v37  ;;  %v2116_v37 = vshll.u32 %v6856_v11, 16 }
 0x196   : > { %5406 = vmatmul.mubr.bf16.gmra.mrb[36].mxu1 %v6901_v48  ;;  %v2172_v48 = vshll.u32 %v6935_v4, 16 }
 0x197   : > { %5702 = vmatmul.mubr.bf16.gmra.mrb[12].mxu0 %v7089_v18  ;;  %5409 = vmatprep.mubr.bf16.mxu1 %v6916_v9  ;;  %v2110_v18 = vrot.slane %v2108_v36, 1  ;;  %v2168_v9 = vshrl.u32 %v6921_v62, 16  ;;  %v2190_v36 = vrot.slane %v2188_v55, 1 }
 0x198   : > { %5705 = vmatprep.mubr.bf16.mxu0 %v7104_v44  ;;  %v2106_v44 = vor.u32 %v2104_v52, %v2102_v24 }
 0x199   : > { %v2170_v47 = vor.u32 %v2168_v9, %v2166_v42 }
 0x19a   : > { %v2111_v60 = vsel %vm383_vm0, %v2106_v44, %v2110_v18 }
 0x19e   : > { %5410 = vmatmul.mubr.bf16.gmra.mrb[40].mxu1 %v6921_v62 }
 0x19f   : > { %5706 = vmatmul.mubr.bf16.gmra.mrb[16].mxu0 %v7110_v35  ;;  %5413 = vmatprep.mubr.bf16.mxu1 %v6935_v4  ;;  %v2114_v35 = vor.u32 %v2112_v29, %v2110_v18 }
 0x1a0   : > { %5709 = vmatprep.mubr.bf16.mxu0 %v7119_v28  ;;  %v2118_v28 = vrot.slane %v2116_v37, 1 }
 0x1a2   : > { %v2119_v34 = vsel %vm383_vm0, %v2114_v35, %v2118_v28 }
 0x1a6   : > { %5414 = vmatmul.mubr.bf16.gmra.mrb[44].mxu1 %v6939_v32 }
 0x1a7   : > { %5710 = vmatmul.mubr.bf16.gmra.mrb[20].mxu0 %v7122_v56  ;;  %5457 = vmatprep.mubr.bf16.mxu1 %v2103_v25  ;;  %v2126_v56 = vrot.slane %v2124_v26, 1 }
 0x1a8   : > { %5713 = vmatprep.mubr.bf16.mxu0 %v7138_v38  ;;  %v2122_v38 = vor.u32 %v2120_v30, %v2118_v28 }
 0x1a9   : > { %v2130_v46 = vor.u32 %v2128_v23, %v2126_v56 }
 0x1aa   : > { %v2127_v11 = vsel %vm383_vm0, %v2122_v38, %v2126_v56 }
 0x1ab   : > { %v2135_v20 = vsel %vm383_vm0, %v2130_v46, %v2134_v22 }
 0x1ae   : > { %5458 = vmatmul.mubr.bf16.vlgmr.msra.gmra.mrb[24].mxu1 %v2111_v60 }
 0x1af   : > { %5714 = vmatmul.mubr.bf16.gmra.mrb[24].mxu0 %v7141_v57  ;;  %5461 = vmatprep.mubr.bf16.mxu1 %v2119_v34  ;;  %v2142_v57 = vrot.slane %v2140_v21, 1 }
 0x1b0   : > { %5717 = vmatprep.mubr.bf16.mxu0 %v7156_v63  ;;  %v2138_v63 = vor.u32 %v2136_v50, %v2134_v22 }
 0x1b1   : > { %v2146_v14 = vor.u32 %v2144_v10, %v2142_v57 }
 0x1b2   : > { %v2143_v12 = vsel %vm383_vm0, %v2138_v63, %v2142_v57 }
 0x1b3   : > { %v2151_v15 = vsel %vm383_vm0, %v2146_v14, %v2150_v17  ;;  %v7367_v14 = vld [vmem:[%s7464_s2] ss:$0 sm:$0xff] }
 0x1b6   : > { %5462 = vmatmul.mubr.bf16.gmra.mrb[28].mxu1 %v2127_v11 }
 0x1b7   : > { %5718 = vmatmul.mubr.bf16.gmra.mrb[28].mxu0 %v7159_v45  ;;  %5465 = vmatprep.mubr.bf16.mxu1 %v2135_v20  ;;  %v2158_v45 = vrot.slane %v2156_v49, 1 }
 0x1b8   : > { %5721 = vmatprep.mubr.bf16.mxu0 %v7174_v0  ;;  %v2154_v0 = vor.u32 %v2152_v31, %v2150_v17 }
 0x1b9   : > { %v2162_v27 = vor.u32 %v2160_v6, %v2158_v45 }
 0x1ba   : > { %v2159_v51 = vsel %vm383_vm0, %v2154_v0, %v2158_v45 }
 0x1bb   : > { %v2167_v59 = vsel %vm383_vm0, %v2162_v27, %v2166_v42 }
 0x1be   : > { %5466 = vmatmul.mubr.bf16.gmra.mrb[32].mxu1 %v2143_v12 }
 0x1bf   : > { %5722 = vmatmul.mubr.bf16.gmra.mrb[32].mxu0 %v7177_v39  ;;  %5469 = vmatprep.mubr.bf16.mxu1 %v2151_v15  ;;  %v2180_v39 = vshll.u32 %v6939_v32, 16  ;;  %v3694_v32 = vsel %vm1191_vm1, %v3691_v1, %v3693_v16 }
 0x1c0   : > { %5725 = vmatprep.mubr.bf16.mxu0 %v7191_v19  ;;  %v2174_v19 = vrot.slane %v2172_v48, 1 }
 0x1c1   : > { %v2182_v62 = vrot.slane %v2180_v39, 1 }
 0x1c2   : > { %v2178_v53 = vor.u32 %v2176_v40, %v2174_v19  ;;  %v2175_v4 = vsel %vm383_vm0, %v2170_v47, %v2174_v19 }
 0x1c3   : > { %v2186_v3 = vor.u32 %v2184_v58, %v2182_v62 }
 0x1c4   : > { %v2183_v24 = vsel %vm383_vm0, %v2178_v53, %v2182_v62 }
 0x1c5   : > { %v2191_v52 = vsel %vm383_vm0, %v2186_v3, %v2190_v36 }
 0x1c6   : > { %5470 = vmatmul.mubr.bf16.gmra.mrb[36].mxu1 %v2159_v51 }
 0x1c7   : > { %5726 = vmatmul.mubr.bf16.gmra.mrb[36].mxu0 %v7195_v7  ;;  %5473 = vmatprep.mubr.bf16.mxu1 %v2167_v59  ;;  %v3692_v7 = vsel %vm1191_vm1, %v3689_v13, %v3691_v1 }
 0x1c8   : > { %5729 = vmatprep.mubr.bf16.mxu0 %v3688_v43 }
 0x1ce   : > { %5474 = vmatmul.mubr.bf16.gmra.mrb[40].mxu1 %v2175_v4 }
 0x1cf   : > { %5730 = vmatmul.mubr.bf16.gmra.mrb[40].mxu0 %v3690_v41  ;;  %5477 = vmatprep.mubr.bf16.mxu1 %v2183_v24 }
 0x1d0   : > { %5733 = vmatprep.mubr.bf16.mxu0 %v3692_v7 }
 0x1d6   : > { %5478 = vmatmul.mubr.bf16.gmra.mrb[44].mxu1 %v2191_v52 }
 0x1d7   : > { %5734 = vmatmul.mubr.bf16.gmra.mrb[44].mxu0 %v3694_v32 }
 0x221   : > { %v5371_v54 = vpop.f32.mrb[0].mxu1 }
 0x222   : > { %v1737_v25 = vpop.f32.mrb[1].mxu1 }
 0x223   : > { %v5372_v29 = vpop.f32.mrb[2].mxu1 }
 0x224   : > { %v1740_v37 = vpop.f32.mrb[3].mxu1 }
 0x229   : > { %v5375_v18 = vpop.f32.mrb[4].mxu1 }
 0x22a   : > { %v1753_v44 = vpop.f32.mrb[5].mxu1 }
 0x22b   : > { %v5376_v35 = vpop.f32.mrb[6].mxu1 }
 0x22c   : > { %v1756_v28 = vpop.f32.mrb[7].mxu1 }
 0x231   : > { %v5379_v26 = vpop.f32.mrb[8].mxu1 }
 0x232   : > { %v1769_v60 = vpop.f32.mrb[9].mxu1 }
 0x233   : > { %v5380_v30 = vpop.f32.mrb[10].mxu1 }
 0x234   : > { %v1772_v34 = vpop.f32.mrb[11].mxu1 }
 0x239   : > { %v7340_v23 = vpop.f32.mrb[12].mxu1 }
 0x23a   : > { %v7342_v61 = vpop.f32.mrb[13].mxu1 }
 0x23b   : > { %v7344_v8 = vpop.f32.mrb[14].mxu1 }
 0x23c   : > { %v7346_v56 = vpop.f32.mrb[15].mxu1 }
 0x241   : > { %v7348_v38 = vpop.f32.mrb[16].mxu1 }
 0x242   : > { %v7350_v46 = vpop.f32.mrb[17].mxu1 }
 0x243   : > { %v7352_v22 = vpop.f32.mrb[18].mxu1 }
 0x244   : > { %v7354_v21 = vpop.f32.mrb[19].mxu1 }
 0x249   : > { %v7356_v11 = vpop.f32.mrb[20].mxu1 }
 0x24a   : > { %v7358_v50 = vpop.f32.mrb[21].mxu1 }
 0x24b   : > { %v7360_v20 = vpop.f32.mrb[22].mxu1 }
 0x24c   : > { %v7362_v10 = vpop.f32.mrb[23].mxu1 }
 0x252   : > { %v5691_v2 = vpop.f32.mrb[0].mxu0 }
 0x253   : > { %v5753_v57 = vadd.f32 %v5691_v2, %v5371_v54  ;;  %v3781_v63 = vpop.f32.mrb[1].mxu0 }
 0x254   : > { %v5754_v17 = vadd.f32 %v3781_v63, %v1737_v25  ;;  %v5692_v49 = vpop.f32.mrb[2].mxu0 }
 0x255   : > { %v5755_v12 = vadd.f32 %v5692_v49, %v5372_v29  ;;  %v3784_v31 = vpop.f32.mrb[3].mxu0  ;;  %v4029_v6 = vadd.f32 %v5753_v57, %v7367_v14 }
 0x256   : > { %v5756_v15 = vadd.f32 %v3784_v31, %v1740_v37  ;;  %v4027_v45 = vadd.f32 %v5754_v17, %v7367_v14 }
 0x257   : > { %v4030_v33 = vadd.f32 %v5755_v12, %v7367_v14 }
 0x258   : > { %v4028_v0 = vadd.f32 %v5756_v15, %v7367_v14 }
 0x259   : > { %v4738_v27 = vpack.c.bf16 %v4030_v33, %v4029_v6 }
 0x25a   : > { %v4733_v42 = vpack.c.bf16 %v4028_v0, %v4027_v45  ;;  %v5695_v5 = vpop.f32.mrb[4].mxu0 }
 0x25b   : > { %4850 = vst [vmem:[%s7376_s11 + $0x8] sm:$0xff] %v4738_v27   ;;  %v5757_v48 = vadd.f32 %v5695_v5, %v5375_v18  ;;  %v3797_v51 = vpop.f32.mrb[5].mxu0 }
 0x25c   : > { %4734 = vst [vmem:[%s7376_s11] sm:$0xff] %v4733_v42   ;;  %v5758_v9 = vadd.f32 %v3797_v51, %v1753_v44  ;;  %v5696_v59 = vpop.f32.mrb[6].mxu0 }
 0x25d   : > { %v5759_v40 = vadd.f32 %v5696_v59, %v5376_v35  ;;  %v3800_v39 = vpop.f32.mrb[7].mxu0  ;;  %v4033_v19 = vadd.f32 %v5757_v48, %v7367_v14 }
 0x25e   : > { %v5760_v43 = vadd.f32 %v3800_v39, %v1756_v28  ;;  %v4031_v13 = vadd.f32 %v5758_v9, %v7367_v14 }
 0x25f   : > { %v4034_v47 = vadd.f32 %v5759_v40, %v7367_v14 }
 0x260   : > { %v4032_v53 = vadd.f32 %v5760_v43, %v7367_v14 }
 0x261   : > { %v4748_v62 = vpack.c.bf16 %v4034_v47, %v4033_v19 }
 0x262   : > { %v4743_v1 = vpack.c.bf16 %v4032_v53, %v4031_v13  ;;  %v5699_v4 = vpop.f32.mrb[8].mxu0 }
 0x263   : > { %4852 = vst [vmem:[%s7376_s11 + $0x18] sm:$0xff] %v4748_v62   ;;  %v5761_v58 = vadd.f32 %v5699_v4, %v5379_v26  ;;  %v3813_v55 = vpop.f32.mrb[9].mxu0 }
 0x264   : > { %4851 = vst [vmem:[%s7376_s11 + $0x10] sm:$0xff] %v4743_v1   ;;  %v5762_v41 = vadd.f32 %v3813_v55, %v1769_v60  ;;  %v5700_v24 = vpop.f32.mrb[10].mxu0 }
 0x265   : > { %v5763_v7 = vadd.f32 %v5700_v24, %v5380_v30  ;;  %v3816_v3 = vpop.f32.mrb[11].mxu0  ;;  %v4037_v16 = vadd.f32 %v5761_v58, %v7367_v14 }
 0x266   : > { %v5764_v36 = vadd.f32 %v3816_v3, %v1772_v34  ;;  %v4035_v32 = vadd.f32 %v5762_v41, %v7367_v14 }
 0x267   : > { %v4038_v52 = vadd.f32 %v5763_v7, %v7367_v14 }
 0x268   : > { %v4036_v54 = vadd.f32 %v5764_v36, %v7367_v14 }
 0x269   : > { %v4758_v25 = vpack.c.bf16 %v4038_v52, %v4037_v16 }
 0x26a   : > { %v4753_v29 = vpack.c.bf16 %v4036_v54, %v4035_v32  ;;  %v5703_v37 = vpop.f32.mrb[12].mxu0 }
 0x26b   : > { %4854 = vst [vmem:[%s7376_s11 + $0x28] sm:$0xff] %v4758_v25   ;;  %v5765_v18 = vadd.f32 %v5703_v37, %v7340_v23  ;;  %v3829_v44 = vpop.f32.mrb[13].mxu0 }
 0x26c   : > { %4853 = vst [vmem:[%s7376_s11 + $0x20] sm:$0xff] %v4753_v29   ;;  %v5766_v35 = vadd.f32 %v3829_v44, %v7342_v61  ;;  %v5704_v28 = vpop.f32.mrb[14].mxu0 }
 0x26d   : > { %v5767_v26 = vadd.f32 %v5704_v28, %v7344_v8  ;;  %v3832_v60 = vpop.f32.mrb[15].mxu0  ;;  %v4041_v34 = vadd.f32 %v5765_v18, %v7367_v14 }
 0x26e   : > { %v5768_v30 = vadd.f32 %v3832_v60, %v7346_v56  ;;  %v4039_v57 = vadd.f32 %v5766_v35, %v7367_v14 }
 0x26f   : > { %v4042_v2 = vadd.f32 %v5767_v26, %v7367_v14 }
 0x270   : > { %v4040_v63 = vadd.f32 %v5768_v30, %v7367_v14 }
 0x271   : > { %v4768_v23 = vpack.c.bf16 %v4042_v2, %v4041_v34 }
 0x272   : > { %v4763_v17 = vpack.c.bf16 %v4040_v63, %v4039_v57  ;;  %v5707_v49 = vpop.f32.mrb[16].mxu0 }
 0x273   : > { %4856 = vst [vmem:[%s7376_s11 + $0x38] sm:$0xff] %v4768_v23   ;;  %v5769_v61 = vadd.f32 %v5707_v49, %v7348_v38  ;;  %v3845_v12 = vpop.f32.mrb[17].mxu0 }
 0x274   : > { %4855 = vst [vmem:[%s7376_s11 + $0x30] sm:$0xff] %v4763_v17   ;;  %v5770_v8 = vadd.f32 %v3845_v12, %v7350_v46  ;;  %v5708_v56 = vpop.f32.mrb[18].mxu0 }
 0x275   : > { %v5771_v31 = vadd.f32 %v5708_v56, %v7352_v22  ;;  %v3848_v15 = vpop.f32.mrb[19].mxu0  ;;  %v4045_v33 = vadd.f32 %v5769_v61, %v7367_v14 }
 0x276   : > { %v5772_v6 = vadd.f32 %v3848_v15, %v7354_v21  ;;  %v4043_v0 = vadd.f32 %v5770_v8, %v7367_v14 }
 0x277   : > { %v4046_v45 = vadd.f32 %v5771_v31, %v7367_v14 }
 0x278   : > { %v4044_v27 = vadd.f32 %v5772_v6, %v7367_v14 }
 0x279   : > { %v4778_v38 = vpack.c.bf16 %v4046_v45, %v4045_v33 }
 0x27a   : > { %v4773_v42 = vpack.c.bf16 %v4044_v27, %v4043_v0  ;;  %v5711_v5 = vpop.f32.mrb[20].mxu0 }
 0x27b   : > { %4858 = vst [vmem:[%s7376_s11 + $0x48] sm:$0xff] %v4778_v38   ;;  %v5773_v46 = vadd.f32 %v5711_v5, %v7356_v11  ;;  %v3861_v48 = vpop.f32.mrb[21].mxu0 }
 0x27c   : > { %4857 = vst [vmem:[%s7376_s11 + $0x40] sm:$0xff] %v4773_v42   ;;  %v5774_v22 = vadd.f32 %v3861_v48, %v7358_v50  ;;  %v5712_v21 = vpop.f32.mrb[22].mxu0 }
 0x27d   : > { %v5775_v51 = vadd.f32 %v5712_v21, %v7360_v20  ;;  %v3864_v9 = vpop.f32.mrb[23].mxu0  ;;  %v4049_v40 = vadd.f32 %v5773_v46, %v7367_v14 }
 0x27e   : > { %v5776_v59 = vadd.f32 %v3864_v9, %v7362_v10  ;;  %v4047_v43 = vadd.f32 %v5774_v22, %v7367_v14 }
 0x27f   : > { %v4050_v39 = vadd.f32 %v5775_v51, %v7367_v14 }
 0x280   : > { %v4048_v11 = vadd.f32 %v5776_v59, %v7367_v14 }
 0x281   : > { %v4788_v19 = vpack.c.bf16 %v4050_v39, %v4049_v40  ;;  %v5459_v47 = vpop.f32.mrb[24].mxu1 }
 0x282   : > { %v4783_v13 = vpack.c.bf16 %v4048_v11, %v4047_v43  ;;  %v5715_v53 = vpop.f32.mrb[24].mxu0  ;;  %v2394_v50 = vpop.f32.mrb[25].mxu1 }
 0x283   : > { %4860 = vst [vmem:[%s7376_s11 + $0x58] sm:$0xff] %v4788_v19   ;;  %v5777_v62 = vadd.f32 %v5715_v53, %v5459_v47  ;;  %v3877_v20 = vpop.f32.mrb[25].mxu0  ;;  %v5460_v1 = vpop.f32.mrb[26].mxu1 }
 0x284   : > { %4859 = vst [vmem:[%s7376_s11 + $0x50] sm:$0xff] %v4783_v13   ;;  %v5778_v10 = vadd.f32 %v3877_v20, %v2394_v50  ;;  %v5716_v4 = vpop.f32.mrb[26].mxu0  ;;  %v2397_v58 = vpop.f32.mrb[27].mxu1 }
 0x285   : > { %v5779_v55 = vadd.f32 %v5716_v4, %v5460_v1  ;;  %v3880_v41 = vpop.f32.mrb[27].mxu0  ;;  %v4053_v7 = vadd.f32 %v5777_v62, %v7367_v14 }
 0x286   : > { %v5780_v24 = vadd.f32 %v3880_v41, %v2397_v58  ;;  %v4051_v36 = vadd.f32 %v5778_v10, %v7367_v14 }
 0x287   : > { %v4054_v3 = vadd.f32 %v5779_v55, %v7367_v14 }
 0x288   : > { %v4052_v16 = vadd.f32 %v5780_v24, %v7367_v14 }
 0x289   : > { %v4798_v52 = vpack.c.bf16 %v4054_v3, %v4053_v7  ;;  %v5463_v32 = vpop.f32.mrb[28].mxu1 }
 0x28a   : > { %v4793_v54 = vpack.c.bf16 %v4052_v16, %v4051_v36  ;;  %v5719_v25 = vpop.f32.mrb[28].mxu0  ;;  %v2410_v29 = vpop.f32.mrb[29].mxu1 }
 0x28b   : > { %4862 = vst [vmem:[%s7376_s11 + $0x68] sm:$0xff] %v4798_v52   ;;  %v5781_v37 = vadd.f32 %v5719_v25, %v5463_v32  ;;  %v3893_v18 = vpop.f32.mrb[29].mxu0  ;;  %v5464_v44 = vpop.f32.mrb[30].mxu1 }
 0x28c   : > { %4861 = vst [vmem:[%s7376_s11 + $0x60] sm:$0xff] %v4793_v54   ;;  %v5782_v35 = vadd.f32 %v3893_v18, %v2410_v29  ;;  %v5720_v28 = vpop.f32.mrb[30].mxu0  ;;  %v2413_v26 = vpop.f32.mrb[31].mxu1 }
 0x28d   : > { %v5783_v60 = vadd.f32 %v5720_v28, %v5464_v44  ;;  %v3896_v30 = vpop.f32.mrb[31].mxu0  ;;  %v4057_v2 = vadd.f32 %v5781_v37, %v7367_v14 }
 0x28e   : > { %v5784_v34 = vadd.f32 %v3896_v30, %v2413_v26  ;;  %v4055_v63 = vadd.f32 %v5782_v35, %v7367_v14 }
 0x28f   : > { %v4058_v57 = vadd.f32 %v5783_v60, %v7367_v14 }
 0x290   : > { %v4056_v23 = vadd.f32 %v5784_v34, %v7367_v14 }
 0x291   : > { %v4808_v17 = vpack.c.bf16 %v4058_v57, %v4057_v2  ;;  %v5467_v49 = vpop.f32.mrb[32].mxu1 }
 0x292   : > { %v4803_v61 = vpack.c.bf16 %v4056_v23, %v4055_v63  ;;  %v5723_v12 = vpop.f32.mrb[32].mxu0  ;;  %v2426_v8 = vpop.f32.mrb[33].mxu1 }
 0x293   : > { %4864 = vst [vmem:[%s7376_s11 + $0x78] sm:$0xff] %v4808_v17   ;;  %v5785_v56 = vadd.f32 %v5723_v12, %v5467_v49  ;;  %v3909_v31 = vpop.f32.mrb[33].mxu0  ;;  %v5468_v15 = vpop.f32.mrb[34].mxu1 }
 0x294   : > { %4863 = vst [vmem:[%s7376_s11 + $0x70] sm:$0xff] %v4803_v61   ;;  %v5786_v6 = vadd.f32 %v3909_v31, %v2426_v8  ;;  %v5724_v33 = vpop.f32.mrb[34].mxu0  ;;  %v2429_v45 = vpop.f32.mrb[35].mxu1 }
 0x295   : > { %v5787_v0 = vadd.f32 %v5724_v33, %v5468_v15  ;;  %v3912_v27 = vpop.f32.mrb[35].mxu0  ;;  %v4061_v42 = vadd.f32 %v5785_v56, %v7367_v14 }
 0x296   : > { %v5788_v38 = vadd.f32 %v3912_v27, %v2429_v45  ;;  %v4059_v46 = vadd.f32 %v5786_v6, %v7367_v14 }
 0x297   : > { %v4062_v5 = vadd.f32 %v5787_v0, %v7367_v14 }
 0x298   : > { %v4060_v48 = vadd.f32 %v5788_v38, %v7367_v14 }
 0x299   : > { %v4818_v22 = vpack.c.bf16 %v4062_v5, %v4061_v42  ;;  %v5471_v21 = vpop.f32.mrb[36].mxu1 }
 0x29a   : > { %v4813_v51 = vpack.c.bf16 %v4060_v48, %v4059_v46  ;;  %v5727_v9 = vpop.f32.mrb[36].mxu0  ;;  %v2442_v59 = vpop.f32.mrb[37].mxu1 }
 0x29b   : > { %4866 = vst [vmem:[%s7376_s11 + $0x88] sm:$0xff] %v4818_v22   ;;  %v5789_v40 = vadd.f32 %v5727_v9, %v5471_v21  ;;  %v3925_v39 = vpop.f32.mrb[37].mxu0  ;;  %v5472_v43 = vpop.f32.mrb[38].mxu1 }
 0x29c   : > { %4865 = vst [vmem:[%s7376_s11 + $0x80] sm:$0xff] %v4813_v51   ;;  %v5790_v11 = vadd.f32 %v3925_v39, %v2442_v59  ;;  %v5728_v19 = vpop.f32.mrb[38].mxu0  ;;  %v2445_v47 = vpop.f32.mrb[39].mxu1 }
 0x29d   : > { %v5791_v13 = vadd.f32 %v5728_v19, %v5472_v43  ;;  %v3928_v53 = vpop.f32.mrb[39].mxu0  ;;  %v4065_v62 = vadd.f32 %v5789_v40, %v7367_v14 }
 0x29e   : > { %v5792_v50 = vadd.f32 %v3928_v53, %v2445_v47  ;;  %v4063_v1 = vadd.f32 %v5790_v11, %v7367_v14 }
 0x29f   : > { %v4066_v20 = vadd.f32 %v5791_v13, %v7367_v14 }
 0x2a0   : > { %v4064_v10 = vadd.f32 %v5792_v50, %v7367_v14 }
 0x2a1   : > { %v4828_v4 = vpack.c.bf16 %v4066_v20, %v4065_v62  ;;  %v5475_v58 = vpop.f32.mrb[40].mxu1 }
 0x2a2   : > { %v4823_v55 = vpack.c.bf16 %v4064_v10, %v4063_v1  ;;  %v5731_v41 = vpop.f32.mrb[40].mxu0  ;;  %v2458_v24 = vpop.f32.mrb[41].mxu1 }
 0x2a3   : > { %4868 = vst [vmem:[%s7376_s11 + $0x98] sm:$0xff] %v4828_v4   ;;  %v5793_v7 = vadd.f32 %v5731_v41, %v5475_v58  ;;  %v3941_v3 = vpop.f32.mrb[41].mxu0  ;;  %v5476_v36 = vpop.f32.mrb[42].mxu1 }
 0x2a4   : > { %4867 = vst [vmem:[%s7376_s11 + $0x90] sm:$0xff] %v4823_v55   ;;  %v5794_v16 = vadd.f32 %v3941_v3, %v2458_v24  ;;  %v5732_v52 = vpop.f32.mrb[42].mxu0  ;;  %v2461_v32 = vpop.f32.mrb[43].mxu1 }
 0x2a5   : > { %v5795_v54 = vadd.f32 %v5732_v52, %v5476_v36  ;;  %v3944_v25 = vpop.f32.mrb[43].mxu0  ;;  %v4069_v37 = vadd.f32 %v5793_v7, %v7367_v14 }
 0x2a6   : > { %v5796_v29 = vadd.f32 %v3944_v25, %v2461_v32  ;;  %v4067_v44 = vadd.f32 %v5794_v16, %v7367_v14 }
 0x2a7   : > { %v4070_v18 = vadd.f32 %v5795_v54, %v7367_v14 }
 0x2a8   : > { %v4068_v35 = vadd.f32 %v5796_v29, %v7367_v14 }
 0x2a9   : > { %v4838_v28 = vpack.c.bf16 %v4070_v18, %v4069_v37  ;;  %v5479_v26 = vpop.f32.mrb[44].mxu1 }
 0x2aa   : > { %v4833_v60 = vpack.c.bf16 %v4068_v35, %v4067_v44  ;;  %v5735_v30 = vpop.f32.mrb[44].mxu0  ;;  %v2474_v34 = vpop.f32.mrb[45].mxu1 }
 0x2ab   : > { %4870 = vst [vmem:[%s7376_s11 + $0xa8] sm:$0xff] %v4838_v28   ;;  %v5797_v2 = vadd.f32 %v5735_v30, %v5479_v26  ;;  %v3957_v57 = vpop.f32.mrb[45].mxu0  ;;  %v5480_v63 = vpop.f32.mrb[46].mxu1 }
 0x2ac   : > { %4869 = vst [vmem:[%s7376_s11 + $0xa0] sm:$0xff] %v4833_v60   ;;  %v5798_v23 = vadd.f32 %v3957_v57, %v2474_v34  ;;  %v5736_v17 = vpop.f32.mrb[46].mxu0  ;;  %v2477_v49 = vpop.f32.mrb[47].mxu1 }
 0x2ad   : > { %v5799_v61 = vadd.f32 %v5736_v17, %v5480_v63  ;;  %v3960_v12 = vpop.f32.mrb[47].mxu0  ;;  %v4073_v56 = vadd.f32 %v5797_v2, %v7367_v14 }
 0x2ae   : > { %v5800_v8 = vadd.f32 %v3960_v12, %v2477_v49  ;;  %v4071_v15 = vadd.f32 %v5798_v23, %v7367_v14 }
 0x2af   : > { %v4074_v31 = vadd.f32 %v5799_v61, %v7367_v14 }
 0x2b0   : > { %v4072_v6 = vadd.f32 %v5800_v8, %v7367_v14 }
 0x2b1   : > { %v4848_v33 = vpack.c.bf16 %v4074_v31, %v4073_v56 }
 0x2b2   : > { %v4843_v45 = vpack.c.bf16 %v4072_v6, %v4071_v15 }
 0x2b3   : > { %4872 = vst [vmem:[%s7376_s11 + $0xb8] sm:$0xff] %v4848_v33  }
 0x2b4   : > { %4871 = vst [vmem:[%s7376_s11 + $0xb0] sm:$0xff] %v4843_v45  }
 0x2b5 PF: > { %s13_s12 = sadd.s32 1, %s6288_s12  }
 0x2b6   : > { %p10_p4 = scmp.ge.s32.totalorder %s13_s12, 4  }
 0x2b8   :  { %12 = sbr.rel (!%p10_p4) target bundleno = 1 (0x1), region = 70 }

// kernel: feature_pyramid.9
= control target key start
LH: loop header
LB: loop body
LE: loop exit
PB: predicated region body
PF: predicated region fallthrough
CT: control target
= control target key end

     0   :  { %s2084_s12 = smov 0   ;;  %s2413_s0 = inlined_call_operand.vmem [shape: bf16[2,56,128], index: 0, kind: input, shape index: {}]   ;;  %s2414_s1 = inlined_call_operand.vmem [shape: bf16[9,128,128], index: 1, kind: input, shape index: {}]   ;;  %s2415_s2 = inlined_call_operand.vmem [shape: f32[1,128], index: 2, kind: input, shape index: {}]   ;;  %s2416_s3 = inlined_call_operand.vmem [shape: bf16[2,32,128], index: 3, kind: output, shape index: {}]  }
   0x1 LB: > { %s1426_s13 = sadd.s32 4294967295, %s2062_s12   ;;  %p1430_p0 = scmp.ge.s32.totalorder %s2062_s12, 1  ;;  %s2062_s12 = sphi %s2084_s12, %s13_s12  }
   0x2   : > { %p137_p1 = scmp.lt.s32.totalorder %s2062_s12, 3 }
   0x4   : > { %p138_p2 = pnand %p1430_p0, %p137_p1 }
   0x5   : > { %v1976_v0 = vld [vmem:[%s2414_s1 + $0x40] sm:$0xff] (!%p138_p2)   ;;  %p161_p3 = scmp.lt.s32.totalorder (!%p138_p2), %s1426_s13, 1  ;;  %v1978_v2 = vld [vmem:[%s2414_s1 + $0x48] sm:$0xff] (!%p138_p2)   ;;  %v1980_v4 = vld [vmem:[%s2414_s1 + $0x50] sm:$0xff] (!%p138_p2)   ;;  %vm225_vm0 = vsmask.f32 (!%p138_p2), 7424 }
   0x6   : > { %141 = sbr.rel (%p138_p2) target bundleno = 389 (0x185), region = 32  ;;  %v1977_v1 = vld [vmem:[%s2414_s1 + $0x100] sm:$0xff] (!%p138_p2)   ;;  %1755 = vmatprep.subr.bf16.mxu1 (!%p138_p2), %v1976_v0  ;;  %v1979_v3 = vld [vmem:[%s2414_s1 + $0x108] sm:$0xff] (!%p138_p2)   ;;  %v1981_v5 = vld [vmem:[%s2414_s1 + $0x110] sm:$0xff] (!%p138_p2)   ;;  %vm461_vm1 = vcmask (!%p138_p2), 1046528  }
   0x7   : > { %1835 = vmatprep.subr.bf16.mxu0 (!%p138_p2), %v1977_v1  ;;  %1756 = vmatpush3.bf16.msra.mxu1 (!%p138_p2), %v1976_v0  ;;  %v1982_v6 = vld [vmem:[%s2414_s1 + $0x58] sm:$0xff] (!%p138_p2)   ;;  %v1984_v8 = vld [vmem:[%s2414_s1 + $0x60] sm:$0xff] (!%p138_p2)   ;;  %v1986_v10 = vld [vmem:[%s2414_s1 + $0x68] sm:$0xff] (!%p138_p2)  }
   0x8   : > { %1836 = vmatpush3.bf16.msra.mxu0 (!%p138_p2), %v1977_v1  ;;  %1757 = vmatprep.subr.bf16.mxu1 (!%p138_p2), %v1978_v2  ;;  %v1983_v7 = vld [vmem:[%s2414_s1 + $0x118] sm:$0xff] (!%p138_p2)   ;;  %v1985_v9 = vld [vmem:[%s2414_s1 + $0x120] sm:$0xff] (!%p138_p2)   ;;  %v1987_v14 = vld [vmem:[%s2414_s1 + $0x128] sm:$0xff] (!%p138_p2)  }
   0x9   : > { %1837 = vmatprep.subr.bf16.mxu0 (!%p138_p2), %v1979_v3  ;;  %v1988_v20 = vld [vmem:[%s2414_s1 + $0x70] sm:$0xff] (!%p138_p2)   ;;  %v1990_v32 = vld [vmem:[%s2414_s1 + $0x78] sm:$0xff] (!%p138_p2)   ;;  %v1994_v49 = vld [vmem:[%s2414_s1] sm:$0xff] (!%p138_p2)  }
   0xa   : > { %v1989_v24 = vld [vmem:[%s2414_s1 + $0x130] sm:$0xff] (!%p138_p2)   ;;  %v1991_v37 = vld [vmem:[%s2414_s1 + $0x138] sm:$0xff] (!%p138_p2)   ;;  %v1997_v52 = vld [vmem:[%s2414_s1 + $0x140] sm:$0xff] (!%p138_p2)  }
   0xb   : > { %1758 = vmatpush3.bf16.msra.mxu1 (!%p138_p2), %v1978_v2  ;;  %v2000_v57 = vld [vmem:[%s2414_s1 + $0x8] sm:$0xff] (!%p138_p2)   ;;  %v2002_v60 = vld [vmem:[%s2414_s1 + $0x10] sm:$0xff] (!%p138_p2)  }
   0xc   : > { %1838 = vmatpush3.bf16.msra.mxu0 (!%p138_p2), %v1979_v3  ;;  %1759 = vmatprep.subr.bf16.mxu1 (!%p138_p2), %v1980_v4  ;;  %v2001_v58 = vld [vmem:[%s2414_s1 + $0x148] sm:$0xff] (!%p138_p2)   ;;  %v2003_v1 = vld [vmem:[%s2414_s1 + $0x150] sm:$0xff] (!%p138_p2)  }
   0xd   : > { %s2418_s13 = smov (!%p161_p3, %s1426_s13), 1  ;;  %1839 = vmatprep.subr.bf16.mxu0 %v1981_v5 }
   0xe   : > { %s1967_s30 = smul.u32 28, %s2418_s13  ;;  %s1649_s16 = sshll.u32 %s2418_s13, 4 }
   0xf   : > { %1760 = vmatpush3.bf16.msra.mxu1 %v1980_v4  ;;  %v2004_v4 = vld [vmem:[%s2414_s1 + $0x18] sm:$0xff]   ;;  %s170_s19 = scalar_lea.vmem %s2416_s3, %s1649_s16 }
  0x10   : > { %1840 = vmatpush3.bf16.msra.mxu0 %v1981_v5  ;;  %1761 = vmatprep.subr.bf16.mxu1 %v1982_v6  ;;  %s2128_s10 = scalar_lea.vmem %s2413_s0, %s1967_s30  ;;  %v2005_v5 = vld [vmem:[%s2414_s1 + $0x158] sm:$0xff]  }
  0x11   : > { %1841 = vmatprep.subr.bf16.mxu0 %v1983_v7  ;;  %v172_v11 = vld [vmem:[%s2128_s10] sm:$0xf]  ;;  %v173_v12 = vld [vmem:[%s2128_s10 + $0x4] sm:$0xf]  ;;  %v174_v13 = vld [vmem:[%s2128_s10 + $0x8] sm:$0xf] }
  0x12   : > { %v175_v15 = vld [vmem:[%s2128_s10 + $0xc] sm:$0xf]  ;;  %v2140_v16 = vcombine.low %v172_v11, %v173_v12  ;;  %v2142_v17 = vcombine.low %v173_v12, %v174_v13  ;;  %v176_v19 = vld [vmem:[%s2128_s10 + $0x10] sm:$0xf]  ;;  %v177_v31 = vld [vmem:[%s2128_s10 + $0x14] sm:$0xf] }
  0x13   : > { %1762 = vmatpush3.bf16.msra.mxu1 %v1982_v6  ;;  %v2144_v18 = vcombine.low %v174_v13, %v175_v15  ;;  %v2152_v23 = vcombine.low %v175_v15, %v176_v19  ;;  %v2160_v28 = vcombine.low %v176_v19, %v176_v19  ;;  %v2168_v36 = vcombine.low %v177_v31, %v177_v31  ;;  %v2006_v6 = vld [vmem:[%s2414_s1 + $0x20] sm:$0xff]   ;;  %v2011_v11 = vld [vmem:[%s2414_s1 + $0x170] sm:$0xff]   ;;  %v2012_v12 = vld [vmem:[%s2414_s1 + $0x38] sm:$0xff]  }
  0x14   : > { %1842 = vmatpush3.bf16.msra.mxu0 %v1983_v7  ;;  %1763 = vmatprep.subr.bf16.mxu1 %v1984_v8  ;;  %v227_v21 = vshrl.u32 %v2140_v16, 16  ;;  %v229_v22 = vshll.u32 %v2140_v16, 16  ;;  %v713_v26 = vshrl.u32 %v2142_v17, 16  ;;  %v715_v27 = vshll.u32 %v2142_v17, 16  ;;  %v2007_v7 = vld [vmem:[%s2414_s1 + $0x160] sm:$0xff]   ;;  %v2013_v13 = vld [vmem:[%s2414_s1 + $0x178] sm:$0xff]  }
  0x15   : > { %1843 = vmatprep.subr.bf16.mxu0 %v1985_v9  ;;  %v234_v25 = vshll.u32 %v2144_v18, 16  ;;  %v720_v30 = vshll.u32 %v2152_v23, 16  ;;  %v238_v35 = vshrl.u32 %v2144_v18, 16  ;;  %v242_v40 = vshll.u32 %v2160_v28, 16 }
  0x16   : > { %v231_v29 = vrot.slane %v229_v22, 1  ;;  %v717_v34 = vrot.slane %v715_v27, 1  ;;  %v2174_v41 = vcombine.low %v176_v19, %v177_v31  ;;  %v724_v43 = vshrl.u32 %v2152_v23, 16  ;;  %v2015_v19 = vld [vmem:[%s2414_s1 + $0x180] sm:$0xff]   ;;  %v2016_v22 = vld [vmem:[%s2414_s1 + $0x88] sm:$0xff]   ;;  %v2019_v27 = vld [vmem:[%s2414_s1 + $0x190] sm:$0xff]  }
  0x17   : > { %1764 = vmatpush3.bf16.msra.mxu1 %v1984_v8  ;;  %v236_v33 = vrot.slane %v234_v25, 1  ;;  %v722_v39 = vrot.slane %v720_v30, 1  ;;  %v728_v44 = vshll.u32 %v2168_v36, 16  ;;  %v244_v48 = vrot.slane %v242_v40, 1  ;;  %v2008_v8 = vld [vmem:[%s2414_s1 + $0x28] sm:$0xff]   ;;  %v2018_v25 = vld [vmem:[%s2414_s1 + $0x90] sm:$0xff]  }
  0x18   : > { %1844 = vmatpush3.bf16.msra.mxu0 %v1985_v9  ;;  %1765 = vmatprep.subr.bf16.mxu1 %v1986_v10  ;;  %v232_v38 = vor.u32 %v231_v29, %v227_v21  ;;  %v718_v42 = vor.u32 %v717_v34, %v713_v26  ;;  %v852_v54 = vrot.slane %v2142_v17, 1  ;;  %v853_v55 = vrot.slane %v2152_v23, 1  ;;  %v2009_v9 = vld [vmem:[%s2414_s1 + $0x168] sm:$0xff]   ;;  %v2048_v29 = vld [vmem:[%s2128_s10 + $0x18] ss:$0 sps:$4 sm:$0xff]  }
  0x19   : > { %1845 = vmatprep.subr.bf16.mxu0 %v1987_v14  ;;  %v240_v47 = vor.u32 %v238_v35, %v236_v33  ;;  %v726_v50 = vor.u32 %v724_v43, %v722_v39  ;;  %v730_v51 = vrot.slane %v728_v44, 1  ;;  %v1101_v59 = vshll.u32 %v2174_v41, 16  ;;  %v2021_v34 = vld [vmem:[%s2414_s1 + $0x198] sm:$0xff]   ;;  %v2025_v40 = vld [vmem:[%s2414_s1 + $0x1a8] sm:$0xff]   ;;  %v2027_v43 = vld [vmem:[%s2414_s1 + $0x1b0] sm:$0xff]  }
  0x1a   : > { %v237_v45 = vsel %vm225_vm0, %v232_v38, %v236_v33  ;;  %v723_v46 = vsel %vm225_vm0, %v718_v42, %v722_v39  ;;  %v854_v61 = vsel %vm461_vm1, %v852_v54, %v853_v55  ;;  %v2206_v63 = vrot.slane %v2144_v18, 1  ;;  %v2023_v38 = vld [vmem:[%s2414_s1 + $0x1a0] sm:$0xff]   ;;  %v2024_v39 = vld [vmem:[%s2414_s1 + $0xa8] sm:$0xff]   ;;  %v2026_v42 = vld [vmem:[%s2414_s1 + $0xb0] sm:$0xff]  }
  0x1b   : > { %1766 = vmatpush3.bf16.msra.mxu1 %v1986_v10  ;;  %1771 = vmatprep.mubr.bf16.mxu1 %v237_v45  ;;  %v245_v53 = vsel %vm225_vm0, %v240_v47, %v244_v48  ;;  %v731_v56 = vsel %vm225_vm0, %v726_v50, %v730_v51  ;;  %v2203_v62 = vrot.slane %v1101_v59, 1  ;;  %v1233_v0 = vrot.slane %v2174_v41, 1  ;;  %v2010_v10 = vld [vmem:[%s2414_s1 + $0x30] sm:$0xff]   ;;  %v2028_v44 = vld [vmem:[%s2414_s1 + $0xb8] sm:$0xff]   ;;  %v2031_v48 = vld [vmem:[%s2414_s1 + $0x1c0] sm:$0xff]  }
  0x1c   : > { %1846 = vmatpush3.bf16.msra.mxu0 %v1987_v14  ;;  %1767 = vmatprep.subr.bf16.mxu1 %v1988_v20  ;;  %v2014_v14 = vld [vmem:[%s2414_s1 + $0x80] sm:$0xff]   ;;  %v855_v15 = vrot.slane %v2168_v36, 1  ;;  %v1105_v26 = vshrl.u32 %v2174_v41, 16  ;;  %v1109_v31 = vshll.u32 %v2048_v29, 16  ;;  %v1235_v33 = vrot.slane %v2048_v29, 1  ;;  %v2029_v45 = vld [vmem:[%s2414_s1 + $0x1b8] sm:$0xff]  }
  0x1d   : > { %1847 = vmatprep.subr.bf16.mxu0 %v1989_v24  ;;  %1851 = vmatprep.mubr.bf16.mxu0 %v723_v46  ;;  %v2215_v2 = vsel %vm225_vm0, %v240_v47, %v2203_v62  ;;  %v2221_v3 = vsel %vm461_vm1, %v2206_v63, %v1233_v0  ;;  %v465_v46 = vrot.slane %v2160_v28, 1  ;;  %v2030_v47 = vld [vmem:[%s2414_s1 + $0xc0] sm:$0xff]   ;;  %v2033_v28 = vld [vmem:[%s2414_s1 + $0xc8] sm:$0xff]   ;;  %v2035_v51 = vld [vmem:[%s2414_s1 + $0xd0] sm:$0xff]  }
  0x1e   : > { %v856_v21 = vsel %vm461_vm1, %v853_v55, %v855_v15  ;;  %v1107_v30 = vor.u32 %v1105_v26, %v2203_v62  ;;  %v1111_v35 = vrot.slane %v1109_v31, 1  ;;  %v2034_v50 = vld [vmem:[%s2414_s1 + $0x1c8] sm:$0xff]   ;;  %v2040_v54 = vld [vmem:[%s2414_s1 + $0x1e0] sm:$0xff]   ;;  %v2045_v59 = vld [vmem:[%s2414_s1 + $0xf8] sm:$0xff]  }
  0x1f   : > { %1768 = vmatpush3.bf16.msra.mxu1 %v1988_v20  ;;  %v462_v20 = vrot.slane %v2140_v16, 1  ;;  %v2041_v55 = vld [vmem:[%s2414_s1 + $0xe8] sm:$0xff]  }
  0x20   : > { %1848 = vmatpush3.bf16.msra.mxu0 %v1989_v24  ;;  %1769 = vmatprep.subr.bf16.mxu1 %v1990_v32  ;;  %v2017_v24 = vld [vmem:[%s2414_s1 + $0x188] sm:$0xff]   ;;  %v2295_v36 = vsel %vm225_vm0, %v1107_v30, %v1111_v35 }
  0x21   : > { %1849 = vmatprep.subr.bf16.mxu0 %v1991_v37  ;;  %v2049_v62 = vld [vmem:[%s2414_s1 + $0x208] sm:$0xff]  }
  0x23   : > { %1770 = vmatpush3.bf16.msra.mxu1 %v1990_v32  ;;  %v2020_v32 = vld [vmem:[%s2414_s1 + $0x98] sm:$0xff]  }
  0x24   : > { %1850 = vmatpush3.bf16.msra.mxu0 %v1991_v37  ;;  %1775 = vmatprep.subr.bf16.mxu1 %v1994_v49  ;;  %v2022_v37 = vld [vmem:[%s2414_s1 + $0xa0] sm:$0xff]  }
  0x25   : > { %1855 = vmatprep.subr.bf16.mxu0 %v1997_v52 }
  0x26   : > { %1772 = vmatmul.mubr.bf16.vlgmr.msra.gmra.mrb[0].mxu1 %v245_v53  ;;  %v2038_v53 = vld [vmem:[%s2414_s1 + $0x1d8] sm:$0xff]  }
  0x27   : > { %1776 = vmatpush3.bf16.msra.mxu1 %v1994_v49  ;;  %1852 = vmatmul.mubr.bf16.vlgmr.msra.gmra.mrb[0].mxu0 %v731_v56  ;;  %v466_v49 = vsel %vm461_vm1, %v2206_v63, %v465_v46  ;;  %v2042_v56 = vld [vmem:[%s2414_s1 + $0x1e8] sm:$0xff]  }
  0x28   : > { %1856 = vmatpush3.bf16.msra.mxu0 %v1997_v52  ;;  %1777 = vmatprep.subr.bf16.mxu1 %v2000_v57  ;;  %v2036_v52 = vld [vmem:[%s2414_s1 + $0x1d0] sm:$0xff]  }
  0x29   : > { %1857 = vmatprep.subr.bf16.mxu0 %v2001_v58  ;;  %1791 = vmatprep.mubr.bf16.mxu1 %v2140_v16  ;;  %v464_v16 = vsel %vm461_vm1, %v462_v20, %v2206_v63  ;;  %v2050_v63 = vld [vmem:[%s2414_s1 + $0x210] sm:$0xff]  }
  0x2a   : > { %1871 = vmatprep.mubr.bf16.mxu0 %v854_v61  ;;  %v2047_v61 = vld [vmem:[%s2414_s1 + $0x200] sm:$0xff]  }
  0x2b   : > { %1778 = vmatpush3.bf16.msra.mxu1 %v2000_v57  ;;  %v2043_v57 = vld [vmem:[%s2414_s1 + $0xf0] sm:$0xff]  }
  0x2c   : > { %1858 = vmatpush3.bf16.msra.mxu0 %v2001_v58  ;;  %1779 = vmatprep.subr.bf16.mxu1 %v2002_v60  ;;  %v2044_v58 = vld [vmem:[%s2414_s1 + $0x1f0] sm:$0xff]  }
  0x2d   : > { %1859 = vmatprep.subr.bf16.mxu0 %v2003_v1 }
  0x2f   : > { %1780 = vmatpush3.bf16.msra.mxu1 %v2002_v60  ;;  %v2046_v60 = vld [vmem:[%s2414_s1 + $0x1f8] sm:$0xff]  }
  0x30   : > { %1860 = vmatpush3.bf16.msra.mxu0 %v2003_v1  ;;  %1781 = vmatprep.subr.bf16.mxu1 %v2004_v4  ;;  %v2053_v1 = vld [vmem:[%s2414_s1 + $0x228] sm:$0xff]  }
  0x31   : > { %1861 = vmatprep.subr.bf16.mxu0 %v2005_v5 }
  0x33   : > { %1782 = vmatpush3.bf16.msra.mxu1 %v2004_v4 }
  0x34   : > { %1862 = vmatpush3.bf16.msra.mxu0 %v2005_v5  ;;  %1783 = vmatprep.subr.bf16.mxu1 %v2006_v6 }
  0x35   : > { %1863 = vmatprep.subr.bf16.mxu0 %v2007_v7 }
  0x37   : > { %1784 = vmatpush3.bf16.msra.mxu1 %v2006_v6 }
  0x38   : > { %1864 = vmatpush3.bf16.msra.mxu0 %v2007_v7  ;;  %1785 = vmatprep.subr.bf16.mxu1 %v2008_v8 }
  0x39   : > { %1865 = vmatprep.subr.bf16.mxu0 %v2009_v9 }
  0x3b   : > { %1786 = vmatpush3.bf16.msra.mxu1 %v2008_v8 }
  0x3c   : > { %1866 = vmatpush3.bf16.msra.mxu0 %v2009_v9  ;;  %1787 = vmatprep.subr.bf16.mxu1 %v2010_v10 }
  0x3d   : > { %1867 = vmatprep.subr.bf16.mxu0 %v2011_v11 }
  0x3f   : > { %1788 = vmatpush3.bf16.msra.mxu1 %v2010_v10 }
  0x40   : > { %1868 = vmatpush3.bf16.msra.mxu0 %v2011_v11  ;;  %1789 = vmatprep.subr.bf16.mxu1 %v2012_v12  ;;  %v1642_v11 = vld [vmem:[%s2415_s2] ss:$0 sm:$0xff] }
  0x41   : > { %1869 = vmatprep.subr.bf16.mxu0 %v2013_v13 }
  0x43   : > { %1790 = vmatpush3.bf16.msra.mxu1 %v2012_v12 }
  0x44   : > { %1870 = vmatpush3.bf16.msra.mxu0 %v2013_v13  ;;  %1795 = vmatprep.subr.bf16.mxu1 %v2014_v14 }
  0x45   : > { %1875 = vmatprep.subr.bf16.mxu0 %v2015_v19 }
  0x46   : > { %1792 = vmatmul.mubr.bf16.vlgmr.msra.gmra.mrb[0].mxu1 %v2144_v18 }
  0x47   : > { %1796 = vmatpush3.bf16.msra.mxu1 %v2014_v14  ;;  %1872 = vmatmul.mubr.bf16.vlgmr.msra.gmra.mrb[0].mxu0 %v856_v21 }
  0x48   : > { %1876 = vmatpush3.bf16.msra.mxu0 %v2015_v19  ;;  %1797 = vmatprep.subr.bf16.mxu1 %v2016_v22 }
  0x49   : > { %1877 = vmatprep.subr.bf16.mxu0 %v2017_v24  ;;  %1811 = vmatprep.mubr.bf16.mxu1 %v464_v16 }
  0x4a   : > { %1891 = vmatprep.mubr.bf16.mxu0 %v2144_v18  ;;  %v2292_v18 = vsel %vm461_vm1, %v1233_v0, %v1235_v33  ;;  %v2051_v0 = vld [vmem:[%s2414_s1 + $0x218] sm:$0xff]  }
  0x4b   : > { %1798 = vmatpush3.bf16.msra.mxu1 %v2016_v22 }
  0x4c   : > { %1878 = vmatpush3.bf16.msra.mxu0 %v2017_v24  ;;  %1799 = vmatprep.subr.bf16.mxu1 %v2018_v25 }
  0x4d   : > { %1879 = vmatprep.subr.bf16.mxu0 %v2019_v27 }
  0x4f   : > { %1800 = vmatpush3.bf16.msra.mxu1 %v2018_v25 }
  0x50   : > { %1880 = vmatpush3.bf16.msra.mxu0 %v2019_v27  ;;  %1801 = vmatprep.subr.bf16.mxu1 %v2020_v32 }
  0x51   : > { %1881 = vmatprep.subr.bf16.mxu0 %v2021_v34 }
  0x53   : > { %1802 = vmatpush3.bf16.msra.mxu1 %v2020_v32 }
  0x54   : > { %1882 = vmatpush3.bf16.msra.mxu0 %v2021_v34  ;;  %1803 = vmatprep.subr.bf16.mxu1 %v2022_v37 }
  0x55   : > { %1883 = vmatprep.subr.bf16.mxu0 %v2023_v38 }
  0x57   : > { %1804 = vmatpush3.bf16.msra.mxu1 %v2022_v37 }
  0x58   : > { %1884 = vmatpush3.bf16.msra.mxu0 %v2023_v38  ;;  %1805 = vmatprep.subr.bf16.mxu1 %v2024_v39 }
  0x59   : > { %1885 = vmatprep.subr.bf16.mxu0 %v2025_v40 }
  0x5b   : > { %1806 = vmatpush3.bf16.msra.mxu1 %v2024_v39 }
  0x5c   : > { %1886 = vmatpush3.bf16.msra.mxu0 %v2025_v40  ;;  %1807 = vmatprep.subr.bf16.mxu1 %v2026_v42 }
  0x5d   : > { %1887 = vmatprep.subr.bf16.mxu0 %v2027_v43 }
  0x5f   : > { %1808 = vmatpush3.bf16.msra.mxu1 %v2026_v42 }
  0x60   : > { %1888 = vmatpush3.bf16.msra.mxu0 %v2027_v43  ;;  %1809 = vmatprep.subr.bf16.mxu1 %v2028_v44 }
  0x61   : > { %1889 = vmatprep.subr.bf16.mxu0 %v2029_v45 }
  0x63   : > { %1810 = vmatpush3.bf16.msra.mxu1 %v2028_v44 }
  0x64   : > { %1890 = vmatpush3.bf16.msra.mxu0 %v2029_v45  ;;  %1815 = vmatprep.subr.bf16.mxu1 %v2030_v47 }
  0x65   : > { %1895 = vmatprep.subr.bf16.mxu0 %v2031_v48 }
  0x66   : > { %1812 = vmatmul.mubr.bf16.vlgmr.msra.gmra.mrb[0].mxu1 %v466_v49 }
  0x67   : > { %1816 = vmatpush3.bf16.msra.mxu1 %v2030_v47  ;;  %1892 = vmatmul.mubr.bf16.vlgmr.msra.gmra.mrb[0].mxu0 %v2174_v41  ;;  %v2037_v41 = vld [vmem:[%s2414_s1 + $0xd8] sm:$0xff]  }
  0x68   : > { %1896 = vmatpush3.bf16.msra.mxu0 %v2031_v48  ;;  %1817 = vmatprep.subr.bf16.mxu1 %v2033_v28 }
  0x69   : > { %1897 = vmatprep.subr.bf16.mxu0 %v2034_v50  ;;  %1831 = vmatprep.mubr.bf16.mxu1 %v2142_v17  ;;  %v2039_v17 = vld [vmem:[%s2414_s1 + $0xe0] sm:$0xff]  }
  0x6a   : > { %1911 = vmatprep.mubr.bf16.mxu0 %v2215_v2  ;;  %v2054_v2 = vld [vmem:[%s2414_s1 + $0x230] sm:$0xff]  }
  0x6b   : > { %1818 = vmatpush3.bf16.msra.mxu1 %v2033_v28 }
  0x6c   : > { %1898 = vmatpush3.bf16.msra.mxu0 %v2034_v50  ;;  %1819 = vmatprep.subr.bf16.mxu1 %v2035_v51 }
  0x6d   : > { %1899 = vmatprep.subr.bf16.mxu0 %v2036_v52 }
  0x6f   : > { %1820 = vmatpush3.bf16.msra.mxu1 %v2035_v51 }
  0x70   : > { %1900 = vmatpush3.bf16.msra.mxu0 %v2036_v52  ;;  %1821 = vmatprep.subr.bf16.mxu1 %v2037_v41 }
  0x71   : > { %1901 = vmatprep.subr.bf16.mxu0 %v2038_v53 }
  0x73   : > { %1822 = vmatpush3.bf16.msra.mxu1 %v2037_v41 }
  0x74   : > { %1902 = vmatpush3.bf16.msra.mxu0 %v2038_v53  ;;  %1823 = vmatprep.subr.bf16.mxu1 %v2039_v17 }
  0x75   : > { %1903 = vmatprep.subr.bf16.mxu0 %v2040_v54 }
  0x77   : > { %1824 = vmatpush3.bf16.msra.mxu1 %v2039_v17 }
  0x78   : > { %1904 = vmatpush3.bf16.msra.mxu0 %v2040_v54  ;;  %1825 = vmatprep.subr.bf16.mxu1 %v2041_v55 }
  0x79   : > { %1905 = vmatprep.subr.bf16.mxu0 %v2042_v56 }
  0x7b   : > { %1826 = vmatpush3.bf16.msra.mxu1 %v2041_v55 }
  0x7c   : > { %1906 = vmatpush3.bf16.msra.mxu0 %v2042_v56  ;;  %1827 = vmatprep.subr.bf16.mxu1 %v2043_v57 }
  0x7d   : > { %1907 = vmatprep.subr.bf16.mxu0 %v2044_v58 }
  0x7f   : > { %1828 = vmatpush3.bf16.msra.mxu1 %v2043_v57 }
  0x80   : > { %1908 = vmatpush3.bf16.msra.mxu0 %v2044_v58  ;;  %1829 = vmatprep.subr.bf16.mxu1 %v2045_v59 }
  0x81   : > { %1909 = vmatprep.subr.bf16.mxu0 %v2046_v60 }
  0x83   : > { %1830 = vmatpush3.bf16.msra.mxu1 %v2045_v59 }
  0x84   : > { %1910 = vmatpush3.bf16.msra.mxu0 %v2046_v60 }
  0x85   : > { %1915 = vmatprep.subr.bf16.mxu0 %v2047_v61 }
  0x86   : > { %1832 = vmatmul.mubr.bf16.vlgmr.msra.gmra.mrb[0].mxu1 %v2152_v23  ;;  %v2052_v23 = vld [vmem:[%s2414_s1 + $0x220] sm:$0xff]  }
  0x87   : > { %1912 = vmatmul.mubr.bf16.vlgmr.msra.gmra.mrb[0].mxu0 %v2295_v36 }
  0x88   : > { %1916 = vmatpush3.bf16.msra.mxu0 %v2047_v61  ;;  %1931 = vmatprep.mubr.bf16.mxu0 %v2221_v3  ;;  %v2055_v3 = vld [vmem:[%s2414_s1 + $0x238] sm:$0xff]  }
  0x89   : > { %1917 = vmatprep.subr.bf16.mxu0 %v2049_v62 }
  0x8c   : > { %1918 = vmatpush3.bf16.msra.mxu0 %v2049_v62 }
  0x8d   : > { %1919 = vmatprep.subr.bf16.mxu0 %v2050_v63 }
  0x90   : > { %1920 = vmatpush3.bf16.msra.mxu0 %v2050_v63 }
  0x91   : > { %1921 = vmatprep.subr.bf16.mxu0 %v2051_v0 }
  0x94   : > { %1922 = vmatpush3.bf16.msra.mxu0 %v2051_v0 }
  0x95   : > { %1923 = vmatprep.subr.bf16.mxu0 %v2052_v23 }
  0x98   : > { %1924 = vmatpush3.bf16.msra.mxu0 %v2052_v23 }
  0x99   : > { %1925 = vmatprep.subr.bf16.mxu0 %v2053_v1 }
  0x9c   : > { %1926 = vmatpush3.bf16.msra.mxu0 %v2053_v1 }
  0x9d   : > { %1927 = vmatprep.subr.bf16.mxu0 %v2054_v2 }
  0xa0   : > { %1928 = vmatpush3.bf16.msra.mxu0 %v2054_v2 }
  0xa1   : > { %1929 = vmatprep.subr.bf16.mxu0 %v2055_v3 }
  0xa4   : > { %1930 = vmatpush3.bf16.msra.mxu0 %v2055_v3 }
  0xa7   : > { %1932 = vmatmul.mubr.bf16.vlgmr.msra.gmra.mrb[0].mxu0 %v2292_v18 }
 0x159   : > { %v1833_v4 = vpop.f32.mrb[0].mxu1 }
 0x15a   : > { %v673_v5 = vpop.f32.mrb[1].mxu1 }
 0x15b   : > { %v1834_v6 = vpop.f32.mrb[2].mxu1 }
 0x15c   : > { %v676_v7 = vpop.f32.mrb[3].mxu1 }
 0x17a   : > { %v1933_v8 = vpop.f32.mrb[0].mxu0 }
 0x17b   : > { %v1935_v9 = vadd.f32 %v1933_v8, %v1833_v4  ;;  %v1321_v10 = vpop.f32.mrb[1].mxu0 }
 0x17c   : > { %v1936_v12 = vadd.f32 %v1321_v10, %v673_v5  ;;  %v1934_v13 = vpop.f32.mrb[2].mxu0 }
 0x17d   : > { %v1937_v14 = vadd.f32 %v1934_v13, %v1834_v6  ;;  %v1324_v15 = vpop.f32.mrb[3].mxu0  ;;  %v1349_v20 = vadd.f32 %v1935_v9, %v1642_v11 }
 0x17e   : > { %v1938_v19 = vadd.f32 %v1324_v15, %v676_v7  ;;  %v1347_v22 = vadd.f32 %v1936_v12, %v1642_v11 }
 0x17f   : > { %v1350_v21 = vadd.f32 %v1937_v14, %v1642_v11 }
 0x180   : > { %v1348_v24 = vadd.f32 %v1938_v19, %v1642_v11 }
 0x181   : > { %v1662_v16 = vpack.c.bf16 %v1350_v21, %v1349_v20 }
 0x182   : > { %v1657_v25 = vpack.c.bf16 %v1348_v24, %v1347_v22 }
 0x183   : > { %1664 = vst [vmem:[%s170_s19 + $0x8] sm:$0xff] %v1662_v16  }
 0x184   : > { %1658 = vst [vmem:[%s170_s19] sm:$0xff] %v1657_v25  }
 0x185 PF: > { %s13_s12 = sadd.s32 1, %s2062_s12  }
 0x186   : > { %p10_p4 = scmp.ge.s32.totalorder %s13_s12, 4  }
 0x188   :  { %12 = sbr.rel (!%p10_p4) target bundleno = 1 (0x1), region = 70 }

</bundles_post_ra>
